<compile_context>
chip_gen: v7x
topology: tpu7x:2x2x1
jax: 0.10.0
libtpu: 0.0.40
codegen_flags: <defaults>
</compile_context>

<pallas_src>
import functools

import numpy as np

import jax
import jax.numpy as jnp
from jax.experimental import pallas as pl
from jax.experimental.pallas import tpu as pltpu

LEAKY_SLOPE = 0.2
CP = 128                      # lane-padded channel count (every conv is a 128->128 GEMM)
MXU_DTYPE = jnp.bfloat16      # MXU operand dtype; accumulation stays f32


# ----------------------------------------------------------------------------
# Pallas kernels
# ----------------------------------------------------------------------------
def _conv_rows_kernel(a_ref, w_ref, b_ref, mask_ref, o_ref, *, shifts, halo, tm, act):
    """One output row-tile of a padded-frame conv: o = mask * act(sum_t A[rows+s_t] @ W_t + b).

    a_ref    : (halo + R + halo, CP) guarded, flattened, zero-ringed frames (VMEM resident)
    w_ref    : (T, CP, CP)           one (CP, CP) weight slab per kernel tap
    b_ref    : (1, CP)
    mask_ref : (tm, 1)               1.0 on real (interior) pixels, 0.0 on ring / tail rows
    o_ref    : (tm, CP)
    """
    m = pl.program_id(0)
    base = m * tm
    acc = jnp.zeros((tm, CP), jnp.float32)
    for t, s in enumerate(shifts):                      # k*k taps, statically unrolled
        a_blk = a_ref[pl.ds(base + halo + s, tm), :]    # row-shifted window, no im2col copy
        acc = acc + jnp.dot(
            a_blk.astype(MXU_DTYPE),
            w_ref[t].astype(MXU_DTYPE),
            preferred_element_type=jnp.float32,
        )
    acc = acc + b_ref[...]
    if act == "leaky":
        acc = jnp.where(acc > 0, acc, LEAKY_SLOPE * acc)
    elif act == "sigmoid":
        acc = pl.reciprocal(1.0 + jnp.exp(-acc), approx=True)   # exp + rcp on the EUP slot
    o_ref[...] = acc * mask_ref[...]                    # re-zero the padding ring


def _dense_kernel(a_ref, w_ref, b_ref, o_ref, *, act):
    """Plain fused GEMM + bias + activation (used by the tiny 4x4 / 1x1 head convs)."""
    acc = jnp.dot(a_ref[...].astype(MXU_DTYPE), w_ref[...].astype(MXU_DTYPE),
                  preferred_element_type=jnp.float32)
    acc = acc + b_ref[...]
    if act == "leaky":
        acc = jnp.where(acc > 0, acc, LEAKY_SLOPE * acc)
    elif act == "sigmoid":
        acc = pl.reciprocal(1.0 + jnp.exp(-acc), approx=True)
    o_ref[...] = acc


def _avgpool_kernel(x_ref, o_ref, *, hi, wi):
    """2x2 avg-pool one image; emit a zero-ringed frame at the pooled resolution.

    x_ref: (1, hi, 2, wi, 2*CP) -- (row-pair, col-pair folded into lanes), read once
    o_ref: (1, hi+2, wi+2, CP)
    """
    x = x_ref[...]
    s = x[..., :CP] + x[..., CP:]                            # horizontal pair (lane slice)
    avg = 0.25 * (s[:, :, 0, :, :] + s[:, :, 1, :, :])       # vertical pair (leading dim)
    o_ref[...] = jnp.zeros(o_ref.shape, o_ref.dtype)
    o_ref[:, 1:1 + hi, 1:1 + wi, :] = avg


def _avgpool_fade_kernel(alpha_ref, x_ref, down_ref, o_ref, *, hi, wi):
    """Fused avg-pool + ProGAN fade-in: alpha*pool(out) + (1-alpha)*downscaled."""
    a = alpha_ref[0, 0]                                      # alpha lives in SMEM (no recompile)
    x = x_ref[...]
    s = x[..., :CP] + x[..., CP:]
    avg = 0.25 * (s[:, :, 0, :, :] + s[:, :, 1, :, :])
    mixed = a * avg + (1.0 - a) * down_ref[:, 1:1 + hi, 1:1 + wi, :]
    o_ref[...] = jnp.zeros(o_ref.shape, o_ref.dtype)
    o_ref[:, 1:1 + hi, 1:1 + wi, :] = mixed


def _mbstd_kernel(x_ref, o_ref, *, c_real, h, w, n):
    """Minibatch-std: scalar = mean over (c_real, h, w) of the unbiased per-entry std over batch.

    Ring pixels / lane-pad channels are identically zero across the batch (std 0), so summing
    the std over the whole padded frame and dividing by c_real*h*w equals torch.std(x,0).mean().
    The scalar is written into channel `c_real` of the interior pixels (the extra feature map),
    leaving the zero ring intact -- no broadcast store, no HBM concat.
    """
    x = x_ref[...]
    mean = jnp.mean(x, axis=0, keepdims=True)
    var = jnp.sum((x - mean) ** 2, axis=0) / max(n - 1, 1)   # TODO(synk): torch.std is NaN for n==1
    stat = jnp.sum(jnp.sqrt(var)) / (c_real * h * w)
    fy = jax.lax.broadcasted_iota(jnp.int32, x.shape, 1)
    fx = jax.lax.broadcasted_iota(jnp.int32, x.shape, 2)
    fc = jax.lax.broadcasted_iota(jnp.int32, x.shape, 3)
    sel = (fc == c_real) & (fy >= 1) & (fy <= h) & (fx >= 1) & (fx <= w)
    o_ref[...] = jnp.where(sel, stat, x)


# ----------------------------------------------------------------------------
# Wrappers (layout plumbing is cheap XLA reshape/pad; all math is in the kernels)
# ----------------------------------------------------------------------------
def _round_up(v, m):
    return (v + m - 1) // m * m


def _interior_mask(n, h, w, rows):
    """(rows, 1) f32 mask: 1 on interior pixels of the flattened zero-ringed frames."""
    hp, wp = h + 2, w + 2
    yy, xx = np.meshgrid(np.arange(hp), np.arange(wp), indexing="ij")
    inner = ((yy >= 1) & (yy <= h) & (xx >= 1) & (xx <= w)).astype(np.float32)
    m = np.zeros((rows, 1), np.float32)
    m[: n * hp * wp, 0] = np.tile(inner.reshape(-1), n)
    return jnp.asarray(m)


def conv_frame_rows(rows, wpad, bpad, *, n, h, w, ksize, act):
    """k x k 'same' conv (k in {1, 3}) over zero-ringed frames stored as flattened rows."""
    hp, wp = h + 2, w + 2
    mp = n * hp * wp
    tm = min(256, _round_up(mp, 8))
    mtiles = pl.cdiv(mp, tm)
    r = mtiles * tm
    if ksize == 3:
        halo = wp + 1
        shifts = [(ki - 1) * wp + (kj - 1) for ki in range(3) for kj in range(3)]
    else:
        halo = 0
        shifts = [0]
    a_guard = jnp.pad(rows[:mp], ((halo, r - mp + halo), (0, 0)))
    mask = _interior_mask(n, h, w, r)
    gr = a_guard.shape[0]

    kern = functools.partial(_conv_rows_kernel, shifts=shifts, halo=halo, tm=tm, act=act)
    return pl.pallas_call(
        kern,
        out_shape=jax.ShapeDtypeStruct((r, CP), jnp.float32),
        grid=(mtiles,),
        in_specs=[
            pl.BlockSpec((gr, CP), lambda m: (0, 0)),          # activation, VMEM resident
            pl.BlockSpec(wpad.shape, lambda m: (0, 0, 0)),     # all taps' weights
            pl.BlockSpec((1, CP), lambda m: (0, 0)),           # bias
            pl.BlockSpec((tm, 1), lambda m: (m, 0)),           # interior mask tile
        ],
        out_specs=pl.BlockSpec((tm, CP), lambda m: (m, 0)),
        compiler_params=pltpu.CompilerParams(dimension_semantics=("parallel",)),
    )(a_guard, wpad, bpad, mask)


def dense(a, wpad, bpad, act):
    vmem = pl.BlockSpec(memory_space=pltpu.MemorySpace.VMEM)
    return pl.pallas_call(
        functools.partial(_dense_kernel, act=act),
        out_shape=jax.ShapeDtypeStruct((a.shape[0], wpad.shape[1]), jnp.float32),
        in_specs=[vmem, vmem, vmem],
        out_specs=vmem,
    )(a, wpad, bpad)


def avgpool_to_frame(frame):
    n, hp, wp, _ = frame.shape
    h, w = hp - 2, wp - 2
    ho, wo = h // 2, w // 2
    x = frame[:, 1:1 + h, 1:1 + w, :].reshape(n, ho, 2, wo, 2 * CP)
    return pl.pallas_call(
        functools.partial(_avgpool_kernel, hi=ho, wi=wo),
        out_shape=jax.ShapeDtypeStruct((n, ho + 2, wo + 2, CP), jnp.float32),
        grid=(n,),
        in_specs=[pl.BlockSpec((1, ho, 2, wo, 2 * CP), lambda i: (i, 0, 0, 0, 0))],
        out_specs=pl.BlockSpec((1, ho + 2, wo + 2, CP), lambda i: (i, 0, 0, 0)),
        compiler_params=pltpu.CompilerParams(dimension_semantics=("parallel",)),
    )(x)


def avgpool_fade_to_frame(frame, down_frame, alpha):
    n, hp, wp, _ = frame.shape
    h, w = hp - 2, wp - 2
    ho, wo = h // 2, w // 2
    x = frame[:, 1:1 + h, 1:1 + w, :].reshape(n, ho, 2, wo, 2 * CP)
    alpha_arr = jnp.full((1, 1), alpha, jnp.float32)
    return pl.pallas_call(
        functools.partial(_avgpool_fade_kernel, hi=ho, wi=wo),
        out_shape=jax.ShapeDtypeStruct((n, ho + 2, wo + 2, CP), jnp.float32),
        grid=(n,),
        in_specs=[
            pl.BlockSpec((1, 1), lambda i: (0, 0), memory_space=pltpu.MemorySpace.SMEM),
            pl.BlockSpec((1, ho, 2, wo, 2 * CP), lambda i: (i, 0, 0, 0, 0)),
            pl.BlockSpec((1, ho + 2, wo + 2, CP), lambda i: (i, 0, 0, 0)),
        ],
        out_specs=pl.BlockSpec((1, ho + 2, wo + 2, CP), lambda i: (i, 0, 0, 0)),
        compiler_params=pltpu.CompilerParams(dimension_semantics=("parallel",)),
    )(alpha_arr, x, down_frame)


def minibatch_std_frame(frame, c_real):
    n, fh, fw, _ = frame.shape
    vmem = pl.BlockSpec(memory_space=pltpu.MemorySpace.VMEM)
    return pl.pallas_call(
        functools.partial(_mbstd_kernel, c_real=c_real, h=fh - 2, w=fw - 2, n=n),
        out_shape=jax.ShapeDtypeStruct(frame.shape, jnp.float32),
        in_specs=[vmem],
        out_specs=vmem,
    )(frame)


# ----------------------------------------------------------------------------
# Parameters (PyTorch-default-style uniform init, then lane-padded to CP)
# ----------------------------------------------------------------------------
def init_conv(key, cout, cin, kh, kw):
    kw_key, kb_key = jax.random.split(key)
    fan_in = cin * kh * kw
    bound = 1.0 / (fan_in ** 0.5)
    w = jax.random.uniform(kw_key, (cout, cin, kh, kw), jnp.float32, -bound, bound)
    b = jax.random.uniform(kb_key, (cout,), jnp.float32, -bound, bound)
    return w, b


def pad_conv_taps(w, b):
    """(Cout,Cin,kh,kw) torch-layout -> (kh*kw, CP, CP) tap slabs + (1, CP) bias."""
    cout, cin, kh, kw = w.shape
    wt = jnp.transpose(w, (2, 3, 1, 0)).reshape(kh * kw, cin, cout)
    wp = jnp.zeros((kh * kw, CP, CP), jnp.float32).at[:, :cin, :cout].set(wt)
    bp = jnp.zeros((1, CP), jnp.float32).at[0, :cout].set(b)
    return wp, bp


def pad_head_weight(w, b):
    """4x4 'valid' head conv -> (16*CP, CP) dense matrix matching the (y, x, c) flatten."""
    cout, cin, kh, kw = w.shape
    wt = jnp.transpose(w, (2, 3, 1, 0))
    wp = jnp.zeros((kh, kw, CP, CP), jnp.float32).at[:, :, :cin, :cout].set(wt)
    bp = jnp.zeros((1, CP), jnp.float32).at[0, :cout].set(b)
    return wp.reshape(kh * kw * CP, CP), bp


def pad_1x1_weight(w, b):
    cout, cin, _, _ = w.shape
    wp = jnp.zeros((CP, CP), jnp.float32).at[:cin, :cout].set(w[:, :, 0, 0].T)
    bp = jnp.zeros((1, CP), jnp.float32).at[0, :cout].set(b)
    return wp, bp


def build_params(key, in_channels, factors, img_size=3):
    keys = iter(jax.random.split(key, 64))
    prog, rgb = [], []
    for i in range(len(factors) - 1, 0, -1):
        in_size = int(in_channels * factors[i])
        out_size = int(in_channels * factors[i - 1])
        prog.append({
            "conv0": pad_conv_taps(*init_conv(next(keys), out_size, in_size, 3, 3)),
            "conv1": pad_conv_taps(*init_conv(next(keys), out_size, out_size, 3, 3)),
        })
        rgb.append(pad_conv_taps(*init_conv(next(keys), in_size, img_size, 1, 1)))
    rgb.append(pad_conv_taps(*init_conv(next(keys), in_channels, img_size, 1, 1)))  # initial_rgb
    final = {
        "conv0": pad_conv_taps(*init_conv(next(keys), in_channels, in_channels + 1, 3, 3)),
        "conv1": pad_head_weight(*init_conv(next(keys), in_channels, in_channels, 4, 4)),
        "conv2": pad_1x1_weight(*init_conv(next(keys), 1, in_channels, 1, 1)),
    }
    return {"prog_blocks": prog, "rgb_layers": rgb, "final": final}


# ----------------------------------------------------------------------------
# Forward pass (mirrors Discriminator.forward)
# ----------------------------------------------------------------------------
def rows_to_frame(rows, n, h, w):
    hp, wp = h + 2, w + 2
    return rows[: n * hp * wp].reshape(n, hp, wp, CP)


def disc_conv_block(rows, blk, *, n, h, w):
    w0, b0 = blk["conv0"]
    w1, b1 = blk["conv1"]
    rows = conv_frame_rows(rows, w0, b0, n=n, h=h, w=w, ksize=3, act="leaky")
    rows = conv_frame_rows(rows, w1, b1, n=n, h=h, w=w, ksize=3, act="leaky")
    return rows


def final_block(frame4, fparams, *, n):
    # frame4: (N, 6, 6, CP) zero-ringed 4x4 feature frame with in_channels+1 live channels
    w0, b0 = fparams["conv0"]
    rows = conv_frame_rows(frame4.reshape(n * 36, CP), w0, b0,
                           n=n, h=4, w=4, ksize=3, act="leaky")
    frame = rows_to_frame(rows, n, 4, 4)
    flat = frame[:, 1:5, 1:5, :].reshape(n, 16 * CP)         # 4x4 'valid' conv as one dense GEMM
    w1, b1 = fparams["conv1"]
    hid = dense(flat, w1, b1, act="leaky")                   # (N, CP)
    w2, b2 = fparams["conv2"]
    out = dense(hid, w2, b2, act="sigmoid")                  # (N, CP); channel 0 is the logit
    return out[:, :1]


def discriminator_forward(params, x_nchw, alpha, steps, *, in_channels, img_size):
    n, _, h, w = x_nchw.shape
    n_blocks = len(params["prog_blocks"])
    cs = n_blocks - steps

    x = jnp.transpose(x_nchw, (0, 2, 3, 1))                                  # NCHW -> NHWC
    frame_x = jnp.pad(x, ((0, 0), (1, 1), (1, 1), (0, CP - img_size)))       # zero ring + lane pad

    wr, br = params["rgb_layers"][cs]
    out_rows = conv_frame_rows(frame_x.reshape(n * (h + 2) * (w + 2), CP),
                               wr, br, n=n, h=h, w=w, ksize=1, act="leaky")  # relu(rgb(x))

    if steps == 0:
        # TODO(synk): PyTorch source feeds `x` (not `out`) to minibatch_std here and calls
        # .view(out.shape, -1); reproduced literally -- only meaningful when img_size == in_channels.
        frame = minibatch_std_frame(frame_x, img_size)
        y = final_block(frame, params["final"], n=n)
        return y.reshape(n, -1)

    # fade-in path: downscale the image and re-project with the next rgb layer
    wd, bd = params["rgb_layers"][cs + 1]
    pooled_x = avgpool_to_frame(frame_x)
    down_rows = conv_frame_rows(pooled_x.reshape(n * (h // 2 + 2) * (w // 2 + 2), CP),
                                wd, bd, n=n, h=h // 2, w=w // 2, ksize=1, act="leaky")
    down_frame = rows_to_frame(down_rows, n, h // 2, w // 2)

    out_rows = disc_conv_block(out_rows, params["prog_blocks"][cs], n=n, h=h, w=w)
    frame = avgpool_fade_to_frame(rows_to_frame(out_rows, n, h, w), down_frame, alpha)
    ch, cw = h // 2, w // 2

    for step in range(cs + 1, n_blocks):
        rows = disc_conv_block(frame.reshape(n * (ch + 2) * (cw + 2), CP),
                               params["prog_blocks"][step], n=n, h=ch, w=cw)
        frame = avgpool_to_frame(rows_to_frame(rows, n, ch, cw))
        ch, cw = ch // 2, cw // 2

    frame = minibatch_std_frame(frame, in_channels)          # adds the std feature map in-lane
    y = final_block(frame, params["final"], n=n)
    return y.reshape(n, -1)


# ----------------------------------------------------------------------------
if __name__ == "__main__":
    key = jax.random.PRNGKey(0)
    k_params, k_x = jax.random.split(key)

    # option = {'shapes': {'in_channels': 16}, 'factors': [1.0, 0.5, 0.25]}, img_size = 3
    in_channels = 16
    factors = [1.0, 0.5, 0.25]
    img_size = 3
    params = build_params(k_params, in_channels, factors, img_size=img_size)

    # steps=2 -> 16x16 RGB input; path: rgb -> block(4->8) -> pool+fade -> block(8->16) -> pool -> 4x4 head
    x = jax.random.normal(k_x, (2, img_size, 16, 16), jnp.float32)   # NCHW, like PyTorch
    alpha = 0.7
    steps = 2

    fwd = jax.jit(discriminator_forward,
                  static_argnames=("steps", "in_channels", "img_size"))
    y = fwd(params, x, alpha, steps=steps, in_channels=in_channels, img_size=img_size)
    jax.block_until_ready(y)

    assert y.shape == (2, 1), y.shape
    # sigmoid output (small slack: final reciprocal uses the approximate EUP rcp)
    assert bool(jnp.all((y > -1e-2) & (y < 1.0 + 1e-2)))
    print("KERNEL_OK")
</pallas_src>

<mosaic_0001>
module attributes {stable_mosaic.version = 11 : i64} {
  func.func @_conv_rows_kernel(%arg0: i32, %arg1: memref<768x128xf32, #tpu.memory_space<vmem>>, %arg2: memref<1x128x128xf32, #tpu.memory_space<vmem>>, %arg3: memref<1x128xf32, #tpu.memory_space<vmem>>, %arg4: memref<256x1xf32, #tpu.memory_space<vmem>>, %arg5: memref<256x128xf32, #tpu.memory_space<vmem>>) attributes {dimension_semantics = [#tpu.dimension_semantics<parallel>], iteration_bounds = array<i64: 3>, scalar_prefetch = 0 : i64, scratch_operands = 0 : i64, tpu.core_type = #tpu.core_type<tc>, window_params = [{pipeline_mode = #tpu.pipeline_mode<synchronous>, transform_indices = @transform_0, window_bounds = array<i64: 768, 128>}, {pipeline_mode = #tpu.pipeline_mode<synchronous>, transform_indices = @transform_1, window_bounds = array<i64: 1, 128, 128>}, {pipeline_mode = #tpu.pipeline_mode<synchronous>, transform_indices = @transform_2, window_bounds = array<i64: 1, 128>}, {transform_indices = @transform_3, window_bounds = array<i64: 256, 1>}, {transform_indices = @transform_4, window_bounds = array<i64: 256, 128>}]} {
    %c256_i32 = arith.constant 256 : i32
    %0 = arith.muli %arg0, %c256_i32 : i32
    %cst = arith.constant 0.000000e+00 : f32
    %1 = vector.broadcast %cst : f32 to vector<256x128xf32>
    %c0_i32 = arith.constant 0 : i32
    %2 = arith.addi %0, %c0_i32 : i32
    %c0_i32_0 = arith.constant 0 : i32
    %3 = arith.addi %2, %c0_i32_0 : i32
    %4 = arith.index_cast %3 : i32 to index
    %c0 = arith.constant 0 : index
    %5 = vector.load %arg1[%4, %c0] : memref<768x128xf32, #tpu.memory_space<vmem>>, vector<256x128xf32>
    %6 = arith.truncf %5 : vector<256x128xf32> to vector<256x128xbf16>
    %c0_1 = arith.constant 0 : index
    %c0_2 = arith.constant 0 : index
    %c0_3 = arith.constant 0 : index
    %7 = vector.load %arg2[%c0_1, %c0_2, %c0_3] : memref<1x128x128xf32, #tpu.memory_space<vmem>>, vector<1x128x128xf32>
    %8 = vector.shape_cast %7 : vector<1x128x128xf32> to vector<128x128xf32>
    %9 = arith.truncf %8 : vector<128x128xf32> to vector<128x128xbf16>
    %cst_4 = arith.constant dense<0.000000e+00> : vector<256x128xf32>
    %10 = tpu.matmul %6, %9, %cst_4 {dimension_numbers = #tpu.dot_dimension_numbers<[1], [0], [0], [1], [0, 0, 1, 1], [], []>} : vector<256x128xbf16>, vector<128x128xbf16>, vector<256x128xf32> -> vector<256x128xf32>
    %11 = arith.addf %1, %10 : vector<256x128xf32>
    %c0_5 = arith.constant 0 : index
    %c0_6 = arith.constant 0 : index
    %12 = vector.load %arg3[%c0_5, %c0_6] : memref<1x128xf32, #tpu.memory_space<vmem>>, vector<1x128xf32>
    %13 = vector.broadcast %12 : vector<1x128xf32> to vector<256x128xf32>
    %14 = arith.addf %11, %13 : vector<256x128xf32>
    %cst_7 = arith.constant 0.000000e+00 : f32
    %15 = vector.broadcast %cst_7 : f32 to vector<256x128xf32>
    %16 = arith.cmpf ogt, %14, %15 : vector<256x128xf32>
    %cst_8 = arith.constant 2.000000e-01 : f32
    %17 = vector.broadcast %cst_8 : f32 to vector<256x128xf32>
    %18 = arith.mulf %17, %14 : vector<256x128xf32>
    %19 = arith.select %16, %14, %18 : vector<256x128xi1>, vector<256x128xf32>
    %c0_9 = arith.constant 0 : index
    %c0_10 = arith.constant 0 : index
    %20 = vector.load %arg4[%c0_9, %c0_10] : memref<256x1xf32, #tpu.memory_space<vmem>>, vector<256x1xf32>
    %21 = vector.broadcast %20 : vector<256x1xf32> to vector<256x128xf32>
    %22 = arith.mulf %19, %21 : vector<256x128xf32>
    %c0_11 = arith.constant 0 : index
    %c0_12 = arith.constant 0 : index
    %23 = vector.load %arg5[%c0_11, %c0_12] : memref<256x128xf32, #tpu.memory_space<vmem>>, vector<256x128xf32>
    tpu.vector_store %arg5[%c0_11, %c0_12], %22 {strides = array<i32>} : memref<256x128xf32, #tpu.memory_space<vmem>>, vector<256x128xf32>,
    return
  }
  func.func @transform_0(%arg0: i32) -> (i32, i32) {
    %c0_i32 = arith.constant 0 : i32
    %c0_i32_0 = arith.constant 0 : i32
    %c0_i32_1 = arith.constant 0 : i32
    return %c0_i32, %c0_i32_0 : i32, i32
  }
  func.func @transform_1(%arg0: i32) -> (i32, i32, i32) {
    %c0_i32 = arith.constant 0 : i32
    %c0_i32_0 = arith.constant 0 : i32
    %c0_i32_1 = arith.constant 0 : i32
    %c0_i32_2 = arith.constant 0 : i32
    return %c0_i32, %c0_i32_0, %c0_i32_1 : i32, i32, i32
  }
  func.func @transform_2(%arg0: i32) -> (i32, i32) {
    %c0_i32 = arith.constant 0 : i32
    %c0_i32_0 = arith.constant 0 : i32
    %c0_i32_1 = arith.constant 0 : i32
    return %c0_i32, %c0_i32_0 : i32, i32
  }
  func.func @transform_3(%arg0: i32) -> (i32, i32) {
    %c0_i32 = arith.constant 0 : i32
    %c0_i32_0 = arith.constant 0 : i32
    return %arg0, %c0_i32 : i32, i32
  }
  func.func @transform_4(%arg0: i32) -> (i32, i32) {
    %c0_i32 = arith.constant 0 : i32
    %c0_i32_0 = arith.constant 0 : i32
    return %arg0, %c0_i32 : i32, i32
  }
}

module attributes {stable_mosaic.version = 11 : i64} {
  func.func @_conv_rows_kernel(%arg0: i32, %arg1: memref<806x128xf32, #tpu.memory_space<vmem>>, %arg2: memref<9x128x128xf32, #tpu.memory_space<vmem>>, %arg3: memref<1x128xf32, #tpu.memory_space<vmem>>, %arg4: memref<256x1xf32, #tpu.memory_space<vmem>>, %arg5: memref<256x128xf32, #tpu.memory_space<vmem>>) attributes {dimension_semantics = [#tpu.dimension_semantics<parallel>], iteration_bounds = array<i64: 3>, scalar_prefetch = 0 : i64, scratch_operands = 0 : i64, tpu.core_type = #tpu.core_type<tc>, window_params = [{pipeline_mode = #tpu.pipeline_mode<synchronous>, transform_indices = @transform_0, window_bounds = array<i64: 806, 128>}, {pipeline_mode = #tpu.pipeline_mode<synchronous>, transform_indices = @transform_1, window_bounds = array<i64: 9, 128, 128>}, {pipeline_mode = #tpu.pipeline_mode<synchronous>, transform_indices = @transform_2, window_bounds = array<i64: 1, 128>}, {transform_indices = @transform_3, window_bounds = array<i64: 256, 1>}, {transform_indices = @transform_4, window_bounds = array<i64: 256, 128>}]} {
    %c256_i32 = arith.constant 256 : i32
    %0 = arith.muli %arg0, %c256_i32 : i32
    %cst = arith.constant 0.000000e+00 : f32
    %1 = vector.broadcast %cst : f32 to vector<256x128xf32>
    %c19_i32 = arith.constant 19 : i32
    %2 = arith.addi %0, %c19_i32 : i32
    %c-19_i32 = arith.constant -19 : i32
    %3 = arith.addi %2, %c-19_i32 : i32
    %4 = arith.index_cast %3 : i32 to index
    %c0 = arith.constant 0 : index
    %5 = vector.load %arg1[%4, %c0] : memref<806x128xf32, #tpu.memory_space<vmem>>, vector<256x128xf32>
    %6 = arith.truncf %5 : vector<256x128xf32> to vector<256x128xbf16>
    %c0_0 = arith.constant 0 : index
    %c0_1 = arith.constant 0 : index
    %c0_2 = arith.constant 0 : index
    %7 = vector.load %arg2[%c0_0, %c0_1, %c0_2] : memref<9x128x128xf32, #tpu.memory_space<vmem>>, vector<1x128x128xf32>
    %8 = vector.shape_cast %7 : vector<1x128x128xf32> to vector<128x128xf32>
    %9 = arith.truncf %8 : vector<128x128xf32> to vector<128x128xbf16>
    %cst_3 = arith.constant dense<0.000000e+00> : vector<256x128xf32>
    %10 = tpu.matmul %6, %9, %cst_3 {dimension_numbers = #tpu.dot_dimension_numbers<[1], [0], [0], [1], [0, 0, 1, 1], [], []>} : vector<256x128xbf16>, vector<128x128xbf16>, vector<256x128xf32> -> vector<256x128xf32>
    %11 = arith.addf %1, %10 : vector<256x128xf32>
    %c19_i32_4 = arith.constant 19 : i32
    %12 = arith.addi %0, %c19_i32_4 : i32
    %c-18_i32 = arith.constant -18 : i32
    %13 = arith.addi %12, %c-18_i32 : i32
    %14 = arith.index_cast %13 : i32 to index
    %c0_5 = arith.constant 0 : index
    %15 = vector.load %arg1[%14, %c0_5] : memref<806x128xf32, #tpu.memory_space<vmem>>, vector<256x128xf32>
    %16 = arith.truncf %15 : vector<256x128xf32> to vector<256x128xbf16>
    %c1 = arith.constant 1 : index
    %c0_6 = arith.constant 0 : index
    %c0_7 = arith.constant 0 : index
    %17 = vector.load %arg2[%c1, %c0_6, %c0_7] : memref<9x128x128xf32, #tpu.memory_space<vmem>>, vector<1x128x128xf32>
    %18 = vector.shape_cast %17 : vector<1x128x128xf32> to vector<128x128xf32>
    %19 = arith.truncf %18 : vector<128x128xf32> to vector<128x128xbf16>
    %cst_8 = arith.constant dense<0.000000e+00> : vector<256x128xf32>
    %20 = tpu.matmul %16, %19, %cst_8 {dimension_numbers = #tpu.dot_dimension_numbers<[1], [0], [0], [1], [0, 0, 1, 1], [], []>} : vector<256x128xbf16>, vector<128x128xbf16>, vector<256x128xf32> -> vector<256x128xf32>
    %21 = arith.addf %11, %20 : vector<256x128xf32>
    %c19_i32_9 = arith.constant 19 : i32
    %22 = arith.addi %0, %c19_i32_9 : i32
    %c-17_i32 = arith.constant -17 : i32
    %23 = arith.addi %22, %c-17_i32 : i32
    %24 = arith.index_cast %23 : i32 to index
    %c0_10 = arith.constant 0 : index
    %25 = vector.load %arg1[%24, %c0_10] : memref<806x128xf32, #tpu.memory_space<vmem>>, vector<256x128xf32>
    %26 = arith.truncf %25 : vector<256x128xf32> to vector<256x128xbf16>
    %c2 = arith.constant 2 : index
    %c0_11 = arith.constant 0 : index
    %c0_12 = arith.constant 0 : index
    %27 = vector.load %arg2[%c2, %c0_11, %c0_12] : memref<9x128x128xf32, #tpu.memory_space<vmem>>, vector<1x128x128xf32>
    %28 = vector.shape_cast %27 : vector<1x128x128xf32> to vector<128x128xf32>
    %29 = arith.truncf %28 : vector<128x128xf32> to vector<128x128xbf16>
    %cst_13 = arith.constant dense<0.000000e+00> : vector<256x128xf32>
    %30 = tpu.matmul %26, %29, %cst_13 {dimension_numbers = #tpu.dot_dimension_numbers<[1], [0], [0], [1], [0, 0, 1, 1], [], []>} : vector<256x128xbf16>, vector<128x128xbf16>, vector<256x128xf32> -> vector<256x128xf32>
    %31 = arith.addf %21, %30 : vector<256x128xf32>
    %c19_i32_14 = arith.constant 19 : i32
    %32 = arith.addi %0, %c19_i32_14 : i32
    %c-1_i32 = arith.constant -1 : i32
    %33 = arith.addi %32, %c-1_i32 : i32
    %34 = arith.index_cast %33 : i32 to index
    %c0_15 = arith.constant 0 : index
    %35 = vector.load %arg1[%34, %c0_15] : memref<806x128xf32, #tpu.memory_space<vmem>>, vector<256x128xf32>
    %36 = arith.truncf %35 : vector<256x128xf32> to vector<256x128xbf16>
    %c3 = arith.constant 3 : index
    %c0_16 = arith.constant 0 : index
    %c0_17 = arith.constant 0 : index
    %37 = vector.load %arg2[%c3, %c0_16, %c0_17] : memref<9x128x128xf32, #tpu.memory_space<vmem>>, vector<1x128x128xf32>
    %38 = vector.shape_cast %37 : vector<1x128x128xf32> to vector<128x128xf32>
    %39 = arith.truncf %38 : vector<128x128xf32> to vector<128x128xbf16>
    %cst_18 = arith.constant dense<0.000000e+00> : vector<256x128xf32>
    %40 = tpu.matmul %36, %39, %cst_18 {dimension_numbers = #tpu.dot_dimension_numbers<[1], [0], [0], [1], [0, 0, 1, 1], [], []>} : vector<256x128xbf16>, vector<128x128xbf16>, vector<256x128xf32> -> vector<256x128xf32>
    %41 = arith.addf %31, %40 : vector<256x128xf32>
    %c19_i32_19 = arith.constant 19 : i32
    %42 = arith.addi %0, %c19_i32_19 : i32
    %c0_i32 = arith.constant 0 : i32
    %43 = arith.addi %42, %c0_i32 : i32
    %44 = arith.index_cast %43 : i32 to index
    %c0_20 = arith.constant 0 : index
    %45 = vector.load %arg1[%44, %c0_20] : memref<806x128xf32, #tpu.memory_space<vmem>>, vector<256x128xf32>
    %46 = arith.truncf %45 : vector<256x128xf32> to vector<256x128xbf16>
    %c4 = arith.constant 4 : index
    %c0_21 = arith.constant 0 : index
    %c0_22 = arith.constant 0 : index
    %47 = vector.load %arg2[%c4, %c0_21, %c0_22] : memref<9x128x128xf32, #tpu.memory_space<vmem>>, vector<1x128x128xf32>
    %48 = vector.shape_cast %47 : vector<1x128x128xf32> to vector<128x128xf32>
    %49 = arith.truncf %48 : vector<128x128xf32> to vector<128x128xbf16>
    %cst_23 = arith.constant dense<0.000000e+00> : vector<256x128xf32>
    %50 = tpu.matmul %46, %49, %cst_23 {dimension_numbers = #tpu.dot_dimension_numbers<[1], [0], [0], [1], [0, 0, 1, 1], [], []>} : vector<256x128xbf16>, vector<128x128xbf16>, vector<256x128xf32> -> vector<256x128xf32>
    %51 = arith.addf %41, %50 : vector<256x128xf32>
    %c19_i32_24 = arith.constant 19 : i32
    %52 = arith.addi %0, %c19_i32_24 : i32
    %c1_i32 = arith.constant 1 : i32
    %53 = arith.addi %52, %c1_i32 : i32
    %54 = arith.index_cast %53 : i32 to index
    %c0_25 = arith.constant 0 : index
    %55 = vector.load %arg1[%54, %c0_25] : memref<806x128xf32, #tpu.memory_space<vmem>>, vector<256x128xf32>
    %56 = arith.truncf %55 : vector<256x128xf32> to vector<256x128xbf16>
    %c5 = arith.constant 5 : index
    %c0_26 = arith.constant 0 : index
    %c0_27 = arith.constant 0 : index
    %57 = vector.load %arg2[%c5, %c0_26, %c0_27] : memref<9x128x128xf32, #tpu.memory_space<vmem>>, vector<1x128x128xf32>
    %58 = vector.shape_cast %57 : vector<1x128x128xf32> to vector<128x128xf32>
    %59 = arith.truncf %58 : vector<128x128xf32> to vector<128x128xbf16>
    %cst_28 = arith.constant dense<0.000000e+00> : vector<256x128xf32>
    %60 = tpu.matmul %56, %59, %cst_28 {dimension_numbers = #tpu.dot_dimension_numbers<[1], [0], [0], [1], [0, 0, 1, 1], [], []>} : vector<256x128xbf16>, vector<128x128xbf16>, vector<256x128xf32> -> vector<256x128xf32>
    %61 = arith.addf %51, %60 : vector<256x128xf32>
    %c19_i32_29 = arith.constant 19 : i32
    %62 = arith.addi %0, %c19_i32_29 : i32
    %c17_i32 = arith.constant 17 : i32
    %63 = arith.addi %62, %c17_i32 : i32
    %64 = arith.index_cast %63 : i32 to index
    %c0_30 = arith.constant 0 : index
    %65 = vector.load %arg1[%64, %c0_30] : memref<806x128xf32, #tpu.memory_space<vmem>>, vector<256x128xf32>
    %66 = arith.truncf %65 : vector<256x128xf32> to vector<256x128xbf16>
    %c6 = arith.constant 6 : index
    %c0_31 = arith.constant 0 : index
    %c0_32 = arith.constant 0 : index
    %67 = vector.load %arg2[%c6, %c0_31, %c0_32] : memref<9x128x128xf32, #tpu.memory_space<vmem>>, vector<1x128x128xf32>
    %68 = vector.shape_cast %67 : vector<1x128x128xf32> to vector<128x128xf32>
    %69 = arith.truncf %68 : vector<128x128xf32> to vector<128x128xbf16>
    %cst_33 = arith.constant dense<0.000000e+00> : vector<256x128xf32>
    %70 = tpu.matmul %66, %69, %cst_33 {dimension_numbers = #tpu.dot_dimension_numbers<[1], [0], [0], [1], [0, 0, 1, 1], [], []>} : vector<256x128xbf16>, vector<128x128xbf16>, vector<256x128xf32> -> vector<256x128xf32>
    %71 = arith.addf %61, %70 : vector<256x128xf32>
    %c19_i32_34 = arith.constant 19 : i32
    %72 = arith.addi %0, %c19_i32_34 : i32
    %c18_i32 = arith.constant 18 : i32
    %73 = arith.addi %72, %c18_i32 : i32
    %74 = arith.index_cast %73 : i32 to index
    %c0_35 = arith.constant 0 : index
    %75 = vector.load %arg1[%74, %c0_35] : memref<806x128xf32, #tpu.memory_space<vmem>>, vector<256x128xf32>
    %76 = arith.truncf %75 : vector<256x128xf32> to vector<256x128xbf16>
    %c7 = arith.constant 7 : index
    %c0_36 = arith.constant 0 : index
    %c0_37 = arith.constant 0 : index
    %77 = vector.load %arg2[%c7, %c0_36, %c0_37] : memref<9x128x128xf32, #tpu.memory_space<vmem>>, vector<1x128x128xf32>
    %78 = vector.shape_cast %77 : vector<1x128x128xf32> to vector<128x128xf32>
    %79 = arith.truncf %78 : vector<128x128xf32> to vector<128x128xbf16>
    %cst_38 = arith.constant dense<0.000000e+00> : vector<256x128xf32>
    %80 = tpu.matmul %76, %79, %cst_38 {dimension_numbers = #tpu.dot_dimension_numbers<[1], [0], [0], [1], [0, 0, 1, 1], [], []>} : vector<256x128xbf16>, vector<128x128xbf16>, vector<256x128xf32> -> vector<256x128xf32>
    %81 = arith.addf %71, %80 : vector<256x128xf32>
    %c19_i32_39 = arith.constant 19 : i32
    %82 = arith.addi %0, %c19_i32_39 : i32
    %c19_i32_40 = arith.constant 19 : i32
    %83 = arith.addi %82, %c19_i32_40 : i32
    %84 = arith.index_cast %83 : i32 to index
    %c0_41 = arith.constant 0 : index
    %85 = vector.load %arg1[%84, %c0_41] : memref<806x128xf32, #tpu.memory_space<vmem>>, vector<256x128xf32>
    %86 = arith.truncf %85 : vector<256x128xf32> to vector<256x128xbf16>
    %c8 = arith.constant 8 : index
    %c0_42 = arith.constant 0 : index
    %c0_43 = arith.constant 0 : index
    %87 = vector.load %arg2[%c8, %c0_42, %c0_43] : memref<9x128x128xf32, #tpu.memory_space<vmem>>, vector<1x128x128xf32>
    %88 = vector.shape_cast %87 : vector<1x128x128xf32> to vector<128x128xf32>
    %89 = arith.truncf %88 : vector<128x128xf32> to vector<128x128xbf16>
    %cst_44 = arith.constant dense<0.000000e+00> : vector<256x128xf32>
    %90 = tpu.matmul %86, %89, %cst_44 {dimension_numbers = #tpu.dot_dimension_numbers<[1], [0], [0], [1], [0, 0, 1, 1], [], []>} : vector<256x128xbf16>, vector<128x128xbf16>, vector<256x128xf32> -> vector<256x128xf32>
    %91 = arith.addf %81, %90 : vector<256x128xf32>
    %c0_45 = arith.constant 0 : index
    %c0_46 = arith.constant 0 : index
    %92 = vector.load %arg3[%c0_45, %c0_46] : memref<1x128xf32, #tpu.memory_space<vmem>>, vector<1x128xf32>
    %93 = vector.broadcast %92 : vector<1x128xf32> to vector<256x128xf32>
    %94 = arith.addf %91, %93 : vector<256x128xf32>
    %cst_47 = arith.constant 0.000000e+00 : f32
    %95 = vector.broadcast %cst_47 : f32 to vector<256x128xf32>
    %96 = arith.cmpf ogt, %94, %95 : vector<256x128xf32>
    %cst_48 = arith.constant 2.000000e-01 : f32
    %97 = vector.broadcast %cst_48 : f32 to vector<256x128xf32>
    %98 = arith.mulf %97, %94 : vector<256x128xf32>
    %99 = arith.select %96, %94, %98 : vector<256x128xi1>, vector<256x128xf32>
    %c0_49 = arith.constant 0 : index
    %c0_50 = arith.constant 0 : index
    %100 = vector.load %arg4[%c0_49, %c0_50] : memref<256x1xf32, #tpu.memory_space<vmem>>, vector<256x1xf32>
    %101 = vector.broadcast %100 : vector<256x1xf32> to vector<256x128xf32>
    %102 = arith.mulf %99, %101 : vector<256x128xf32>
    %c0_51 = arith.constant 0 : index
    %c0_52 = arith.constant 0 : index
    %103 = vector.load %arg5[%c0_51, %c0_52] : memref<256x128xf32, #tpu.memory_space<vmem>>, vector<256x128xf32>
    tpu.vector_store %arg5[%c0_51, %c0_52], %102 {strides = array<i32>} : memref<256x128xf32, #tpu.memory_space<vmem>>, vector<256x128xf32>,
    return
  }
  func.func @transform_0(%arg0: i32) -> (i32, i32) {
    %c0_i32 = arith.constant 0 : i32
    %c0_i32_0 = arith.constant 0 : i32
    %c0_i32_1 = arith.constant 0 : i32
    return %c0_i32, %c0_i32_0 : i32, i32
  }
  func.func @transform_1(%arg0: i32) -> (i32, i32, i32) {
    %c0_i32 = arith.constant 0 : i32
    %c0_i32_0 = arith.constant 0 : i32
    %c0_i32_1 = arith.constant 0 : i32
    %c0_i32_2 = arith.constant 0 : i32
    return %c0_i32, %c0_i32_0, %c0_i32_1 : i32, i32, i32
  }
  func.func @transform_2(%arg0: i32) -> (i32, i32) {
    %c0_i32 = arith.constant 0 : i32
    %c0_i32_0 = arith.constant 0 : i32
    %c0_i32_1 = arith.constant 0 : i32
    return %c0_i32, %c0_i32_0 : i32, i32
  }
  func.func @transform_3(%arg0: i32) -> (i32, i32) {
    %c0_i32 = arith.constant 0 : i32
    %c0_i32_0 = arith.constant 0 : i32
    return %arg0, %c0_i32 : i32, i32
  }
  func.func @transform_4(%arg0: i32) -> (i32, i32) {
    %c0_i32 = arith.constant 0 : i32
    %c0_i32_0 = arith.constant 0 : i32
    return %arg0, %c0_i32 : i32, i32
  }
}

module attributes {stable_mosaic.version = 11 : i64} {
  func.func @_avgpool_kernel(%arg0: i32, %arg1: memref<1x8x2x8x256xf32, #tpu.memory_space<vmem>>, %arg2: memref<1x10x10x128xf32, #tpu.memory_space<vmem>>) attributes {dimension_semantics = [#tpu.dimension_semantics<parallel>], iteration_bounds = array<i64: 2>, scalar_prefetch = 0 : i64, scratch_operands = 0 : i64, tpu.core_type = #tpu.core_type<tc>, window_params = [{transform_indices = @transform_0, window_bounds = array<i64: 1, 8, 2, 8, 256>}, {transform_indices = @transform_1, window_bounds = array<i64: 1, 10, 10, 128>}]} {
    %c0 = arith.constant 0 : index
    %c0_0 = arith.constant 0 : index
    %c0_1 = arith.constant 0 : index
    %c0_2 = arith.constant 0 : index
    %c0_3 = arith.constant 0 : index
    %0 = vector.load %arg1[%c0, %c0_0, %c0_1, %c0_2, %c0_3] : memref<1x8x2x8x256xf32, #tpu.memory_space<vmem>>, vector<1x8x2x8x256xf32>
    %1 = vector.extract_strided_slice %0 {offsets = [0, 0, 0, 0, 0], sizes = [1, 8, 2, 8, 128], strides = [1, 1, 1, 1, 1]} : vector<1x8x2x8x256xf32> to vector<1x8x2x8x128xf32>
    %2 = vector.extract_strided_slice %0 {offsets = [0, 0, 0, 0, 128], sizes = [1, 8, 2, 8, 128], strides = [1, 1, 1, 1, 1]} : vector<1x8x2x8x256xf32> to vector<1x8x2x8x128xf32>
    %3 = arith.addf %1, %2 : vector<1x8x2x8x128xf32>
    %4 = vector.extract_strided_slice %3 {offsets = [0, 0, 0, 0, 0], sizes = [1, 8, 1, 8, 128], strides = [1, 1, 1, 1, 1]} : vector<1x8x2x8x128xf32> to vector<1x8x1x8x128xf32>
    %5 = vector.shape_cast %4 : vector<1x8x1x8x128xf32> to vector<1x8x8x128xf32>
    %6 = vector.extract_strided_slice %3 {offsets = [0, 0, 1, 0, 0], sizes = [1, 8, 1, 8, 128], strides = [1, 1, 1, 1, 1]} : vector<1x8x2x8x128xf32> to vector<1x8x1x8x128xf32>
    %7 = vector.shape_cast %6 : vector<1x8x1x8x128xf32> to vector<1x8x8x128xf32>
    %8 = arith.addf %5, %7 : vector<1x8x8x128xf32>
    %cst = arith.constant 2.500000e-01 : f32
    %9 = vector.broadcast %cst : f32 to vector<1x8x8x128xf32>
    %10 = arith.mulf %9, %8 : vector<1x8x8x128xf32>
    %cst_4 = arith.constant 0.000000e+00 : f32
    %11 = vector.broadcast %cst_4 : f32 to vector<1x10x10x128xf32>
    %c0_5 = arith.constant 0 : index
    %c0_6 = arith.constant 0 : index
    %c0_7 = arith.constant 0 : index
    %c0_8 = arith.constant 0 : index
    %12 = vector.load %arg2[%c0_5, %c0_6, %c0_7, %c0_8] : memref<1x10x10x128xf32, #tpu.memory_space<vmem>>, vector<1x10x10x128xf32>
    tpu.vector_store %arg2[%c0_5, %c0_6, %c0_7, %c0_8], %11 {strides = array<i32>} : memref<1x10x10x128xf32, #tpu.memory_space<vmem>>, vector<1x10x10x128xf32>,
    %c0_9 = arith.constant 0 : index
    %c1 = arith.constant 1 : index
    %c1_10 = arith.constant 1 : index
    %c0_11 = arith.constant 0 : index
    %13 = vector.load %arg2[%c0_9, %c1, %c1_10, %c0_11] : memref<1x10x10x128xf32, #tpu.memory_space<vmem>>, vector<1x8x8x128xf32>
    tpu.vector_store %arg2[%c0_9, %c1, %c1_10, %c0_11], %10 {strides = array<i32>} : memref<1x10x10x128xf32, #tpu.memory_space<vmem>>, vector<1x8x8x128xf32>,
    return
  }
  func.func @transform_0(%arg0: i32) -> (i32, i32, i32, i32, i32) {
    %c0_i32 = arith.constant 0 : i32
    %c0_i32_0 = arith.constant 0 : i32
    %c0_i32_1 = arith.constant 0 : i32
    %c0_i32_2 = arith.constant 0 : i32
    %c0_i32_3 = arith.constant 0 : i32
    return %arg0, %c0_i32, %c0_i32_0, %c0_i32_1, %c0_i32_2 : i32, i32, i32, i32, i32
  }
  func.func @transform_1(%arg0: i32) -> (i32, i32, i32, i32) {
    %c0_i32 = arith.constant 0 : i32
    %c0_i32_0 = arith.constant 0 : i32
    %c0_i32_1 = arith.constant 0 : i32
    %c0_i32_2 = arith.constant 0 : i32
    return %arg0, %c0_i32, %c0_i32_0, %c0_i32_1 : i32, i32, i32, i32
  }
}

module attributes {stable_mosaic.version = 11 : i64} {
  func.func @_conv_rows_kernel(%arg0: i32, %arg1: memref<200x128xf32, #tpu.memory_space<vmem>>, %arg2: memref<1x128x128xf32, #tpu.memory_space<vmem>>, %arg3: memref<1x128xf32, #tpu.memory_space<vmem>>, %arg4: memref<200x1xf32, #tpu.memory_space<vmem>>, %arg5: memref<200x128xf32, #tpu.memory_space<vmem>>) attributes {dimension_semantics = [#tpu.dimension_semantics<parallel>], iteration_bounds = array<i64: 1>, scalar_prefetch = 0 : i64, scratch_operands = 0 : i64, tpu.core_type = #tpu.core_type<tc>, window_params = [{pipeline_mode = #tpu.pipeline_mode<synchronous>, transform_indices = @transform_0, window_bounds = array<i64: 200, 128>}, {pipeline_mode = #tpu.pipeline_mode<synchronous>, transform_indices = @transform_1, window_bounds = array<i64: 1, 128, 128>}, {pipeline_mode = #tpu.pipeline_mode<synchronous>, transform_indices = @transform_2, window_bounds = array<i64: 1, 128>}, {transform_indices = @transform_3, window_bounds = array<i64: 200, 1>}, {transform_indices = @transform_4, window_bounds = array<i64: 200, 128>}]} {
    %c200_i32 = arith.constant 200 : i32
    %0 = arith.muli %arg0, %c200_i32 : i32
    %cst = arith.constant 0.000000e+00 : f32
    %1 = vector.broadcast %cst : f32 to vector<200x128xf32>
    %c0_i32 = arith.constant 0 : i32
    %2 = arith.addi %0, %c0_i32 : i32
    %c0_i32_0 = arith.constant 0 : i32
    %3 = arith.addi %2, %c0_i32_0 : i32
    %4 = arith.index_cast %3 : i32 to index
    %c0 = arith.constant 0 : index
    %5 = vector.load %arg1[%4, %c0] : memref<200x128xf32, #tpu.memory_space<vmem>>, vector<200x128xf32>
    %6 = arith.truncf %5 : vector<200x128xf32> to vector<200x128xbf16>
    %c0_1 = arith.constant 0 : index
    %c0_2 = arith.constant 0 : index
    %c0_3 = arith.constant 0 : index
    %7 = vector.load %arg2[%c0_1, %c0_2, %c0_3] : memref<1x128x128xf32, #tpu.memory_space<vmem>>, vector<1x128x128xf32>
    %8 = vector.shape_cast %7 : vector<1x128x128xf32> to vector<128x128xf32>
    %9 = arith.truncf %8 : vector<128x128xf32> to vector<128x128xbf16>
    %cst_4 = arith.constant dense<0.000000e+00> : vector<200x128xf32>
    %10 = tpu.matmul %6, %9, %cst_4 {dimension_numbers = #tpu.dot_dimension_numbers<[1], [0], [0], [1], [0, 0, 1, 1], [], []>} : vector<200x128xbf16>, vector<128x128xbf16>, vector<200x128xf32> -> vector<200x128xf32>
    %11 = arith.addf %1, %10 : vector<200x128xf32>
    %c0_5 = arith.constant 0 : index
    %c0_6 = arith.constant 0 : index
    %12 = vector.load %arg3[%c0_5, %c0_6] : memref<1x128xf32, #tpu.memory_space<vmem>>, vector<1x128xf32>
    %13 = vector.broadcast %12 : vector<1x128xf32> to vector<200x128xf32>
    %14 = arith.addf %11, %13 : vector<200x128xf32>
    %cst_7 = arith.constant 0.000000e+00 : f32
    %15 = vector.broadcast %cst_7 : f32 to vector<200x128xf32>
    %16 = arith.cmpf ogt, %14, %15 : vector<200x128xf32>
    %cst_8 = arith.constant 2.000000e-01 : f32
    %17 = vector.broadcast %cst_8 : f32 to vector<200x128xf32>
    %18 = arith.mulf %17, %14 : vector<200x128xf32>
    %19 = arith.select %16, %14, %18 : vector<200x128xi1>, vector<200x128xf32>
    %c0_9 = arith.constant 0 : index
    %c0_10 = arith.constant 0 : index
    %20 = vector.load %arg4[%c0_9, %c0_10] : memref<200x1xf32, #tpu.memory_space<vmem>>, vector<200x1xf32>
    %21 = vector.broadcast %20 : vector<200x1xf32> to vector<200x128xf32>
    %22 = arith.mulf %19, %21 : vector<200x128xf32>
    %c0_11 = arith.constant 0 : index
    %c0_12 = arith.constant 0 : index
    %23 = vector.load %arg5[%c0_11, %c0_12] : memref<200x128xf32, #tpu.memory_space<vmem>>, vector<200x128xf32>
    tpu.vector_store %arg5[%c0_11, %c0_12], %22 {strides = array<i32>} : memref<200x128xf32, #tpu.memory_space<vmem>>, vector<200x128xf32>,
    return
  }
  func.func @transform_0(%arg0: i32) -> (i32, i32) {
    %c0_i32 = arith.constant 0 : i32
    %c0_i32_0 = arith.constant 0 : i32
    %c0_i32_1 = arith.constant 0 : i32
    return %c0_i32, %c0_i32_0 : i32, i32
  }
  func.func @transform_1(%arg0: i32) -> (i32, i32, i32) {
    %c0_i32 = arith.constant 0 : i32
    %c0_i32_0 = arith.constant 0 : i32
    %c0_i32_1 = arith.constant 0 : i32
    %c0_i32_2 = arith.constant 0 : i32
    return %c0_i32, %c0_i32_0, %c0_i32_1 : i32, i32, i32
  }
  func.func @transform_2(%arg0: i32) -> (i32, i32) {
    %c0_i32 = arith.constant 0 : i32
    %c0_i32_0 = arith.constant 0 : i32
    %c0_i32_1 = arith.constant 0 : i32
    return %c0_i32, %c0_i32_0 : i32, i32
  }
  func.func @transform_3(%arg0: i32) -> (i32, i32) {
    %c0_i32 = arith.constant 0 : i32
    %c0_i32_0 = arith.constant 0 : i32
    return %arg0, %c0_i32 : i32, i32
  }
  func.func @transform_4(%arg0: i32) -> (i32, i32) {
    %c0_i32 = arith.constant 0 : i32
    %c0_i32_0 = arith.constant 0 : i32
    return %arg0, %c0_i32 : i32, i32
  }
}

module attributes {stable_mosaic.version = 11 : i64} {
  func.func @_avgpool_fade_kernel(%arg0: i32, %arg1: memref<1x1xf32, #tpu.memory_space<smem>>, %arg2: memref<1x8x2x8x256xf32, #tpu.memory_space<vmem>>, %arg3: memref<1x10x10x128xf32, #tpu.memory_space<vmem>>, %arg4: memref<1x10x10x128xf32, #tpu.memory_space<vmem>>) attributes {dimension_semantics = [#tpu.dimension_semantics<parallel>], iteration_bounds = array<i64: 2>, scalar_prefetch = 0 : i64, scratch_operands = 0 : i64, tpu.core_type = #tpu.core_type<tc>, window_params = [{transform_indices = @transform_0, window_bounds = array<i64: 1, 1>}, {transform_indices = @transform_1, window_bounds = array<i64: 1, 8, 2, 8, 256>}, {transform_indices = @transform_2, window_bounds = array<i64: 1, 10, 10, 128>}, {transform_indices = @transform_3, window_bounds = array<i64: 1, 10, 10, 128>}]} {
    %c0 = arith.constant 0 : index
    %c0_0 = arith.constant 0 : index
    %0 = memref.load %arg1[%c0, %c0_0] : memref<1x1xf32, #tpu.memory_space<smem>>
    %c0_1 = arith.constant 0 : index
    %c0_2 = arith.constant 0 : index
    %c0_3 = arith.constant 0 : index
    %c0_4 = arith.constant 0 : index
    %c0_5 = arith.constant 0 : index
    %1 = vector.load %arg2[%c0_1, %c0_2, %c0_3, %c0_4, %c0_5] : memref<1x8x2x8x256xf32, #tpu.memory_space<vmem>>, vector<1x8x2x8x256xf32>
    %2 = vector.extract_strided_slice %1 {offsets = [0, 0, 0, 0, 0], sizes = [1, 8, 2, 8, 128], strides = [1, 1, 1, 1, 1]} : vector<1x8x2x8x256xf32> to vector<1x8x2x8x128xf32>
    %3 = vector.extract_strided_slice %1 {offsets = [0, 0, 0, 0, 128], sizes = [1, 8, 2, 8, 128], strides = [1, 1, 1, 1, 1]} : vector<1x8x2x8x256xf32> to vector<1x8x2x8x128xf32>
    %4 = arith.addf %2, %3 : vector<1x8x2x8x128xf32>
    %5 = vector.extract_strided_slice %4 {offsets = [0, 0, 0, 0, 0], sizes = [1, 8, 1, 8, 128], strides = [1, 1, 1, 1, 1]} : vector<1x8x2x8x128xf32> to vector<1x8x1x8x128xf32>
    %6 = vector.shape_cast %5 : vector<1x8x1x8x128xf32> to vector<1x8x8x128xf32>
    %7 = vector.extract_strided_slice %4 {offsets = [0, 0, 1, 0, 0], sizes = [1, 8, 1, 8, 128], strides = [1, 1, 1, 1, 1]} : vector<1x8x2x8x128xf32> to vector<1x8x1x8x128xf32>
    %8 = vector.shape_cast %7 : vector<1x8x1x8x128xf32> to vector<1x8x8x128xf32>
    %9 = arith.addf %6, %8 : vector<1x8x8x128xf32>
    %cst = arith.constant 2.500000e-01 : f32
    %10 = vector.broadcast %cst : f32 to vector<1x8x8x128xf32>
    %11 = arith.mulf %10, %9 : vector<1x8x8x128xf32>
    %12 = vector.broadcast %0 : f32 to vector<1x8x8x128xf32>
    %13 = arith.mulf %12, %11 : vector<1x8x8x128xf32>
    %cst_6 = arith.constant 1.000000e+00 : f32
    %14 = arith.subf %cst_6, %0 : f32
    %c0_7 = arith.constant 0 : index
    %c1 = arith.constant 1 : index
    %c1_8 = arith.constant 1 : index
    %c0_9 = arith.constant 0 : index
    %15 = vector.load %arg3[%c0_7, %c1, %c1_8, %c0_9] : memref<1x10x10x128xf32, #tpu.memory_space<vmem>>, vector<1x8x8x128xf32>
    %16 = vector.broadcast %14 : f32 to vector<1x8x8x128xf32>
    %17 = arith.mulf %16, %15 : vector<1x8x8x128xf32>
    %18 = arith.addf %13, %17 : vector<1x8x8x128xf32>
    %cst_10 = arith.constant 0.000000e+00 : f32
    %19 = vector.broadcast %cst_10 : f32 to vector<1x10x10x128xf32>
    %c0_11 = arith.constant 0 : index
    %c0_12 = arith.constant 0 : index
    %c0_13 = arith.constant 0 : index
    %c0_14 = arith.constant 0 : index
    %20 = vector.load %arg4[%c0_11, %c0_12, %c0_13, %c0_14] : memref<1x10x10x128xf32, #tpu.memory_space<vmem>>, vector<1x10x10x128xf32>
    tpu.vector_store %arg4[%c0_11, %c0_12, %c0_13, %c0_14], %19 {strides = array<i32>} : memref<1x10x10x128xf32, #tpu.memory_space<vmem>>, vector<1x10x10x128xf32>,
    %c0_15 = arith.constant 0 : index
    %c1_16 = arith.constant 1 : index
    %c1_17 = arith.constant 1 : index
    %c0_18 = arith.constant 0 : index
    %21 = vector.load %arg4[%c0_15, %c1_16, %c1_17, %c0_18] : memref<1x10x10x128xf32, #tpu.memory_space<vmem>>, vector<1x8x8x128xf32>
    tpu.vector_store %arg4[%c0_15, %c1_16, %c1_17, %c0_18], %18 {strides = array<i32>} : memref<1x10x10x128xf32, #tpu.memory_space<vmem>>, vector<1x8x8x128xf32>,
    return
  }
  func.func @transform_0(%arg0: i32) -> (i32, i32) {
    %c0_i32 = arith.constant 0 : i32
    %c0_i32_0 = arith.constant 0 : i32
    %c0_i32_1 = arith.constant 0 : i32
    return %c0_i32, %c0_i32_0 : i32, i32
  }
  func.func @transform_1(%arg0: i32) -> (i32, i32, i32, i32, i32) {
    %c0_i32 = arith.constant 0 : i32
    %c0_i32_0 = arith.constant 0 : i32
    %c0_i32_1 = arith.constant 0 : i32
    %c0_i32_2 = arith.constant 0 : i32
    %c0_i32_3 = arith.constant 0 : i32
    return %arg0, %c0_i32, %c0_i32_0, %c0_i32_1, %c0_i32_2 : i32, i32, i32, i32, i32
  }
  func.func @transform_2(%arg0: i32) -> (i32, i32, i32, i32) {
    %c0_i32 = arith.constant 0 : i32
    %c0_i32_0 = arith.constant 0 : i32
    %c0_i32_1 = arith.constant 0 : i32
    %c0_i32_2 = arith.constant 0 : i32
    return %arg0, %c0_i32, %c0_i32_0, %c0_i32_1 : i32, i32, i32, i32
  }
  func.func @transform_3(%arg0: i32) -> (i32, i32, i32, i32) {
    %c0_i32 = arith.constant 0 : i32
    %c0_i32_0 = arith.constant 0 : i32
    %c0_i32_1 = arith.constant 0 : i32
    %c0_i32_2 = arith.constant 0 : i32
    return %arg0, %c0_i32, %c0_i32_0, %c0_i32_1 : i32, i32, i32, i32
  }
}

module attributes {stable_mosaic.version = 11 : i64} {
  func.func @_conv_rows_kernel(%arg0: i32, %arg1: memref<222x128xf32, #tpu.memory_space<vmem>>, %arg2: memref<9x128x128xf32, #tpu.memory_space<vmem>>, %arg3: memref<1x128xf32, #tpu.memory_space<vmem>>, %arg4: memref<200x1xf32, #tpu.memory_space<vmem>>, %arg5: memref<200x128xf32, #tpu.memory_space<vmem>>) attributes {dimension_semantics = [#tpu.dimension_semantics<parallel>], iteration_bounds = array<i64: 1>, scalar_prefetch = 0 : i64, scratch_operands = 0 : i64, tpu.core_type = #tpu.core_type<tc>, window_params = [{pipeline_mode = #tpu.pipeline_mode<synchronous>, transform_indices = @transform_0, window_bounds = array<i64: 222, 128>}, {pipeline_mode = #tpu.pipeline_mode<synchronous>, transform_indices = @transform_1, window_bounds = array<i64: 9, 128, 128>}, {pipeline_mode = #tpu.pipeline_mode<synchronous>, transform_indices = @transform_2, window_bounds = array<i64: 1, 128>}, {transform_indices = @transform_3, window_bounds = array<i64: 200, 1>}, {transform_indices = @transform_4, window_bounds = array<i64: 200, 128>}]} {
    %c200_i32 = arith.constant 200 : i32
    %0 = arith.muli %arg0, %c200_i32 : i32
    %cst = arith.constant 0.000000e+00 : f32
    %1 = vector.broadcast %cst : f32 to vector<200x128xf32>
    %c11_i32 = arith.constant 11 : i32
    %2 = arith.addi %0, %c11_i32 : i32
    %c-11_i32 = arith.constant -11 : i32
    %3 = arith.addi %2, %c-11_i32 : i32
    %4 = arith.index_cast %3 : i32 to index
    %c0 = arith.constant 0 : index
    %5 = vector.load %arg1[%4, %c0] : memref<222x128xf32, #tpu.memory_space<vmem>>, vector<200x128xf32>
    %6 = arith.truncf %5 : vector<200x128xf32> to vector<200x128xbf16>
    %c0_0 = arith.constant 0 : index
    %c0_1 = arith.constant 0 : index
    %c0_2 = arith.constant 0 : index
    %7 = vector.load %arg2[%c0_0, %c0_1, %c0_2] : memref<9x128x128xf32, #tpu.memory_space<vmem>>, vector<1x128x128xf32>
    %8 = vector.shape_cast %7 : vector<1x128x128xf32> to vector<128x128xf32>
    %9 = arith.truncf %8 : vector<128x128xf32> to vector<128x128xbf16>
    %cst_3 = arith.constant dense<0.000000e+00> : vector<200x128xf32>
    %10 = tpu.matmul %6, %9, %cst_3 {dimension_numbers = #tpu.dot_dimension_numbers<[1], [0], [0], [1], [0, 0, 1, 1], [], []>} : vector<200x128xbf16>, vector<128x128xbf16>, vector<200x128xf32> -> vector<200x128xf32>
    %11 = arith.addf %1, %10 : vector<200x128xf32>
    %c11_i32_4 = arith.constant 11 : i32
    %12 = arith.addi %0, %c11_i32_4 : i32
    %c-10_i32 = arith.constant -10 : i32
    %13 = arith.addi %12, %c-10_i32 : i32
    %14 = arith.index_cast %13 : i32 to index
    %c0_5 = arith.constant 0 : index
    %15 = vector.load %arg1[%14, %c0_5] : memref<222x128xf32, #tpu.memory_space<vmem>>, vector<200x128xf32>
    %16 = arith.truncf %15 : vector<200x128xf32> to vector<200x128xbf16>
    %c1 = arith.constant 1 : index
    %c0_6 = arith.constant 0 : index
    %c0_7 = arith.constant 0 : index
    %17 = vector.load %arg2[%c1, %c0_6, %c0_7] : memref<9x128x128xf32, #tpu.memory_space<vmem>>, vector<1x128x128xf32>
    %18 = vector.shape_cast %17 : vector<1x128x128xf32> to vector<128x128xf32>
    %19 = arith.truncf %18 : vector<128x128xf32> to vector<128x128xbf16>
    %cst_8 = arith.constant dense<0.000000e+00> : vector<200x128xf32>
    %20 = tpu.matmul %16, %19, %cst_8 {dimension_numbers = #tpu.dot_dimension_numbers<[1], [0], [0], [1], [0, 0, 1, 1], [], []>} : vector<200x128xbf16>, vector<128x128xbf16>, vector<200x128xf32> -> vector<200x128xf32>
    %21 = arith.addf %11, %20 : vector<200x128xf32>
    %c11_i32_9 = arith.constant 11 : i32
    %22 = arith.addi %0, %c11_i32_9 : i32
    %c-9_i32 = arith.constant -9 : i32
    %23 = arith.addi %22, %c-9_i32 : i32
    %24 = arith.index_cast %23 : i32 to index
    %c0_10 = arith.constant 0 : index
    %25 = vector.load %arg1[%24, %c0_10] : memref<222x128xf32, #tpu.memory_space<vmem>>, vector<200x128xf32>
    %26 = arith.truncf %25 : vector<200x128xf32> to vector<200x128xbf16>
    %c2 = arith.constant 2 : index
    %c0_11 = arith.constant 0 : index
    %c0_12 = arith.constant 0 : index
    %27 = vector.load %arg2[%c2, %c0_11, %c0_12] : memref<9x128x128xf32, #tpu.memory_space<vmem>>, vector<1x128x128xf32>
    %28 = vector.shape_cast %27 : vector<1x128x128xf32> to vector<128x128xf32>
    %29 = arith.truncf %28 : vector<128x128xf32> to vector<128x128xbf16>
    %cst_13 = arith.constant dense<0.000000e+00> : vector<200x128xf32>
    %30 = tpu.matmul %26, %29, %cst_13 {dimension_numbers = #tpu.dot_dimension_numbers<[1], [0], [0], [1], [0, 0, 1, 1], [], []>} : vector<200x128xbf16>, vector<128x128xbf16>, vector<200x128xf32> -> vector<200x128xf32>
    %31 = arith.addf %21, %30 : vector<200x128xf32>
    %c11_i32_14 = arith.constant 11 : i32
    %32 = arith.addi %0, %c11_i32_14 : i32
    %c-1_i32 = arith.constant -1 : i32
    %33 = arith.addi %32, %c-1_i32 : i32
    %34 = arith.index_cast %33 : i32 to index
    %c0_15 = arith.constant 0 : index
    %35 = vector.load %arg1[%34, %c0_15] : memref<222x128xf32, #tpu.memory_space<vmem>>, vector<200x128xf32>
    %36 = arith.truncf %35 : vector<200x128xf32> to vector<200x128xbf16>
    %c3 = arith.constant 3 : index
    %c0_16 = arith.constant 0 : index
    %c0_17 = arith.constant 0 : index
    %37 = vector.load %arg2[%c3, %c0_16, %c0_17] : memref<9x128x128xf32, #tpu.memory_space<vmem>>, vector<1x128x128xf32>
    %38 = vector.shape_cast %37 : vector<1x128x128xf32> to vector<128x128xf32>
    %39 = arith.truncf %38 : vector<128x128xf32> to vector<128x128xbf16>
    %cst_18 = arith.constant dense<0.000000e+00> : vector<200x128xf32>
    %40 = tpu.matmul %36, %39, %cst_18 {dimension_numbers = #tpu.dot_dimension_numbers<[1], [0], [0], [1], [0, 0, 1, 1], [], []>} : vector<200x128xbf16>, vector<128x128xbf16>, vector<200x128xf32> -> vector<200x128xf32>
    %41 = arith.addf %31, %40 : vector<200x128xf32>
    %c11_i32_19 = arith.constant 11 : i32
    %42 = arith.addi %0, %c11_i32_19 : i32
    %c0_i32 = arith.constant 0 : i32
    %43 = arith.addi %42, %c0_i32 : i32
    %44 = arith.index_cast %43 : i32 to index
    %c0_20 = arith.constant 0 : index
    %45 = vector.load %arg1[%44, %c0_20] : memref<222x128xf32, #tpu.memory_space<vmem>>, vector<200x128xf32>
    %46 = arith.truncf %45 : vector<200x128xf32> to vector<200x128xbf16>
    %c4 = arith.constant 4 : index
    %c0_21 = arith.constant 0 : index
    %c0_22 = arith.constant 0 : index
    %47 = vector.load %arg2[%c4, %c0_21, %c0_22] : memref<9x128x128xf32, #tpu.memory_space<vmem>>, vector<1x128x128xf32>
    %48 = vector.shape_cast %47 : vector<1x128x128xf32> to vector<128x128xf32>
    %49 = arith.truncf %48 : vector<128x128xf32> to vector<128x128xbf16>
    %cst_23 = arith.constant dense<0.000000e+00> : vector<200x128xf32>
    %50 = tpu.matmul %46, %49, %cst_23 {dimension_numbers = #tpu.dot_dimension_numbers<[1], [0], [0], [1], [0, 0, 1, 1], [], []>} : vector<200x128xbf16>, vector<128x128xbf16>, vector<200x128xf32> -> vector<200x128xf32>
    %51 = arith.addf %41, %50 : vector<200x128xf32>
    %c11_i32_24 = arith.constant 11 : i32
    %52 = arith.addi %0, %c11_i32_24 : i32
    %c1_i32 = arith.constant 1 : i32
    %53 = arith.addi %52, %c1_i32 : i32
    %54 = arith.index_cast %53 : i32 to index
    %c0_25 = arith.constant 0 : index
    %55 = vector.load %arg1[%54, %c0_25] : memref<222x128xf32, #tpu.memory_space<vmem>>, vector<200x128xf32>
    %56 = arith.truncf %55 : vector<200x128xf32> to vector<200x128xbf16>
    %c5 = arith.constant 5 : index
    %c0_26 = arith.constant 0 : index
    %c0_27 = arith.constant 0 : index
    %57 = vector.load %arg2[%c5, %c0_26, %c0_27] : memref<9x128x128xf32, #tpu.memory_space<vmem>>, vector<1x128x128xf32>
    %58 = vector.shape_cast %57 : vector<1x128x128xf32> to vector<128x128xf32>
    %59 = arith.truncf %58 : vector<128x128xf32> to vector<128x128xbf16>
    %cst_28 = arith.constant dense<0.000000e+00> : vector<200x128xf32>
    %60 = tpu.matmul %56, %59, %cst_28 {dimension_numbers = #tpu.dot_dimension_numbers<[1], [0], [0], [1], [0, 0, 1, 1], [], []>} : vector<200x128xbf16>, vector<128x128xbf16>, vector<200x128xf32> -> vector<200x128xf32>
    %61 = arith.addf %51, %60 : vector<200x128xf32>
    %c11_i32_29 = arith.constant 11 : i32
    %62 = arith.addi %0, %c11_i32_29 : i32
    %c9_i32 = arith.constant 9 : i32
    %63 = arith.addi %62, %c9_i32 : i32
    %64 = arith.index_cast %63 : i32 to index
    %c0_30 = arith.constant 0 : index
    %65 = vector.load %arg1[%64, %c0_30] : memref<222x128xf32, #tpu.memory_space<vmem>>, vector<200x128xf32>
    %66 = arith.truncf %65 : vector<200x128xf32> to vector<200x128xbf16>
    %c6 = arith.constant 6 : index
    %c0_31 = arith.constant 0 : index
    %c0_32 = arith.constant 0 : index
    %67 = vector.load %arg2[%c6, %c0_31, %c0_32] : memref<9x128x128xf32, #tpu.memory_space<vmem>>, vector<1x128x128xf32>
    %68 = vector.shape_cast %67 : vector<1x128x128xf32> to vector<128x128xf32>
    %69 = arith.truncf %68 : vector<128x128xf32> to vector<128x128xbf16>
    %cst_33 = arith.constant dense<0.000000e+00> : vector<200x128xf32>
    %70 = tpu.matmul %66, %69, %cst_33 {dimension_numbers = #tpu.dot_dimension_numbers<[1], [0], [0], [1], [0, 0, 1, 1], [], []>} : vector<200x128xbf16>, vector<128x128xbf16>, vector<200x128xf32> -> vector<200x128xf32>
    %71 = arith.addf %61, %70 : vector<200x128xf32>
    %c11_i32_34 = arith.constant 11 : i32
    %72 = arith.addi %0, %c11_i32_34 : i32
    %c10_i32 = arith.constant 10 : i32
    %73 = arith.addi %72, %c10_i32 : i32
    %74 = arith.index_cast %73 : i32 to index
    %c0_35 = arith.constant 0 : index
    %75 = vector.load %arg1[%74, %c0_35] : memref<222x128xf32, #tpu.memory_space<vmem>>, vector<200x128xf32>
    %76 = arith.truncf %75 : vector<200x128xf32> to vector<200x128xbf16>
    %c7 = arith.constant 7 : index
    %c0_36 = arith.constant 0 : index
    %c0_37 = arith.constant 0 : index
    %77 = vector.load %arg2[%c7, %c0_36, %c0_37] : memref<9x128x128xf32, #tpu.memory_space<vmem>>, vector<1x128x128xf32>
    %78 = vector.shape_cast %77 : vector<1x128x128xf32> to vector<128x128xf32>
    %79 = arith.truncf %78 : vector<128x128xf32> to vector<128x128xbf16>
    %cst_38 = arith.constant dense<0.000000e+00> : vector<200x128xf32>
    %80 = tpu.matmul %76, %79, %cst_38 {dimension_numbers = #tpu.dot_dimension_numbers<[1], [0], [0], [1], [0, 0, 1, 1], [], []>} : vector<200x128xbf16>, vector<128x128xbf16>, vector<200x128xf32> -> vector<200x128xf32>
    %81 = arith.addf %71, %80 : vector<200x128xf32>
    %c11_i32_39 = arith.constant 11 : i32
    %82 = arith.addi %0, %c11_i32_39 : i32
    %c11_i32_40 = arith.constant 11 : i32
    %83 = arith.addi %82, %c11_i32_40 : i32
    %84 = arith.index_cast %83 : i32 to index
    %c0_41 = arith.constant 0 : index
    %85 = vector.load %arg1[%84, %c0_41] : memref<222x128xf32, #tpu.memory_space<vmem>>, vector<200x128xf32>
    %86 = arith.truncf %85 : vector<200x128xf32> to vector<200x128xbf16>
    %c8 = arith.constant 8 : index
    %c0_42 = arith.constant 0 : index
    %c0_43 = arith.constant 0 : index
    %87 = vector.load %arg2[%c8, %c0_42, %c0_43] : memref<9x128x128xf32, #tpu.memory_space<vmem>>, vector<1x128x128xf32>
    %88 = vector.shape_cast %87 : vector<1x128x128xf32> to vector<128x128xf32>
    %89 = arith.truncf %88 : vector<128x128xf32> to vector<128x128xbf16>
    %cst_44 = arith.constant dense<0.000000e+00> : vector<200x128xf32>
    %90 = tpu.matmul %86, %89, %cst_44 {dimension_numbers = #tpu.dot_dimension_numbers<[1], [0], [0], [1], [0, 0, 1, 1], [], []>} : vector<200x128xbf16>, vector<128x128xbf16>, vector<200x128xf32> -> vector<200x128xf32>
    %91 = arith.addf %81, %90 : vector<200x128xf32>
    %c0_45 = arith.constant 0 : index
    %c0_46 = arith.constant 0 : index
    %92 = vector.load %arg3[%c0_45, %c0_46] : memref<1x128xf32, #tpu.memory_space<vmem>>, vector<1x128xf32>
    %93 = vector.broadcast %92 : vector<1x128xf32> to vector<200x128xf32>
    %94 = arith.addf %91, %93 : vector<200x128xf32>
    %cst_47 = arith.constant 0.000000e+00 : f32
    %95 = vector.broadcast %cst_47 : f32 to vector<200x128xf32>
    %96 = arith.cmpf ogt, %94, %95 : vector<200x128xf32>
    %cst_48 = arith.constant 2.000000e-01 : f32
    %97 = vector.broadcast %cst_48 : f32 to vector<200x128xf32>
    %98 = arith.mulf %97, %94 : vector<200x128xf32>
    %99 = arith.select %96, %94, %98 : vector<200x128xi1>, vector<200x128xf32>
    %c0_49 = arith.constant 0 : index
    %c0_50 = arith.constant 0 : index
    %100 = vector.load %arg4[%c0_49, %c0_50] : memref<200x1xf32, #tpu.memory_space<vmem>>, vector<200x1xf32>
    %101 = vector.broadcast %100 : vector<200x1xf32> to vector<200x128xf32>
    %102 = arith.mulf %99, %101 : vector<200x128xf32>
    %c0_51 = arith.constant 0 : index
    %c0_52 = arith.constant 0 : index
    %103 = vector.load %arg5[%c0_51, %c0_52] : memref<200x128xf32, #tpu.memory_space<vmem>>, vector<200x128xf32>
    tpu.vector_store %arg5[%c0_51, %c0_52], %102 {strides = array<i32>} : memref<200x128xf32, #tpu.memory_space<vmem>>, vector<200x128xf32>,
    return
  }
  func.func @transform_0(%arg0: i32) -> (i32, i32) {
    %c0_i32 = arith.constant 0 : i32
    %c0_i32_0 = arith.constant 0 : i32
    %c0_i32_1 = arith.constant 0 : i32
    return %c0_i32, %c0_i32_0 : i32, i32
  }
  func.func @transform_1(%arg0: i32) -> (i32, i32, i32) {
    %c0_i32 = arith.constant 0 : i32
    %c0_i32_0 = arith.constant 0 : i32
    %c0_i32_1 = arith.constant 0 : i32
    %c0_i32_2 = arith.constant 0 : i32
    return %c0_i32, %c0_i32_0, %c0_i32_1 : i32, i32, i32
  }
  func.func @transform_2(%arg0: i32) -> (i32, i32) {
    %c0_i32 = arith.constant 0 : i32
    %c0_i32_0 = arith.constant 0 : i32
    %c0_i32_1 = arith.constant 0 : i32
    return %c0_i32, %c0_i32_0 : i32, i32
  }
  func.func @transform_3(%arg0: i32) -> (i32, i32) {
    %c0_i32 = arith.constant 0 : i32
    %c0_i32_0 = arith.constant 0 : i32
    return %arg0, %c0_i32 : i32, i32
  }
  func.func @transform_4(%arg0: i32) -> (i32, i32) {
    %c0_i32 = arith.constant 0 : i32
    %c0_i32_0 = arith.constant 0 : i32
    return %arg0, %c0_i32 : i32, i32
  }
}

module attributes {stable_mosaic.version = 11 : i64} {
  func.func @_mbstd_kernel(%arg0: memref<2x6x6x128xf32, #tpu.memory_space<vmem>>, %arg1: memref<2x6x6x128xf32, #tpu.memory_space<vmem>>) attributes {dimension_semantics = [], scalar_prefetch = 0 : i64, scratch_operands = 0 : i64, tpu.core_type = #tpu.core_type<tc>} {
    %c0 = arith.constant 0 : index
    %c0_0 = arith.constant 0 : index
    %c0_1 = arith.constant 0 : index
    %c0_2 = arith.constant 0 : index
    %0 = vector.load %arg0[%c0, %c0_0, %c0_1, %c0_2] : memref<2x6x6x128xf32, #tpu.memory_space<vmem>>, vector<2x6x6x128xf32>
    %cst = arith.constant dense<0.000000e+00> : vector<6x6x128xf32>
    %1 = vector.multi_reduction <add>, %0, %cst [0] : vector<2x6x6x128xf32> to vector<6x6x128xf32>
    %2 = vector.shape_cast %1 : vector<6x6x128xf32> to vector<1x6x6x128xf32>
    %cst_3 = arith.constant 2.000000e+00 : f32
    %3 = vector.broadcast %cst_3 : f32 to vector<1x6x6x128xf32>
    %4 = arith.divf %2, %3 : vector<1x6x6x128xf32>
    %5 = vector.broadcast %4 : vector<1x6x6x128xf32> to vector<2x6x6x128xf32>
    %6 = arith.subf %0, %5 : vector<2x6x6x128xf32>
    %7 = arith.mulf %6, %6 : vector<2x6x6x128xf32>
    %cst_4 = arith.constant dense<0.000000e+00> : vector<6x6x128xf32>
    %8 = vector.multi_reduction <add>, %7, %cst_4 [0] : vector<2x6x6x128xf32> to vector<6x6x128xf32>
    %cst_5 = arith.constant 1.000000e+00 : f32
    %9 = vector.broadcast %cst_5 : f32 to vector<6x6x128xf32>
    %10 = arith.divf %8, %9 : vector<6x6x128xf32>
    %11 = math.sqrt %10 : vector<6x6x128xf32>
    %12 = vector.shape_cast %11 : vector<6x6x128xf32> to vector<1x6x6x128xf32>
    %cst_6 = arith.constant dense<0.000000e+00> : vector<1xf32>
    %13 = vector.multi_reduction <add>, %12, %cst_6 [1, 2, 3] : vector<1x6x6x128xf32> to vector<1xf32>
    %14 = vector.shape_cast %13 : vector<1xf32> to vector<1x1x1x1xf32>
    %15 = vector.extract %14[0, 0, 0, 0] : f32 from vector<1x1x1x1xf32>
    %cst_7 = arith.constant 2.560000e+02 : f32
    %16 = arith.divf %15, %cst_7 : f32
    %17 = tpu.iota {dimensions = array<i32: 1>} : vector<2x6x6x128xi32>
    %18 = tpu.iota {dimensions = array<i32: 2>} : vector<2x6x6x128xi32>
    %19 = tpu.iota {dimensions = array<i32: 3>} : vector<2x6x6x128xi32>
    %c16_i32 = arith.constant 16 : i32
    %20 = vector.broadcast %c16_i32 : i32 to vector<2x6x6x128xi32>
    %21 = arith.cmpi eq, %19, %20 : vector<2x6x6x128xi32>
    %c1_i32 = arith.constant 1 : i32
    %22 = vector.broadcast %c1_i32 : i32 to vector<2x6x6x128xi32>
    %23 = arith.cmpi sge, %17, %22 : vector<2x6x6x128xi32>
    %24 = arith.andi %21, %23 : vector<2x6x6x128xi1>
    %c4_i32 = arith.constant 4 : i32
    %25 = vector.broadcast %c4_i32 : i32 to vector<2x6x6x128xi32>
    %26 = arith.cmpi sle, %17, %25 : vector<2x6x6x128xi32>
    %27 = arith.andi %24, %26 : vector<2x6x6x128xi1>
    %c1_i32_8 = arith.constant 1 : i32
    %28 = vector.broadcast %c1_i32_8 : i32 to vector<2x6x6x128xi32>
    %29 = arith.cmpi sge, %18, %28 : vector<2x6x6x128xi32>
    %30 = arith.andi %27, %29 : vector<2x6x6x128xi1>
    %c4_i32_9 = arith.constant 4 : i32
    %31 = vector.broadcast %c4_i32_9 : i32 to vector<2x6x6x128xi32>
    %32 = arith.cmpi sle, %18, %31 : vector<2x6x6x128xi32>
    %33 = arith.andi %30, %32 : vector<2x6x6x128xi1>
    %34 = vector.broadcast %16 : f32 to vector<2x6x6x128xf32>
    %35 = arith.select %33, %34, %0 : vector<2x6x6x128xi1>, vector<2x6x6x128xf32>
    %c0_10 = arith.constant 0 : index
    %c0_11 = arith.constant 0 : index
    %c0_12 = arith.constant 0 : index
    %c0_13 = arith.constant 0 : index
    %36 = vector.load %arg1[%c0_10, %c0_11, %c0_12, %c0_13] : memref<2x6x6x128xf32, #tpu.memory_space<vmem>>, vector<2x6x6x128xf32>
    tpu.vector_store %arg1[%c0_10, %c0_11, %c0_12, %c0_13], %35 {strides = array<i32>} : memref<2x6x6x128xf32, #tpu.memory_space<vmem>>, vector<2x6x6x128xf32>,
    return
  }
}

module attributes {stable_mosaic.version = 11 : i64} {
  func.func @_avgpool_kernel(%arg0: i32, %arg1: memref<1x4x2x4x256xf32, #tpu.memory_space<vmem>>, %arg2: memref<1x6x6x128xf32, #tpu.memory_space<vmem>>) attributes {dimension_semantics = [#tpu.dimension_semantics<parallel>], iteration_bounds = array<i64: 2>, scalar_prefetch = 0 : i64, scratch_operands = 0 : i64, tpu.core_type = #tpu.core_type<tc>, window_params = [{transform_indices = @transform_0, window_bounds = array<i64: 1, 4, 2, 4, 256>}, {transform_indices = @transform_1, window_bounds = array<i64: 1, 6, 6, 128>}]} {
    %c0 = arith.constant 0 : index
    %c0_0 = arith.constant 0 : index
    %c0_1 = arith.constant 0 : index
    %c0_2 = arith.constant 0 : index
    %c0_3 = arith.constant 0 : index
    %0 = vector.load %arg1[%c0, %c0_0, %c0_1, %c0_2, %c0_3] : memref<1x4x2x4x256xf32, #tpu.memory_space<vmem>>, vector<1x4x2x4x256xf32>
    %1 = vector.extract_strided_slice %0 {offsets = [0, 0, 0, 0, 0], sizes = [1, 4, 2, 4, 128], strides = [1, 1, 1, 1, 1]} : vector<1x4x2x4x256xf32> to vector<1x4x2x4x128xf32>
    %2 = vector.extract_strided_slice %0 {offsets = [0, 0, 0, 0, 128], sizes = [1, 4, 2, 4, 128], strides = [1, 1, 1, 1, 1]} : vector<1x4x2x4x256xf32> to vector<1x4x2x4x128xf32>
    %3 = arith.addf %1, %2 : vector<1x4x2x4x128xf32>
    %4 = vector.extract_strided_slice %3 {offsets = [0, 0, 0, 0, 0], sizes = [1, 4, 1, 4, 128], strides = [1, 1, 1, 1, 1]} : vector<1x4x2x4x128xf32> to vector<1x4x1x4x128xf32>
    %5 = vector.shape_cast %4 : vector<1x4x1x4x128xf32> to vector<1x4x4x128xf32>
    %6 = vector.extract_strided_slice %3 {offsets = [0, 0, 1, 0, 0], sizes = [1, 4, 1, 4, 128], strides = [1, 1, 1, 1, 1]} : vector<1x4x2x4x128xf32> to vector<1x4x1x4x128xf32>
    %7 = vector.shape_cast %6 : vector<1x4x1x4x128xf32> to vector<1x4x4x128xf32>
    %8 = arith.addf %5, %7 : vector<1x4x4x128xf32>
    %cst = arith.constant 2.500000e-01 : f32
    %9 = vector.broadcast %cst : f32 to vector<1x4x4x128xf32>
    %10 = arith.mulf %9, %8 : vector<1x4x4x128xf32>
    %cst_4 = arith.constant 0.000000e+00 : f32
    %11 = vector.broadcast %cst_4 : f32 to vector<1x6x6x128xf32>
    %c0_5 = arith.constant 0 : index
    %c0_6 = arith.constant 0 : index
    %c0_7 = arith.constant 0 : index
    %c0_8 = arith.constant 0 : index
    %12 = vector.load %arg2[%c0_5, %c0_6, %c0_7, %c0_8] : memref<1x6x6x128xf32, #tpu.memory_space<vmem>>, vector<1x6x6x128xf32>
    tpu.vector_store %arg2[%c0_5, %c0_6, %c0_7, %c0_8], %11 {strides = array<i32>} : memref<1x6x6x128xf32, #tpu.memory_space<vmem>>, vector<1x6x6x128xf32>,
    %c0_9 = arith.constant 0 : index
    %c1 = arith.constant 1 : index
    %c1_10 = arith.constant 1 : index
    %c0_11 = arith.constant 0 : index
    %13 = vector.load %arg2[%c0_9, %c1, %c1_10, %c0_11] : memref<1x6x6x128xf32, #tpu.memory_space<vmem>>, vector<1x4x4x128xf32>
    tpu.vector_store %arg2[%c0_9, %c1, %c1_10, %c0_11], %10 {strides = array<i32>} : memref<1x6x6x128xf32, #tpu.memory_space<vmem>>, vector<1x4x4x128xf32>,
    return
  }
  func.func @transform_0(%arg0: i32) -> (i32, i32, i32, i32, i32) {
    %c0_i32 = arith.constant 0 : i32
    %c0_i32_0 = arith.constant 0 : i32
    %c0_i32_1 = arith.constant 0 : i32
    %c0_i32_2 = arith.constant 0 : i32
    %c0_i32_3 = arith.constant 0 : i32
    return %arg0, %c0_i32, %c0_i32_0, %c0_i32_1, %c0_i32_2 : i32, i32, i32, i32, i32
  }
  func.func @transform_1(%arg0: i32) -> (i32, i32, i32, i32) {
    %c0_i32 = arith.constant 0 : i32
    %c0_i32_0 = arith.constant 0 : i32
    %c0_i32_1 = arith.constant 0 : i32
    %c0_i32_2 = arith.constant 0 : i32
    return %arg0, %c0_i32, %c0_i32_0, %c0_i32_1 : i32, i32, i32, i32
  }
}

module attributes {stable_mosaic.version = 11 : i64} {
  func.func @_conv_rows_kernel(%arg0: i32, %arg1: memref<86x128xf32, #tpu.memory_space<vmem>>, %arg2: memref<9x128x128xf32, #tpu.memory_space<vmem>>, %arg3: memref<1x128xf32, #tpu.memory_space<vmem>>, %arg4: memref<72x1xf32, #tpu.memory_space<vmem>>, %arg5: memref<72x128xf32, #tpu.memory_space<vmem>>) attributes {dimension_semantics = [#tpu.dimension_semantics<parallel>], iteration_bounds = array<i64: 1>, scalar_prefetch = 0 : i64, scratch_operands = 0 : i64, tpu.core_type = #tpu.core_type<tc>, window_params = [{pipeline_mode = #tpu.pipeline_mode<synchronous>, transform_indices = @transform_0, window_bounds = array<i64: 86, 128>}, {pipeline_mode = #tpu.pipeline_mode<synchronous>, transform_indices = @transform_1, window_bounds = array<i64: 9, 128, 128>}, {pipeline_mode = #tpu.pipeline_mode<synchronous>, transform_indices = @transform_2, window_bounds = array<i64: 1, 128>}, {transform_indices = @transform_3, window_bounds = array<i64: 72, 1>}, {transform_indices = @transform_4, window_bounds = array<i64: 72, 128>}]} {
    %c72_i32 = arith.constant 72 : i32
    %0 = arith.muli %arg0, %c72_i32 : i32
    %cst = arith.constant 0.000000e+00 : f32
    %1 = vector.broadcast %cst : f32 to vector<72x128xf32>
    %c7_i32 = arith.constant 7 : i32
    %2 = arith.addi %0, %c7_i32 : i32
    %c-7_i32 = arith.constant -7 : i32
    %3 = arith.addi %2, %c-7_i32 : i32
    %4 = arith.index_cast %3 : i32 to index
    %c0 = arith.constant 0 : index
    %5 = vector.load %arg1[%4, %c0] : memref<86x128xf32, #tpu.memory_space<vmem>>, vector<72x128xf32>
    %6 = arith.truncf %5 : vector<72x128xf32> to vector<72x128xbf16>
    %c0_0 = arith.constant 0 : index
    %c0_1 = arith.constant 0 : index
    %c0_2 = arith.constant 0 : index
    %7 = vector.load %arg2[%c0_0, %c0_1, %c0_2] : memref<9x128x128xf32, #tpu.memory_space<vmem>>, vector<1x128x128xf32>
    %8 = vector.shape_cast %7 : vector<1x128x128xf32> to vector<128x128xf32>
    %9 = arith.truncf %8 : vector<128x128xf32> to vector<128x128xbf16>
    %cst_3 = arith.constant dense<0.000000e+00> : vector<72x128xf32>
    %10 = tpu.matmul %6, %9, %cst_3 {dimension_numbers = #tpu.dot_dimension_numbers<[1], [0], [0], [1], [0, 0, 1, 1], [], []>} : vector<72x128xbf16>, vector<128x128xbf16>, vector<72x128xf32> -> vector<72x128xf32>
    %11 = arith.addf %1, %10 : vector<72x128xf32>
    %c7_i32_4 = arith.constant 7 : i32
    %12 = arith.addi %0, %c7_i32_4 : i32
    %c-6_i32 = arith.constant -6 : i32
    %13 = arith.addi %12, %c-6_i32 : i32
    %14 = arith.index_cast %13 : i32 to index
    %c0_5 = arith.constant 0 : index
    %15 = vector.load %arg1[%14, %c0_5] : memref<86x128xf32, #tpu.memory_space<vmem>>, vector<72x128xf32>
    %16 = arith.truncf %15 : vector<72x128xf32> to vector<72x128xbf16>
    %c1 = arith.constant 1 : index
    %c0_6 = arith.constant 0 : index
    %c0_7 = arith.constant 0 : index
    %17 = vector.load %arg2[%c1, %c0_6, %c0_7] : memref<9x128x128xf32, #tpu.memory_space<vmem>>, vector<1x128x128xf32>
    %18 = vector.shape_cast %17 : vector<1x128x128xf32> to vector<128x128xf32>
    %19 = arith.truncf %18 : vector<128x128xf32> to vector<128x128xbf16>
    %cst_8 = arith.constant dense<0.000000e+00> : vector<72x128xf32>
    %20 = tpu.matmul %16, %19, %cst_8 {dimension_numbers = #tpu.dot_dimension_numbers<[1], [0], [0], [1], [0, 0, 1, 1], [], []>} : vector<72x128xbf16>, vector<128x128xbf16>, vector<72x128xf32> -> vector<72x128xf32>
    %21 = arith.addf %11, %20 : vector<72x128xf32>
    %c7_i32_9 = arith.constant 7 : i32
    %22 = arith.addi %0, %c7_i32_9 : i32
    %c-5_i32 = arith.constant -5 : i32
    %23 = arith.addi %22, %c-5_i32 : i32
    %24 = arith.index_cast %23 : i32 to index
    %c0_10 = arith.constant 0 : index
    %25 = vector.load %arg1[%24, %c0_10] : memref<86x128xf32, #tpu.memory_space<vmem>>, vector<72x128xf32>
    %26 = arith.truncf %25 : vector<72x128xf32> to vector<72x128xbf16>
    %c2 = arith.constant 2 : index
    %c0_11 = arith.constant 0 : index
    %c0_12 = arith.constant 0 : index
    %27 = vector.load %arg2[%c2, %c0_11, %c0_12] : memref<9x128x128xf32, #tpu.memory_space<vmem>>, vector<1x128x128xf32>
    %28 = vector.shape_cast %27 : vector<1x128x128xf32> to vector<128x128xf32>
    %29 = arith.truncf %28 : vector<128x128xf32> to vector<128x128xbf16>
    %cst_13 = arith.constant dense<0.000000e+00> : vector<72x128xf32>
    %30 = tpu.matmul %26, %29, %cst_13 {dimension_numbers = #tpu.dot_dimension_numbers<[1], [0], [0], [1], [0, 0, 1, 1], [], []>} : vector<72x128xbf16>, vector<128x128xbf16>, vector<72x128xf32> -> vector<72x128xf32>
    %31 = arith.addf %21, %30 : vector<72x128xf32>
    %c7_i32_14 = arith.constant 7 : i32
    %32 = arith.addi %0, %c7_i32_14 : i32
    %c-1_i32 = arith.constant -1 : i32
    %33 = arith.addi %32, %c-1_i32 : i32
    %34 = arith.index_cast %33 : i32 to index
    %c0_15 = arith.constant 0 : index
    %35 = vector.load %arg1[%34, %c0_15] : memref<86x128xf32, #tpu.memory_space<vmem>>, vector<72x128xf32>
    %36 = arith.truncf %35 : vector<72x128xf32> to vector<72x128xbf16>
    %c3 = arith.constant 3 : index
    %c0_16 = arith.constant 0 : index
    %c0_17 = arith.constant 0 : index
    %37 = vector.load %arg2[%c3, %c0_16, %c0_17] : memref<9x128x128xf32, #tpu.memory_space<vmem>>, vector<1x128x128xf32>
    %38 = vector.shape_cast %37 : vector<1x128x128xf32> to vector<128x128xf32>
    %39 = arith.truncf %38 : vector<128x128xf32> to vector<128x128xbf16>
    %cst_18 = arith.constant dense<0.000000e+00> : vector<72x128xf32>
    %40 = tpu.matmul %36, %39, %cst_18 {dimension_numbers = #tpu.dot_dimension_numbers<[1], [0], [0], [1], [0, 0, 1, 1], [], []>} : vector<72x128xbf16>, vector<128x128xbf16>, vector<72x128xf32> -> vector<72x128xf32>
    %41 = arith.addf %31, %40 : vector<72x128xf32>
    %c7_i32_19 = arith.constant 7 : i32
    %42 = arith.addi %0, %c7_i32_19 : i32
    %c0_i32 = arith.constant 0 : i32
    %43 = arith.addi %42, %c0_i32 : i32
    %44 = arith.index_cast %43 : i32 to index
    %c0_20 = arith.constant 0 : index
    %45 = vector.load %arg1[%44, %c0_20] : memref<86x128xf32, #tpu.memory_space<vmem>>, vector<72x128xf32>
    %46 = arith.truncf %45 : vector<72x128xf32> to vector<72x128xbf16>
    %c4 = arith.constant 4 : index
    %c0_21 = arith.constant 0 : index
    %c0_22 = arith.constant 0 : index
    %47 = vector.load %arg2[%c4, %c0_21, %c0_22] : memref<9x128x128xf32, #tpu.memory_space<vmem>>, vector<1x128x128xf32>
    %48 = vector.shape_cast %47 : vector<1x128x128xf32> to vector<128x128xf32>
    %49 = arith.truncf %48 : vector<128x128xf32> to vector<128x128xbf16>
    %cst_23 = arith.constant dense<0.000000e+00> : vector<72x128xf32>
    %50 = tpu.matmul %46, %49, %cst_23 {dimension_numbers = #tpu.dot_dimension_numbers<[1], [0], [0], [1], [0, 0, 1, 1], [], []>} : vector<72x128xbf16>, vector<128x128xbf16>, vector<72x128xf32> -> vector<72x128xf32>
    %51 = arith.addf %41, %50 : vector<72x128xf32>
    %c7_i32_24 = arith.constant 7 : i32
    %52 = arith.addi %0, %c7_i32_24 : i32
    %c1_i32 = arith.constant 1 : i32
    %53 = arith.addi %52, %c1_i32 : i32
    %54 = arith.index_cast %53 : i32 to index
    %c0_25 = arith.constant 0 : index
    %55 = vector.load %arg1[%54, %c0_25] : memref<86x128xf32, #tpu.memory_space<vmem>>, vector<72x128xf32>
    %56 = arith.truncf %55 : vector<72x128xf32> to vector<72x128xbf16>
    %c5 = arith.constant 5 : index
    %c0_26 = arith.constant 0 : index
    %c0_27 = arith.constant 0 : index
    %57 = vector.load %arg2[%c5, %c0_26, %c0_27] : memref<9x128x128xf32, #tpu.memory_space<vmem>>, vector<1x128x128xf32>
    %58 = vector.shape_cast %57 : vector<1x128x128xf32> to vector<128x128xf32>
    %59 = arith.truncf %58 : vector<128x128xf32> to vector<128x128xbf16>
    %cst_28 = arith.constant dense<0.000000e+00> : vector<72x128xf32>
    %60 = tpu.matmul %56, %59, %cst_28 {dimension_numbers = #tpu.dot_dimension_numbers<[1], [0], [0], [1], [0, 0, 1, 1], [], []>} : vector<72x128xbf16>, vector<128x128xbf16>, vector<72x128xf32> -> vector<72x128xf32>
    %61 = arith.addf %51, %60 : vector<72x128xf32>
    %c7_i32_29 = arith.constant 7 : i32
    %62 = arith.addi %0, %c7_i32_29 : i32
    %c5_i32 = arith.constant 5 : i32
    %63 = arith.addi %62, %c5_i32 : i32
    %64 = arith.index_cast %63 : i32 to index
    %c0_30 = arith.constant 0 : index
    %65 = vector.load %arg1[%64, %c0_30] : memref<86x128xf32, #tpu.memory_space<vmem>>, vector<72x128xf32>
    %66 = arith.truncf %65 : vector<72x128xf32> to vector<72x128xbf16>
    %c6 = arith.constant 6 : index
    %c0_31 = arith.constant 0 : index
    %c0_32 = arith.constant 0 : index
    %67 = vector.load %arg2[%c6, %c0_31, %c0_32] : memref<9x128x128xf32, #tpu.memory_space<vmem>>, vector<1x128x128xf32>
    %68 = vector.shape_cast %67 : vector<1x128x128xf32> to vector<128x128xf32>
    %69 = arith.truncf %68 : vector<128x128xf32> to vector<128x128xbf16>
    %cst_33 = arith.constant dense<0.000000e+00> : vector<72x128xf32>
    %70 = tpu.matmul %66, %69, %cst_33 {dimension_numbers = #tpu.dot_dimension_numbers<[1], [0], [0], [1], [0, 0, 1, 1], [], []>} : vector<72x128xbf16>, vector<128x128xbf16>, vector<72x128xf32> -> vector<72x128xf32>
    %71 = arith.addf %61, %70 : vector<72x128xf32>
    %c7_i32_34 = arith.constant 7 : i32
    %72 = arith.addi %0, %c7_i32_34 : i32
    %c6_i32 = arith.constant 6 : i32
    %73 = arith.addi %72, %c6_i32 : i32
    %74 = arith.index_cast %73 : i32 to index
    %c0_35 = arith.constant 0 : index
    %75 = vector.load %arg1[%74, %c0_35] : memref<86x128xf32, #tpu.memory_space<vmem>>, vector<72x128xf32>
    %76 = arith.truncf %75 : vector<72x128xf32> to vector<72x128xbf16>
    %c7 = arith.constant 7 : index
    %c0_36 = arith.constant 0 : index
    %c0_37 = arith.constant 0 : index
    %77 = vector.load %arg2[%c7, %c0_36, %c0_37] : memref<9x128x128xf32, #tpu.memory_space<vmem>>, vector<1x128x128xf32>
    %78 = vector.shape_cast %77 : vector<1x128x128xf32> to vector<128x128xf32>
    %79 = arith.truncf %78 : vector<128x128xf32> to vector<128x128xbf16>
    %cst_38 = arith.constant dense<0.000000e+00> : vector<72x128xf32>
    %80 = tpu.matmul %76, %79, %cst_38 {dimension_numbers = #tpu.dot_dimension_numbers<[1], [0], [0], [1], [0, 0, 1, 1], [], []>} : vector<72x128xbf16>, vector<128x128xbf16>, vector<72x128xf32> -> vector<72x128xf32>
    %81 = arith.addf %71, %80 : vector<72x128xf32>
    %c7_i32_39 = arith.constant 7 : i32
    %82 = arith.addi %0, %c7_i32_39 : i32
    %c7_i32_40 = arith.constant 7 : i32
    %83 = arith.addi %82, %c7_i32_40 : i32
    %84 = arith.index_cast %83 : i32 to index
    %c0_41 = arith.constant 0 : index
    %85 = vector.load %arg1[%84, %c0_41] : memref<86x128xf32, #tpu.memory_space<vmem>>, vector<72x128xf32>
    %86 = arith.truncf %85 : vector<72x128xf32> to vector<72x128xbf16>
    %c8 = arith.constant 8 : index
    %c0_42 = arith.constant 0 : index
    %c0_43 = arith.constant 0 : index
    %87 = vector.load %arg2[%c8, %c0_42, %c0_43] : memref<9x128x128xf32, #tpu.memory_space<vmem>>, vector<1x128x128xf32>
    %88 = vector.shape_cast %87 : vector<1x128x128xf32> to vector<128x128xf32>
    %89 = arith.truncf %88 : vector<128x128xf32> to vector<128x128xbf16>
    %cst_44 = arith.constant dense<0.000000e+00> : vector<72x128xf32>
    %90 = tpu.matmul %86, %89, %cst_44 {dimension_numbers = #tpu.dot_dimension_numbers<[1], [0], [0], [1], [0, 0, 1, 1], [], []>} : vector<72x128xbf16>, vector<128x128xbf16>, vector<72x128xf32> -> vector<72x128xf32>
    %91 = arith.addf %81, %90 : vector<72x128xf32>
    %c0_45 = arith.constant 0 : index
    %c0_46 = arith.constant 0 : index
    %92 = vector.load %arg3[%c0_45, %c0_46] : memref<1x128xf32, #tpu.memory_space<vmem>>, vector<1x128xf32>
    %93 = vector.broadcast %92 : vector<1x128xf32> to vector<72x128xf32>
    %94 = arith.addf %91, %93 : vector<72x128xf32>
    %cst_47 = arith.constant 0.000000e+00 : f32
    %95 = vector.broadcast %cst_47 : f32 to vector<72x128xf32>
    %96 = arith.cmpf ogt, %94, %95 : vector<72x128xf32>
    %cst_48 = arith.constant 2.000000e-01 : f32
    %97 = vector.broadcast %cst_48 : f32 to vector<72x128xf32>
    %98 = arith.mulf %97, %94 : vector<72x128xf32>
    %99 = arith.select %96, %94, %98 : vector<72x128xi1>, vector<72x128xf32>
    %c0_49 = arith.constant 0 : index
    %c0_50 = arith.constant 0 : index
    %100 = vector.load %arg4[%c0_49, %c0_50] : memref<72x1xf32, #tpu.memory_space<vmem>>, vector<72x1xf32>
    %101 = vector.broadcast %100 : vector<72x1xf32> to vector<72x128xf32>
    %102 = arith.mulf %99, %101 : vector<72x128xf32>
    %c0_51 = arith.constant 0 : index
    %c0_52 = arith.constant 0 : index
    %103 = vector.load %arg5[%c0_51, %c0_52] : memref<72x128xf32, #tpu.memory_space<vmem>>, vector<72x128xf32>
    tpu.vector_store %arg5[%c0_51, %c0_52], %102 {strides = array<i32>} : memref<72x128xf32, #tpu.memory_space<vmem>>, vector<72x128xf32>,
    return
  }
  func.func @transform_0(%arg0: i32) -> (i32, i32) {
    %c0_i32 = arith.constant 0 : i32
    %c0_i32_0 = arith.constant 0 : i32
    %c0_i32_1 = arith.constant 0 : i32
    return %c0_i32, %c0_i32_0 : i32, i32
  }
  func.func @transform_1(%arg0: i32) -> (i32, i32, i32) {
    %c0_i32 = arith.constant 0 : i32
    %c0_i32_0 = arith.constant 0 : i32
    %c0_i32_1 = arith.constant 0 : i32
    %c0_i32_2 = arith.constant 0 : i32
    return %c0_i32, %c0_i32_0, %c0_i32_1 : i32, i32, i32
  }
  func.func @transform_2(%arg0: i32) -> (i32, i32) {
    %c0_i32 = arith.constant 0 : i32
    %c0_i32_0 = arith.constant 0 : i32
    %c0_i32_1 = arith.constant 0 : i32
    return %c0_i32, %c0_i32_0 : i32, i32
  }
  func.func @transform_3(%arg0: i32) -> (i32, i32) {
    %c0_i32 = arith.constant 0 : i32
    %c0_i32_0 = arith.constant 0 : i32
    return %arg0, %c0_i32 : i32, i32
  }
  func.func @transform_4(%arg0: i32) -> (i32, i32) {
    %c0_i32 = arith.constant 0 : i32
    %c0_i32_0 = arith.constant 0 : i32
    return %arg0, %c0_i32 : i32, i32
  }
}

module attributes {stable_mosaic.version = 11 : i64} {
  func.func @_dense_kernel(%arg0: memref<2x2048xf32, #tpu.memory_space<vmem>>, %arg1: memref<2048x128xf32, #tpu.memory_space<vmem>>, %arg2: memref<1x128xf32, #tpu.memory_space<vmem>>, %arg3: memref<2x128xf32, #tpu.memory_space<vmem>>) attributes {dimension_semantics = [], scalar_prefetch = 0 : i64, scratch_operands = 0 : i64, tpu.core_type = #tpu.core_type<tc>} {
    %c0 = arith.constant 0 : index
    %c0_0 = arith.constant 0 : index
    %0 = vector.load %arg0[%c0, %c0_0] : memref<2x2048xf32, #tpu.memory_space<vmem>>, vector<2x2048xf32>
    %1 = arith.truncf %0 : vector<2x2048xf32> to vector<2x2048xbf16>
    %c0_1 = arith.constant 0 : index
    %c0_2 = arith.constant 0 : index
    %2 = vector.load %arg1[%c0_1, %c0_2] : memref<2048x128xf32, #tpu.memory_space<vmem>>, vector<2048x128xf32>
    %3 = arith.truncf %2 : vector<2048x128xf32> to vector<2048x128xbf16>
    %cst = arith.constant dense<0.000000e+00> : vector<2x128xf32>
    %4 = tpu.matmul %1, %3, %cst {dimension_numbers = #tpu.dot_dimension_numbers<[1], [0], [0], [1], [0, 0, 1, 1], [], []>} : vector<2x2048xbf16>, vector<2048x128xbf16>, vector<2x128xf32> -> vector<2x128xf32>
    %c0_3 = arith.constant 0 : index
    %c0_4 = arith.constant 0 : index
    %5 = vector.load %arg2[%c0_3, %c0_4] : memref<1x128xf32, #tpu.memory_space<vmem>>, vector<1x128xf32>
    %6 = vector.broadcast %5 : vector<1x128xf32> to vector<2x128xf32>
    %7 = arith.addf %4, %6 : vector<2x128xf32>
    %cst_5 = arith.constant 0.000000e+00 : f32
    %8 = vector.broadcast %cst_5 : f32 to vector<2x128xf32>
    %9 = arith.cmpf ogt, %7, %8 : vector<2x128xf32>
    %cst_6 = arith.constant 2.000000e-01 : f32
    %10 = vector.broadcast %cst_6 : f32 to vector<2x128xf32>
    %11 = arith.mulf %10, %7 : vector<2x128xf32>
    %12 = arith.select %9, %7, %11 : vector<2x128xi1>, vector<2x128xf32>
    %c0_7 = arith.constant 0 : index
    %c0_8 = arith.constant 0 : index
    %13 = vector.load %arg3[%c0_7, %c0_8] : memref<2x128xf32, #tpu.memory_space<vmem>>, vector<2x128xf32>
    tpu.vector_store %arg3[%c0_7, %c0_8], %12 {strides = array<i32>} : memref<2x128xf32, #tpu.memory_space<vmem>>, vector<2x128xf32>,
    return
  }
}

module attributes {stable_mosaic.version = 11 : i64} {
  func.func @_dense_kernel(%arg0: memref<2x128xf32, #tpu.memory_space<vmem>>, %arg1: memref<128x128xf32, #tpu.memory_space<vmem>>, %arg2: memref<1x128xf32, #tpu.memory_space<vmem>>, %arg3: memref<2x128xf32, #tpu.memory_space<vmem>>) attributes {dimension_semantics = [], scalar_prefetch = 0 : i64, scratch_operands = 0 : i64, tpu.core_type = #tpu.core_type<tc>} {
    %c0 = arith.constant 0 : index
    %c0_0 = arith.constant 0 : index
    %0 = vector.load %arg0[%c0, %c0_0] : memref<2x128xf32, #tpu.memory_space<vmem>>, vector<2x128xf32>
    %1 = arith.truncf %0 : vector<2x128xf32> to vector<2x128xbf16>
    %c0_1 = arith.constant 0 : index
    %c0_2 = arith.constant 0 : index
    %2 = vector.load %arg1[%c0_1, %c0_2] : memref<128x128xf32, #tpu.memory_space<vmem>>, vector<128x128xf32>
    %3 = arith.truncf %2 : vector<128x128xf32> to vector<128x128xbf16>
    %cst = arith.constant dense<0.000000e+00> : vector<2x128xf32>
    %4 = tpu.matmul %1, %3, %cst {dimension_numbers = #tpu.dot_dimension_numbers<[1], [0], [0], [1], [0, 0, 1, 1], [], []>} : vector<2x128xbf16>, vector<128x128xbf16>, vector<2x128xf32> -> vector<2x128xf32>
    %c0_3 = arith.constant 0 : index
    %c0_4 = arith.constant 0 : index
    %5 = vector.load %arg2[%c0_3, %c0_4] : memref<1x128xf32, #tpu.memory_space<vmem>>, vector<1x128xf32>
    %6 = vector.broadcast %5 : vector<1x128xf32> to vector<2x128xf32>
    %7 = arith.addf %4, %6 : vector<2x128xf32>
    %cst_5 = arith.constant 0.000000e+00 : f32
    %8 = vector.broadcast %cst_5 : f32 to vector<2x128xf32>
    %9 = arith.subf %8, %7 : vector<2x128xf32>
    %10 = math.exp %9 : vector<2x128xf32>
    %cst_6 = arith.constant 1.000000e+00 : f32
    %11 = vector.broadcast %cst_6 : f32 to vector<2x128xf32>
    %12 = arith.addf %11, %10 : vector<2x128xf32>
    %13 = tpu.reciprocal %12 {approx = true} : vector<2x128xf32> -> vector<2x128xf32>
    %c0_7 = arith.constant 0 : index
    %c0_8 = arith.constant 0 : index
    %14 = vector.load %arg3[%c0_7, %c0_8] : memref<2x128xf32, #tpu.memory_space<vmem>>, vector<2x128xf32>
    tpu.vector_store %arg3[%c0_7, %c0_8], %13 {strides = array<i32>} : memref<2x128xf32, #tpu.memory_space<vmem>>, vector<2x128xf32>,
    return
  }
}

</mosaic_0001>

<bundles_post_ra>
// kernel: discriminator_forward.13
= control target key start
LH: loop header
LB: loop body
LE: loop exit
PB: predicated region body
PF: predicated region fallthrough
CT: control target
= control target key end

     0   :  { %s1000_s15 = smov 0   ;;  %s1275_s0 = inlined_call_operand.vmem [shape: f32[768,128], index: 0, kind: input, shape index: {}]   ;;  %s1276_s1 = inlined_call_operand.vmem [shape: f32[1,128,128], index: 1, kind: input, shape index: {}]   ;;  %s1277_s2 = inlined_call_operand.vmem [shape: f32[1,128], index: 2, kind: input, shape index: {}]   ;;  %s1278_s3 = inlined_call_operand.vmem [shape: f32[768,1], index: 3, kind: input, shape index: {}]   ;;  %s1279_s4 = inlined_call_operand.vmem [shape: f32[768,128], index: 4, kind: output, shape index: {}]  }
   0x1 LB: > { %s854_s16 = sadd.s32 4294967295, %s972_s15   ;;  %p858_p0 = scmp.ge.s32.totalorder %s972_s15, 1  ;;  %s972_s15 = sphi %s1000_s15, %s14_s15  }
   0x2   : > { %p163_p1 = scmp.lt.s32.totalorder %s972_s15, 4 }
   0x4   : > { %p164_p2 = pnand %p858_p0, %p163_p1 }
   0x5   : > { %v252_v0 = vld [vmem:[%s1276_s1] sm:$0xff] (!%p164_p2)  ;;  %v253_v1 = vld [vmem:[%s1276_s1 + $0x8] sm:$0xff] (!%p164_p2)  ;;  %v254_v2 = vld [vmem:[%s1276_s1 + $0x10] sm:$0xff] (!%p164_p2)  ;;  %s859_s23 = sshll.u32 (!%p164_p2), %s854_s16, 5  ;;  %s863_s24 = sshll.u32 (!%p164_p2), %s854_s16, 8  ;;  %v974_v5 = vmov (!%p164_p2), 0  }
   0x6   : > { %167 = sbr.rel (%p164_p2) target bundleno = 301 (0x12d), region = 36  ;;  %v268_v3 = vpack.c.bf16 (!%p164_p2), %v253_v1, %v252_v0  ;;  %v255_v4 = vld [vmem:[%s1276_s1 + $0x18] sm:$0xff] (!%p164_p2)  ;;  %965 = vset.pattern.permute.xlu1 (!%p164_p2), %v974_v5  ;;  %964 = vset.pattern.permute.xlu0 (!%p164_p2), %v974_v5  ;;  %p190_p3 = scmp.lt.s32.totalorder (!%p164_p2), %s859_s23, 95  ;;  %v256_v7 = vld [vmem:[%s1276_s1 + $0x20] sm:$0xff] (!%p164_p2)  ;;  %v257_v8 = vld [vmem:[%s1276_s1 + $0x28] sm:$0xff] (!%p164_p2) }
   0x7   : > { %v269_v6 = vpack.c.bf16 (!%p164_p2), %v255_v4, %v254_v2  ;;  %s1029_s7 = scalar_lea.vmem (!%p164_p2), %s1275_s0, %s863_s24  ;;  %v270_v9 = vpack.c.bf16 (!%p164_p2), %v257_v8, %v256_v7  ;;  %v258_v10 = vld [vmem:[%s1276_s1 + $0x30] sm:$0xff] (!%p164_p2)  ;;  %v259_v13 = vld [vmem:[%s1276_s1 + $0x38] sm:$0xff] (!%p164_p2)  ;;  %v260_v21 = vld [vmem:[%s1276_s1 + $0x40] sm:$0xff] (!%p164_p2) }
   0x8   : > { %891 = vmatprep.subr.bf16.mxu0 (!%p164_p2), %v268_v3  ;;  %939 = vmatprep.subr.bf16.mxu1 (!%p164_p2), %v268_v3  ;;  %v204_v11 = vld [vmem:[%s1029_s7] sm:$0xff] (!%p164_p2)  ;;  %v205_v12 = vld [vmem:[%s1029_s7 + $0x8] sm:$0xff] (!%p164_p2)  ;;  %v271_v20 = vpack.c.bf16 (!%p164_p2), %v259_v13, %v258_v10  ;;  %v262_v26 = vld [vmem:[%s1276_s1 + $0x50] sm:$0xff] (!%p164_p2) }
   0x9   : > { %892 = vmatpush3.bf16.msra.mxu0 (!%p164_p2), %v268_v3  ;;  %947 = vmatpush3.bf16.msra.mxu1 (!%p164_p2), %v268_v3  ;;  %v220_v14 = vld [vmem:[%s1029_s7 + $0x80] sm:$0xff] (!%p164_p2)  ;;  %v221_v15 = vld [vmem:[%s1029_s7 + $0x88] sm:$0xff] (!%p164_p2)  ;;  %v236_v18 = vpack.c.bf16 (!%p164_p2), %v205_v12, %v204_v11  ;;  %v263_v27 = vld [vmem:[%s1276_s1 + $0x58] sm:$0xff] (!%p164_p2) }
   0xa   : > { %893 = vmatprep.subr.bf16.mxu0 (!%p164_p2), %v269_v6  ;;  %940 = vmatprep.subr.bf16.mxu1 (!%p164_p2), %v269_v6  ;;  %v244_v19 = vpack.c.bf16 (!%p164_p2), %v221_v15, %v220_v14  ;;  %v261_v22 = vld [vmem:[%s1276_s1 + $0x48] sm:$0xff] (!%p164_p2)  ;;  %v273_v30 = vpack.c.bf16 (!%p164_p2), %v263_v27, %v262_v26  ;;  %v264_v31 = vld [vmem:[%s1276_s1 + $0x60] sm:$0xff] (!%p164_p2)  ;;  %v266_v36 = vld [vmem:[%s1276_s1 + $0x70] sm:$0xff] (!%p164_p2) }
   0xb   : > { %907 = vmatprep.mubr.bf16.mxu0 (!%p164_p2), %v236_v18  ;;  %v272_v25 = vpack.c.bf16 (!%p164_p2), %v261_v22, %v260_v21  ;;  %v265_v32 = vld [vmem:[%s1276_s1 + $0x68] sm:$0xff] (!%p164_p2)  ;;  %v267_v37 = vld [vmem:[%s1276_s1 + $0x78] sm:$0xff] (!%p164_p2)  ;;  %v206_v41 = vld [vmem:[%s1029_s7 + $0x10] sm:$0xff] (!%p164_p2) }
   0xc   : > { %923 = vmatprep.mubr.bf16.mxu1 (!%p164_p2), %v244_v19  ;;  %v274_v35 = vpack.c.bf16 (!%p164_p2), %v265_v32, %v264_v31  ;;  %v275_v40 = vpack.c.bf16 (!%p164_p2), %v267_v37, %v266_v36  ;;  %v207_v42 = vld [vmem:[%s1029_s7 + $0x18] sm:$0xff] (!%p164_p2)  ;;  %v222_v45 = vld [vmem:[%s1029_s7 + $0x90] sm:$0xff] (!%p164_p2)  ;;  %v208_v47 = vld [vmem:[%s1029_s7 + $0x20] sm:$0xff] (!%p164_p2) }
   0xd   : > { %s1281_s23 = smov (!%p190_p3, %s859_s23), 95  ;;  %894 = vmatpush3.bf16.msra.mxu0 %v269_v6  ;;  %948 = vmatpush3.bf16.msra.mxu1 %v269_v6  ;;  %v223_v46 = vld [vmem:[%s1029_s7 + $0x98] sm:$0xff]  ;;  %v209_v48 = vld [vmem:[%s1029_s7 + $0x28] sm:$0xff]  ;;  %v224_v49 = vld [vmem:[%s1029_s7 + $0xa0] sm:$0xff]  ;;  %v237_v51 = vpack.c.bf16 %v207_v42, %v206_v41 }
   0xe   : > { %s860_s10 = sshll.u32 %s1281_s23, 3  ;;  %895 = vmatprep.subr.bf16.mxu0 %v270_v9  ;;  %941 = vmatprep.subr.bf16.mxu1 %v270_v9  ;;  %v225_v50 = vld [vmem:[%s1029_s7 + $0xa8] sm:$0xff]  ;;  %v245_v52 = vpack.c.bf16 %v223_v46, %v222_v45  ;;  %v238_v55 = vpack.c.bf16 %v209_v48, %v208_v47  ;;  %v210_v57 = vld [vmem:[%s1029_s7 + $0x30] sm:$0xff]  ;;  %v211_v58 = vld [vmem:[%s1029_s7 + $0x38] sm:$0xff] }
   0xf   : > { %s1047_s16 = scalar_lea.vmem %s1278_s3, %s860_s10  ;;  %v246_v56 = vpack.c.bf16 %v225_v50, %v224_v49  ;;  %v226_v61 = vld [vmem:[%s1029_s7 + $0xb0] sm:$0xff]  ;;  %v227_v62 = vld [vmem:[%s1029_s7 + $0xb8] sm:$0xff]  ;;  %v212_v63 = vld [vmem:[%s1029_s7 + $0x40] sm:$0xff]  ;;  %v239_v3 = vpack.c.bf16 %v211_v58, %v210_v57  ;;  %s1183_s13 = scalar_lea.vmem %s1279_s4, %s860_s10 }
  0x10   : > { %v542_v16 = vld [vmem:[%s1047_s16 + $0x10] sm:$0xff]  ;;  %v540_v17 = vld [vmem:[%s1047_s16] sm:$0xff]  ;;  %v543_v23 = vld [vmem:[%s1047_s16 + $0x18] sm:$0xff]  ;;  %v247_v4 = vpack.c.bf16 %v227_v62, %v226_v61 }
  0x11   : > { %584 = vperm.xlu1 %965, %v542_v16   ;;  %574 = vperm.xlu0 %964, %v540_v17   ;;  %v541_v24 = vld [vmem:[%s1047_s16 + $0x8] sm:$0xff]  ;;  %v544_v29 = vld [vmem:[%s1047_s16 + $0x20] sm:$0xff]  ;;  %v547_v33 = vld [vmem:[%s1047_s16 + $0x38] sm:$0xff] }
  0x12   : > { %896 = vmatpush3.bf16.msra.mxu0 %v270_v9  ;;  %949 = vmatpush3.bf16.msra.mxu1 %v270_v9  ;;  %v545_v28 = vld [vmem:[%s1047_s16 + $0x28] sm:$0xff]  ;;  %v546_v34 = vld [vmem:[%s1047_s16 + $0x30] sm:$0xff]  ;;  %v548_v39 = vld [vmem:[%s1047_s16 + $0x40] sm:$0xff] }
  0x13   : > { %897 = vmatprep.subr.bf16.mxu0 %v271_v20  ;;  %942 = vmatprep.subr.bf16.mxu1 %v271_v20  ;;  %v549_v38 = vld [vmem:[%s1047_s16 + $0x48] sm:$0xff]  ;;  %v551_v43 = vld [vmem:[%s1047_s16 + $0x58] sm:$0xff]  ;;  %v550_v44 = vld [vmem:[%s1047_s16 + $0x50] sm:$0xff] }
  0x14   : > { %v553_v53 = vld [vmem:[%s1047_s16 + $0x68] sm:$0xff]  ;;  %v552_v54 = vld [vmem:[%s1047_s16 + $0x60] sm:$0xff]  ;;  %v555_v59 = vld [vmem:[%s1047_s16 + $0x78] sm:$0xff] }
  0x15   : > { %589 = vperm.xlu1 %965, %v543_v23   ;;  %579 = vperm.xlu0 %964, %v541_v24   ;;  %v554_v60 = vld [vmem:[%s1047_s16 + $0x70] sm:$0xff]  ;;  %v213_v0 = vld [vmem:[%s1029_s7 + $0x48] sm:$0xff]  ;;  %v228_v1 = vld [vmem:[%s1029_s7 + $0xc0] sm:$0xff] }
  0x16   : > { %898 = vmatpush3.bf16.msra.mxu0 %v271_v20  ;;  %950 = vmatpush3.bf16.msra.mxu1 %v271_v20  ;;  %v229_v2 = vld [vmem:[%s1029_s7 + $0xc8] sm:$0xff]  ;;  %v556_v6 = vld [vmem:[%s1047_s16 + $0x80] sm:$0xff]  ;;  %v240_v7 = vpack.c.bf16 %v213_v0, %v212_v63  ;;  %v214_v9 = vld [vmem:[%s1029_s7 + $0x50] sm:$0xff] }
  0x17   : > { %899 = vmatprep.subr.bf16.mxu0 %v272_v25  ;;  %943 = vmatprep.subr.bf16.mxu1 %v272_v25  ;;  %v557_v5 = vld [vmem:[%s1047_s16 + $0x88] sm:$0xff]  ;;  %v248_v8 = vpack.c.bf16 %v229_v2, %v228_v1  ;;  %v215_v10 = vld [vmem:[%s1029_s7 + $0x58] sm:$0xff]  ;;  %v558_v12 = vld [vmem:[%s1047_s16 + $0x90] sm:$0xff] }
  0x18   : > { %v559_v11 = vld [vmem:[%s1047_s16 + $0x98] sm:$0xff]  ;;  %v230_v13 = vld [vmem:[%s1029_s7 + $0xd0] sm:$0xff]  ;;  %v216_v15 = vld [vmem:[%s1029_s7 + $0x60] sm:$0xff]  ;;  %v241_v19 = vpack.c.bf16 %v215_v10, %v214_v9 }
  0x19   : > { %599 = vperm.xlu1 %965, %v545_v28   ;;  %594 = vperm.xlu0 %964, %v544_v29   ;;  %v231_v14 = vld [vmem:[%s1029_s7 + $0xd8] sm:$0xff]  ;;  %v217_v16 = vld [vmem:[%s1029_s7 + $0x68] sm:$0xff]  ;;  %v232_v17 = vld [vmem:[%s1029_s7 + $0xe0] sm:$0xff] }
  0x1a   : > { %900 = vmatpush3.bf16.msra.mxu0 %v272_v25  ;;  %951 = vmatpush3.bf16.msra.mxu1 %v272_v25  ;;  %v233_v18 = vld [vmem:[%s1029_s7 + $0xe8] sm:$0xff]  ;;  %v249_v20 = vpack.c.bf16 %v231_v14, %v230_v13  ;;  %v560_v22 = vld [vmem:[%s1047_s16 + $0xa0] sm:$0xff]  ;;  %v242_v23 = vpack.c.bf16 %v217_v16, %v216_v15  ;;  %v218_v25 = vld [vmem:[%s1029_s7 + $0x70] sm:$0xff] }
  0x1b   : > { %901 = vmatprep.subr.bf16.mxu0 %v273_v30  ;;  %944 = vmatprep.subr.bf16.mxu1 %v273_v30  ;;  %v561_v21 = vld [vmem:[%s1047_s16 + $0xa8] sm:$0xff]  ;;  %v250_v24 = vpack.c.bf16 %v233_v18, %v232_v17  ;;  %v563_v26 = vld [vmem:[%s1047_s16 + $0xb8] sm:$0xff]  ;;  %v562_v27 = vld [vmem:[%s1047_s16 + $0xb0] sm:$0xff] }
  0x1c   : > { %v219_v28 = vld [vmem:[%s1029_s7 + $0x78] sm:$0xff]  ;;  %v234_v29 = vld [vmem:[%s1029_s7 + $0xf0] sm:$0xff]  ;;  %v569_v37 = vld [vmem:[%s1047_s16 + $0xe8] sm:$0xff] }
  0x1d   : > { %609 = vperm.xlu1 %965, %v547_v33   ;;  %604 = vperm.xlu0 %964, %v546_v34   ;;  %v243_v31 = vpack.c.bf16 %v219_v28, %v218_v25  ;;  %v565_v33 = vld [vmem:[%s1047_s16 + $0xc8] sm:$0xff]  ;;  %v564_v34 = vld [vmem:[%s1047_s16 + $0xc0] sm:$0xff]  ;;  %v566_v36 = vld [vmem:[%s1047_s16 + $0xd0] sm:$0xff] }
  0x1e   : > { %902 = vmatpush3.bf16.msra.mxu0 %v273_v30  ;;  %952 = vmatpush3.bf16.msra.mxu1 %v273_v30  ;;  %v235_v30 = vld [vmem:[%s1029_s7 + $0xf8] sm:$0xff]  ;;  %v1168_v61 = vld [vmem:[%s1277_s2] ss:$0 sm:$0xff] }
  0x1f   : > { %903 = vmatprep.subr.bf16.mxu0 %v274_v35  ;;  %945 = vmatprep.subr.bf16.mxu1 %v274_v35  ;;  %v251_v32 = vpack.c.bf16 %v235_v30, %v234_v29 }
  0x21   : > { %619 = vperm.xlu1 %965, %v549_v38   ;;  %614 = vperm.xlu0 %964, %v548_v39   ;;  %v568_v38 = vld [vmem:[%s1047_s16 + $0xe0] sm:$0xff]  ;;  %v571_v39 = vld [vmem:[%s1047_s16 + $0xf8] sm:$0xff] }
  0x22   : > { %904 = vmatpush3.bf16.msra.mxu0 %v274_v35  ;;  %953 = vmatpush3.bf16.msra.mxu1 %v274_v35  ;;  %v567_v35 = vld [vmem:[%s1047_s16 + $0xd8] sm:$0xff] }
  0x23   : > { %905 = vmatprep.subr.bf16.mxu0 %v275_v40  ;;  %946 = vmatprep.subr.bf16.mxu1 %v275_v40 }
  0x25   : > { %629 = vperm.xlu1 %965, %v551_v43   ;;  %624 = vperm.xlu0 %964, %v550_v44  }
  0x26   : > { %906 = vmatpush3.bf16.msra.mxu0 %v275_v40  ;;  %954 = vmatpush3.bf16.msra.mxu1 %v275_v40  ;;  %v570_v40 = vld [vmem:[%s1047_s16 + $0xf0] sm:$0xff] }
  0x29   : > { %639 = vperm.xlu1 %965, %v553_v53   ;;  %634 = vperm.xlu0 %964, %v552_v54  }
  0x2a   : > { %908 = vmatmul.mubr.bf16.vlgmr.msra.gmra.mrb[0].mxu0 %v237_v51  ;;  %924 = vmatmul.mubr.bf16.vlgmr.msra.gmra.mrb[0].mxu1 %v245_v52 }
  0x2b   : > { %911 = vmatprep.mubr.bf16.mxu0 %v238_v55  ;;  %927 = vmatprep.mubr.bf16.mxu1 %v246_v56 }
  0x2d   : > { %649 = vperm.xlu1 %965, %v555_v59   ;;  %644 = vperm.xlu0 %964, %v554_v60  }
  0x31   : > { %659 = vperm.xlu1 %965, %v557_v5   ;;  %654 = vperm.xlu0 %964, %v556_v6  }
  0x32   : > { %912 = vmatmul.mubr.bf16.gmra.mrb[4].mxu0 %v239_v3  ;;  %928 = vmatmul.mubr.bf16.gmra.mrb[4].mxu1 %v247_v4 }
  0x33   : > { %915 = vmatprep.mubr.bf16.mxu0 %v240_v7  ;;  %931 = vmatprep.mubr.bf16.mxu1 %v248_v8 }
  0x35   : > { %669 = vperm.xlu1 %965, %v559_v11   ;;  %664 = vperm.xlu0 %964, %v558_v12  }
  0x39   : > { %679 = vperm.xlu1 %965, %v561_v21   ;;  %674 = vperm.xlu0 %964, %v560_v22  }
  0x3a   : > { %916 = vmatmul.mubr.bf16.gmra.mrb[8].mxu0 %v241_v19  ;;  %932 = vmatmul.mubr.bf16.gmra.mrb[8].mxu1 %v249_v20 }
  0x3b   : > { %919 = vmatprep.mubr.bf16.mxu0 %v242_v23  ;;  %935 = vmatprep.mubr.bf16.mxu1 %v250_v24 }
  0x3d   : > { %689 = vperm.xlu1 %965, %v563_v26   ;;  %684 = vperm.xlu0 %964, %v562_v27  }
  0x41   : > { %699 = vperm.xlu1 %965, %v565_v33   ;;  %694 = vperm.xlu0 %964, %v564_v34  }
  0x42   : > { %920 = vmatmul.mubr.bf16.gmra.mrb[12].mxu0 %v243_v31  ;;  %936 = vmatmul.mubr.bf16.gmra.mrb[12].mxu1 %v251_v32 }
  0x45   : > { %709 = vperm.xlu1 %965, %v567_v35   ;;  %704 = vperm.xlu0 %964, %v566_v36  }
  0x49   : > { %719 = vperm.xlu1 %965, %v569_v37   ;;  %714 = vperm.xlu0 %964, %v568_v38  }
  0x4d   : > { %729 = vperm.xlu1 %965, %v571_v39   ;;  %724 = vperm.xlu0 %964, %v570_v40  }
  0x90   : > { %v585_v41 = vpop.permute.xlu1 %584  ;;  %v575_v42 = vpop.permute.xlu0 %574 }
  0x94   : > { %v1135_v43 = vpop.permute.xlu1 %589  ;;  %v1137_v44 = vpop.permute.xlu0 %579 }
  0x98   : > { %v1139_v45 = vpop.permute.xlu1 %599  ;;  %v1141_v46 = vpop.permute.xlu0 %594 }
  0x9c   : > { %v1143_v47 = vpop.permute.xlu1 %609  ;;  %v1145_v48 = vpop.permute.xlu0 %604 }
  0xa0   : > { %v1147_v49 = vpop.permute.xlu1 %619  ;;  %v1149_v50 = vpop.permute.xlu0 %614 }
  0xa4   : > { %v1151_v51 = vpop.permute.xlu1 %629  ;;  %v1153_v52 = vpop.permute.xlu0 %624 }
  0xa8   : > { %v1155_v53 = vpop.permute.xlu1 %639  ;;  %v1157_v54 = vpop.permute.xlu0 %634 }
  0xac   : > { %v1159_v55 = vpop.permute.xlu1 %649  ;;  %v1161_v56 = vpop.permute.xlu0 %644 }
  0xb0   : > { %v1163_v57 = vpop.permute.xlu1 %659  ;;  %v655_v58 = vpop.permute.xlu0 %654 }
  0xb4   : > { %v670_v59 = vpop.permute.xlu1 %669  ;;  %v665_v60 = vpop.permute.xlu0 %664 }
  0xb8   : > { %v1170_v62 = vpop.permute.xlu1 %679  ;;  %v1172_v63 = vpop.permute.xlu0 %674 }
  0xbc   : > { %v1187_v24 = vpop.permute.xlu1 %689  ;;  %v685_v25 = vpop.permute.xlu0 %684 }
  0xfd   : > { %v909_v0 = vpop.f32.mrb[0].mxu0  ;;  %v925_v1 = vpop.f32.mrb[0].mxu1 }
  0xfe   : > { %v326_v2 = vadd.f32 %v909_v0, %v1168_v61  ;;  %v390_v3 = vadd.f32 %v925_v1, %v1168_v61  ;;  %v317_v4 = vpop.f32.mrb[1].mxu0  ;;  %v381_v5 = vpop.f32.mrb[1].mxu1 }
  0xff   : > { %v318_v6 = vadd.f32 %v1168_v61, %v317_v4  ;;  %v382_v7 = vadd.f32 %v1168_v61, %v381_v5  ;;  %v910_v8 = vpop.f32.mrb[2].mxu0  ;;  %v926_v9 = vpop.f32.mrb[2].mxu1 }
 0x100   : > { %vm446_vm0 = vcmp.gt.f32.partialorder %v326_v2, 0.0  ;;  %v478_v10 = vmul.f32 0.2, %v326_v2  ;;  %vm462_vm1 = vcmp.gt.f32.partialorder %v390_v3, 0.0  ;;  %v494_v11 = vmul.f32 0.2, %v390_v3 }
 0x101   : > { %vm444_vm2 = vcmp.gt.f32.partialorder %v318_v6, 0.0  ;;  %v476_v12 = vmul.f32 0.2, %v318_v6  ;;  %vm460_vm3 = vcmp.gt.f32.partialorder %v382_v7, 0.0  ;;  %v492_v13 = vmul.f32 0.2, %v382_v7 }
 0x102   : > { %v510_v14 = vsel %vm446_vm0, %v326_v2, %v478_v10  ;;  %v526_v15 = vsel %vm462_vm1, %v390_v3, %v494_v11  ;;  %v329_v16 = vadd.f32 %v910_v8, %v1168_v61  ;;  %v393_v17 = vadd.f32 %v926_v9, %v1168_v61  ;;  %v320_v18 = vpop.f32.mrb[3].mxu0  ;;  %v384_v19 = vpop.f32.mrb[3].mxu1 }
 0x103   : > { %v734_v20 = vmul.f32 %v585_v41, %v510_v14  ;;  %v750_v21 = vmul.f32 %v665_v60, %v526_v15  ;;  %v508_v22 = vsel %vm444_vm2, %v318_v6, %v476_v12  ;;  %v524_v23 = vsel %vm460_vm3, %v382_v7, %v492_v13  ;;  %v1209_v15 = vpop.permute.xlu0 %694 }
 0x104   : > { %v732_v26 = vmul.f32 %v575_v42, %v508_v22  ;;  %v748_v27 = vmul.f32 %v655_v58, %v524_v23  ;;  %vm447_vm4 = vcmp.gt.f32.partialorder %v329_v16, 0.0  ;;  %v479_v28 = vmul.f32 0.2, %v329_v16 }
 0x105   : > { %766 = vst [vmem:[%s1183_s13 + $0x10] sm:$0xff] %v734_v20  ;;  %782 = vst [vmem:[%s1183_s13 + $0x90] sm:$0xff] %v750_v21  ;;  %vm463_vm5 = vcmp.gt.f32.partialorder %v393_v17, 0.0  ;;  %v495_v29 = vmul.f32 0.2, %v393_v17  ;;  %v321_v30 = vadd.f32 %v1168_v61, %v320_v18  ;;  %v385_v31 = vadd.f32 %v1168_v61, %v384_v19  ;;  %v913_v32 = vpop.f32.mrb[4].mxu0 }
 0x106   : > { %v929_v33 = vpop.f32.mrb[4].mxu1  ;;  %764 = vst [vmem:[%s1183_s13] sm:$0xff] %v732_v26  ;;  %780 = vst [vmem:[%s1183_s13 + $0x80] sm:$0xff] %v748_v27  ;;  %v511_v34 = vsel %vm447_vm4, %v329_v16, %v479_v28  ;;  %v342_v35 = vadd.f32 %v913_v32, %v1168_v61  ;;  %v333_v37 = vpop.f32.mrb[5].mxu0 }
 0x107   : > { %v406_v36 = vadd.f32 %v929_v33, %v1168_v61  ;;  %v397_v38 = vpop.f32.mrb[5].mxu1  ;;  %v735_v39 = vmul.f32 %v1135_v43, %v511_v34  ;;  %v527_v40 = vsel %vm463_vm5, %v393_v17, %v495_v29  ;;  %vm445_vm6 = vcmp.gt.f32.partialorder %v321_v30, 0.0  ;;  %v914_v42 = vpop.f32.mrb[6].mxu0 }
 0x108   : > { %v477_v41 = vmul.f32 0.2, %v321_v30  ;;  %v930_v58 = vpop.f32.mrb[6].mxu1  ;;  %v751_v60 = vmul.f32 %v670_v59, %v527_v40  ;;  %vm461_vm7 = vcmp.gt.f32.partialorder %v385_v31, 0.0  ;;  %v493_v0 = vmul.f32 0.2, %v385_v31 }
 0x109   : > { %vm450_vm8 = vcmp.gt.f32.partialorder %v342_v35, 0.0  ;;  %v336_v1 = vpop.f32.mrb[7].mxu0  ;;  %v400_v2 = vpop.f32.mrb[7].mxu1  ;;  %767 = vst [vmem:[%s1183_s13 + $0x18] sm:$0xff] %v735_v39  ;;  %v482_v4 = vmul.f32 0.2, %v342_v35  ;;  %v334_v7 = vadd.f32 %v1168_v61, %v333_v37  ;;  %v398_v59 = vadd.f32 %v1168_v61, %v397_v38 }
 0x10a   : > { %v509_v3 = vsel %vm445_vm6, %v321_v30, %v477_v41  ;;  %vm466_vm9 = vcmp.gt.f32.partialorder %v406_v36, 0.0  ;;  %v498_v5 = vmul.f32 0.2, %v406_v36  ;;  %783 = vst [vmem:[%s1183_s13 + $0x98] sm:$0xff] %v751_v60  ;;  %v525_v6 = vsel %vm461_vm7, %v385_v31, %v493_v0 }
 0x10b   : > { %v733_v43 = vmul.f32 %v1137_v44, %v509_v3  ;;  %v749_v8 = vmul.f32 %v1163_v57, %v525_v6  ;;  %v514_v9 = vsel %vm450_vm8, %v342_v35, %v482_v4  ;;  %v345_v11 = vadd.f32 %v914_v42, %v1168_v61  ;;  %v1207_v44 = vpop.permute.xlu1 %699 }
 0x10c   : > { %v530_v10 = vsel %vm466_vm9, %v406_v36, %v498_v5  ;;  %v738_v12 = vmul.f32 %v1145_v48, %v514_v9  ;;  %vm448_vm10 = vcmp.gt.f32.partialorder %v334_v7, 0.0  ;;  %v480_v14 = vmul.f32 0.2, %v334_v7 }
 0x10d   : > { %765 = vst [vmem:[%s1183_s13 + $0x8] sm:$0xff] %v733_v43  ;;  %v754_v13 = vmul.f32 %v685_v25, %v530_v10  ;;  %781 = vst [vmem:[%s1183_s13 + $0x88] sm:$0xff] %v749_v8  ;;  %vm464_vm11 = vcmp.gt.f32.partialorder %v398_v59, 0.0  ;;  %v496_v16 = vmul.f32 0.2, %v398_v59  ;;  %vm451_vm12 = vcmp.gt.f32.partialorder %v345_v11, 0.0 }
 0x10e   : > { %v483_v57 = vmul.f32 0.2, %v345_v11  ;;  %770 = vst [vmem:[%s1183_s13 + $0x30] sm:$0xff] %v738_v12  ;;  %v512_v17 = vsel %vm448_vm10, %v334_v7, %v480_v14  ;;  %v409_v18 = vadd.f32 %v930_v58, %v1168_v61  ;;  %v337_v19 = vadd.f32 %v1168_v61, %v336_v1  ;;  %v917_v20 = vpop.f32.mrb[8].mxu0  ;;  %v933_v21 = vpop.f32.mrb[8].mxu1 }
 0x10f   : > { %786 = vst [vmem:[%s1183_s13 + $0xb0] sm:$0xff] %v754_v13  ;;  %v401_v48 = vadd.f32 %v1168_v61, %v400_v2  ;;  %v736_v22 = vmul.f32 %v1141_v46, %v512_v17  ;;  %v528_v23 = vsel %vm464_vm11, %v398_v59, %v496_v16  ;;  %v358_v26 = vadd.f32 %v917_v20, %v1168_v61  ;;  %v349_v27 = vpop.f32.mrb[9].mxu0  ;;  %v413_v28 = vpop.f32.mrb[9].mxu1 }
 0x110   : > { %v515_v25 = vsel %vm451_vm12, %v345_v11, %v483_v57  ;;  %v752_v29 = vmul.f32 %v1172_v63, %v528_v23  ;;  %vm467_vm13 = vcmp.gt.f32.partialorder %v409_v18, 0.0  ;;  %v499_v31 = vmul.f32 0.2, %v409_v18  ;;  %v918_v32 = vpop.f32.mrb[10].mxu0  ;;  %v934_v33 = vpop.f32.mrb[10].mxu1 }
 0x111   : > { %v739_v30 = vmul.f32 %v1143_v47, %v515_v25  ;;  %768 = vst [vmem:[%s1183_s13 + $0x20] sm:$0xff] %v736_v22  ;;  %vm449_vm14 = vcmp.gt.f32.partialorder %v337_v19, 0.0  ;;  %v481_v34 = vmul.f32 0.2, %v337_v19  ;;  %vm465_vm15 = vcmp.gt.f32.partialorder %v401_v48, 0.0  ;;  %v352_v63 = vpop.f32.mrb[11].mxu0  ;;  %v710_v42 = vpop.permute.xlu1 %709 }
 0x112   : > { %v497_v46 = vmul.f32 0.2, %v401_v48  ;;  %784 = vst [vmem:[%s1183_s13 + $0xa0] sm:$0xff] %v752_v29  ;;  %v531_v35 = vsel %vm467_vm13, %v409_v18, %v499_v31  ;;  %vm454_vm0 = vcmp.gt.f32.partialorder %v358_v26, 0.0  ;;  %v486_v36 = vmul.f32 0.2, %v358_v26  ;;  %v705_v1 = vpop.permute.xlu0 %704 }
 0x113   : > { %771 = vst [vmem:[%s1183_s13 + $0x38] sm:$0xff] %v739_v30  ;;  %v422_v37 = vadd.f32 %v933_v21, %v1168_v61  ;;  %v416_v38 = vpop.f32.mrb[11].mxu1  ;;  %v755_v47 = vmul.f32 %v1187_v24, %v531_v35  ;;  %v513_v39 = vsel %vm449_vm14, %v337_v19, %v481_v34  ;;  %v350_v41 = vadd.f32 %v1168_v61, %v349_v27 }
 0x114   : > { %v529_v40 = vsel %vm465_vm15, %v401_v48, %v497_v46  ;;  %v737_v58 = vmul.f32 %v1139_v45, %v513_v39  ;;  %v518_v0 = vsel %vm454_vm0, %v358_v26, %v486_v36  ;;  %v414_v5 = vadd.f32 %v1168_v61, %v413_v28 }
 0x115   : > { %v753_v60 = vmul.f32 %v1170_v62, %v529_v40  ;;  %vm470_vm1 = vcmp.gt.f32.partialorder %v422_v37, 0.0  ;;  %787 = vst [vmem:[%s1183_s13 + $0xb8] sm:$0xff] %v755_v47  ;;  %v742_v2 = vmul.f32 %v1153_v52, %v518_v0  ;;  %v502_v3 = vmul.f32 0.2, %v422_v37  ;;  %v921_v4 = vpop.f32.mrb[12].mxu0  ;;  %v937_v6 = vpop.f32.mrb[12].mxu1 }
 0x116   : > { %vm452_vm2 = vcmp.gt.f32.partialorder %v350_v41, 0.0  ;;  %v484_v24 = vmul.f32 0.2, %v350_v41  ;;  %769 = vst [vmem:[%s1183_s13 + $0x28] sm:$0xff] %v737_v58  ;;  %v361_v43 = vadd.f32 %v918_v32, %v1168_v61  ;;  %v425_v45 = vadd.f32 %v934_v33, %v1168_v61  ;;  %v365_v7 = vpop.f32.mrb[13].mxu0  ;;  %v429_v10 = vpop.f32.mrb[13].mxu1 }
 0x117   : > { %785 = vst [vmem:[%s1183_s13 + $0xa8] sm:$0xff] %v753_v60  ;;  %v353_v62 = vadd.f32 %v1168_v61, %v352_v63  ;;  %774 = vst [vmem:[%s1183_s13 + $0x50] sm:$0xff] %v742_v2  ;;  %v534_v59 = vsel %vm470_vm1, %v422_v37, %v502_v3  ;;  %v417_v8 = vadd.f32 %v1168_v61, %v416_v38  ;;  %v922_v11 = vpop.f32.mrb[14].mxu0  ;;  %vm468_vm3 = vcmp.gt.f32.partialorder %v414_v5, 0.0  ;;  %v938_v16 = vpop.f32.mrb[14].mxu1 }
 0x118   : > { %v516_v52 = vsel %vm452_vm2, %v350_v41, %v484_v24  ;;  %v374_v9 = vadd.f32 %v921_v4, %v1168_v61  ;;  %v758_v12 = vmul.f32 %v705_v1, %v534_v59  ;;  %v500_v14 = vmul.f32 0.2, %v414_v5  ;;  %v368_v57 = vpop.f32.mrb[15].mxu0  ;;  %v432_v20 = vpop.f32.mrb[15].mxu1 }
 0x119   : > { %v740_v13 = vmul.f32 %v1149_v50, %v516_v52  ;;  %vm455_vm4 = vcmp.gt.f32.partialorder %v361_v43, 0.0  ;;  %v487_v17 = vmul.f32 0.2, %v361_v43  ;;  %vm471_vm5 = vcmp.gt.f32.partialorder %v425_v45, 0.0  ;;  %v715_v21 = vpop.permute.xlu0 %714  ;;  %v720_v33 = vpop.permute.xlu1 %719 }
 0x11a   : > { %v503_v18 = vmul.f32 0.2, %v425_v45  ;;  %790 = vst [vmem:[%s1183_s13 + $0xd0] sm:$0xff] %v758_v12  ;;  %v532_v19 = vsel %vm468_vm3, %v414_v5, %v500_v14  ;;  %vm453_vm6 = vcmp.gt.f32.partialorder %v353_v62, 0.0  ;;  %v485_v48 = vmul.f32 0.2, %v353_v62 }
 0x11b   : > { %772 = vst [vmem:[%s1183_s13 + $0x40] sm:$0xff] %v740_v13  ;;  %vm469_vm7 = vcmp.gt.f32.partialorder %v417_v8, 0.0  ;;  %v756_v50 = vmul.f32 %v1209_v15, %v532_v19  ;;  %v519_v22 = vsel %vm455_vm4, %v361_v43, %v487_v17  ;;  %v501_v25 = vmul.f32 0.2, %v417_v8 }
 0x11c   : > { %v535_v23 = vsel %vm471_vm5, %v425_v45, %v503_v18  ;;  %v743_v26 = vmul.f32 %v1151_v51, %v519_v22  ;;  %v517_v28 = vsel %vm453_vm6, %v353_v62, %v485_v48  ;;  %vm458_vm8 = vcmp.gt.f32.partialorder %v374_v9, 0.0 }
 0x11d   : > { %v759_v27 = vmul.f32 %v710_v42, %v535_v23  ;;  %788 = vst [vmem:[%s1183_s13 + $0xc0] sm:$0xff] %v756_v50  ;;  %v741_v29 = vmul.f32 %v1147_v49, %v517_v28  ;;  %v533_v30 = vsel %vm469_vm7, %v417_v8, %v501_v25  ;;  %v490_v31 = vmul.f32 0.2, %v374_v9  ;;  %v730_v1 = vpop.permute.xlu1 %729 }
 0x11e   : > { %v438_v32 = vadd.f32 %v937_v6, %v1168_v61  ;;  %775 = vst [vmem:[%s1183_s13 + $0x58] sm:$0xff] %v743_v26  ;;  %v757_v15 = vmul.f32 %v1207_v44, %v533_v30  ;;  %v366_v34 = vadd.f32 %v1168_v61, %v365_v7  ;;  %v430_v51 = vadd.f32 %v1168_v61, %v429_v10  ;;  %v725_v44 = vpop.permute.xlu0 %724 }
 0x11f   : > { %791 = vst [vmem:[%s1183_s13 + $0xd8] sm:$0xff] %v759_v27  ;;  %v377_v46 = vadd.f32 %v922_v11, %v1168_v61  ;;  %773 = vst [vmem:[%s1183_s13 + $0x48] sm:$0xff] %v741_v29  ;;  %v522_v35 = vsel %vm458_vm8, %v374_v9, %v490_v31  ;;  %v441_v36 = vadd.f32 %v938_v16, %v1168_v61 }
 0x120   : > { %vm474_vm9 = vcmp.gt.f32.partialorder %v438_v32, 0.0  ;;  %v506_v49 = vmul.f32 0.2, %v438_v32  ;;  %789 = vst [vmem:[%s1183_s13 + $0xc8] sm:$0xff] %v757_v15  ;;  %v746_v37 = vmul.f32 %v1161_v56, %v522_v35  ;;  %vm456_vm10 = vcmp.gt.f32.partialorder %v366_v34, 0.0 }
 0x121   : > { %v488_v63 = vmul.f32 0.2, %v366_v34  ;;  %vm472_vm11 = vcmp.gt.f32.partialorder %v430_v51, 0.0  ;;  %v504_v47 = vmul.f32 0.2, %v430_v51  ;;  %vm459_vm12 = vcmp.gt.f32.partialorder %v377_v46, 0.0 }
 0x122   : > { %v538_v38 = vsel %vm474_vm9, %v438_v32, %v506_v49  ;;  %v491_v39 = vmul.f32 0.2, %v377_v46  ;;  %778 = vst [vmem:[%s1183_s13 + $0x70] sm:$0xff] %v746_v37  ;;  %vm475_vm13 = vcmp.gt.f32.partialorder %v441_v36, 0.0  ;;  %v507_v42 = vmul.f32 0.2, %v441_v36 }
 0x123   : > { %v762_v40 = vmul.f32 %v725_v44, %v538_v38  ;;  %v520_v41 = vsel %vm456_vm10, %v366_v34, %v488_v63  ;;  %v536_v56 = vsel %vm472_vm11, %v430_v51, %v504_v47  ;;  %v369_v0 = vadd.f32 %v1168_v61, %v368_v57 }
 0x124   : > { %v744_v58 = vmul.f32 %v1157_v54, %v520_v41  ;;  %v523_v60 = vsel %vm459_vm12, %v377_v46, %v491_v39  ;;  %v760_v2 = vmul.f32 %v715_v21, %v536_v56  ;;  %v539_v24 = vsel %vm475_vm13, %v441_v36, %v507_v42 }
 0x125   : > { %794 = vst [vmem:[%s1183_s13 + $0xf0] sm:$0xff] %v762_v40  ;;  %v747_v3 = vmul.f32 %v1159_v55, %v523_v60  ;;  %v433_v4 = vadd.f32 %v1168_v61, %v432_v20  ;;  %v763_v5 = vmul.f32 %v730_v1, %v539_v24  ;;  %vm457_vm14 = vcmp.gt.f32.partialorder %v369_v0, 0.0 }
 0x126   : > { %776 = vst [vmem:[%s1183_s13 + $0x60] sm:$0xff] %v744_v58  ;;  %v489_v43 = vmul.f32 0.2, %v369_v0  ;;  %792 = vst [vmem:[%s1183_s13 + $0xe0] sm:$0xff] %v760_v2 }
 0x127   : > { %779 = vst [vmem:[%s1183_s13 + $0x78] sm:$0xff] %v747_v3  ;;  %vm473_vm15 = vcmp.gt.f32.partialorder %v433_v4, 0.0  ;;  %v505_v54 = vmul.f32 0.2, %v433_v4  ;;  %795 = vst [vmem:[%s1183_s13 + $0xf8] sm:$0xff] %v763_v5 }
 0x128   : > { %v521_v45 = vsel %vm457_vm14, %v369_v0, %v489_v43 }
 0x129   : > { %v745_v62 = vmul.f32 %v1155_v53, %v521_v45  ;;  %v537_v6 = vsel %vm473_vm15, %v433_v4, %v505_v54 }
 0x12a   : > { %v761_v7 = vmul.f32 %v720_v33, %v537_v6 }
 0x12b   : > { %777 = vst [vmem:[%s1183_s13 + $0x68] sm:$0xff] %v745_v62 }
 0x12c   : > { %793 = vst [vmem:[%s1183_s13 + $0xe8] sm:$0xff] %v761_v7 }
 0x12d PF: > { %s14_s15 = sadd.s32 1, %s972_s15  }
 0x12e   : > { %p11_p4 = scmp.ge.s32.totalorder %s14_s15, 5  }
 0x130   :  { %13 = sbr.rel (!%p11_p4) target bundleno = 1 (0x1), region = 67 }

// kernel: discriminator_forward.14
= control target key start
LH: loop header
LB: loop body
LE: loop exit
PB: predicated region body
PF: predicated region fallthrough
CT: control target
= control target key end

     0   :  { %s313_s6 = smov 0   ;;  %s394_s0 = inlined_call_operand.vmem [shape: f32[2,8,2,8,256], index: 0, kind: input, shape index: {}]   ;;  %s395_s1 = inlined_call_operand.vmem [shape: f32[2,10,10,128], index: 1, kind: output, shape index: {}]  }
   0x1 LB: > { %s265_s7 = sadd.s32 4294967295, %s300_s6   ;;  %p269_p0 = scmp.ge.s32.totalorder %s300_s6, 1  ;;  %s300_s6 = sphi %s313_s6, %s11_s6  }
   0x2   : > { %p87_p1 = scmp.lt.s32.totalorder %s300_s6, 3 }
   0x4   : > { %p88_p2 = pnand %p269_p0, %p87_p1 }
   0x5   : > { %p107_p3 = scmp.lt.s32.totalorder (!%p88_p2), %s265_s7, 1  ;;  %v302_v3 = vmov (!%p88_p2), 0.0  }
   0x6   : > { %91 = sbr.rel (%p88_p2) target bundleno = 37 (0x25), region = 24 }
   0xd   : > { %s397_s7 = smov (!%p107_p3, %s265_s7), 1 }
   0xe   : > { %s283_s8 = sshll.u32 %s397_s7, 8  ;;  %s284_s9 = smul.u32 160, %s397_s7 }
   0xf   : > { %s324_s12 = scalar_lea.vmem %s394_s0, %s283_s8 }
  0x10   : > { %s329_s15 = scalar_lea.vmem %s395_s1, %s284_s9  ;;  %v117_v0 = vld [vmem:[%s324_s12] sm:$0xff]  ;;  %v118_v1 = vld [vmem:[%s324_s12 + $0x8] sm:$0xff]  ;;  %v119_v2 = vld [vmem:[%s324_s12 + $0x10] sm:$0xff] }
  0x11   : > { %183 = vst [vmem:[%s329_s15 + $0x10] sm:$0xff] %v302_v3  ;;  %181 = vst [vmem:[%s329_s15] sm:$0xff] %v302_v3  ;;  %v120_v4 = vld [vmem:[%s324_s12 + $0x18] sm:$0xff]  ;;  %v149_v5 = vadd.f32 %v118_v1, %v117_v0  ;;  %v121_v6 = vld [vmem:[%s324_s12 + $0x20] sm:$0xff] }
  0x12   : > { %182 = vst [vmem:[%s329_s15 + $0x8] sm:$0x3] %v302_v3  ;;  %184 = vst [vmem:[%s329_s15 + $0x18] sm:$0x3] %v302_v3  ;;  %v122_v7 = vld [vmem:[%s324_s12 + $0x28] sm:$0xff]  ;;  %v150_v8 = vadd.f32 %v120_v4, %v119_v2  ;;  %v123_v9 = vld [vmem:[%s324_s12 + $0x30] sm:$0xff] }
  0x13   : > { %185 = vst [vmem:[%s329_s15 + $0x20] sm:$0xff] %v302_v3  ;;  %186 = vst [vmem:[%s329_s15 + $0x28] sm:$0x3] %v302_v3  ;;  %v124_v10 = vld [vmem:[%s324_s12 + $0x38] sm:$0xff]  ;;  %v151_v11 = vadd.f32 %v122_v7, %v121_v6  ;;  %v125_v12 = vld [vmem:[%s324_s12 + $0x40] sm:$0xff] }
  0x14   : > { %187 = vst [vmem:[%s329_s15 + $0x30] sm:$0xff] %v302_v3  ;;  %188 = vst [vmem:[%s329_s15 + $0x38] sm:$0x3] %v302_v3  ;;  %v152_v13 = vadd.f32 %v124_v10, %v123_v9  ;;  %v126_v14 = vld [vmem:[%s324_s12 + $0x48] sm:$0xff]  ;;  %v127_v15 = vld [vmem:[%s324_s12 + $0x50] sm:$0xff]  ;;  %v165_v17 = vadd.f32 %v150_v8, %v149_v5 }
  0x15   : > { %189 = vst [vmem:[%s329_s15 + $0x40] sm:$0xff] %v302_v3  ;;  %190 = vst [vmem:[%s329_s15 + $0x48] sm:$0x3] %v302_v3  ;;  %v128_v16 = vld [vmem:[%s324_s12 + $0x58] sm:$0xff]  ;;  %v153_v18 = vadd.f32 %v126_v14, %v125_v12  ;;  %v129_v20 = vld [vmem:[%s324_s12 + $0x60] sm:$0xff] }
  0x16   : > { %191 = vst [vmem:[%s329_s15 + $0x50] sm:$0xff] %v302_v3  ;;  %192 = vst [vmem:[%s329_s15 + $0x58] sm:$0x3] %v302_v3  ;;  %v154_v19 = vadd.f32 %v128_v16, %v127_v15  ;;  %v130_v21 = vld [vmem:[%s324_s12 + $0x68] sm:$0xff]  ;;  %v131_v22 = vld [vmem:[%s324_s12 + $0x70] sm:$0xff]  ;;  %v166_v23 = vadd.f32 %v152_v13, %v151_v11  ;;  %v173_v28 = vmul.f32 0.25, %v165_v17 }
  0x17   : > { %193 = vst [vmem:[%s329_s15 + $0x60] sm:$0xff] %v302_v3  ;;  %194 = vst [vmem:[%s329_s15 + $0x68] sm:$0x3] %v302_v3  ;;  %v132_v24 = vld [vmem:[%s324_s12 + $0x78] sm:$0xff]  ;;  %v155_v25 = vadd.f32 %v130_v21, %v129_v20  ;;  %v133_v26 = vld [vmem:[%s324_s12 + $0x80] sm:$0xff] }
  0x18   : > { %195 = vst [vmem:[%s329_s15 + $0x70] sm:$0xff] %v302_v3  ;;  %196 = vst [vmem:[%s329_s15 + $0x78] sm:$0x3] %v302_v3  ;;  %v134_v27 = vld [vmem:[%s324_s12 + $0x88] sm:$0xff]  ;;  %v167_v29 = vadd.f32 %v154_v19, %v153_v18  ;;  %v156_v30 = vadd.f32 %v132_v24, %v131_v22  ;;  %v135_v31 = vld [vmem:[%s324_s12 + $0x90] sm:$0xff]  ;;  %v174_v35 = vmul.f32 0.25, %v166_v23 }
  0x19   : > { %197 = vst [vmem:[%s329_s15 + $0x80] sm:$0xff] %v302_v3  ;;  %198 = vst [vmem:[%s329_s15 + $0x88] sm:$0x3] %v302_v3  ;;  %v136_v32 = vld [vmem:[%s324_s12 + $0x98] sm:$0xff]  ;;  %v157_v33 = vadd.f32 %v134_v27, %v133_v26  ;;  %v137_v34 = vld [vmem:[%s324_s12 + $0xa0] sm:$0xff] }
  0x1a   : > { %199 = vst [vmem:[%s329_s15 + $0x90] sm:$0xff] %v302_v3  ;;  %200 = vst [vmem:[%s329_s15 + $0x98] sm:$0x3] %v302_v3  ;;  %v158_v36 = vadd.f32 %v136_v32, %v135_v31  ;;  %v138_v37 = vld [vmem:[%s324_s12 + $0xa8] sm:$0xff]  ;;  %v139_v38 = vld [vmem:[%s324_s12 + $0xb0] sm:$0xff]  ;;  %v175_v40 = vmul.f32 0.25, %v167_v29  ;;  %v168_v41 = vadd.f32 %v156_v30, %v155_v25 }
  0x1b   : > { %v140_v39 = vld [vmem:[%s324_s12 + $0xb8] sm:$0xff]  ;;  %273 = vst [vmem:[%s329_s15 + $0x11] sm:$0xff] %v173_v28  ;;  %v159_v42 = vadd.f32 %v138_v37, %v137_v34  ;;  %v141_v44 = vld [vmem:[%s324_s12 + $0xc0] sm:$0xff]  ;;  %v142_v45 = vld [vmem:[%s324_s12 + $0xc8] sm:$0xff] }
  0x1c   : > { %v160_v43 = vadd.f32 %v140_v39, %v139_v38  ;;  %v143_v46 = vld [vmem:[%s324_s12 + $0xd0] sm:$0xff]  ;;  %274 = vst [vmem:[%s329_s15 + $0x21] sm:$0xff] %v174_v35  ;;  %v169_v47 = vadd.f32 %v158_v36, %v157_v33  ;;  %v144_v48 = vld [vmem:[%s324_s12 + $0xd8] sm:$0xff]  ;;  %v161_v49 = vadd.f32 %v142_v45, %v141_v44  ;;  %v145_v50 = vld [vmem:[%s324_s12 + $0xe0] sm:$0xff]  ;;  %v176_v52 = vmul.f32 0.25, %v168_v41 }
  0x1d   : > { %v146_v51 = vld [vmem:[%s324_s12 + $0xe8] sm:$0xff]  ;;  %275 = vst [vmem:[%s329_s15 + $0x31] sm:$0xff] %v175_v40  ;;  %v162_v54 = vadd.f32 %v144_v48, %v143_v46  ;;  %v147_v55 = vld [vmem:[%s324_s12 + $0xf0] sm:$0xff]  ;;  %v148_v56 = vld [vmem:[%s324_s12 + $0xf8] sm:$0xff] }
  0x1e   : > { %v170_v53 = vadd.f32 %v160_v43, %v159_v42  ;;  %v163_v57 = vadd.f32 %v146_v51, %v145_v50  ;;  %v177_v58 = vmul.f32 0.25, %v169_v47  ;;  %v164_v59 = vadd.f32 %v148_v56, %v147_v55  ;;  %276 = vst [vmem:[%s329_s15 + $0x41] sm:$0xff] %v176_v52 }
  0x1f   : > { %v171_v61 = vadd.f32 %v162_v54, %v161_v49 }
  0x20   : > { %v178_v60 = vmul.f32 0.25, %v170_v53  ;;  %277 = vst [vmem:[%s329_s15 + $0x51] sm:$0xff] %v177_v58  ;;  %v172_v62 = vadd.f32 %v164_v59, %v163_v57 }
  0x21   : > { %v179_v63 = vmul.f32 0.25, %v171_v61 }
  0x22   : > { %278 = vst [vmem:[%s329_s15 + $0x61] sm:$0xff] %v178_v60  ;;  %v180_v0 = vmul.f32 0.25, %v172_v62 }
  0x23   : > { %279 = vst [vmem:[%s329_s15 + $0x71] sm:$0xff] %v179_v63 }
  0x24   : > { %280 = vst [vmem:[%s329_s15 + $0x81] sm:$0xff] %v180_v0 }
  0x25 PF: > { %s11_s6 = sadd.s32 1, %s300_s6  }
  0x26   : > { %p8_p4 = scmp.ge.s32.totalorder %s11_s6, 4  }
  0x28   :  { %10 = sbr.rel (!%p8_p4) target bundleno = 1 (0x1), region = 55 }

// kernel: discriminator_forward.15
= control target key start
LH: loop header
LB: loop body
LE: loop exit
PB: predicated region body
PF: predicated region fallthrough
CT: control target
= control target key end

     0   :  { %v615_v0 = vmov 0.0   ;;  %vm616_vm0 = vmmov 0   ;;  %v617_v6 = vmov 0   ;;  %s1024_s1 = inlined_call_operand.vmem [shape: f32[1,128,128], index: 1, kind: input, shape index: {}]   ;;  %s1025_s3 = inlined_call_operand.vmem [shape: f32[200,1], index: 3, kind: input, shape index: {}]   ;;  %s1026_s0 = inlined_call_operand.vmem [shape: f32[200,128], index: 0, kind: input, shape index: {}]   ;;  %s1027_s2 = inlined_call_operand.vmem [shape: f32[1,128], index: 2, kind: input, shape index: {}]   ;;  %s1028_s4 = inlined_call_operand.vmem [shape: f32[200,128], index: 4, kind: output, shape index: {}]  }
   0x1   :  { %526 = vmatprep.subr.bf16.mxu0 %v615_v0  ;;  %594 = vmatprep.subr.bf16.mxu1 %v615_v0  ;;  %v58_v1 = vld [vmem:[%s1024_s1] sm:$0xff]  ;;  %v59_v2 = vld [vmem:[%s1024_s1 + $0x8] sm:$0xff]  ;;  %v60_v3 = vld [vmem:[%s1024_s1 + $0x10] sm:$0xff] }
   0x2   :  { %v74_v4 = vpack.c.bf16 %v59_v2, %v58_v1  ;;  %v61_v5 = vld [vmem:[%s1024_s1 + $0x18] sm:$0xff]  ;;  %542 = vmatprep.mubr.msk.bf16.mxu0 %vm616_vm0, %v615_v0  ;;  %570 = vmatprep.mubr.msk.bf16.mxu1 %vm616_vm0, %v615_v0  ;;  %v62_v8 = vld [vmem:[%s1024_s1 + $0x20] sm:$0xff]  ;;  %v63_v9 = vld [vmem:[%s1024_s1 + $0x28] sm:$0xff] }
   0x3   :  { %613 = vset.pattern.permute.xlu0 %v617_v6  ;;  %614 = vset.pattern.permute.xlu1 %v617_v6  ;;  %v75_v7 = vpack.c.bf16 %v61_v5, %v60_v3  ;;  %v76_v10 = vpack.c.bf16 %v63_v9, %v62_v8  ;;  %v64_v11 = vld [vmem:[%s1024_s1 + $0x30] sm:$0xff]  ;;  %v65_v12 = vld [vmem:[%s1024_s1 + $0x38] sm:$0xff]  ;;  %v66_v14 = vld [vmem:[%s1024_s1 + $0x40] sm:$0xff] }
   0x4   :  { %527 = vmatpush3.bf16.msra.mxu0 %v74_v4  ;;  %602 = vmatpush3.bf16.msra.mxu1 %v74_v4  ;;  %v77_v13 = vpack.c.bf16 %v65_v12, %v64_v11  ;;  %v67_v15 = vld [vmem:[%s1024_s1 + $0x48] sm:$0xff]  ;;  %v300_v16 = vld [vmem:[%s1025_s3] sm:$0xff]  ;;  %v302_v17 = vld [vmem:[%s1025_s3 + $0x10] sm:$0xff] }
   0x5   :  { %528 = vmatprep.subr.bf16.mxu0 %v615_v0  ;;  %595 = vmatprep.subr.bf16.mxu1 %v615_v0  ;;  %v78_v18 = vpack.c.bf16 %v67_v15, %v66_v14  ;;  %v301_v19 = vld [vmem:[%s1025_s3 + $0x8] sm:$0xff]  ;;  %v68_v20 = vld [vmem:[%s1024_s1 + $0x50] sm:$0xff]  ;;  %v69_v21 = vld [vmem:[%s1024_s1 + $0x58] sm:$0xff] }
   0x6   :  { %327 = vperm.xlu0 %613, %v300_v16   ;;  %337 = vperm.xlu1 %614, %v302_v17   ;;  %v303_v22 = vld [vmem:[%s1025_s3 + $0x18] sm:$0xff]  ;;  %v79_v23 = vpack.c.bf16 %v69_v21, %v68_v20  ;;  %v304_v24 = vld [vmem:[%s1025_s3 + $0x20] sm:$0xff]  ;;  %v71_v26 = vld [vmem:[%s1024_s1 + $0x68] sm:$0xff] }
   0x7   :  { %v70_v25 = vld [vmem:[%s1024_s1 + $0x60] sm:$0xff]  ;;  %v305_v27 = vld [vmem:[%s1025_s3 + $0x28] sm:$0xff]  ;;  %v306_v29 = vld [vmem:[%s1025_s3 + $0x30] sm:$0xff] }
   0x8   :  { %529 = vmatpush3.bf16.msra.mxu0 %v75_v7  ;;  %603 = vmatpush3.bf16.msra.mxu1 %v75_v7  ;;  %v80_v28 = vpack.c.bf16 %v71_v26, %v70_v25  ;;  %v72_v30 = vld [vmem:[%s1024_s1 + $0x70] sm:$0xff]  ;;  %v73_v31 = vld [vmem:[%s1024_s1 + $0x78] sm:$0xff]  ;;  %v20_v32 = vld [vmem:[%s1026_s0] sm:$0xff] }
   0x9   :  { %530 = vmatprep.subr.bf16.mxu0 %v615_v0  ;;  %596 = vmatprep.subr.bf16.mxu1 %v615_v0  ;;  %v21_v33 = vld [vmem:[%s1026_s0 + $0x8] sm:$0xff]  ;;  %v307_v34 = vld [vmem:[%s1025_s3 + $0x38] sm:$0xff]  ;;  %v81_v35 = vpack.c.bf16 %v73_v31, %v72_v30  ;;  %v34_v36 = vld [vmem:[%s1026_s0 + $0x70] sm:$0xff] }
   0xa   :  { %332 = vperm.xlu0 %613, %v301_v19   ;;  %342 = vperm.xlu1 %614, %v303_v22   ;;  %v35_v37 = vld [vmem:[%s1026_s0 + $0x78] sm:$0xff]  ;;  %v308_v38 = vld [vmem:[%s1025_s3 + $0x40] sm:$0xff]  ;;  %v45_v39 = vpack.c.bf16 %v21_v33, %v20_v32  ;;  %v309_v41 = vld [vmem:[%s1025_s3 + $0x48] sm:$0xff] }
   0xb   :  { %v52_v40 = vpack.c.bf16 %v35_v37, %v34_v36  ;;  %v310_v42 = vld [vmem:[%s1025_s3 + $0x50] sm:$0xff]  ;;  %v311_v44 = vld [vmem:[%s1025_s3 + $0x58] sm:$0xff]  ;;  %v36_v46 = vld [vmem:[%s1026_s0 + $0x80] sm:$0xff] }
   0xc   :  { %531 = vmatpush3.bf16.msra.mxu0 %v76_v10  ;;  %604 = vmatpush3.bf16.msra.mxu1 %v76_v10  ;;  %v22_v43 = vld [vmem:[%s1026_s0 + $0x10] sm:$0xff]  ;;  %v23_v45 = vld [vmem:[%s1026_s0 + $0x18] sm:$0xff]  ;;  %v37_v47 = vld [vmem:[%s1026_s0 + $0x88] sm:$0xff] }
   0xd   :  { %532 = vmatprep.subr.bf16.mxu0 %v615_v0  ;;  %597 = vmatprep.subr.bf16.mxu1 %v615_v0  ;;  %v312_v48 = vld [vmem:[%s1025_s3 + $0x60] sm:$0xff]  ;;  %v46_v49 = vpack.c.bf16 %v23_v45, %v22_v43  ;;  %v53_v50 = vpack.c.bf16 %v37_v47, %v36_v46  ;;  %v313_v51 = vld [vmem:[%s1025_s3 + $0x68] sm:$0xff]  ;;  %v314_v52 = vld [vmem:[%s1025_s3 + $0x70] sm:$0xff] }
   0xe   :  { %347 = vperm.xlu0 %613, %v304_v24   ;;  %352 = vperm.xlu1 %614, %v305_v27   ;;  %v24_v53 = vld [vmem:[%s1026_s0 + $0x20] sm:$0xff]  ;;  %v315_v54 = vld [vmem:[%s1025_s3 + $0x78] sm:$0xff]  ;;  %v25_v55 = vld [vmem:[%s1026_s0 + $0x28] sm:$0xff] }
   0xf   :  { %v38_v56 = vld [vmem:[%s1026_s0 + $0x90] sm:$0xff]  ;;  %v39_v57 = vld [vmem:[%s1026_s0 + $0x98] sm:$0xff]  ;;  %v316_v58 = vld [vmem:[%s1025_s3 + $0x80] sm:$0xff]  ;;  %v47_v59 = vpack.c.bf16 %v25_v55, %v24_v53 }
  0x10   :  { %533 = vmatpush3.bf16.msra.mxu0 %v77_v13  ;;  %605 = vmatpush3.bf16.msra.mxu1 %v77_v13  ;;  %v54_v60 = vpack.c.bf16 %v39_v57, %v38_v56  ;;  %v317_v61 = vld [vmem:[%s1025_s3 + $0x88] sm:$0xff]  ;;  %v318_v62 = vld [vmem:[%s1025_s3 + $0x90] sm:$0xff]  ;;  %v319_v1 = vld [vmem:[%s1025_s3 + $0x98] sm:$0xff] }
  0x11   :  { %534 = vmatprep.subr.bf16.mxu0 %v615_v0  ;;  %598 = vmatprep.subr.bf16.mxu1 %v615_v0  ;;  %v26_v63 = vld [vmem:[%s1026_s0 + $0x30] sm:$0xff]  ;;  %v27_v2 = vld [vmem:[%s1026_s0 + $0x38] sm:$0xff]  ;;  %v40_v3 = vld [vmem:[%s1026_s0 + $0xa0] sm:$0xff] }
  0x12   :  { %357 = vperm.xlu0 %613, %v306_v29   ;;  %362 = vperm.xlu1 %614, %v307_v34   ;;  %v41_v4 = vld [vmem:[%s1026_s0 + $0xa8] sm:$0xff]  ;;  %v320_v5 = vld [vmem:[%s1025_s3 + $0xa0] sm:$0xff]  ;;  %v48_v6 = vpack.c.bf16 %v27_v2, %v26_v63  ;;  %v322_v9 = vld [vmem:[%s1025_s3 + $0xb0] sm:$0xff] }
  0x13   :  { %v55_v7 = vpack.c.bf16 %v41_v4, %v40_v3  ;;  %v321_v8 = vld [vmem:[%s1025_s3 + $0xa8] sm:$0xff]  ;;  %v28_v10 = vld [vmem:[%s1026_s0 + $0x40] sm:$0xff]  ;;  %v323_v11 = vld [vmem:[%s1025_s3 + $0xb8] sm:$0xff] }
  0x14   :  { %535 = vmatpush3.bf16.msra.mxu0 %v78_v18  ;;  %606 = vmatpush3.bf16.msra.mxu1 %v78_v18  ;;  %v29_v12 = vld [vmem:[%s1026_s0 + $0x48] sm:$0xff]  ;;  %v42_v13 = vld [vmem:[%s1026_s0 + $0xb0] sm:$0xff]  ;;  %v43_v14 = vld [vmem:[%s1026_s0 + $0xb8] sm:$0xff] }
  0x15   :  { %536 = vmatprep.subr.bf16.mxu0 %v615_v0  ;;  %599 = vmatprep.subr.bf16.mxu1 %v615_v0  ;;  %v324_v15 = vld [vmem:[%s1025_s3 + $0xc0] sm:$0xff]  ;;  %v49_v16 = vpack.c.bf16 %v29_v12, %v28_v10  ;;  %v56_v17 = vpack.c.bf16 %v43_v14, %v42_v13  ;;  %v30_v18 = vld [vmem:[%s1026_s0 + $0x50] sm:$0xff]  ;;  %v31_v19 = vld [vmem:[%s1026_s0 + $0x58] sm:$0xff] }
  0x16   :  { %367 = vperm.xlu0 %613, %v308_v38   ;;  %372 = vperm.xlu1 %614, %v309_v41   ;;  %v44_v20 = vld [vmem:[%s1026_s0 + $0xc0] sm:$0xff]  ;;  %v50_v21 = vpack.c.bf16 %v31_v19, %v30_v18  ;;  %v33_v24 = vld [vmem:[%s1026_s0 + $0x68] sm:$0xff] }
  0x17   :  { %v57_v22 = vpack.c.bf16 %v44_v20, %v44_v20  ;;  %v906_v37 = vld [vmem:[%s1027_s2] ss:$0 sm:$0xff] }
  0x18   :  { %537 = vmatpush3.bf16.msra.mxu0 %v79_v23  ;;  %607 = vmatpush3.bf16.msra.mxu1 %v79_v23  ;;  %v32_v23 = vld [vmem:[%s1026_s0 + $0x60] sm:$0xff] }
  0x19   :  { %538 = vmatprep.subr.bf16.mxu0 %v615_v0  ;;  %600 = vmatprep.subr.bf16.mxu1 %v615_v0  ;;  %v51_v25 = vpack.c.bf16 %v33_v24, %v32_v23 }
  0x1a   :  { %377 = vperm.xlu0 %613, %v310_v42   ;;  %382 = vperm.xlu1 %614, %v311_v44  }
  0x1c   :  { %539 = vmatpush3.bf16.msra.mxu0 %v80_v28  ;;  %608 = vmatpush3.bf16.msra.mxu1 %v80_v28 }
  0x1d   :  { %540 = vmatprep.subr.bf16.mxu0 %v615_v0  ;;  %601 = vmatprep.subr.bf16.mxu1 %v615_v0 }
  0x1e   :  { %387 = vperm.xlu0 %613, %v312_v48   ;;  %392 = vperm.xlu1 %614, %v313_v51  }
  0x20   :  { %541 = vmatpush3.bf16.msra.mxu0 %v81_v35  ;;  %609 = vmatpush3.bf16.msra.mxu1 %v81_v35 }
  0x22   :  { %397 = vperm.xlu0 %613, %v314_v52   ;;  %402 = vperm.xlu1 %614, %v315_v54  }
  0x23   :  { %543 = vmatmul.mubr.bf16.vlgmr.msra.gmra.mrb[0].mxu0 %v45_v39  ;;  %571 = vmatmul.mubr.bf16.vlgmr.msra.gmra.mrb[0].mxu1 %v52_v40 }
  0x24   :  { %546 = vmatprep.mubr.msk.bf16.mxu0 %vm616_vm0, %v615_v0  ;;  %574 = vmatprep.mubr.msk.bf16.mxu1 %vm616_vm0, %v615_v0 }
  0x26   :  { %407 = vperm.xlu0 %613, %v316_v58   ;;  %412 = vperm.xlu1 %614, %v317_v61  }
  0x2a   :  { %417 = vperm.xlu0 %613, %v318_v62   ;;  %422 = vperm.xlu1 %614, %v319_v1  }
  0x2b   :  { %547 = vmatmul.mubr.bf16.gmra.mrb[4].mxu0 %v46_v49  ;;  %575 = vmatmul.mubr.bf16.gmra.mrb[4].mxu1 %v53_v50 }
  0x2c   :  { %550 = vmatprep.mubr.msk.bf16.mxu0 %vm616_vm0, %v615_v0  ;;  %578 = vmatprep.mubr.msk.bf16.mxu1 %vm616_vm0, %v615_v0 }
  0x2e   :  { %427 = vperm.xlu0 %613, %v320_v5   ;;  %432 = vperm.xlu1 %614, %v321_v8  }
  0x32   :  { %437 = vperm.xlu0 %613, %v322_v9   ;;  %442 = vperm.xlu1 %614, %v323_v11  }
  0x33   :  { %551 = vmatmul.mubr.bf16.gmra.mrb[8].mxu0 %v47_v59  ;;  %579 = vmatmul.mubr.bf16.gmra.mrb[8].mxu1 %v54_v60 }
  0x34   :  { %554 = vmatprep.mubr.msk.bf16.mxu0 %vm616_vm0, %v615_v0  ;;  %582 = vmatprep.mubr.msk.bf16.mxu1 %vm616_vm0, %v615_v0 }
  0x36   :  { %447 = vperm.xlu0 %613, %v324_v15  }
  0x3b   :  { %555 = vmatmul.mubr.bf16.gmra.mrb[12].mxu0 %v48_v6  ;;  %583 = vmatmul.mubr.bf16.gmra.mrb[12].mxu1 %v55_v7 }
  0x3c   :  { %558 = vmatprep.mubr.msk.bf16.mxu0 %vm616_vm0, %v615_v0  ;;  %586 = vmatprep.mubr.msk.bf16.mxu1 %vm616_vm0, %v615_v0 }
  0x43   :  { %559 = vmatmul.mubr.bf16.gmra.mrb[16].mxu0 %v49_v16  ;;  %587 = vmatmul.mubr.bf16.gmra.mrb[16].mxu1 %v56_v17 }
  0x44   :  { %562 = vmatprep.mubr.msk.bf16.mxu0 %vm616_vm0, %v615_v0  ;;  %590 = vmatprep.mubr.msk.bf16.mxu1 %vm616_vm0, %v615_v0 }
  0x4b   :  { %563 = vmatmul.mubr.bf16.gmra.mrb[20].mxu0 %v50_v21  ;;  %591 = vmatmul.mubr.bf16.gmra.mrb[20].mxu1 %v57_v22 }
  0x4c   :  { %566 = vmatprep.mubr.msk.bf16.mxu0 %vm616_vm0, %v615_v0 }
  0x53   :  { %567 = vmatmul.mubr.bf16.gmra.mrb[24].mxu0 %v51_v25 }
  0x85   :  { %v328_v26 = vpop.permute.xlu0 %327  ;;  %v883_v27 = vpop.permute.xlu1 %337 }
  0x89   :  { %v333_v28 = vpop.permute.xlu0 %332  ;;  %v885_v29 = vpop.permute.xlu1 %342 }
  0x8d   :  { %v887_v30 = vpop.permute.xlu0 %347  ;;  %v889_v31 = vpop.permute.xlu1 %352 }
  0x91   :  { %v891_v0 = vpop.permute.xlu0 %357  ;;  %v893_v32 = vpop.permute.xlu1 %362 }
  0x95   :  { %v895_v33 = vpop.permute.xlu0 %367  ;;  %v897_v34 = vpop.permute.xlu1 %372 }
  0x99   :  { %v899_v35 = vpop.permute.xlu0 %377  ;;  %v901_v36 = vpop.permute.xlu1 %382 }
  0x9d   :  { %v908_v38 = vpop.permute.xlu0 %387  ;;  %v910_v39 = vpop.permute.xlu1 %392 }
  0xa1   :  { %v398_v56 = vpop.permute.xlu0 %397  ;;  %v403_v60 = vpop.permute.xlu1 %402 }
  0xa5   :  { %v408_v17 = vpop.permute.xlu0 %407  ;;  %v413_v23 = vpop.permute.xlu1 %412 }
  0xf6   :  { %v123_v40 = vpop.f32.mrb[0].mxu0  ;;  %v179_v41 = vpop.f32.mrb[0].mxu1 }
  0xf7   :  { %v124_v42 = vadd.f32 %v906_v37, %v123_v40  ;;  %v544_v43 = vpop.f32.mrb[1].mxu0  ;;  %v180_v44 = vadd.f32 %v906_v37, %v179_v41  ;;  %v572_v45 = vpop.f32.mrb[1].mxu1 }
  0xf8   :  { %v126_v46 = vpop.f32.mrb[2].mxu0  ;;  %v182_v47 = vpop.f32.mrb[2].mxu1 }
  0xf9   :  { %vm225_vm1 = vcmp.gt.f32.partialorder %v124_v42, 0.0  ;;  %v250_v48 = vmul.f32 0.2, %v124_v42  ;;  %v127_v49 = vadd.f32 %v906_v37, %v126_v46  ;;  %vm239_vm2 = vcmp.gt.f32.partialorder %v180_v44, 0.0  ;;  %v545_v50 = vpop.f32.mrb[3].mxu0  ;;  %v573_v51 = vpop.f32.mrb[3].mxu1 }
  0xfa   :  { %v264_v52 = vmul.f32 0.2, %v180_v44  ;;  %v183_v53 = vadd.f32 %v906_v37, %v182_v47 }
  0xfb   :  { %v275_v54 = vsel %vm225_vm1, %v124_v42, %v250_v48  ;;  %vm226_vm3 = vcmp.gt.f32.partialorder %v127_v49, 0.0  ;;  %v251_v55 = vmul.f32 0.2, %v127_v49 }
  0xfc   :  { %v450_v57 = vmul.f32 %v328_v26, %v275_v54  ;;  %v289_v58 = vsel %vm239_vm2, %v180_v44, %v264_v52  ;;  %vm240_vm4 = vcmp.gt.f32.partialorder %v183_v53, 0.0  ;;  %v265_v59 = vmul.f32 0.2, %v183_v53 }
  0xfd   :  { %v276_v61 = vsel %vm226_vm3, %v127_v49, %v251_v55  ;;  %v464_v62 = vmul.f32 %v398_v56, %v289_v58 }
  0xfe   :  { %475 = vst [vmem:[%s1028_s4] sm:$0xff] %v450_v57  ;;  %v451_v63 = vmul.f32 %v333_v28, %v276_v61  ;;  %v290_v1 = vsel %vm240_vm4, %v183_v53, %v265_v59  ;;  %v131_v2 = vpop.f32.mrb[4].mxu0  ;;  %v187_v3 = vpop.f32.mrb[4].mxu1 }
  0xff   :  { %489 = vst [vmem:[%s1028_s4 + $0x70] sm:$0xff] %v464_v62  ;;  %v465_v4 = vmul.f32 %v403_v60, %v290_v1  ;;  %v132_v5 = vadd.f32 %v906_v37, %v131_v2  ;;  %v188_v6 = vadd.f32 %v906_v37, %v187_v3  ;;  %v548_v7 = vpop.f32.mrb[5].mxu0  ;;  %v576_v8 = vpop.f32.mrb[5].mxu1 }
 0x100   :  { %476 = vst [vmem:[%s1028_s4 + $0x8] sm:$0xff] %v451_v63  ;;  %v134_v9 = vpop.f32.mrb[6].mxu0  ;;  %v190_v10 = vpop.f32.mrb[6].mxu1 }
 0x101   :  { %490 = vst [vmem:[%s1028_s4 + $0x78] sm:$0xff] %v465_v4  ;;  %vm227_vm5 = vcmp.gt.f32.partialorder %v132_v5, 0.0  ;;  %v252_v11 = vmul.f32 0.2, %v132_v5  ;;  %vm241_vm6 = vcmp.gt.f32.partialorder %v188_v6, 0.0  ;;  %v135_v13 = vadd.f32 %v906_v37, %v134_v9  ;;  %v549_v15 = vpop.f32.mrb[7].mxu0  ;;  %v418_v53 = vpop.permute.xlu0 %417 }
 0x102   :  { %v266_v12 = vmul.f32 0.2, %v188_v6  ;;  %v191_v14 = vadd.f32 %v906_v37, %v190_v10  ;;  %v577_v16 = vpop.f32.mrb[7].mxu1  ;;  %v423_v59 = vpop.permute.xlu1 %422 }
 0x103   :  { %v277_v18 = vsel %vm227_vm5, %v132_v5, %v252_v11  ;;  %vm228_vm7 = vcmp.gt.f32.partialorder %v135_v13, 0.0  ;;  %v253_v22 = vmul.f32 0.2, %v135_v13 }
 0x104   :  { %v291_v19 = vsel %vm241_vm6, %v188_v6, %v266_v12  ;;  %v452_v20 = vmul.f32 %v883_v27, %v277_v18  ;;  %vm242_vm8 = vcmp.gt.f32.partialorder %v191_v14, 0.0  ;;  %v267_v24 = vmul.f32 0.2, %v191_v14 }
 0x105   :  { %v466_v21 = vmul.f32 %v408_v17, %v291_v19  ;;  %v278_v25 = vsel %vm228_vm7, %v135_v13, %v253_v22 }
 0x106   :  { %477 = vst [vmem:[%s1028_s4 + $0x10] sm:$0xff] %v452_v20  ;;  %v139_v26 = vpop.f32.mrb[8].mxu0  ;;  %v195_v28 = vpop.f32.mrb[8].mxu1  ;;  %v453_v40 = vmul.f32 %v885_v29, %v278_v25  ;;  %v292_v27 = vsel %vm242_vm8, %v191_v14, %v267_v24 }
 0x107   :  { %491 = vst [vmem:[%s1028_s4 + $0x80] sm:$0xff] %v466_v21  ;;  %v140_v41 = vadd.f32 %v906_v37, %v139_v26  ;;  %v196_v42 = vadd.f32 %v906_v37, %v195_v28  ;;  %v552_v43 = vpop.f32.mrb[9].mxu0  ;;  %v580_v44 = vpop.f32.mrb[9].mxu1  ;;  %v467_v45 = vmul.f32 %v413_v23, %v292_v27 }
 0x108   :  { %v142_v46 = vpop.f32.mrb[10].mxu0  ;;  %v198_v47 = vpop.f32.mrb[10].mxu1  ;;  %478 = vst [vmem:[%s1028_s4 + $0x18] sm:$0xff] %v453_v40 }
 0x109   :  { %vm229_vm9 = vcmp.gt.f32.partialorder %v140_v41, 0.0  ;;  %v254_v48 = vmul.f32 0.2, %v140_v41  ;;  %vm243_vm10 = vcmp.gt.f32.partialorder %v196_v42, 0.0  ;;  %v268_v49 = vmul.f32 0.2, %v196_v42  ;;  %v428_v14 = vpop.permute.xlu0 %427  ;;  %v433_v20 = vpop.permute.xlu1 %432 }
 0x10a   :  { %492 = vst [vmem:[%s1028_s4 + $0x88] sm:$0xff] %v467_v45  ;;  %v143_v29 = vadd.f32 %v906_v37, %v142_v46  ;;  %v199_v50 = vadd.f32 %v906_v37, %v198_v47  ;;  %v553_v51 = vpop.f32.mrb[11].mxu0  ;;  %v581_v52 = vpop.f32.mrb[11].mxu1 }
 0x10b   :  { %v279_v54 = vsel %vm229_vm9, %v140_v41, %v254_v48  ;;  %v293_v55 = vsel %vm243_vm10, %v196_v42, %v268_v49 }
 0x10c   :  { %v454_v56 = vmul.f32 %v887_v30, %v279_v54  ;;  %v468_v57 = vmul.f32 %v418_v53, %v293_v55  ;;  %vm230_vm11 = vcmp.gt.f32.partialorder %v143_v29, 0.0  ;;  %v255_v58 = vmul.f32 0.2, %v143_v29 }
 0x10d   :  { %vm244_vm12 = vcmp.gt.f32.partialorder %v199_v50, 0.0  ;;  %v269_v60 = vmul.f32 0.2, %v199_v50  ;;  %v438_v49 = vpop.permute.xlu0 %437  ;;  %v443_v54 = vpop.permute.xlu1 %442 }
 0x10e   :  { %479 = vst [vmem:[%s1028_s4 + $0x20] sm:$0xff] %v454_v56  ;;  %493 = vst [vmem:[%s1028_s4 + $0x90] sm:$0xff] %v468_v57  ;;  %v280_v61 = vsel %vm230_vm11, %v143_v29, %v255_v58  ;;  %v147_v62 = vpop.f32.mrb[12].mxu0  ;;  %v203_v63 = vpop.f32.mrb[12].mxu1 }
 0x10f   :  { %v455_v1 = vmul.f32 %v889_v31, %v280_v61  ;;  %v294_v30 = vsel %vm244_vm12, %v199_v50, %v269_v60  ;;  %v148_v2 = vadd.f32 %v906_v37, %v147_v62  ;;  %v204_v3 = vadd.f32 %v906_v37, %v203_v63  ;;  %v556_v4 = vpop.f32.mrb[13].mxu0  ;;  %v584_v5 = vpop.f32.mrb[13].mxu1 }
 0x110   :  { %v469_v6 = vmul.f32 %v423_v59, %v294_v30  ;;  %v150_v7 = vpop.f32.mrb[14].mxu0  ;;  %v206_v8 = vpop.f32.mrb[14].mxu1 }
 0x111   :  { %480 = vst [vmem:[%s1028_s4 + $0x28] sm:$0xff] %v455_v1  ;;  %vm231_vm13 = vcmp.gt.f32.partialorder %v148_v2, 0.0  ;;  %v256_v9 = vmul.f32 0.2, %v148_v2  ;;  %vm245_vm14 = vcmp.gt.f32.partialorder %v204_v3, 0.0  ;;  %v151_v31 = vadd.f32 %v906_v37, %v150_v7  ;;  %v557_v12 = vpop.f32.mrb[15].mxu0  ;;  %v448_v7 = vpop.permute.xlu0 %447 }
 0x112   :  { %v270_v10 = vmul.f32 0.2, %v204_v3  ;;  %494 = vst [vmem:[%s1028_s4 + $0x98] sm:$0xff] %v469_v6  ;;  %v207_v11 = vadd.f32 %v906_v37, %v206_v8  ;;  %v585_v13 = vpop.f32.mrb[15].mxu1 }
 0x113   :  { %v281_v15 = vsel %vm231_vm13, %v148_v2, %v256_v9  ;;  %vm232_vm15 = vcmp.gt.f32.partialorder %v151_v31, 0.0  ;;  %v257_v19 = vmul.f32 0.2, %v151_v31 }
 0x114   :  { %v295_v16 = vsel %vm245_vm14, %v204_v3, %v270_v10  ;;  %v456_v17 = vmul.f32 %v891_v0, %v281_v15  ;;  %vm246_vm0 = vcmp.gt.f32.partialorder %v207_v11, 0.0  ;;  %v271_v21 = vmul.f32 0.2, %v207_v11 }
 0x115   :  { %v470_v18 = vmul.f32 %v428_v14, %v295_v16  ;;  %v282_v22 = vsel %vm232_vm15, %v151_v31, %v257_v19 }
 0x116   :  { %481 = vst [vmem:[%s1028_s4 + $0x30] sm:$0xff] %v456_v17  ;;  %v155_v23 = vpop.f32.mrb[16].mxu0  ;;  %v211_v24 = vpop.f32.mrb[16].mxu1  ;;  %v457_v25 = vmul.f32 %v893_v32, %v282_v22  ;;  %v296_v0 = vsel %vm246_vm0, %v207_v11, %v271_v21 }
 0x117   :  { %495 = vst [vmem:[%s1028_s4 + $0xa0] sm:$0xff] %v470_v18  ;;  %v156_v26 = vadd.f32 %v906_v37, %v155_v23  ;;  %v212_v28 = vadd.f32 %v906_v37, %v211_v24  ;;  %v560_v40 = vpop.f32.mrb[17].mxu0  ;;  %v588_v27 = vpop.f32.mrb[17].mxu1  ;;  %v471_v41 = vmul.f32 %v433_v20, %v296_v0 }
 0x118   :  { %v158_v42 = vpop.f32.mrb[18].mxu0  ;;  %v214_v43 = vpop.f32.mrb[18].mxu1  ;;  %482 = vst [vmem:[%s1028_s4 + $0x38] sm:$0xff] %v457_v25 }
 0x119   :  { %vm233_vm1 = vcmp.gt.f32.partialorder %v156_v26, 0.0  ;;  %v258_v44 = vmul.f32 0.2, %v156_v26  ;;  %vm247_vm2 = vcmp.gt.f32.partialorder %v212_v28, 0.0  ;;  %v272_v45 = vmul.f32 0.2, %v212_v28 }
 0x11a   :  { %496 = vst [vmem:[%s1028_s4 + $0xa8] sm:$0xff] %v471_v41  ;;  %v159_v32 = vadd.f32 %v906_v37, %v158_v42  ;;  %v215_v46 = vadd.f32 %v906_v37, %v214_v43  ;;  %v561_v47 = vpop.f32.mrb[19].mxu0  ;;  %v589_v48 = vpop.f32.mrb[19].mxu1 }
 0x11b   :  { %v283_v29 = vsel %vm233_vm1, %v156_v26, %v258_v44  ;;  %v297_v50 = vsel %vm247_vm2, %v212_v28, %v272_v45 }
 0x11c   :  { %v458_v51 = vmul.f32 %v895_v33, %v283_v29  ;;  %v472_v52 = vmul.f32 %v438_v49, %v297_v50  ;;  %vm234_vm3 = vcmp.gt.f32.partialorder %v159_v32, 0.0  ;;  %v259_v53 = vmul.f32 0.2, %v159_v32 }
 0x11d   :  { %vm248_vm4 = vcmp.gt.f32.partialorder %v215_v46, 0.0  ;;  %v273_v55 = vmul.f32 0.2, %v215_v46 }
 0x11e   :  { %483 = vst [vmem:[%s1028_s4 + $0x40] sm:$0xff] %v458_v51  ;;  %497 = vst [vmem:[%s1028_s4 + $0xb0] sm:$0xff] %v472_v52  ;;  %v284_v56 = vsel %vm234_vm3, %v159_v32, %v259_v53  ;;  %v163_v57 = vpop.f32.mrb[20].mxu0  ;;  %v219_v58 = vpop.f32.mrb[20].mxu1 }
 0x11f   :  { %v459_v59 = vmul.f32 %v897_v34, %v284_v56  ;;  %v298_v33 = vsel %vm248_vm4, %v215_v46, %v273_v55  ;;  %v164_v60 = vadd.f32 %v906_v37, %v163_v57  ;;  %v220_v61 = vadd.f32 %v906_v37, %v219_v58  ;;  %v564_v62 = vpop.f32.mrb[21].mxu0  ;;  %v592_v63 = vpop.f32.mrb[21].mxu1 }
 0x120   :  { %v473_v1 = vmul.f32 %v443_v54, %v298_v33  ;;  %v166_v30 = vpop.f32.mrb[22].mxu0  ;;  %v222_v2 = vpop.f32.mrb[22].mxu1 }
 0x121   :  { %484 = vst [vmem:[%s1028_s4 + $0x48] sm:$0xff] %v459_v59  ;;  %vm235_vm5 = vcmp.gt.f32.partialorder %v164_v60, 0.0  ;;  %v260_v3 = vmul.f32 0.2, %v164_v60  ;;  %vm249_vm6 = vcmp.gt.f32.partialorder %v220_v61, 0.0  ;;  %v167_v34 = vadd.f32 %v906_v37, %v166_v30  ;;  %v565_v5 = vpop.f32.mrb[23].mxu0 }
 0x122   :  { %v274_v4 = vmul.f32 0.2, %v220_v61  ;;  %498 = vst [vmem:[%s1028_s4 + $0xb8] sm:$0xff] %v473_v1  ;;  %v593_v6 = vpop.f32.mrb[23].mxu1 }
 0x123   :  { %v285_v8 = vsel %vm235_vm5, %v164_v60, %v260_v3  ;;  %vm236_vm7 = vcmp.gt.f32.partialorder %v167_v34, 0.0  ;;  %v261_v11 = vmul.f32 0.2, %v167_v34 }
 0x124   :  { %v299_v9 = vsel %vm249_vm6, %v220_v61, %v274_v4  ;;  %v460_v10 = vmul.f32 %v899_v35, %v285_v8 }
 0x125   :  { %v474_v31 = vmul.f32 %v448_v7, %v299_v9  ;;  %v286_v12 = vsel %vm236_vm7, %v167_v34, %v261_v11 }
 0x126   :  { %485 = vst [vmem:[%s1028_s4 + $0x50] sm:$0xff] %v460_v10  ;;  %v171_v13 = vpop.f32.mrb[24].mxu0  ;;  %v461_v14 = vmul.f32 %v901_v36, %v286_v12 }
 0x127   :  { %499 = vst [vmem:[%s1028_s4 + $0xc0] sm:$0xff] %v474_v31  ;;  %v172_v15 = vadd.f32 %v906_v37, %v171_v13  ;;  %v568_v16 = vpop.f32.mrb[25].mxu0 }
 0x128   :  { %v174_v17 = vpop.f32.mrb[26].mxu0  ;;  %486 = vst [vmem:[%s1028_s4 + $0x58] sm:$0xff] %v461_v14 }
 0x129   :  { %vm237_vm8 = vcmp.gt.f32.partialorder %v172_v15, 0.0  ;;  %v262_v35 = vmul.f32 0.2, %v172_v15  ;;  %v175_v18 = vadd.f32 %v906_v37, %v174_v17  ;;  %v569_v19 = vpop.f32.mrb[27].mxu0 }
 0x12b   :  { %v287_v20 = vsel %vm237_vm8, %v172_v15, %v262_v35  ;;  %vm238_vm9 = vcmp.gt.f32.partialorder %v175_v18, 0.0  ;;  %v263_v21 = vmul.f32 0.2, %v175_v18 }
 0x12c   :  { %v462_v22 = vmul.f32 %v908_v38, %v287_v20 }
 0x12d   :  { %v288_v23 = vsel %vm238_vm9, %v175_v18, %v263_v21 }
 0x12e   :  { %487 = vst [vmem:[%s1028_s4 + $0x60] sm:$0xff] %v462_v22  ;;  %v463_v36 = vmul.f32 %v910_v39, %v288_v23 }
 0x130   :  { %488 = vst [vmem:[%s1028_s4 + $0x68] sm:$0xff] %v463_v36 }

// kernel: discriminator_forward.16
= control target key start
LH: loop header
LB: loop body
LE: loop exit
PB: predicated region body
PF: predicated region fallthrough
CT: control target
= control target key end

     0   :  { %s4392_s15 = smov 0   ;;  %s5461_s0 = inlined_call_operand.vmem [shape: f32[806,128], index: 0, kind: input, shape index: {}]   ;;  %s5462_s1 = inlined_call_operand.vmem [shape: f32[9,128,128], index: 1, kind: input, shape index: {}]   ;;  %s5463_s2 = inlined_call_operand.vmem [shape: f32[1,128], index: 2, kind: input, shape index: {}]   ;;  %s5464_s3 = inlined_call_operand.vmem [shape: f32[768,1], index: 3, kind: input, shape index: {}]   ;;  %s5465_s4 = inlined_call_operand.vmem [shape: f32[768,128], index: 4, kind: output, shape index: {}]  }
   0x1 LB: > { %s3022_s16 = sadd.s32 4294967295, %s4364_s15   ;;  %p3026_p0 = scmp.ge.s32.totalorder %s4364_s15, 1  ;;  %s4364_s15 = sphi %s4392_s15, %s14_s15  }
   0x2   : > { %p163_p1 = scmp.lt.s32.totalorder %s4364_s15, 4 }
   0x4   : > { %p164_p2 = pnand %p3026_p0, %p163_p1 }
   0x5   : > { %v3065_v0 = vld [vmem:[%s5462_s1 + $0x80] sm:$0xff] (!%p164_p2)  ;;  %v3066_v1 = vld [vmem:[%s5462_s1 + $0x88] sm:$0xff] (!%p164_p2)  ;;  %v3067_v5 = vld [vmem:[%s5462_s1 + $0x90] sm:$0xff] (!%p164_p2)  ;;  %s3031_s17 = sshll.u32 (!%p164_p2), %s3022_s16, 8 }
   0x6   : > { %167 = sbr.rel (%p164_p2) target bundleno = 546 (0x222), region = 36  ;;  %v3212_v2 = vld [vmem:[%s5462_s1 + $0x200] sm:$0xff] (!%p164_p2)  ;;  %v343_v3 = vpack.c.bf16 (!%p164_p2), %v3066_v1, %v3065_v0  ;;  %v3213_v4 = vld [vmem:[%s5462_s1 + $0x208] sm:$0xff] (!%p164_p2)  ;;  %v3068_v6 = vld [vmem:[%s5462_s1 + $0x98] sm:$0xff] (!%p164_p2)  ;;  %s4462_s28 = scalar_lea.vmem (!%p164_p2), %s5461_s0, %s3031_s17 }
   0x7   : > { %v4418_v7 = vpack.c.bf16 (!%p164_p2), %v3213_v4, %v3212_v2  ;;  %v344_v8 = vpack.c.bf16 (!%p164_p2), %v3068_v6, %v3067_v5  ;;  %v3214_v9 = vld [vmem:[%s5462_s1 + $0x210] sm:$0xff] (!%p164_p2)  ;;  %v3215_v10 = vld [vmem:[%s5462_s1 + $0x218] sm:$0xff] (!%p164_p2)  ;;  %v3069_v11 = vld [vmem:[%s5462_s1 + $0xa0] sm:$0xff] (!%p164_p2)  ;;  %s3027_s17 = sshll.u32 (!%p164_p2), %s3022_s16, 5 }
   0x8   : > { %3643 = vmatprep.subr.bf16.mxu1 (!%p164_p2), %v343_v3  ;;  %v4429_v12 = vpack.c.bf16 (!%p164_p2), %v3215_v10, %v3214_v9  ;;  %v3070_v13 = vld [vmem:[%s5462_s1 + $0xa8] sm:$0xff] (!%p164_p2)  ;;  %v3216_v14 = vld [vmem:[%s5462_s1 + $0x220] sm:$0xff] (!%p164_p2)  ;;  %v3071_v18 = vld [vmem:[%s5462_s1 + $0xb0] sm:$0xff] (!%p164_p2)  ;;  %p190_p3 = scmp.lt.s32.totalorder (!%p164_p2), %s3027_s17, 95 }
   0x9   : > { %v3217_v15 = vld [vmem:[%s5462_s1 + $0x228] sm:$0xff] (!%p164_p2)  ;;  %3835 = vmatprep.subr.bf16.mxu0 (!%p164_p2), %v4418_v7  ;;  %3644 = vmatpush3.bf16.msra.mxu1 (!%p164_p2), %v343_v3  ;;  %v345_v16 = vpack.c.bf16 (!%p164_p2), %v3070_v13, %v3069_v11  ;;  %v3072_v19 = vld [vmem:[%s5462_s1 + $0xb8] sm:$0xff] (!%p164_p2)  ;;  %v3218_v20 = vld [vmem:[%s5462_s1 + $0x230] sm:$0xff] (!%p164_p2) }
   0xa   : > { %3836 = vmatpush3.bf16.msra.mxu0 (!%p164_p2), %v4418_v7  ;;  %3645 = vmatprep.subr.bf16.mxu1 (!%p164_p2), %v344_v8  ;;  %v4445_v17 = vpack.c.bf16 (!%p164_p2), %v3217_v15, %v3216_v14  ;;  %v3219_v21 = vld [vmem:[%s5462_s1 + $0x238] sm:$0xff] (!%p164_p2)  ;;  %v346_v22 = vpack.c.bf16 (!%p164_p2), %v3072_v19, %v3071_v18  ;;  %v3073_v23 = vld [vmem:[%s5462_s1 + $0xc0] sm:$0xff] (!%p164_p2)  ;;  %v3074_v24 = vld [vmem:[%s5462_s1 + $0xc8] sm:$0xff] (!%p164_p2) }
   0xb   : > { %3837 = vmatprep.subr.bf16.mxu0 (!%p164_p2), %v4429_v12  ;;  %v4472_v25 = vpack.c.bf16 (!%p164_p2), %v3219_v21, %v3218_v20  ;;  %v3220_v26 = vld [vmem:[%s5462_s1 + $0x240] sm:$0xff] (!%p164_p2)  ;;  %v3221_v27 = vld [vmem:[%s5462_s1 + $0x248] sm:$0xff] (!%p164_p2)  ;;  %v3180_v30 = vld [vmem:[%s4462_s28 + $0x13] sm:$0xff] (!%p164_p2)  ;;  %v347_v34 = vpack.c.bf16 (!%p164_p2), %v3074_v24, %v3073_v23 }
   0xc   : > { %v3033_v28 = vld [vmem:[%s4462_s28 + $0x1] sm:$0xff] (!%p164_p2)  ;;  %v3034_v29 = vld [vmem:[%s4462_s28 + $0x9] sm:$0xff] (!%p164_p2)  ;;  %v4486_v35 = vpack.c.bf16 (!%p164_p2), %v3221_v27, %v3220_v26  ;;  %v3076_v37 = vld [vmem:[%s5462_s1 + $0xd8] sm:$0xff] (!%p164_p2) }
   0xd   : > { %3646 = vmatpush3.bf16.msra.mxu1 %v344_v8  ;;  %v3181_v31 = vld [vmem:[%s4462_s28 + $0x1b] sm:$0xff]  ;;  %v310_v32 = vpack.c.bf16 %v3034_v29, %v3033_v28  ;;  %v3075_v36 = vld [vmem:[%s5462_s1 + $0xd0] sm:$0xff]  ;;  %v3078_v43 = vld [vmem:[%s5462_s1 + $0xe8] sm:$0xff]  ;;  %s5467_s17 = smov (!%p190_p3, %s3027_s17), 95 }
   0xe   : > { %3838 = vmatpush3.bf16.msra.mxu0 %v4429_v12  ;;  %3647 = vmatprep.subr.bf16.mxu1 %v345_v16  ;;  %v1243_v33 = vpack.c.bf16 %v3181_v31, %v3180_v30  ;;  %v3222_v38 = vld [vmem:[%s5462_s1 + $0x250] sm:$0xff]  ;;  %v3223_v39 = vld [vmem:[%s5462_s1 + $0x258] sm:$0xff]  ;;  %v348_v40 = vpack.c.bf16 %v3076_v37, %v3075_v36  ;;  %v3077_v42 = vld [vmem:[%s5462_s1 + $0xe0] sm:$0xff]  ;;  %s3028_s25 = sshll.u32 %s5467_s17, 3 }
   0xf   : > { %3839 = vmatprep.subr.bf16.mxu0 %v4445_v17  ;;  %3659 = vmatprep.mubr.bf16.mxu1 %v310_v32  ;;  %v4502_v41 = vpack.c.bf16 %v3223_v39, %v3222_v38  ;;  %v3224_v44 = vld [vmem:[%s5462_s1 + $0x260] sm:$0xff]  ;;  %v3225_v45 = vld [vmem:[%s5462_s1 + $0x268] sm:$0xff]  ;;  %v349_v46 = vpack.c.bf16 %v3078_v43, %v3077_v42  ;;  %v3079_v48 = vld [vmem:[%s5462_s1 + $0xf0] sm:$0xff]  ;;  %s4990_s29 = scalar_lea.vmem %s5464_s3, %s3028_s25  ;;  %s5345_s19 = scalar_lea.vmem %s5465_s4, %s3028_s25 }
  0x10   : > { %3851 = vmatprep.mubr.bf16.mxu0 %v1243_v33  ;;  %v4518_v47 = vpack.c.bf16 %v3225_v45, %v3224_v44  ;;  %v3080_v49 = vld [vmem:[%s5462_s1 + $0xf8] sm:$0xff]  ;;  %v3226_v50 = vld [vmem:[%s5462_s1 + $0x270] sm:$0xff]  ;;  %v252_v54 = vld [vmem:[%s5462_s1] sm:$0xff] }
  0x11   : > { %3648 = vmatpush3.bf16.msra.mxu1 %v345_v16  ;;  %v3227_v51 = vld [vmem:[%s5462_s1 + $0x278] sm:$0xff]  ;;  %v350_v52 = vpack.c.bf16 %v3080_v49, %v3079_v48  ;;  %v253_v55 = vld [vmem:[%s5462_s1 + $0x8] sm:$0xff]  ;;  %v3261_v56 = vld [vmem:[%s5462_s1 + $0x280] sm:$0xff] }
  0x12   : > { %3840 = vmatpush3.bf16.msra.mxu0 %v4445_v17  ;;  %3649 = vmatprep.subr.bf16.mxu1 %v346_v22  ;;  %v4534_v53 = vpack.c.bf16 %v3227_v51, %v3226_v50  ;;  %v3262_v57 = vld [vmem:[%s5462_s1 + $0x288] sm:$0xff]  ;;  %v3035_v58 = vld [vmem:[%s4462_s28 + $0x11] sm:$0xff]  ;;  %v3036_v59 = vld [vmem:[%s4462_s28 + $0x19] sm:$0xff]  ;;  %v268_v60 = vpack.c.bf16 %v253_v55, %v252_v54 }
  0x13   : > { %3841 = vmatprep.subr.bf16.mxu0 %v4472_v25  ;;  %v3182_v61 = vld [vmem:[%s4462_s28 + $0x23] sm:$0xff]  ;;  %v3183_v62 = vld [vmem:[%s4462_s28 + $0x2b] sm:$0xff]  ;;  %v1544_v63 = vpack.c.bf16 %v3262_v57, %v3261_v56  ;;  %v311_v3 = vpack.c.bf16 %v3036_v59, %v3035_v58  ;;  %v3264_v4 = vld [vmem:[%s5462_s1 + $0x298] sm:$0xff] }
  0x14   : > { %v3263_v0 = vld [vmem:[%s5462_s1 + $0x290] sm:$0xff]  ;;  %v3037_v1 = vld [vmem:[%s4462_s28 + $0x21] sm:$0xff]  ;;  %v1244_v8 = vpack.c.bf16 %v3183_v62, %v3182_v61  ;;  %v255_v10 = vld [vmem:[%s5462_s1 + $0x18] sm:$0xff] }
  0x15   : > { %3650 = vmatpush3.bf16.msra.mxu1 %v346_v22  ;;  %v3038_v2 = vld [vmem:[%s4462_s28 + $0x29] sm:$0xff]  ;;  %v3184_v5 = vld [vmem:[%s4462_s28 + $0x33] sm:$0xff]  ;;  %v3185_v6 = vld [vmem:[%s4462_s28 + $0x3b] sm:$0xff]  ;;  %v1545_v13 = vpack.c.bf16 %v3264_v4, %v3263_v0 }
  0x16   : > { %3842 = vmatpush3.bf16.msra.mxu0 %v4472_v25  ;;  %3651 = vmatprep.subr.bf16.mxu1 %v347_v34  ;;  %v254_v9 = vld [vmem:[%s5462_s1 + $0x10] sm:$0xff]  ;;  %v312_v11 = vpack.c.bf16 %v3038_v2, %v3037_v1  ;;  %v1245_v14 = vpack.c.bf16 %v3185_v6, %v3184_v5  ;;  %v256_v15 = vld [vmem:[%s5462_s1 + $0x20] sm:$0xff]  ;;  %v257_v16 = vld [vmem:[%s5462_s1 + $0x28] sm:$0xff] }
  0x17   : > { %3843 = vmatprep.subr.bf16.mxu0 %v4486_v35  ;;  %v269_v18 = vpack.c.bf16 %v255_v10, %v254_v9  ;;  %v3265_v19 = vld [vmem:[%s5462_s1 + $0x2a0] sm:$0xff]  ;;  %v3266_v20 = vld [vmem:[%s5462_s1 + $0x2a8] sm:$0xff]  ;;  %v3039_v21 = vld [vmem:[%s4462_s28 + $0x31] sm:$0xff]  ;;  %v270_v28 = vpack.c.bf16 %v257_v16, %v256_v15 }
  0x18   : > { %v3040_v22 = vld [vmem:[%s4462_s28 + $0x39] sm:$0xff]  ;;  %v3186_v23 = vld [vmem:[%s4462_s28 + $0x43] sm:$0xff]  ;;  %v3187_v24 = vld [vmem:[%s4462_s28 + $0x4b] sm:$0xff]  ;;  %v1546_v29 = vpack.c.bf16 %v3266_v20, %v3265_v19 }
  0x19   : > { %3652 = vmatpush3.bf16.msra.mxu1 %v347_v34  ;;  %v3041_v26 = vld [vmem:[%s4462_s28 + $0x41] sm:$0xff]  ;;  %v3042_v27 = vld [vmem:[%s4462_s28 + $0x49] sm:$0xff]  ;;  %v3188_v30 = vld [vmem:[%s4462_s28 + $0x53] sm:$0xff]  ;;  %v313_v32 = vpack.c.bf16 %v3040_v22, %v3039_v21  ;;  %v1246_v36 = vpack.c.bf16 %v3187_v24, %v3186_v23 }
  0x1a   : > { %3844 = vmatpush3.bf16.msra.mxu0 %v4486_v35  ;;  %3653 = vmatprep.subr.bf16.mxu1 %v348_v40  ;;  %v3189_v31 = vld [vmem:[%s4462_s28 + $0x5b] sm:$0xff]  ;;  %v3267_v33 = vld [vmem:[%s5462_s1 + $0x2b0] sm:$0xff]  ;;  %v314_v37 = vpack.c.bf16 %v3042_v27, %v3041_v26  ;;  %v3190_v49 = vld [vmem:[%s4462_s28 + $0x63] sm:$0xff] }
  0x1b   : > { %3845 = vmatprep.subr.bf16.mxu0 %v4502_v41  ;;  %v3268_v34 = vld [vmem:[%s5462_s1 + $0x2b8] sm:$0xff]  ;;  %v258_v38 = vld [vmem:[%s5462_s1 + $0x30] sm:$0xff]  ;;  %v3269_v45 = vld [vmem:[%s5462_s1 + $0x2c0] sm:$0xff] }
  0x1c   : > { %v259_v39 = vld [vmem:[%s5462_s1 + $0x38] sm:$0xff]  ;;  %v1547_v42 = vpack.c.bf16 %v3268_v34, %v3267_v33  ;;  %v260_v50 = vld [vmem:[%s5462_s1 + $0x40] sm:$0xff]  ;;  %v261_v51 = vld [vmem:[%s5462_s1 + $0x48] sm:$0xff] }
  0x1d   : > { %3654 = vmatpush3.bf16.msra.mxu1 %v348_v40  ;;  %v1247_v40 = vpack.c.bf16 %v3189_v31, %v3188_v30  ;;  %v3043_v43 = vld [vmem:[%s4462_s28 + $0x51] sm:$0xff]  ;;  %v3044_v44 = vld [vmem:[%s4462_s28 + $0x59] sm:$0xff]  ;;  %v271_v48 = vpack.c.bf16 %v259_v39, %v258_v38  ;;  %v3045_v54 = vld [vmem:[%s4462_s28 + $0x61] sm:$0xff]  ;;  %v272_v62 = vpack.c.bf16 %v261_v51, %v260_v50 }
  0x1e   : > { %3846 = vmatpush3.bf16.msra.mxu0 %v4502_v41  ;;  %3655 = vmatprep.subr.bf16.mxu1 %v349_v46  ;;  %v3046_v55 = vld [vmem:[%s4462_s28 + $0x69] sm:$0xff]  ;;  %v3192_v57 = vld [vmem:[%s4462_s28 + $0x73] sm:$0xff]  ;;  %v3193_v58 = vld [vmem:[%s4462_s28 + $0x7b] sm:$0xff]  ;;  %v315_v59 = vpack.c.bf16 %v3044_v44, %v3043_v43 }
  0x1f   : > { %3847 = vmatprep.subr.bf16.mxu0 %v4518_v47  ;;  %v3272_v61 = vld [vmem:[%s5462_s1 + $0x2d8] sm:$0xff]  ;;  %v316_v0 = vpack.c.bf16 %v3046_v55, %v3045_v54  ;;  %v262_v1 = vld [vmem:[%s5462_s1 + $0x50] sm:$0xff]  ;;  %v3274_v9 = vld [vmem:[%s5462_s1 + $0x2e8] sm:$0xff] }
  0x20   : > { %v263_v2 = vld [vmem:[%s5462_s1 + $0x58] sm:$0xff]  ;;  %v3195_v15 = vld [vmem:[%s4462_s28 + $0x8b] sm:$0xff]  ;;  %v3049_v16 = vld [vmem:[%s4462_s28 + $0x81] sm:$0xff] }
  0x21   : > { %3656 = vmatpush3.bf16.msra.mxu1 %v349_v46  ;;  %v3270_v46 = vld [vmem:[%s5462_s1 + $0x2c8] sm:$0xff]  ;;  %v3047_v5 = vld [vmem:[%s4462_s28 + $0x71] sm:$0xff]  ;;  %v3048_v6 = vld [vmem:[%s4462_s28 + $0x79] sm:$0xff]  ;;  %v273_v10 = vpack.c.bf16 %v263_v2, %v262_v1 }
  0x22   : > { %3848 = vmatpush3.bf16.msra.mxu0 %v4518_v47  ;;  %3657 = vmatprep.subr.bf16.mxu1 %v350_v52  ;;  %v1548_v56 = vpack.c.bf16 %v3270_v46, %v3269_v45  ;;  %v3229_v20 = vld [vmem:[%s4462_s28 + $0x14] sm:$0xff]  ;;  %v3230_v21 = vld [vmem:[%s4462_s28 + $0x1c] sm:$0xff]  ;;  %v317_v22 = vpack.c.bf16 %v3048_v6, %v3047_v5  ;;  %v3231_v39 = vld [vmem:[%s4462_s28 + $0x24] sm:$0xff] }
  0x23   : > { %3849 = vmatprep.subr.bf16.mxu0 %v4534_v53  ;;  %v3275_v23 = vld [vmem:[%s5462_s1 + $0x2f0] sm:$0xff]  ;;  %v3276_v24 = vld [vmem:[%s5462_s1 + $0x2f8] sm:$0xff]  ;;  %v1511_v31 = vpack.c.bf16 %v3230_v21, %v3229_v20  ;;  %v3053_v44 = vld [vmem:[%s4462_s28 + $0xa1] sm:$0xff] }
  0x24   : > { %v267_v30 = vld [vmem:[%s5462_s1 + $0x78] sm:$0xff]  ;;  %v3232_v43 = vld [vmem:[%s4462_s28 + $0x2c] sm:$0xff]  ;;  %v3057_v1 = vld [vmem:[%s4462_s28 + $0xc1] sm:$0xff] }
  0x25   : > { %3658 = vmatpush3.bf16.msra.mxu1 %v350_v52  ;;  %v3191_v52 = vld [vmem:[%s4462_s28 + $0x6b] sm:$0xff]  ;;  %v3052_v34 = vld [vmem:[%s4462_s28 + $0x99] sm:$0xff]  ;;  %v4695_v55 = vpack.c.bf16 %v3232_v43, %v3231_v39 }
  0x26   : > { %3850 = vmatpush3.bf16.msra.mxu0 %v4534_v53  ;;  %3691 = vmatprep.subr.bf16.mxu1 %v268_v60  ;;  %v3051_v33 = vld [vmem:[%s4462_s28 + $0x91] sm:$0xff]  ;;  %v3054_v45 = vld [vmem:[%s4462_s28 + $0xa9] sm:$0xff]  ;;  %v3064_v39 = vld [vmem:[%s4462_s28 + $0xf9] sm:$0xff] }
  0x27   : > { %3883 = vmatprep.subr.bf16.mxu0 %v1544_v63  ;;  %v319_v50 = vpack.c.bf16 %v3052_v34, %v3051_v33  ;;  %v3312_v51 = vld [vmem:[%s5462_s1 + $0x310] sm:$0xff]  ;;  %v3239_v20 = vld [vmem:[%s4462_s28 + $0x64] sm:$0xff] }
  0x28   : > { %3660 = vmatmul.mubr.bf16.vlgmr.msra.gmra.mrb[0].mxu1 %v311_v3  ;;  %v1249_v3 = vpack.c.bf16 %v3193_v58, %v3192_v57  ;;  %v3058_v2 = vld [vmem:[%s4462_s28 + $0xc9] sm:$0xff]  ;;  %v204_v43 = vld [vmem:[%s4462_s28] sm:$0xff] }
  0x29   : > { %3852 = vmatmul.mubr.bf16.vlgmr.msra.gmra.mrb[0].mxu0 %v1244_v8  ;;  %3692 = vmatpush3.bf16.msra.mxu1 %v268_v60  ;;  %v3271_v60 = vld [vmem:[%s5462_s1 + $0x2d0] sm:$0xff]  ;;  %v3273_v8 = vld [vmem:[%s5462_s1 + $0x2e0] sm:$0xff] }
  0x2a   : > { %3884 = vmatpush3.bf16.msra.mxu0 %v1544_v63  ;;  %3663 = vmatprep.mubr.bf16.mxu1 %v312_v11  ;;  %v1248_v63 = vpack.c.bf16 %v3191_v52, %v3190_v49  ;;  %v1549_v4 = vpack.c.bf16 %v3272_v61, %v3271_v60  ;;  %v3194_v11 = vld [vmem:[%s4462_s28 + $0x83] sm:$0xff]  ;;  %v1550_v19 = vpack.c.bf16 %v3274_v9, %v3273_v8  ;;  %v3313_v52 = vld [vmem:[%s5462_s1 + $0x318] sm:$0xff]  ;;  %v3316_v8 = vld [vmem:[%s5462_s1 + $0x330] sm:$0xff] }
  0x2b   : > { %3885 = vmatprep.subr.bf16.mxu0 %v1545_v13  ;;  %3855 = vmatprep.mubr.bf16.mxu0 %v1245_v14  ;;  %v265_v14 = vld [vmem:[%s5462_s1 + $0x68] sm:$0xff]  ;;  %v1250_v27 = vpack.c.bf16 %v3195_v15, %v3194_v11  ;;  %v3234_v49 = vld [vmem:[%s4462_s28 + $0x3c] sm:$0xff]  ;;  %v1813_v58 = vpack.c.bf16 %v3313_v52, %v3312_v51  ;;  %v3055_v61 = vld [vmem:[%s4462_s28 + $0xb1] sm:$0xff]  ;;  %v322_v11 = vpack.c.bf16 %v3058_v2, %v3057_v1 }
  0x2c   : > { %3693 = vmatprep.subr.bf16.mxu1 %v269_v18  ;;  %v3315_v60 = vld [vmem:[%s5462_s1 + $0x328] sm:$0xff]  ;;  %v3317_v9 = vld [vmem:[%s5462_s1 + $0x338] sm:$0xff]  ;;  %v3318_v15 = vld [vmem:[%s5462_s1 + $0x340] sm:$0xff] }
  0x2d   : > { %3694 = vmatpush3.bf16.msra.mxu1 %v269_v18  ;;  %v3050_v18 = vld [vmem:[%s4462_s28 + $0x89] sm:$0xff]  ;;  %v3325_v51 = vld [vmem:[%s5462_s1 + $0x378] sm:$0xff]  ;;  %v208_v2 = vld [vmem:[%s4462_s28 + $0x20] sm:$0xff] }
  0x2e   : > { %3886 = vmatpush3.bf16.msra.mxu0 %v1545_v13  ;;  %3695 = vmatprep.subr.bf16.mxu1 %v270_v28  ;;  %v264_v13 = vld [vmem:[%s5462_s1 + $0x60] sm:$0xff]  ;;  %v3240_v21 = vld [vmem:[%s4462_s28 + $0x6c] sm:$0xff] }
  0x2f   : > { %3887 = vmatprep.subr.bf16.mxu0 %v1546_v29  ;;  %v274_v26 = vpack.c.bf16 %v265_v14, %v264_v13  ;;  %v1815_v14 = vpack.c.bf16 %v3317_v9, %v3316_v8  ;;  %v3248_v1 = vld [vmem:[%s4462_s28 + $0xac] sm:$0xff] }
  0x30   : > { %3664 = vmatmul.mubr.bf16.gmra.mrb[4].mxu1 %v313_v32  ;;  %v1551_v32 = vpack.c.bf16 %v3276_v24, %v3275_v23  ;;  %v3062_v23 = vld [vmem:[%s4462_s28 + $0xe9] sm:$0xff]  ;;  %v3241_v24 = vld [vmem:[%s4462_s28 + $0x74] sm:$0xff] }
  0x31   : > { %3856 = vmatmul.mubr.bf16.gmra.mrb[4].mxu0 %v1246_v36  ;;  %3667 = vmatprep.mubr.bf16.mxu1 %v314_v37  ;;  %v3310_v36 = vld [vmem:[%s5462_s1 + $0x300] sm:$0xff]  ;;  %v3311_v37 = vld [vmem:[%s5462_s1 + $0x308] sm:$0xff]  ;;  %v3116_v9 = vld [vmem:[%s5462_s1 + $0x110] sm:$0xff] }
  0x32   : > { %3888 = vmatpush3.bf16.msra.mxu0 %v1546_v29  ;;  %3859 = vmatprep.mubr.bf16.mxu0 %v1247_v40  ;;  %v266_v29 = vld [vmem:[%s5462_s1 + $0x70] sm:$0xff]  ;;  %v3114_v40 = vld [vmem:[%s5462_s1 + $0x100] sm:$0xff]  ;;  %v1812_v46 = vpack.c.bf16 %v3311_v37, %v3310_v36  ;;  %v3323_v37 = vld [vmem:[%s5462_s1 + $0x368] sm:$0xff] }
  0x33   : > { %3889 = vmatprep.subr.bf16.mxu0 %v1547_v42  ;;  %3696 = vmatpush3.bf16.msra.mxu1 %v270_v28  ;;  %v318_v28 = vpack.c.bf16 %v3050_v18, %v3049_v16  ;;  %v275_v38 = vpack.c.bf16 %v267_v30, %v266_v29  ;;  %v3319_v16 = vld [vmem:[%s5462_s1 + $0x348] sm:$0xff]  ;;  %v3059_v18 = vld [vmem:[%s4462_s28 + $0xd1] sm:$0xff]  ;;  %v3322_v36 = vld [vmem:[%s5462_s1 + $0x360] sm:$0xff] }
  0x34   : > { %3697 = vmatprep.subr.bf16.mxu1 %v271_v48  ;;  %v3320_v29 = vld [vmem:[%s5462_s1 + $0x350] sm:$0xff]  ;;  %v3321_v30 = vld [vmem:[%s5462_s1 + $0x358] sm:$0xff] }
  0x35   : > { %v1817_v34 = vpack.c.bf16 %v3321_v30, %v3320_v29  ;;  %v3253_v29 = vld [vmem:[%s4462_s28 + $0xd4] sm:$0xff]  ;;  %v3254_v30 = vld [vmem:[%s4462_s28 + $0xdc] sm:$0xff] }
  0x36   : > { %3890 = vmatpush3.bf16.msra.mxu0 %v1547_v42  ;;  %v3115_v42 = vld [vmem:[%s5462_s1 + $0x108] sm:$0xff] }
  0x37   : > { %3891 = vmatprep.subr.bf16.mxu0 %v1548_v56  ;;  %3698 = vmatpush3.bf16.msra.mxu1 %v271_v48  ;;  %v3233_v48 = vld [vmem:[%s4462_s28 + $0x34] sm:$0xff]  ;;  %v4693_v54 = vpack.c.bf16 %v3115_v42, %v3114_v40  ;;  %v3243_v40 = vld [vmem:[%s4462_s28 + $0x84] sm:$0xff]  ;;  %v3244_v42 = vld [vmem:[%s4462_s28 + $0x8c] sm:$0xff] }
  0x38   : > { %3668 = vmatmul.mubr.bf16.gmra.mrb[8].mxu1 %v315_v59  ;;  %3699 = vmatprep.subr.bf16.mxu1 %v272_v62  ;;  %v4697_v57 = vpack.c.bf16 %v3234_v49, %v3233_v48  ;;  %v3314_v59 = vld [vmem:[%s5462_s1 + $0x320] sm:$0xff]  ;;  %v1818_v48 = vpack.c.bf16 %v3323_v37, %v3322_v36  ;;  %v4774_v52 = vpack.c.bf16 %v3244_v42, %v3243_v40  ;;  %v3123_v42 = vld [vmem:[%s5462_s1 + $0x148] sm:$0xff] }
  0x39   : > { %3860 = vmatmul.mubr.bf16.gmra.mrb[8].mxu0 %v1248_v63  ;;  %3671 = vmatprep.mubr.bf16.mxu1 %v316_v0  ;;  %v3235_v63 = vld [vmem:[%s4462_s28 + $0x44] sm:$0xff]  ;;  %v3236_v0 = vld [vmem:[%s4462_s28 + $0x4c] sm:$0xff]  ;;  %v1814_v5 = vpack.c.bf16 %v3315_v60, %v3314_v59 }
  0x3a   : > { %3892 = vmatpush3.bf16.msra.mxu0 %v1548_v56  ;;  %3863 = vmatprep.mubr.bf16.mxu0 %v1249_v3  ;;  %v320_v56 = vpack.c.bf16 %v3054_v45, %v3053_v44  ;;  %v3237_v3 = vld [vmem:[%s4462_s28 + $0x54] sm:$0xff]  ;;  %v205_v44 = vld [vmem:[%s4462_s28 + $0x8] sm:$0xff]  ;;  %v3359_v60 = vld [vmem:[%s5462_s1 + $0x380] sm:$0xff] }
  0x3b   : > { %3893 = vmatprep.subr.bf16.mxu0 %v1549_v4  ;;  %3700 = vmatpush3.bf16.msra.mxu1 %v272_v62  ;;  %v3056_v62 = vld [vmem:[%s4462_s28 + $0xb9] sm:$0xff] }
  0x3c   : > { %3701 = vmatprep.subr.bf16.mxu1 %v273_v10  ;;  %v321_v6 = vpack.c.bf16 %v3056_v62, %v3055_v61  ;;  %v3245_v45 = vld [vmem:[%s4462_s28 + $0x94] sm:$0xff]  ;;  %v3360_v61 = vld [vmem:[%s5462_s1 + $0x388] sm:$0xff]  ;;  %v3122_v40 = vld [vmem:[%s5462_s1 + $0x140] sm:$0xff] }
  0x3d   : > { %v206_v62 = vld [vmem:[%s4462_s28 + $0x10] sm:$0xff] }
  0x3e   : > { %3894 = vmatpush3.bf16.msra.mxu0 %v1549_v4  ;;  %v3238_v4 = vld [vmem:[%s4462_s28 + $0x5c] sm:$0xff] }
  0x3f   : > { %3895 = vmatprep.subr.bf16.mxu0 %v1550_v19  ;;  %3702 = vmatpush3.bf16.msra.mxu1 %v273_v10  ;;  %v4722_v10 = vpack.c.bf16 %v3236_v0, %v3235_v63  ;;  %v4724_v13 = vpack.c.bf16 %v3238_v4, %v3237_v3  ;;  %v207_v63 = vld [vmem:[%s4462_s28 + $0x18] sm:$0xff]  ;;  %v3247_v0 = vld [vmem:[%s4462_s28 + $0xa4] sm:$0xff] }
  0x40   : > { %3672 = vmatmul.mubr.bf16.gmra.mrb[12].mxu1 %v317_v22  ;;  %3703 = vmatprep.subr.bf16.mxu1 %v274_v26  ;;  %v3061_v22 = vld [vmem:[%s4462_s28 + $0xe1] sm:$0xff]  ;;  %v3249_v4 = vld [vmem:[%s4462_s28 + $0xb4] sm:$0xff]  ;;  %v237_v8 = vpack.c.bf16 %v207_v63, %v206_v62 }
  0x41   : > { %3864 = vmatmul.mubr.bf16.gmra.mrb[12].mxu0 %v1250_v27  ;;  %3675 = vmatprep.mubr.bf16.mxu1 %v318_v28  ;;  %v1816_v27 = vpack.c.bf16 %v3319_v16, %v3318_v15  ;;  %v209_v3 = vld [vmem:[%s4462_s28 + $0x28] sm:$0xff] }
  0x42   : > { %3896 = vmatpush3.bf16.msra.mxu0 %v1550_v19  ;;  %3899 = vmatprep.mubr.bf16.mxu0 %v1511_v31  ;;  %v3060_v19 = vld [vmem:[%s4462_s28 + $0xd9] sm:$0xff]  ;;  %v4748_v31 = vpack.c.bf16 %v3240_v21, %v3239_v20  ;;  %v238_v15 = vpack.c.bf16 %v209_v3, %v208_v2  ;;  %v3119_v20 = vld [vmem:[%s5462_s1 + $0x128] sm:$0xff]  ;;  %v210_v21 = vld [vmem:[%s4462_s28 + $0x30] sm:$0xff] }
  0x43   : > { %3897 = vmatprep.subr.bf16.mxu0 %v1551_v32  ;;  %3704 = vmatpush3.bf16.msra.mxu1 %v274_v26  ;;  %v3242_v26 = vld [vmem:[%s4462_s28 + $0x7c] sm:$0xff]  ;;  %v323_v28 = vpack.c.bf16 %v3060_v19, %v3059_v18  ;;  %v3127_v3 = vld [vmem:[%s5462_s1 + $0x168] sm:$0xff] }
  0x44   : > { %3705 = vmatprep.subr.bf16.mxu1 %v275_v38  ;;  %v4750_v33 = vpack.c.bf16 %v3242_v26, %v3241_v24  ;;  %v3118_v19 = vld [vmem:[%s5462_s1 + $0x120] sm:$0xff]  ;;  %v3252_v24 = vld [vmem:[%s4462_s28 + $0xcc] sm:$0xff] }
  0x45   : > { %v212_v26 = vld [vmem:[%s4462_s28 + $0x40] sm:$0xff] }
  0x46   : > { %3898 = vmatpush3.bf16.msra.mxu0 %v1551_v32  ;;  %v324_v32 = vpack.c.bf16 %v3062_v23, %v3061_v22  ;;  %v211_v22 = vld [vmem:[%s4462_s28 + $0x38] sm:$0xff]  ;;  %v3251_v23 = vld [vmem:[%s4462_s28 + $0xc4] sm:$0xff] }
  0x47   : > { %3931 = vmatprep.subr.bf16.mxu0 %v1812_v46  ;;  %3706 = vmatpush3.bf16.msra.mxu1 %v275_v38  ;;  %v3063_v38 = vld [vmem:[%s4462_s28 + $0xf1] sm:$0xff]  ;;  %v4830_v36 = vpack.c.bf16 %v3252_v24, %v3251_v23  ;;  %v3126_v2 = vld [vmem:[%s5462_s1 + $0x160] sm:$0xff] }
  0x48   : > { %3676 = vmatmul.mubr.bf16.gmra.mrb[16].mxu1 %v319_v50  ;;  %3739 = vmatprep.subr.bf16.mxu1 %v4693_v54  ;;  %v325_v49 = vpack.c.bf16 %v3064_v39, %v3063_v38  ;;  %v3324_v50 = vld [vmem:[%s5462_s1 + $0x370] sm:$0xff]  ;;  %v4832_v38 = vpack.c.bf16 %v3254_v30, %v3253_v29  ;;  %v223_v29 = vld [vmem:[%s4462_s28 + $0x98] sm:$0xff]  ;;  %v224_v30 = vld [vmem:[%s4462_s28 + $0xa0] sm:$0xff] }
  0x49   : > { %3900 = vmatmul.mubr.bf16.vlgmr.msra.gmra.mrb[0].mxu0 %v4695_v55  ;;  %3679 = vmatprep.mubr.bf16.mxu1 %v320_v56  ;;  %v236_v56 = vpack.c.bf16 %v205_v44, %v204_v43  ;;  %v1819_v59 = vpack.c.bf16 %v3325_v51, %v3324_v50  ;;  %v214_v43 = vld [vmem:[%s4462_s28 + $0x50] sm:$0xff]  ;;  %v215_v44 = vld [vmem:[%s4462_s28 + $0x58] sm:$0xff] }
  0x4a   : > { %3932 = vmatpush3.bf16.msra.mxu0 %v1812_v46  ;;  %3903 = vmatprep.mubr.bf16.mxu0 %v4697_v57  ;;  %v3246_v46 = vld [vmem:[%s4462_s28 + $0x9c] sm:$0xff]  ;;  %v3257_v50 = vld [vmem:[%s4462_s28 + $0xf4] sm:$0xff] }
  0x4b   : > { %3933 = vmatprep.subr.bf16.mxu0 %v1813_v58  ;;  %v3258_v51 = vld [vmem:[%s4462_s28 + $0xfc] sm:$0xff] }
  0x4e   : > { %3934 = vmatpush3.bf16.msra.mxu0 %v1813_v58  ;;  %v4776_v58 = vpack.c.bf16 %v3246_v46, %v3245_v45  ;;  %v3255_v45 = vld [vmem:[%s4462_s28 + $0xe4] sm:$0xff]  ;;  %v3256_v46 = vld [vmem:[%s4462_s28 + $0xec] sm:$0xff] }
  0x4f   : > { %3935 = vmatprep.subr.bf16.mxu0 %v1814_v5  ;;  %v4856_v62 = vpack.c.bf16 %v3256_v46, %v3255_v45  ;;  %v227_v45 = vld [vmem:[%s4462_s28 + $0xb8] sm:$0xff]  ;;  %v228_v46 = vld [vmem:[%s4462_s28 + $0xc0] sm:$0xff] }
  0x50   : > { %3680 = vmatmul.mubr.bf16.gmra.mrb[20].mxu1 %v321_v6  ;;  %v4794_v6 = vpack.c.bf16 %v3360_v61, %v3359_v60  ;;  %v3124_v60 = vld [vmem:[%s5462_s1 + $0x150] sm:$0xff]  ;;  %v3125_v61 = vld [vmem:[%s5462_s1 + $0x158] sm:$0xff] }
  0x51   : > { %3904 = vmatmul.mubr.bf16.gmra.mrb[4].mxu0 %v4722_v10  ;;  %3683 = vmatprep.mubr.bf16.mxu1 %v322_v11  ;;  %v3117_v11 = vld [vmem:[%s5462_s1 + $0x118] sm:$0xff] }
  0x52   : > { %3907 = vmatprep.mubr.bf16.mxu0 %v4724_v13  ;;  %3936 = vmatpush3.bf16.msra.mxu0 %v1814_v5  ;;  %v3250_v5 = vld [vmem:[%s4462_s28 + $0xbc] sm:$0xff]  ;;  %v741_v18 = vpack.c.bf16 %v3117_v11, %v3116_v9  ;;  %v3260_v9 = vld [vmem:[%s4462_s28 + $0x10c] sm:$0xff] }
  0x53   : > { %3937 = vmatprep.subr.bf16.mxu0 %v1815_v14  ;;  %v4804_v16 = vpack.c.bf16 %v3250_v5, %v3249_v4  ;;  %v218_v4 = vld [vmem:[%s4462_s28 + $0x70] sm:$0xff]  ;;  %v219_v5 = vld [vmem:[%s4462_s28 + $0x78] sm:$0xff]  ;;  %v220_v11 = vld [vmem:[%s4462_s28 + $0x80] sm:$0xff] }
  0x56   : > { %3938 = vmatpush3.bf16.msra.mxu0 %v1815_v14  ;;  %v4802_v14 = vpack.c.bf16 %v3248_v1, %v3247_v0  ;;  %v4858_v0 = vpack.c.bf16 %v3258_v51, %v3257_v50  ;;  %v745_v1 = vpack.c.bf16 %v3125_v61, %v3124_v60  ;;  %v3365_v51 = vld [vmem:[%s5462_s1 + $0x3b0] sm:$0xff]  ;;  %v231_v61 = vld [vmem:[%s4462_s28 + $0xd8] sm:$0xff] }
  0x57   : > { %3939 = vmatprep.subr.bf16.mxu0 %v1816_v27  ;;  %v230_v60 = vld [vmem:[%s4462_s28 + $0xd0] sm:$0xff] }
  0x58   : > { %3684 = vmatmul.mubr.bf16.gmra.mrb[24].mxu1 %v323_v28  ;;  %v742_v28 = vpack.c.bf16 %v3119_v20, %v3118_v19  ;;  %v243_v19 = vpack.c.bf16 %v219_v5, %v218_v4  ;;  %v3128_v20 = vld [vmem:[%s5462_s1 + $0x170] sm:$0xff] }
  0x59   : > { %3908 = vmatmul.mubr.bf16.gmra.mrb[8].mxu0 %v4748_v31  ;;  %3687 = vmatprep.mubr.bf16.mxu1 %v324_v32  ;;  %v239_v32 = vpack.c.bf16 %v211_v22, %v210_v21  ;;  %v3129_v21 = vld [vmem:[%s5462_s1 + $0x178] sm:$0xff]  ;;  %v3369_v4 = vld [vmem:[%s5462_s1 + $0x3d0] sm:$0xff] }
  0x5a   : > { %3911 = vmatprep.mubr.bf16.mxu0 %v4750_v33  ;;  %3940 = vmatpush3.bf16.msra.mxu0 %v1816_v27  ;;  %v213_v27 = vld [vmem:[%s4462_s28 + $0x48] sm:$0xff]  ;;  %v747_v24 = vpack.c.bf16 %v3129_v21, %v3128_v20 }
  0x5b   : > { %3941 = vmatprep.subr.bf16.mxu0 %v1817_v34  ;;  %v240_v37 = vpack.c.bf16 %v213_v27, %v212_v26  ;;  %v3163_v26 = vld [vmem:[%s5462_s1 + $0x180] sm:$0xff]  ;;  %v3164_v27 = vld [vmem:[%s5462_s1 + $0x188] sm:$0xff] }
  0x5e   : > { %3942 = vmatpush3.bf16.msra.mxu0 %v1817_v34  ;;  %v3121_v34 = vld [vmem:[%s5462_s1 + $0x138] sm:$0xff] }
  0x5f   : > { %3943 = vmatprep.subr.bf16.mxu0 %v1818_v48 }
  0x60   : > { %3688 = vmatmul.mubr.bf16.gmra.mrb[28].mxu1 %v325_v49  ;;  %v217_v49 = vld [vmem:[%s4462_s28 + $0x68] sm:$0xff] }
  0x61   : > { %3912 = vmatmul.mubr.bf16.gmra.mrb[12].mxu0 %v4774_v52  ;;  %3707 = vmatprep.mubr.bf16.mxu1 %v236_v56  ;;  %v744_v56 = vpack.c.bf16 %v3123_v42, %v3122_v40  ;;  %v3363_v42 = vld [vmem:[%s5462_s1 + $0x3a0] sm:$0xff] }
  0x62   : > { %3915 = vmatprep.mubr.bf16.mxu0 %v4776_v58  ;;  %3944 = vmatpush3.bf16.msra.mxu0 %v1818_v48  ;;  %v216_v48 = vld [vmem:[%s4462_s28 + $0x60] sm:$0xff] }
  0x63   : > { %3945 = vmatprep.subr.bf16.mxu0 %v1819_v59  ;;  %v242_v63 = vpack.c.bf16 %v217_v49, %v216_v48  ;;  %v229_v48 = vld [vmem:[%s4462_s28 + $0xc8] sm:$0xff] }
  0x66   : > { %3946 = vmatpush3.bf16.msra.mxu0 %v1819_v59  ;;  %v241_v59 = vpack.c.bf16 %v215_v44, %v214_v43  ;;  %v3364_v43 = vld [vmem:[%s5462_s1 + $0x3a8] sm:$0xff]  ;;  %v226_v44 = vld [vmem:[%s4462_s28 + $0xb0] sm:$0xff] }
  0x67   : > { %3979 = vmatprep.subr.bf16.mxu0 %v4794_v6  ;;  %v2082_v49 = vpack.c.bf16 %v3364_v43, %v3363_v42  ;;  %v247_v50 = vpack.c.bf16 %v227_v45, %v226_v44  ;;  %v2684_v42 = vld [vmem:[%s4990_s29] sm:$0xff]  ;;  %v3168_v45 = vld [vmem:[%s5462_s1 + $0x1a8] sm:$0xff] }
  0x68   : > { %3708 = vmatmul.mubr.bf16.vlgmr.msra.gmra.mrb[0].mxu1 %v237_v8  ;;  %v3259_v8 = vld [vmem:[%s4462_s28 + $0x104] sm:$0xff] }
  0x69   : > { %3916 = vmatmul.mubr.bf16.gmra.mrb[16].mxu0 %v4802_v14  ;;  %3740 = vmatpush3.bf16.msra.mxu1 %v4693_v54  ;;  %v3120_v54 = vld [vmem:[%s5462_s1 + $0x130] sm:$0xff]  ;;  %v4880_v22 = vpack.c.bf16 %v3260_v9, %v3259_v8  ;;  %v3371_v8 = vld [vmem:[%s5462_s1 + $0x3e0] sm:$0xff]  ;;  %v3372_v9 = vld [vmem:[%s5462_s1 + $0x3e8] sm:$0xff] }
  0x6a   : > { %3711 = vmatprep.mubr.bf16.mxu1 %v238_v15  ;;  %3919 = vmatprep.mubr.bf16.mxu0 %v4804_v16  ;;  %v743_v39 = vpack.c.bf16 %v3121_v34, %v3120_v54  ;;  %v221_v15 = vld [vmem:[%s4462_s28 + $0x88] sm:$0xff]  ;;  %v4894_v54 = vpack.c.bf16 %v3164_v27, %v3163_v26  ;;  %v2086_v20 = vpack.c.bf16 %v3372_v9, %v3371_v8  ;;  %v3408_v26 = vld [vmem:[%s5462_s1 + $0x400] sm:$0xff]  ;;  %v3174_v9 = vld [vmem:[%s5462_s1 + $0x1d8] sm:$0xff] }
  0x6b   : > { %3741 = vmatprep.subr.bf16.mxu1 %v741_v18  ;;  %v244_v23 = vpack.c.bf16 %v221_v15, %v220_v11  ;;  %v234_v11 = vld [vmem:[%s4462_s28 + $0xf0] sm:$0xff]  ;;  %v235_v15 = vld [vmem:[%s4462_s28 + $0xf8] sm:$0xff]  ;;  %v3409_v27 = vld [vmem:[%s5462_s1 + $0x408] sm:$0xff] }
  0x6c   : > { %v251_v21 = vpack.c.bf16 %v235_v15, %v234_v11  ;;  %v3167_v44 = vld [vmem:[%s5462_s1 + $0x1a0] sm:$0xff] }
  0x6d   : > { %3742 = vmatpush3.bf16.msra.mxu1 %v741_v18  ;;  %v746_v18 = vpack.c.bf16 %v3127_v3, %v3126_v2  ;;  %v249_v3 = vpack.c.bf16 %v231_v61, %v230_v60  ;;  %v3092_v61 = vld [vmem:[%s4462_s28 + $0x52] sm:$0xff]  ;;  %v2692_v15 = vld [vmem:[%s4990_s29 + $0x40] sm:$0xff] }
  0x6e   : > { %3743 = vmatprep.subr.bf16.mxu1 %v742_v28 }
  0x70   : > { %3712 = vmatmul.mubr.bf16.gmra.mrb[4].mxu1 %v239_v32  ;;  %v225_v32 = vld [vmem:[%s4462_s28 + $0xa8] sm:$0xff] }
  0x71   : > { %3920 = vmatmul.mubr.bf16.gmra.mrb[20].mxu0 %v4830_v36  ;;  %3715 = vmatprep.mubr.bf16.mxu1 %v240_v37  ;;  %v3361_v37 = vld [vmem:[%s5462_s1 + $0x390] sm:$0xff] }
  0x72   : > { %3923 = vmatprep.mubr.bf16.mxu0 %v4832_v38  ;;  %3744 = vmatpush3.bf16.msra.mxu1 %v742_v28  ;;  %v222_v28 = vld [vmem:[%s4462_s28 + $0x90] sm:$0xff] }
  0x73   : > { %3745 = vmatprep.subr.bf16.mxu1 %v743_v39  ;;  %v245_v34 = vpack.c.bf16 %v223_v29, %v222_v28  ;;  %v3084_v28 = vld [vmem:[%s4462_s28 + $0x12] sm:$0xff]  ;;  %v3085_v29 = vld [vmem:[%s4462_s28 + $0x1a] sm:$0xff] }
  0x76   : > { %3746 = vmatpush3.bf16.msra.mxu1 %v743_v39  ;;  %v3362_v39 = vld [vmem:[%s5462_s1 + $0x398] sm:$0xff] }
  0x77   : > { %3747 = vmatprep.subr.bf16.mxu1 %v744_v56  ;;  %v2081_v40 = vpack.c.bf16 %v3362_v39, %v3361_v37  ;;  %v4366_v37 = vmov 0   ;;  %v4976_v39 = vpack.c.bf16 %v3085_v29, %v3084_v28  ;;  %v3099_v28 = vld [vmem:[%s4462_s28 + $0x8a] sm:$0xff] }
  0x78   : > { %3716 = vmatmul.mubr.bf16.gmra.mrb[8].mxu1 %v241_v59  ;;  %v3368_v59 = vld [vmem:[%s5462_s1 + $0x3c8] sm:$0xff]  ;;  %4357 = vset.pattern.permute.xlu1 %v4366_v37 }
  0x79   : > { %3924 = vmatmul.mubr.bf16.gmra.mrb[24].mxu0 %v4856_v62  ;;  %3719 = vmatprep.mubr.bf16.mxu1 %v242_v63  ;;  %v232_v63 = vld [vmem:[%s4462_s28 + $0xe0] sm:$0xff] }
  0x7a   : > { %3927 = vmatprep.mubr.bf16.mxu0 %v4858_v0  ;;  %3748 = vmatpush3.bf16.msra.mxu1 %v744_v56  ;;  %v3367_v56 = vld [vmem:[%s5462_s1 + $0x3c0] sm:$0xff] }
  0x7b   : > { %3749 = vmatprep.subr.bf16.mxu1 %v745_v1  ;;  %v2084_v2 = vpack.c.bf16 %v3368_v59, %v3367_v56  ;;  %4356 = vset.pattern.permute.xlu0 %v4366_v37  ;;  %v2688_v59 = vld [vmem:[%s4990_s29 + $0x20] sm:$0xff]  ;;  %v3177_v37 = vld [vmem:[%s5462_s1 + $0x1f0] sm:$0xff] }
  0x7c   : > { %2718 = vperm.xlu0 %4356, %v2684_v42   ;;  %v3327_v29 = vld [vmem:[%s4462_s28 + $0x25] sm:$0xff] }
  0x7d   : > { %v2696_v42 = vld [vmem:[%s4990_s29 + $0x60] sm:$0xff] }
  0x7e   : > { %3750 = vmatpush3.bf16.msra.mxu1 %v745_v1  ;;  %v233_v1 = vld [vmem:[%s4462_s28 + $0xe8] sm:$0xff] }
  0x7f   : > { %3751 = vmatprep.subr.bf16.mxu1 %v746_v18  ;;  %v250_v5 = vpack.c.bf16 %v233_v1, %v232_v63  ;;  %v3171_v63 = vld [vmem:[%s5462_s1 + $0x1c0] sm:$0xff]  ;;  %v3172_v1 = vld [vmem:[%s5462_s1 + $0x1c8] sm:$0xff] }
  0x80   : > { %3720 = vmatmul.mubr.bf16.gmra.mrb[12].mxu1 %v243_v19  ;;  %v3083_v19 = vld [vmem:[%s4462_s28 + $0xa] sm:$0xff] }
  0x81   : > { %3928 = vmatmul.mubr.bf16.gmra.mrb[28].mxu0 %v4880_v22  ;;  %3723 = vmatprep.mubr.bf16.mxu1 %v244_v23  ;;  %v3373_v23 = vld [vmem:[%s5462_s1 + $0x3f0] sm:$0xff] }
  0x82   : > { %3947 = vmatprep.mubr.bf16.mxu0 %v4695_v55  ;;  %3752 = vmatpush3.bf16.msra.mxu1 %v746_v18  ;;  %v246_v55 = vpack.c.bf16 %v225_v32, %v224_v30  ;;  %v3082_v18 = vld [vmem:[%s4462_s28 + $0x2] sm:$0xff]  ;;  %v3087_v32 = vld [vmem:[%s4462_s28 + $0x2a] sm:$0xff] }
  0x83   : > { %3753 = vmatprep.subr.bf16.mxu1 %v747_v24  ;;  %v3086_v30 = vld [vmem:[%s4462_s28 + $0x22] sm:$0xff] }
  0x86   : > { %3754 = vmatpush3.bf16.msra.mxu1 %v747_v24  ;;  %v707_v24 = vpack.c.bf16 %v3083_v19, %v3082_v18  ;;  %v3096_v18 = vld [vmem:[%s4462_s28 + $0x72] sm:$0xff] }
  0x87   : > { %3787 = vmatprep.subr.bf16.mxu1 %v4894_v54 }
  0x88   : > { %3724 = vmatmul.mubr.bf16.gmra.mrb[16].mxu1 %v245_v34  ;;  %v4974_v34 = vpack.c.bf16 %v3409_v27, %v3408_v26  ;;  %v3309_v26 = vld [vmem:[%s4462_s28 + $0x11c] sm:$0xff] }
  0x89   : > { %3948 = vmatmul.mubr.bf16.vlgmr.msra.gmra.mrb[0].mxu0 %v4697_v57  ;;  %3727 = vmatprep.mubr.bf16.mxu1 %v246_v55  ;;  %v3366_v57 = vld [vmem:[%s5462_s1 + $0x3b8] sm:$0xff]  ;;  %v4992_v55 = vpack.c.bf16 %v3087_v32, %v3086_v30  ;;  %v3098_v27 = vld [vmem:[%s4462_s28 + $0x82] sm:$0xff]  ;;  %v3328_v30 = vld [vmem:[%s4462_s28 + $0x2d] sm:$0xff] }
  0x8a   : > { %3980 = vmatpush3.bf16.msra.mxu0 %v4794_v6  ;;  %3951 = vmatprep.mubr.bf16.mxu0 %v4722_v10  ;;  %v248_v6 = vpack.c.bf16 %v229_v48, %v228_v46  ;;  %v2083_v10 = vpack.c.bf16 %v3366_v57, %v3365_v51  ;;  %v3088_v46 = vld [vmem:[%s4462_s28 + $0x32] sm:$0xff]  ;;  %v3089_v48 = vld [vmem:[%s4462_s28 + $0x3a] sm:$0xff]  ;;  %v3090_v51 = vld [vmem:[%s4462_s28 + $0x42] sm:$0xff] }
  0x8b   : > { %3981 = vmatprep.subr.bf16.mxu0 %v2081_v40  ;;  %v3091_v57 = vld [vmem:[%s4462_s28 + $0x4a] sm:$0xff] }
  0x8c   : > { %v5023_v56 = vpack.c.bf16 %v3091_v57, %v3090_v51  ;;  %v3330_v51 = vld [vmem:[%s4462_s28 + $0x3d] sm:$0xff] }
  0x8d   : > { %v3102_v57 = vld [vmem:[%s4462_s28 + $0xa2] sm:$0xff] }
  0x8e   : > { %3982 = vmatpush3.bf16.msra.mxu0 %v2081_v40  ;;  %v2686_v40 = vld [vmem:[%s4990_s29 + $0x10] sm:$0xff] }
  0x8f   : > { %3983 = vmatprep.subr.bf16.mxu0 %v2082_v49  ;;  %2728 = vperm.xlu1 %4357, %v2686_v40   ;;  %v5083_v40 = vpack.c.bf16 %v3099_v28, %v3098_v27 }
  0x90   : > { %3728 = vmatmul.mubr.bf16.gmra.mrb[20].mxu1 %v247_v50  ;;  %v2685_v50 = vld [vmem:[%s4990_s29 + $0x8] sm:$0xff] }
  0x91   : > { %3952 = vmatmul.mubr.bf16.gmra.mrb[4].mxu0 %v4724_v13  ;;  %3731 = vmatprep.mubr.bf16.mxu1 %v248_v6  ;;  %v3370_v13 = vld [vmem:[%s5462_s1 + $0x3d8] sm:$0xff]  ;;  %v1010_v6 = vpack.c.bf16 %v3168_v45, %v3167_v44 }
  0x92   : > { %3955 = vmatprep.mubr.bf16.mxu0 %v4748_v31  ;;  %3984 = vmatpush3.bf16.msra.mxu0 %v2082_v49  ;;  %v2085_v31 = vpack.c.bf16 %v3370_v13, %v3369_v4  ;;  %v2687_v49 = vld [vmem:[%s4990_s29 + $0x18] sm:$0xff]  ;;  %v2690_v4 = vld [vmem:[%s4990_s29 + $0x30] sm:$0xff]  ;;  %v3094_v13 = vld [vmem:[%s4462_s28 + $0x62] sm:$0xff] }
  0x93   : > { %3985 = vmatprep.subr.bf16.mxu0 %v2083_v10  ;;  %2733 = vperm.xlu1 %4357, %v2687_v49   ;;  %v3100_v45 = vld [vmem:[%s4462_s28 + $0x92] sm:$0xff] }
  0x94   : > { %2723 = vperm.xlu0 %4356, %v2685_v50   ;;  %v2699_v49 = vld [vmem:[%s4990_s29 + $0x78] sm:$0xff]  ;;  %v2698_v50 = vld [vmem:[%s4990_s29 + $0x70] sm:$0xff] }
  0x96   : > { %3986 = vmatpush3.bf16.msra.mxu0 %v2083_v10  ;;  %v5014_v10 = vpack.c.bf16 %v3089_v48, %v3088_v46  ;;  %v3101_v46 = vld [vmem:[%s4462_s28 + $0x9a] sm:$0xff] }
  0x97   : > { %3987 = vmatprep.subr.bf16.mxu0 %v2084_v2  ;;  %v3329_v48 = vld [vmem:[%s4462_s28 + $0x35] sm:$0xff] }
  0x98   : > { %3732 = vmatmul.mubr.bf16.gmra.mrb[24].mxu1 %v249_v3  ;;  %2738 = vperm.xlu0 %4356, %v2688_v59   ;;  %v2691_v3 = vld [vmem:[%s4990_s29 + $0x38] sm:$0xff]  ;;  %v3410_v59 = vld [vmem:[%s5462_s1 + $0x410] sm:$0xff] }
  0x99   : > { %3956 = vmatmul.mubr.bf16.gmra.mrb[8].mxu0 %v4750_v33  ;;  %3735 = vmatprep.mubr.bf16.mxu1 %v250_v5  ;;  %v3374_v33 = vld [vmem:[%s5462_s1 + $0x3f8] sm:$0xff]  ;;  %v3095_v5 = vld [vmem:[%s4462_s28 + $0x6a] sm:$0xff] }
  0x9a   : > { %3959 = vmatprep.mubr.bf16.mxu0 %v4774_v52  ;;  %3988 = vmatpush3.bf16.msra.mxu0 %v2084_v2  ;;  %v2087_v52 = vpack.c.bf16 %v3374_v33, %v3373_v23  ;;  %v3093_v2 = vld [vmem:[%s4462_s28 + $0x5a] sm:$0xff]  ;;  %v5051_v11 = vpack.c.bf16 %v3095_v5, %v3094_v13  ;;  %v3176_v23 = vld [vmem:[%s5462_s1 + $0x1e8] sm:$0xff] }
  0x9b   : > { %3989 = vmatprep.subr.bf16.mxu0 %v2085_v31  ;;  %v5042_v8 = vpack.c.bf16 %v3093_v2, %v3092_v61  ;;  %v3308_v33 = vld [vmem:[%s4462_s28 + $0x114] sm:$0xff]  ;;  %v2701_v61 = vld [vmem:[%s4990_s29 + $0x88] sm:$0xff]  ;;  %v2700_v2 = vld [vmem:[%s4990_s29 + $0x80] sm:$0xff] }
  0x9c   : > { %2748 = vperm.xlu0 %4356, %v2690_v4   ;;  %v3104_v4 = vld [vmem:[%s4462_s28 + $0xb2] sm:$0xff]  ;;  %v3412_v5 = vld [vmem:[%s5462_s1 + $0x420] sm:$0xff] }
  0x9e   : > { %3990 = vmatpush3.bf16.msra.mxu0 %v2085_v31  ;;  %v1012_v31 = vpack.c.bf16 %v3172_v1, %v3171_v63  ;;  %v2048_v63 = vpack.c.bf16 %v3330_v51, %v3329_v48  ;;  %v3111_v48 = vld [vmem:[%s4462_s28 + $0xea] sm:$0xff] }
  0x9f   : > { %3991 = vmatprep.subr.bf16.mxu0 %v2086_v20 }
  0xa0   : > { %3736 = vmatmul.mubr.bf16.gmra.mrb[28].mxu1 %v251_v21  ;;  %v3175_v21 = vld [vmem:[%s5462_s1 + $0x1e0] sm:$0xff]  ;;  %2758 = vperm.xlu0 %4356, %v2692_v15   ;;  %v2702_v15 = vld [vmem:[%s4990_s29 + $0x90] sm:$0xff] }
  0xa1   : > { %3960 = vmatmul.mubr.bf16.gmra.mrb[12].mxu0 %v4776_v58  ;;  %3755 = vmatprep.mubr.bf16.mxu1 %v707_v24  ;;  %v3165_v58 = vld [vmem:[%s5462_s1 + $0x190] sm:$0xff]  ;;  %v2695_v24 = vld [vmem:[%s4990_s29 + $0x58] sm:$0xff]  ;;  %v1014_v32 = vpack.c.bf16 %v3176_v23, %v3175_v21  ;;  %v3335_v21 = vld [vmem:[%s4462_s28 + $0x65] sm:$0xff] }
  0xa2   : > { %3963 = vmatprep.mubr.bf16.mxu0 %v4802_v14  ;;  %3992 = vmatpush3.bf16.msra.mxu0 %v2086_v20  ;;  %v3166_v14 = vld [vmem:[%s5462_s1 + $0x198] sm:$0xff]  ;;  %v3336_v23 = vld [vmem:[%s4462_s28 + $0x6d] sm:$0xff] }
  0xa3   : > { %3993 = vmatprep.subr.bf16.mxu0 %v2087_v52  ;;  %v1009_v43 = vpack.c.bf16 %v3166_v14, %v3165_v58  ;;  %v3097_v20 = vld [vmem:[%s4462_s28 + $0x7a] sm:$0xff]  ;;  %v2697_v58 = vld [vmem:[%s4990_s29 + $0x68] sm:$0xff]  ;;  %v1794_v14 = vpack.c.bf16 %v3309_v26, %v3308_v33 }
  0xa4   : > { %v2705_v26 = vld [vmem:[%s4990_s29 + $0xa8] sm:$0xff] }
  0xa6   : > { %3994 = vmatpush3.bf16.msra.mxu0 %v2087_v52  ;;  %v2694_v52 = vld [vmem:[%s4990_s29 + $0x50] sm:$0xff] }
  0xa7   : > { %4027 = vmatprep.subr.bf16.mxu0 %v4974_v34  ;;  %2768 = vperm.xlu0 %4356, %v2694_v52   ;;  %v3414_v52 = vld [vmem:[%s5462_s1 + $0x430] sm:$0xff] }
  0xa8   : > { %3756 = vmatmul.mubr.bf16.vlgmr.msra.gmra.mrb[0].mxu1 %v4976_v39 }
  0xa9   : > { %3964 = vmatmul.mubr.bf16.gmra.mrb[16].mxu0 %v4804_v16  ;;  %3788 = vmatpush3.bf16.msra.mxu1 %v4894_v54  ;;  %v3169_v16 = vld [vmem:[%s5462_s1 + $0x1b0] sm:$0xff]  ;;  %v3170_v54 = vld [vmem:[%s5462_s1 + $0x1b8] sm:$0xff] }
  0xaa   : > { %3759 = vmatprep.mubr.bf16.mxu1 %v4992_v55  ;;  %3967 = vmatprep.mubr.bf16.mxu0 %v4830_v36  ;;  %v2689_v36 = vld [vmem:[%s4990_s29 + $0x28] sm:$0xff]  ;;  %v1011_v60 = vpack.c.bf16 %v3170_v54, %v3169_v16 }
  0xab   : > { %3789 = vmatprep.subr.bf16.mxu1 %v1009_v43  ;;  %2743 = vperm.xlu1 %4357, %v2689_v36   ;;  %v3331_v16 = vld [vmem:[%s4462_s28 + $0x45] sm:$0xff]  ;;  %v3332_v54 = vld [vmem:[%s4462_s28 + $0x4d] sm:$0xff]  ;;  %v5098_v36 = vpack.c.bf16 %v3101_v46, %v3100_v45  ;;  %v3338_v45 = vld [vmem:[%s4462_s28 + $0x7d] sm:$0xff] }
  0xac   : > { %2778 = vperm.xlu0 %4356, %v2696_v42   ;;  %v3109_v42 = vld [vmem:[%s4462_s28 + $0xda] sm:$0xff]  ;;  %v3110_v46 = vld [vmem:[%s4462_s28 + $0xe2] sm:$0xff] }
  0xad   : > { %3790 = vmatpush3.bf16.msra.mxu1 %v1009_v43  ;;  %v2047_v43 = vpack.c.bf16 %v3328_v30, %v3327_v29  ;;  %v2704_v29 = vld [vmem:[%s4990_s29 + $0xa0] sm:$0xff]  ;;  %v2051_v30 = vpack.c.bf16 %v3336_v23, %v3335_v21  ;;  %v3422_v21 = vld [vmem:[%s5462_s1 + $0x470] sm:$0xff]  ;;  %v3423_v23 = vld [vmem:[%s5462_s1 + $0x478] sm:$0xff] }
  0xae   : > { %3791 = vmatprep.subr.bf16.mxu1 %v1010_v6 }
  0xaf   : > { %2753 = vperm.xlu1 %4357, %v2691_v3   ;;  %v2049_v3 = vpack.c.bf16 %v3332_v54, %v3331_v16  ;;  %v3419_v16 = vld [vmem:[%s5462_s1 + $0x458] sm:$0xff]  ;;  %v2709_v54 = vld [vmem:[%s4990_s29 + $0xc8] sm:$0xff] }
  0xb0   : > { %3760 = vmatmul.mubr.bf16.gmra.mrb[4].mxu1 %v5014_v10  ;;  %2788 = vperm.xlu0 %4356, %v2698_v50   ;;  %v3340_v50 = vld [vmem:[%s4462_s28 + $0x8d] sm:$0xff] }
  0xb1   : > { %3968 = vmatmul.mubr.bf16.gmra.mrb[20].mxu0 %v4832_v38  ;;  %3763 = vmatprep.mubr.bf16.mxu1 %v5023_v56  ;;  %v3173_v38 = vld [vmem:[%s5462_s1 + $0x1d0] sm:$0xff] }
  0xb2   : > { %3971 = vmatprep.mubr.bf16.mxu0 %v4856_v62  ;;  %3792 = vmatpush3.bf16.msra.mxu1 %v1010_v6  ;;  %v2693_v62 = vld [vmem:[%s4990_s29 + $0x48] sm:$0xff]  ;;  %v1013_v19 = vpack.c.bf16 %v3174_v9, %v3173_v38  ;;  %v2703_v38 = vld [vmem:[%s4990_s29 + $0x98] sm:$0xff] }
  0xb3   : > { %3793 = vmatprep.subr.bf16.mxu1 %v1011_v60  ;;  %2763 = vperm.xlu1 %4357, %v2693_v62   ;;  %v3103_v6 = vld [vmem:[%s4462_s28 + $0xaa] sm:$0xff]  ;;  %v3105_v9 = vld [vmem:[%s4462_s28 + $0xba] sm:$0xff] }
  0xb4   : > { %v5107_v1 = vpack.c.bf16 %v3103_v6, %v3102_v57  ;;  %2798 = vperm.xlu0 %4356, %v2700_v2   ;;  %v3333_v62 = vld [vmem:[%s4462_s28 + $0x55] sm:$0xff] }
  0xb5   : > { %v3418_v6 = vld [vmem:[%s5462_s1 + $0x450] sm:$0xff] }
  0xb6   : > { %3794 = vmatpush3.bf16.msra.mxu1 %v1011_v60  ;;  %v3411_v60 = vld [vmem:[%s5462_s1 + $0x418] sm:$0xff]  ;;  %v2353_v2 = vpack.c.bf16 %v3419_v16, %v3418_v6  ;;  %v3381_v16 = vld [vmem:[%s4462_s28 + $0x4e] sm:$0xff] }
  0xb7   : > { %3795 = vmatprep.subr.bf16.mxu1 %v1012_v31  ;;  %2773 = vperm.xlu1 %4357, %v2695_v24   ;;  %v2349_v13 = vpack.c.bf16 %v3411_v60, %v3410_v59  ;;  %v5130_v24 = vpack.c.bf16 %v3105_v9, %v3104_v4  ;;  %v5169_v60 = vpack.c.bf16 %v3111_v48, %v3110_v46  ;;  %v3421_v4 = vld [vmem:[%s5462_s1 + $0x468] sm:$0xff]  ;;  %v3341_v9 = vld [vmem:[%s4462_s28 + $0x95] sm:$0xff] }
  0xb8   : > { %3764 = vmatmul.mubr.bf16.gmra.mrb[8].mxu1 %v5042_v8  ;;  %2808 = vperm.xlu0 %4356, %v2702_v15   ;;  %v3343_v15 = vld [vmem:[%s4462_s28 + $0xa5] sm:$0xff] }
  0xb9   : > { %3972 = vmatmul.mubr.bf16.gmra.mrb[24].mxu0 %v4858_v0  ;;  %3767 = vmatprep.mubr.bf16.mxu1 %v5051_v11  ;;  %v5074_v0 = vpack.c.bf16 %v3097_v20, %v3096_v18  ;;  %v3334_v18 = vld [vmem:[%s4462_s28 + $0x5d] sm:$0xff]  ;;  %v3107_v20 = vld [vmem:[%s4462_s28 + $0xca] sm:$0xff] }
  0xba   : > { %3975 = vmatprep.mubr.bf16.mxu0 %v4880_v22  ;;  %3796 = vmatpush3.bf16.msra.mxu1 %v1012_v31  ;;  %v3178_v22 = vld [vmem:[%s5462_s1 + $0x1f8] sm:$0xff]  ;;  %v3413_v31 = vld [vmem:[%s5462_s1 + $0x428] sm:$0xff]  ;;  %v2050_v27 = vpack.c.bf16 %v3334_v18, %v3333_v62 }
  0xbb   : > { %3797 = vmatprep.subr.bf16.mxu1 %v1013_v19  ;;  %v1015_v44 = vpack.c.bf16 %v3178_v22, %v3177_v37  ;;  %2783 = vperm.xlu1 %4357, %v2697_v58   ;;  %v2350_v33 = vpack.c.bf16 %v3413_v31, %v3412_v5  ;;  %v3416_v22 = vld [vmem:[%s5462_s1 + $0x440] sm:$0xff]  ;;  %v3417_v58 = vld [vmem:[%s5462_s1 + $0x448] sm:$0xff]  ;;  %v3112_v5 = vld [vmem:[%s4462_s28 + $0xf2] sm:$0xff] }
  0xbc   : > { %2818 = vperm.xlu0 %4356, %v2704_v29   ;;  %v2352_v51 = vpack.c.bf16 %v3417_v58, %v3416_v22  ;;  %v3113_v31 = vld [vmem:[%s4462_s28 + $0xfa] sm:$0xff]  ;;  %v3344_v18 = vld [vmem:[%s4462_s28 + $0xad] sm:$0xff]  ;;  %v3347_v22 = vld [vmem:[%s4462_s28 + $0xc5] sm:$0xff] }
  0xbd   : > { %v3342_v62 = vld [vmem:[%s4462_s28 + $0x9d] sm:$0xff]  ;;  %v3348_v58 = vld [vmem:[%s4462_s28 + $0xcd] sm:$0xff]  ;;  %v3355_v48 = vld [vmem:[%s4462_s28 + $0x105] sm:$0xff] }
  0xbe   : > { %3798 = vmatpush3.bf16.msra.mxu1 %v1013_v19  ;;  %v3106_v19 = vld [vmem:[%s4462_s28 + $0xc2] sm:$0xff]  ;;  %v2715_v29 = vld [vmem:[%s4990_s29 + $0xf8] sm:$0xff] }
  0xbf   : > { %3799 = vmatprep.subr.bf16.mxu1 %v1014_v32  ;;  %2793 = vperm.xlu1 %4357, %v2699_v49   ;;  %v5139_v28 = vpack.c.bf16 %v3107_v20, %v3106_v19  ;;  %v3339_v49 = vld [vmem:[%s4462_s28 + $0x85] sm:$0xff]  ;;  %v5188_v20 = vpack.c.bf16 %v3113_v31, %v3112_v5  ;;  %v3196_v31 = vld [vmem:[%s4462_s28 + $0x93] sm:$0xff] }
  0xc0   : > { %3768 = vmatmul.mubr.bf16.gmra.mrb[12].mxu1 %v5074_v0  ;;  %v3391_v5 = vld [vmem:[%s4462_s28 + $0x9e] sm:$0xff] }
  0xc1   : > { %3976 = vmatmul.mubr.bf16.gmra.mrb[28].mxu0 %v1794_v14  ;;  %3771 = vmatprep.mubr.bf16.mxu1 %v5083_v40  ;;  %v2707_v14 = vld [vmem:[%s4990_s29 + $0xb8] sm:$0xff] }
  0xc2   : > { %3995 = vmatprep.mubr.bf16.mxu0 %v2047_v43  ;;  %3800 = vmatpush3.bf16.msra.mxu1 %v1014_v32  ;;  %v3108_v32 = vld [vmem:[%s4462_s28 + $0xd2] sm:$0xff] }
  0xc3   : > { %3801 = vmatprep.subr.bf16.mxu1 %v1015_v44  ;;  %2803 = vperm.xlu1 %4357, %v2701_v61   ;;  %v3337_v43 = vld [vmem:[%s4462_s28 + $0x75] sm:$0xff]  ;;  %v5160_v57 = vpack.c.bf16 %v3109_v42, %v3108_v32  ;;  %v2708_v61 = vld [vmem:[%s4990_s29 + $0xc0] sm:$0xff]  ;;  %v2057_v42 = vpack.c.bf16 %v3348_v58, %v3347_v22  ;;  %v3203_v58 = vld [vmem:[%s4462_s28 + $0xcb] sm:$0xff] }
  0xc4   : > { %v2052_v59 = vpack.c.bf16 %v3338_v45, %v3337_v43  ;;  %v3345_v32 = vld [vmem:[%s4462_s28 + $0xb5] sm:$0xff]  ;;  %v3350_v43 = vld [vmem:[%s4462_s28 + $0xdd] sm:$0xff]  ;;  %v3352_v45 = vld [vmem:[%s4462_s28 + $0xed] sm:$0xff] }
  0xc5   : > { %v3202_v22 = vld [vmem:[%s4462_s28 + $0xc3] sm:$0xff] }
  0xc6   : > { %3802 = vmatpush3.bf16.msra.mxu1 %v1015_v44  ;;  %v2706_v44 = vld [vmem:[%s4990_s29 + $0xb0] sm:$0xff] }
  0xc7   : > { %4075 = vmatprep.subr.bf16.mxu1 %v4418_v7  ;;  %2813 = vperm.xlu1 %4357, %v2703_v38   ;;  %v2710_v38 = vld [vmem:[%s4990_s29 + $0xd0] sm:$0xff] }
  0xc8   : > { %3772 = vmatmul.mubr.bf16.gmra.mrb[16].mxu1 %v5098_v36  ;;  %2828 = vperm.xlu0 %4356, %v2706_v44   ;;  %v3351_v44 = vld [vmem:[%s4462_s28 + $0xe5] sm:$0xff] }
  0xc9   : > { %3996 = vmatmul.mubr.bf16.vlgmr.msra.gmra.mrb[0].mxu0 %v2048_v63  ;;  %3775 = vmatprep.mubr.bf16.mxu1 %v5107_v1  ;;  %v2053_v63 = vpack.c.bf16 %v3340_v50, %v3339_v49  ;;  %v3356_v49 = vld [vmem:[%s4462_s28 + $0x10d] sm:$0xff] }
  0xca   : > { %4028 = vmatpush3.bf16.msra.mxu0 %v4974_v34  ;;  %3999 = vmatprep.mubr.bf16.mxu0 %v2049_v3  ;;  %v3415_v34 = vld [vmem:[%s5462_s1 + $0x438] sm:$0xff]  ;;  %v3420_v3 = vld [vmem:[%s5462_s1 + $0x460] sm:$0xff]  ;;  %v2061_v50 = vpack.c.bf16 %v3356_v49, %v3355_v48  ;;  %v3207_v49 = vld [vmem:[%s4462_s28 + $0xeb] sm:$0xff] }
  0xcb   : > { %4029 = vmatprep.subr.bf16.mxu0 %v2349_v13  ;;  %v2351_v37 = vpack.c.bf16 %v3415_v34, %v3414_v52  ;;  %2823 = vperm.xlu1 %4357, %v2705_v26   ;;  %v2354_v19 = vpack.c.bf16 %v3421_v4, %v3420_v3  ;;  %v2054_v52 = vpack.c.bf16 %v3342_v62, %v3341_v9  ;;  %v2712_v34 = vld [vmem:[%s4990_s29 + $0xe0] sm:$0xff]  ;;  %v3393_v62 = vld [vmem:[%s4462_s28 + $0xae] sm:$0xff] }
  0xcc   : > { %2838 = vperm.xlu0 %4356, %v2708_v61   ;;  %v2055_v26 = vpack.c.bf16 %v3344_v18, %v3343_v15  ;;  %v3392_v9 = vld [vmem:[%s4462_s28 + $0xa6] sm:$0xff] }
  0xcd   : > { %v3206_v48 = vld [vmem:[%s4462_s28 + $0xe3] sm:$0xff] }
  0xce   : > { %4030 = vmatpush3.bf16.msra.mxu0 %v2349_v13  ;;  %v2711_v13 = vld [vmem:[%s4990_s29 + $0xd8] sm:$0xff] }
  0xcf   : > { %4031 = vmatprep.subr.bf16.mxu0 %v2350_v33  ;;  %2833 = vperm.xlu1 %4357, %v2707_v14  }
  0xd0   : > { %3776 = vmatmul.mubr.bf16.gmra.mrb[20].mxu1 %v5130_v24  ;;  %2848 = vperm.xlu0 %4356, %v2710_v38   ;;  %v3197_v38 = vld [vmem:[%s4462_s28 + $0x9b] sm:$0xff] }
  0xd1   : > { %4000 = vmatmul.mubr.bf16.gmra.mrb[4].mxu0 %v2050_v27  ;;  %3779 = vmatprep.mubr.bf16.mxu1 %v5139_v28  ;;  %v2355_v27 = vpack.c.bf16 %v3423_v23, %v3422_v21  ;;  %v1251_v18 = vpack.c.bf16 %v3197_v38, %v3196_v31  ;;  %v3199_v21 = vld [vmem:[%s4462_s28 + $0xab] sm:$0xff]  ;;  %v3394_v23 = vld [vmem:[%s4462_s28 + $0xb6] sm:$0xff] }
  0xd2   : > { %4003 = vmatprep.mubr.bf16.mxu0 %v2051_v30  ;;  %4032 = vmatpush3.bf16.msra.mxu0 %v2350_v33  ;;  %v2713_v33 = vld [vmem:[%s4990_s29 + $0xe8] sm:$0xff]  ;;  %v2714_v30 = vld [vmem:[%s4990_s29 + $0xf0] sm:$0xff] }
  0xd3   : > { %4033 = vmatprep.subr.bf16.mxu0 %v2351_v37  ;;  %2843 = vperm.xlu1 %4357, %v2709_v54  }
  0xd4   : > { %2858 = vperm.xlu0 %4356, %v2712_v34   ;;  %v3201_v34 = vld [vmem:[%s4462_s28 + $0xbb] sm:$0xff] }
  0xd6   : > { %4034 = vmatpush3.bf16.msra.mxu0 %v2351_v37  ;;  %v3346_v37 = vld [vmem:[%s4462_s28 + $0xbd] sm:$0xff] }
  0xd7   : > { %4035 = vmatprep.subr.bf16.mxu0 %v2352_v51  ;;  %2853 = vperm.xlu1 %4357, %v2711_v13   ;;  %v2056_v14 = vpack.c.bf16 %v3346_v37, %v3345_v32  ;;  %v3162_v13 = vld [vmem:[%s4462_s28 + $0x10a] sm:$0xff] }
  0xd8   : > { %3780 = vmatmul.mubr.bf16.gmra.mrb[24].mxu1 %v5160_v57  ;;  %2868 = vperm.xlu0 %4356, %v2714_v30  }
  0xd9   : > { %4004 = vmatmul.mubr.bf16.gmra.mrb[8].mxu0 %v2052_v59  ;;  %3783 = vmatprep.mubr.bf16.mxu1 %v5169_v60  ;;  %v3385_v59 = vld [vmem:[%s4462_s28 + $0x6e] sm:$0xff] }
  0xda   : > { %4007 = vmatprep.mubr.bf16.mxu0 %v2053_v63  ;;  %4036 = vmatpush3.bf16.msra.mxu0 %v2352_v51  ;;  %v3377_v51 = vld [vmem:[%s4462_s28 + $0x2e] sm:$0xff] }
  0xdb   : > { %4037 = vmatprep.subr.bf16.mxu0 %v2353_v2  ;;  %2863 = vperm.xlu1 %4357, %v2713_v33   ;;  %v3395_v33 = vld [vmem:[%s4462_s28 + $0xbe] sm:$0xff] }
  0xdc   : > { %v2324_v30 = vpack.c.bf16 %v3395_v33, %v3394_v23 }
  0xde   : > { %4038 = vmatpush3.bf16.msra.mxu0 %v2353_v2  ;;  %v3389_v2 = vld [vmem:[%s4462_s28 + $0x8e] sm:$0xff] }
  0xdf   : > { %4039 = vmatprep.subr.bf16.mxu0 %v2354_v19  ;;  %2873 = vperm.xlu1 %4357, %v2715_v29  }
  0xe0   : > { %3784 = vmatmul.mubr.bf16.gmra.mrb[28].mxu1 %v5188_v20 }
  0xe1   : > { %4008 = vmatmul.mubr.bf16.gmra.mrb[12].mxu0 %v2054_v52  ;;  %3803 = vmatprep.mubr.bf16.mxu1 %v4976_v39  ;;  %v3349_v39 = vld [vmem:[%s4462_s28 + $0xd5] sm:$0xff] }
  0xe2   : > { %4011 = vmatprep.mubr.bf16.mxu0 %v2055_v26  ;;  %4040 = vmatpush3.bf16.msra.mxu0 %v2354_v19  ;;  %v2058_v46 = vpack.c.bf16 %v3350_v43, %v3349_v39  ;;  %v2323_v19 = vpack.c.bf16 %v3393_v62, %v3392_v9  ;;  %v3200_v52 = vld [vmem:[%s4462_s28 + $0xb3] sm:$0xff]  ;;  %v3396_v26 = vld [vmem:[%s4462_s28 + $0xc6] sm:$0xff]  ;;  %v3205_v43 = vld [vmem:[%s4462_s28 + $0xdb] sm:$0xff] }
  0xe3   : > { %4041 = vmatprep.subr.bf16.mxu0 %v2355_v27  ;;  %v1253_v32 = vpack.c.bf16 %v3201_v34, %v3200_v52  ;;  %v3204_v39 = vld [vmem:[%s4462_s28 + $0xd3] sm:$0xff] }
  0xe6   : > { %4042 = vmatpush3.bf16.msra.mxu0 %v2355_v27  ;;  %v3397_v27 = vld [vmem:[%s4462_s28 + $0xce] sm:$0xff] }
  0xe7   : > { %v2325_v37 = vpack.c.bf16 %v3397_v27, %v3396_v26  ;;  %v5330_v27 = vld [vmem:[%s5463_s2] ss:$0 sm:$0xff] }
  0xe8   : > { %3804 = vmatmul.mubr.bf16.vlgmr.msra.gmra.mrb[0].mxu1 %v4992_v55  ;;  %v2059_v55 = vpack.c.bf16 %v3352_v45, %v3351_v44  ;;  %v3400_v44 = vld [vmem:[%s4462_s28 + $0xe6] sm:$0xff]  ;;  %v3401_v45 = vld [vmem:[%s4462_s28 + $0xee] sm:$0xff] }
  0xe9   : > { %4012 = vmatmul.mubr.bf16.gmra.mrb[16].mxu0 %v2056_v14  ;;  %4083 = vmatpush3.bf16.msra.mxu1 %v4418_v7  ;;  %v3353_v7 = vld [vmem:[%s4462_s28 + $0xf5] sm:$0xff] }
  0xea   : > { %3807 = vmatprep.mubr.bf16.mxu1 %v5014_v10  ;;  %4015 = vmatprep.mubr.bf16.mxu0 %v2057_v42  ;;  %v3354_v10 = vld [vmem:[%s4462_s28 + $0xfd] sm:$0xff] }
  0xeb   : > { %4076 = vmatprep.subr.bf16.mxu1 %v4429_v12  ;;  %v3398_v14 = vld [vmem:[%s4462_s28 + $0xd6] sm:$0xff]  ;;  %v3399_v42 = vld [vmem:[%s4462_s28 + $0xde] sm:$0xff] }
  0xed   : > { %4084 = vmatpush3.bf16.msra.mxu1 %v4429_v12  ;;  %v2060_v12 = vpack.c.bf16 %v3354_v10, %v3353_v7  ;;  %v1255_v7 = vpack.c.bf16 %v3205_v43, %v3204_v39  ;;  %v2327_v10 = vpack.c.bf16 %v3401_v45, %v3400_v44 }
  0xee   : > { %4077 = vmatprep.subr.bf16.mxu1 %v4445_v17 }
  0xf0   : > { %3808 = vmatmul.mubr.bf16.gmra.mrb[4].mxu1 %v5023_v56  ;;  %v3358_v56 = vld [vmem:[%s4462_s28 + $0x11d] sm:$0xff] }
  0xf1   : > { %4016 = vmatmul.mubr.bf16.gmra.mrb[20].mxu0 %v2058_v46  ;;  %3811 = vmatprep.mubr.bf16.mxu1 %v5042_v8  ;;  %v3376_v8 = vld [vmem:[%s4462_s28 + $0x26] sm:$0xff]  ;;  %v1254_v46 = vpack.c.bf16 %v3203_v58, %v3202_v22 }
  0xf2   : > { %4019 = vmatprep.mubr.bf16.mxu0 %v2059_v55  ;;  %4085 = vmatpush3.bf16.msra.mxu1 %v4445_v17  ;;  %v3357_v17 = vld [vmem:[%s4462_s28 + $0x115] sm:$0xff]  ;;  %v2315_v6 = vpack.c.bf16 %v3377_v51, %v3376_v8  ;;  %v2326_v55 = vpack.c.bf16 %v3399_v42, %v3398_v14  ;;  %v3404_v8 = vld [vmem:[%s4462_s28 + $0x106] sm:$0xff] }
  0xf3   : > { %4078 = vmatprep.subr.bf16.mxu1 %v4472_v25  ;;  %v3405_v51 = vld [vmem:[%s4462_s28 + $0x10e] sm:$0xff] }
  0xf6   : > { %4086 = vmatpush3.bf16.msra.mxu1 %v4472_v25  ;;  %v2062_v25 = vpack.c.bf16 %v3358_v56, %v3357_v17  ;;  %v3208_v17 = vld [vmem:[%s4462_s28 + $0xf3] sm:$0xff]  ;;  %v3209_v56 = vld [vmem:[%s4462_s28 + $0xfb] sm:$0xff] }
  0xf7   : > { %4079 = vmatprep.subr.bf16.mxu1 %v4486_v35 }
  0xf8   : > { %3812 = vmatmul.mubr.bf16.gmra.mrb[8].mxu1 %v5051_v11  ;;  %v3379_v11 = vld [vmem:[%s4462_s28 + $0x3e] sm:$0xff] }
  0xf9   : > { %4020 = vmatmul.mubr.bf16.gmra.mrb[24].mxu0 %v2060_v12  ;;  %3815 = vmatprep.mubr.bf16.mxu1 %v5074_v0  ;;  %v3380_v0 = vld [vmem:[%s4462_s28 + $0x46] sm:$0xff]  ;;  %v3402_v12 = vld [vmem:[%s4462_s28 + $0xf6] sm:$0xff] }
  0xfa   : > { %4023 = vmatprep.mubr.bf16.mxu0 %v2061_v50  ;;  %4087 = vmatpush3.bf16.msra.mxu1 %v4486_v35  ;;  %v3378_v35 = vld [vmem:[%s4462_s28 + $0x36] sm:$0xff]  ;;  %v2317_v54 = vpack.c.bf16 %v3381_v16, %v3380_v0  ;;  %v3403_v50 = vld [vmem:[%s4462_s28 + $0xfe] sm:$0xff]  ;;  %v3211_v16 = vld [vmem:[%s4462_s28 + $0x10b] sm:$0xff] }
  0xfb   : > { %4080 = vmatprep.subr.bf16.mxu1 %v4502_v41  ;;  %v3210_v0 = vld [vmem:[%s4462_s28 + $0x103] sm:$0xff] }
  0xfe   : > { %4088 = vmatpush3.bf16.msra.mxu1 %v4502_v41  ;;  %v2316_v41 = vpack.c.bf16 %v3379_v11, %v3378_v35  ;;  %v1257_v35 = vpack.c.bf16 %v3209_v56, %v3208_v17  ;;  %v2329_v11 = vpack.c.bf16 %v3405_v51, %v3404_v8 }
  0xff   : > { %4081 = vmatprep.subr.bf16.mxu1 %v4518_v47 }
 0x100   : > { %3816 = vmatmul.mubr.bf16.gmra.mrb[12].mxu1 %v5083_v40  ;;  %v3382_v40 = vld [vmem:[%s4462_s28 + $0x56] sm:$0xff] }
 0x101   : > { %4024 = vmatmul.mubr.bf16.gmra.mrb[28].mxu0 %v2062_v25  ;;  %3819 = vmatprep.mubr.bf16.mxu1 %v5098_v36  ;;  %v3384_v36 = vld [vmem:[%s4462_s28 + $0x66] sm:$0xff]  ;;  %v1256_v25 = vpack.c.bf16 %v3207_v49, %v3206_v48 }
 0x102   : > { %4043 = vmatprep.mubr.bf16.mxu0 %v2315_v6  ;;  %4089 = vmatpush3.bf16.msra.mxu1 %v4518_v47  ;;  %v3383_v47 = vld [vmem:[%s4462_s28 + $0x5e] sm:$0xff]  ;;  %v2319_v63 = vpack.c.bf16 %v3385_v59, %v3384_v36  ;;  %v2328_v6 = vpack.c.bf16 %v3403_v50, %v3402_v12  ;;  %v2719_v36 = vpop.permute.xlu0 %2718 }
 0x103   : > { %4082 = vmatprep.subr.bf16.mxu1 %v4534_v53  ;;  %v2318_v61 = vpack.c.bf16 %v3383_v47, %v3382_v40  ;;  %v1258_v40 = vpack.c.bf16 %v3211_v16, %v3210_v0 }
 0x106   : > { %4090 = vmatpush3.bf16.msra.mxu1 %v4534_v53  ;;  %v3386_v53 = vld [vmem:[%s4462_s28 + $0x76] sm:$0xff] }
 0x108   : > { %3820 = vmatmul.mubr.bf16.gmra.mrb[16].mxu1 %v5107_v1  ;;  %v3387_v1 = vld [vmem:[%s4462_s28 + $0x7e] sm:$0xff] }
 0x109   : > { %4044 = vmatmul.mubr.bf16.vlgmr.msra.gmra.mrb[0].mxu0 %v2316_v41  ;;  %3823 = vmatprep.mubr.bf16.mxu1 %v5130_v24  ;;  %v3388_v24 = vld [vmem:[%s4462_s28 + $0x86] sm:$0xff]  ;;  %v2320_v3 = vpack.c.bf16 %v3387_v1, %v3386_v53  ;;  %v3406_v41 = vld [vmem:[%s4462_s28 + $0x116] sm:$0xff] }
 0x10a   : > { %4047 = vmatprep.mubr.bf16.mxu0 %v2317_v54  ;;  %v2321_v4 = vpack.c.bf16 %v3389_v2, %v3388_v24  ;;  %v3407_v54 = vld [vmem:[%s4462_s28 + $0x11e] sm:$0xff] }
 0x10b   : > { %v2330_v47 = vpack.c.bf16 %v3407_v54, %v3406_v41 }
 0x10e   : > { %v2729_v53 = vpop.permute.xlu1 %2728 }
 0x110   : > { %3824 = vmatmul.mubr.bf16.gmra.mrb[20].mxu1 %v5139_v28  ;;  %v3161_v28 = vld [vmem:[%s4462_s28 + $0x102] sm:$0xff] }
 0x111   : > { %4048 = vmatmul.mubr.bf16.gmra.mrb[4].mxu0 %v2318_v61  ;;  %3827 = vmatprep.mubr.bf16.mxu1 %v5160_v57  ;;  %v3390_v57 = vld [vmem:[%s4462_s28 + $0x96] sm:$0xff] }
 0x112   : > { %4051 = vmatprep.mubr.bf16.mxu0 %v2319_v63  ;;  %v2322_v15 = vpack.c.bf16 %v3391_v5, %v3390_v57 }
 0x113   : > { %v2724_v24 = vpop.permute.xlu0 %2723 }
 0x118   : > { %3828 = vmatmul.mubr.bf16.gmra.mrb[24].mxu1 %v5169_v60  ;;  %v990_v60 = vpack.c.bf16 %v3162_v13, %v3161_v28  ;;  %v5295_v28 = vpop.permute.xlu0 %2738 }
 0x119   : > { %4052 = vmatmul.mubr.bf16.gmra.mrb[8].mxu0 %v2320_v3  ;;  %3831 = vmatprep.mubr.bf16.mxu1 %v5188_v20  ;;  %v3198_v20 = vld [vmem:[%s4462_s28 + $0xa3] sm:$0xff]  ;;  %v2734_v3 = vpop.permute.xlu1 %2733 }
 0x11a   : > { %4055 = vmatprep.mubr.bf16.mxu0 %v2321_v4  ;;  %v1252_v29 = vpack.c.bf16 %v3199_v21, %v3198_v20 }
 0x11c   : > { %v5299_v31 = vpop.permute.xlu0 %2748 }
 0x120   : > { %3832 = vmatmul.mubr.bf16.gmra.mrb[28].mxu1 %v990_v60 }
 0x121   : > { %4056 = vmatmul.mubr.bf16.gmra.mrb[12].mxu0 %v2322_v15  ;;  %3867 = vmatprep.mubr.bf16.mxu1 %v1251_v18  ;;  %v5311_v18 = vpop.permute.xlu0 %2758 }
 0x122   : > { %4059 = vmatprep.mubr.bf16.mxu0 %v2323_v19 }
 0x126   : > { %v5323_v52 = vpop.permute.xlu0 %2768 }
 0x128   : > { %3868 = vmatmul.mubr.bf16.vlgmr.msra.gmra.mrb[16].mxu1 %v1252_v29 }
 0x129   : > { %4060 = vmatmul.mubr.bf16.gmra.mrb[16].mxu0 %v2324_v30  ;;  %3871 = vmatprep.mubr.bf16.mxu1 %v1253_v32 }
 0x12a   : > { %4063 = vmatprep.mubr.bf16.mxu0 %v2325_v37  ;;  %v5297_v5 = vpop.permute.xlu1 %2743 }
 0x12b   : > { %v5332_v29 = vpop.permute.xlu0 %2778 }
 0x12e   : > { %v5309_v15 = vpop.permute.xlu1 %2753 }
 0x130   : > { %3872 = vmatmul.mubr.bf16.gmra.mrb[20].mxu1 %v1254_v46 }
 0x131   : > { %4064 = vmatmul.mubr.bf16.gmra.mrb[20].mxu0 %v2326_v55  ;;  %3875 = vmatprep.mubr.bf16.mxu1 %v1255_v7 }
 0x132   : > { %4067 = vmatprep.mubr.bf16.mxu0 %v2327_v10  ;;  %v5319_v23 = vpop.permute.xlu1 %2763  ;;  %v5347_v10 = vpop.permute.xlu0 %2788 }
 0x136   : > { %v5325_v34 = vpop.permute.xlu1 %2773 }
 0x138   : > { %3876 = vmatmul.mubr.bf16.gmra.mrb[24].mxu1 %v1256_v25 }
 0x139   : > { %4068 = vmatmul.mubr.bf16.gmra.mrb[24].mxu0 %v2328_v6  ;;  %3879 = vmatprep.mubr.bf16.mxu1 %v1257_v35 }
 0x13a   : > { %4071 = vmatprep.mubr.bf16.mxu0 %v2329_v11  ;;  %v5337_v46 = vpop.permute.xlu1 %2783 }
 0x140   : > { %3880 = vmatmul.mubr.bf16.gmra.mrb[28].mxu1 %v1258_v40 }
 0x141   : > { %4072 = vmatmul.mubr.bf16.gmra.mrb[28].mxu0 %v2330_v47 }
 0x1bb   : > { %v3805_v59 = vpop.f32.mrb[0].mxu1 }
 0x1bc   : > { %v1050_v61 = vpop.f32.mrb[1].mxu1 }
 0x1bd   : > { %v3806_v63 = vpop.f32.mrb[2].mxu1 }
 0x1be   : > { %v1053_v1 = vpop.f32.mrb[3].mxu1 }
 0x1c3   : > { %v3809_v2 = vpop.f32.mrb[4].mxu1 }
 0x1c4   : > { %v1066_v4 = vpop.f32.mrb[5].mxu1 }
 0x1c5   : > { %v3810_v13 = vpop.f32.mrb[6].mxu1 }
 0x1c6   : > { %v1069_v57 = vpop.f32.mrb[7].mxu1 }
 0x1cb   : > { %v5301_v38 = vpop.f32.mrb[8].mxu1 }
 0x1cc   : > { %v5303_v9 = vpop.f32.mrb[9].mxu1 }
 0x1cd   : > { %v5305_v62 = vpop.f32.mrb[10].mxu1 }
 0x1ce   : > { %v5307_v60 = vpop.f32.mrb[11].mxu1 }
 0x1d3   : > { %v5313_v19 = vpop.f32.mrb[12].mxu1 }
 0x1d4   : > { %v5315_v20 = vpop.f32.mrb[13].mxu1 }
 0x1d5   : > { %v5317_v21 = vpop.f32.mrb[14].mxu1 }
 0x1d6   : > { %v5321_v33 = vpop.f32.mrb[15].mxu1 }
 0x1dc   : > { %v4045_v26 = vpop.f32.mrb[0].mxu0 }
 0x1dd   : > { %v4091_v30 = vadd.f32 %v4045_v26, %v3805_v59  ;;  %v2390_v32 = vpop.f32.mrb[1].mxu0  ;;  %v5352_v59 = vpop.permute.xlu1 %2793 }
 0x1de   : > { %v4092_v37 = vadd.f32 %v2390_v32, %v1050_v61  ;;  %v4046_v22 = vpop.f32.mrb[2].mxu0 }
 0x1df   : > { %v2558_v58 = vadd.f32 %v4091_v30, %v5330_v27  ;;  %v4093_v14 = vadd.f32 %v4046_v22, %v3806_v63  ;;  %v2393_v42 = vpop.f32.mrb[3].mxu0  ;;  %v5356_v63 = vpop.permute.xlu0 %2798 }
 0x1e0   : > { %v2556_v39 = vadd.f32 %v4092_v37, %v5330_v27  ;;  %v4094_v43 = vadd.f32 %v2393_v42, %v1053_v1 }
 0x1e1   : > { %vm2590_vm0 = vcmp.gt.f32.partialorder %v2558_v58, 0.0  ;;  %v2622_v44 = vmul.f32 0.2, %v2558_v58  ;;  %v2559_v45 = vadd.f32 %v4093_v14, %v5330_v27  ;;  %v5364_v14 = vpop.permute.xlu1 %2803 }
 0x1e2   : > { %vm2588_vm1 = vcmp.gt.f32.partialorder %v2556_v39, 0.0  ;;  %v2620_v55 = vmul.f32 0.2, %v2556_v39  ;;  %v2557_v7 = vadd.f32 %v4094_v43, %v5330_v27 }
 0x1e3   : > { %v2654_v48 = vsel %vm2590_vm0, %v2558_v58, %v2622_v44  ;;  %vm2591_vm2 = vcmp.gt.f32.partialorder %v2559_v45, 0.0  ;;  %v2623_v49 = vmul.f32 0.2, %v2559_v45  ;;  %v5369_v44 = vpop.permute.xlu0 %2808 }
 0x1e4   : > { %v2878_v12 = vmul.f32 %v2729_v53, %v2654_v48  ;;  %v2652_v50 = vsel %vm2588_vm1, %v2556_v39, %v2620_v55  ;;  %vm2589_vm3 = vcmp.gt.f32.partialorder %v2557_v7, 0.0  ;;  %v2621_v17 = vmul.f32 0.2, %v2557_v7  ;;  %v4049_v56 = vpop.f32.mrb[4].mxu0 }
 0x1e5   : > { %v2876_v8 = vmul.f32 %v2719_v36, %v2652_v50  ;;  %v2655_v51 = vsel %vm2591_vm2, %v2559_v45, %v2623_v49  ;;  %v4095_v25 = vadd.f32 %v4049_v56, %v3809_v2  ;;  %v2406_v6 = vpop.f32.mrb[5].mxu0 }
 0x1e6   : > { %2910 = vst [vmem:[%s5345_s19 + $0x10] sm:$0xff] %v2878_v12  ;;  %v2879_v35 = vmul.f32 %v2734_v3, %v2655_v51  ;;  %v2653_v11 = vsel %vm2589_vm3, %v2557_v7, %v2621_v17  ;;  %v4096_v0 = vadd.f32 %v2406_v6, %v1066_v4  ;;  %v4050_v16 = vpop.f32.mrb[6].mxu0 }
 0x1e7   : > { %2908 = vst [vmem:[%s5345_s19] sm:$0xff] %v2876_v8  ;;  %v2877_v41 = vmul.f32 %v2724_v24, %v2653_v11  ;;  %v2562_v54 = vadd.f32 %v4095_v25, %v5330_v27  ;;  %v4097_v40 = vadd.f32 %v4050_v16, %v3810_v13  ;;  %v2409_v47 = vpop.f32.mrb[7].mxu0  ;;  %v5384_v51 = vpop.permute.xlu0 %2818 }
 0x1e8   : > { %2911 = vst [vmem:[%s5345_s19 + $0x18] sm:$0xff] %v2879_v35  ;;  %v2560_v36 = vadd.f32 %v4096_v0, %v5330_v27  ;;  %v4098_v61 = vadd.f32 %v2409_v47, %v1069_v57 }
 0x1e9   : > { %2909 = vst [vmem:[%s5345_s19 + $0x8] sm:$0xff] %v2877_v41  ;;  %vm2594_vm4 = vcmp.gt.f32.partialorder %v2562_v54, 0.0  ;;  %v2626_v53 = vmul.f32 0.2, %v2562_v54  ;;  %v2563_v1 = vadd.f32 %v4097_v40, %v5330_v27 }
 0x1ea   : > { %vm2592_vm5 = vcmp.gt.f32.partialorder %v2560_v36, 0.0  ;;  %v2624_v24 = vmul.f32 0.2, %v2560_v36  ;;  %v2561_v2 = vadd.f32 %v4098_v61, %v5330_v27 }
 0x1eb   : > { %v2658_v3 = vsel %vm2594_vm4, %v2562_v54, %v2626_v53  ;;  %vm2595_vm6 = vcmp.gt.f32.partialorder %v2563_v1, 0.0  ;;  %v2627_v4 = vmul.f32 0.2, %v2563_v1 }
 0x1ec   : > { %v2882_v13 = vmul.f32 %v5299_v31, %v2658_v3  ;;  %v2656_v26 = vsel %vm2592_vm5, %v2560_v36, %v2624_v24  ;;  %vm2593_vm7 = vcmp.gt.f32.partialorder %v2561_v2, 0.0  ;;  %v2625_v57 = vmul.f32 0.2, %v2561_v2  ;;  %v4053_v30 = vpop.f32.mrb[8].mxu0 }
 0x1ed   : > { %v2880_v32 = vmul.f32 %v5295_v28, %v2656_v26  ;;  %v2659_v37 = vsel %vm2595_vm6, %v2563_v1, %v2627_v4  ;;  %v4099_v22 = vadd.f32 %v4053_v30, %v5301_v38  ;;  %v2422_v58 = vpop.f32.mrb[9].mxu0  ;;  %v5403_v1 = vpop.permute.xlu0 %2828 }
 0x1ee   : > { %2914 = vst [vmem:[%s5345_s19 + $0x30] sm:$0xff] %v2882_v13  ;;  %v2883_v42 = vmul.f32 %v5309_v15, %v2659_v37  ;;  %v2657_v39 = vsel %vm2593_vm7, %v2561_v2, %v2625_v57  ;;  %v4100_v31 = vadd.f32 %v2422_v58, %v5303_v9  ;;  %v4054_v43 = vpop.f32.mrb[10].mxu0 }
 0x1ef   : > { %2912 = vst [vmem:[%s5345_s19 + $0x20] sm:$0xff] %v2880_v32  ;;  %v2881_v28 = vmul.f32 %v5297_v5, %v2657_v39  ;;  %v2566_v45 = vadd.f32 %v4099_v22, %v5330_v27  ;;  %v4101_v38 = vadd.f32 %v4054_v43, %v5305_v62  ;;  %v2425_v55 = vpop.f32.mrb[11].mxu0  ;;  %v5381_v62 = vpop.permute.xlu1 %2813 }
 0x1f0   : > { %2915 = vst [vmem:[%s5345_s19 + $0x38] sm:$0xff] %v2883_v42  ;;  %v2564_v7 = vadd.f32 %v4100_v31, %v5330_v27  ;;  %v4102_v48 = vadd.f32 %v2425_v55, %v5307_v60 }
 0x1f1   : > { %2913 = vst [vmem:[%s5345_s19 + $0x28] sm:$0xff] %v2881_v28  ;;  %vm2598_vm8 = vcmp.gt.f32.partialorder %v2566_v45, 0.0  ;;  %v2630_v15 = vmul.f32 0.2, %v2566_v45  ;;  %v2567_v9 = vadd.f32 %v4101_v38, %v5330_v27 }
 0x1f2   : > { %vm2596_vm9 = vcmp.gt.f32.partialorder %v2564_v7, 0.0  ;;  %v2628_v49 = vmul.f32 0.2, %v2564_v7  ;;  %v2565_v5 = vadd.f32 %v4102_v48, %v5330_v27 }
 0x1f3   : > { %v2662_v12 = vsel %vm2598_vm8, %v2566_v45, %v2630_v15  ;;  %vm2599_vm10 = vcmp.gt.f32.partialorder %v2567_v9, 0.0  ;;  %v2631_v50 = vmul.f32 0.2, %v2567_v9 }
 0x1f4   : > { %v2886_v17 = vmul.f32 %v5323_v52, %v2662_v12  ;;  %v2660_v56 = vsel %vm2596_vm9, %v2564_v7, %v2628_v49  ;;  %vm2597_vm11 = vcmp.gt.f32.partialorder %v2565_v5, 0.0  ;;  %v2629_v60 = vmul.f32 0.2, %v2565_v5  ;;  %v4057_v8 = vpop.f32.mrb[12].mxu0  ;;  %v5417_v49 = vpop.permute.xlu0 %2838 }
 0x1f5   : > { %v2884_v25 = vmul.f32 %v5311_v18, %v2660_v56  ;;  %v2663_v6 = vsel %vm2599_vm10, %v2567_v9, %v2631_v50  ;;  %v4103_v35 = vadd.f32 %v4057_v8, %v5313_v19  ;;  %v2438_v11 = vpop.f32.mrb[13].mxu0 }
 0x1f6   : > { %2918 = vst [vmem:[%s5345_s19 + $0x50] sm:$0xff] %v2886_v17  ;;  %v2887_v0 = vmul.f32 %v5325_v34, %v2663_v6  ;;  %v2661_v16 = vsel %vm2597_vm11, %v2565_v5, %v2629_v60  ;;  %v4104_v52 = vadd.f32 %v2438_v11, %v5315_v20  ;;  %v4058_v41 = vpop.f32.mrb[14].mxu0  ;;  %v5400_v20 = vpop.permute.xlu1 %2823 }
 0x1f7   : > { %2916 = vst [vmem:[%s5345_s19 + $0x40] sm:$0xff] %v2884_v25  ;;  %v2885_v54 = vmul.f32 %v5319_v23, %v2661_v16  ;;  %v2570_v40 = vadd.f32 %v4103_v35, %v5330_v27  ;;  %v4105_v47 = vadd.f32 %v4058_v41, %v5317_v21  ;;  %v2441_v18 = vpop.f32.mrb[15].mxu0 }
 0x1f8   : > { %2919 = vst [vmem:[%s5345_s19 + $0x58] sm:$0xff] %v2887_v0  ;;  %v2568_v36 = vadd.f32 %v4104_v52, %v5330_v27  ;;  %v4106_v19 = vadd.f32 %v2441_v18, %v5321_v33 }
 0x1f9   : > { %2917 = vst [vmem:[%s5345_s19 + $0x48] sm:$0xff] %v2885_v54  ;;  %vm2602_vm12 = vcmp.gt.f32.partialorder %v2570_v40, 0.0  ;;  %v2634_v34 = vmul.f32 0.2, %v2570_v40  ;;  %v2571_v61 = vadd.f32 %v4105_v47, %v5330_v27 }
 0x1fa   : > { %vm2600_vm13 = vcmp.gt.f32.partialorder %v2568_v36, 0.0  ;;  %v2632_v53 = vmul.f32 0.2, %v2568_v36  ;;  %v2569_v23 = vadd.f32 %v4106_v19, %v5330_v27  ;;  %v2834_v48 = vpop.permute.xlu1 %2833 }
 0x1fb   : > { %v2666_v21 = vsel %vm2602_vm12, %v2570_v40, %v2634_v34  ;;  %vm2603_vm14 = vcmp.gt.f32.partialorder %v2571_v61, 0.0  ;;  %v2635_v24 = vmul.f32 0.2, %v2571_v61  ;;  %v3869_v2 = vpop.f32.mrb[16].mxu1 }
 0x1fc   : > { %v2890_v33 = vmul.f32 %v5347_v10, %v2666_v21  ;;  %v2664_v3 = vsel %vm2600_vm13, %v2568_v36, %v2632_v53  ;;  %vm2601_vm15 = vcmp.gt.f32.partialorder %v2569_v23, 0.0  ;;  %v2633_v4 = vmul.f32 0.2, %v2569_v23  ;;  %v4061_v13 = vpop.f32.mrb[16].mxu0  ;;  %v1382_v26 = vpop.f32.mrb[17].mxu1 }
 0x1fd   : > { %v2888_v57 = vmul.f32 %v5332_v29, %v2664_v3  ;;  %v2667_v30 = vsel %vm2603_vm14, %v2571_v61, %v2635_v24  ;;  %v4107_v32 = vadd.f32 %v4061_v13, %v3869_v2  ;;  %v2454_v37 = vpop.f32.mrb[17].mxu0  ;;  %v3870_v22 = vpop.f32.mrb[18].mxu1 }
 0x1fe   : > { %2922 = vst [vmem:[%s5345_s19 + $0x70] sm:$0xff] %v2890_v33  ;;  %v2891_v58 = vmul.f32 %v5352_v59, %v2667_v30  ;;  %v2665_v42 = vsel %vm2601_vm15, %v2569_v23, %v2633_v4  ;;  %v4108_v39 = vadd.f32 %v2454_v37, %v1382_v26  ;;  %v4062_v10 = vpop.f32.mrb[18].mxu0  ;;  %v1385_v31 = vpop.f32.mrb[19].mxu1 }
 0x1ff   : > { %2920 = vst [vmem:[%s5345_s19 + $0x60] sm:$0xff] %v2888_v57  ;;  %v2889_v43 = vmul.f32 %v5337_v46, %v2665_v42  ;;  %v2574_v28 = vadd.f32 %v4107_v32, %v5330_v27  ;;  %v4109_v45 = vadd.f32 %v4062_v10, %v3870_v22  ;;  %v2457_v29 = vpop.f32.mrb[19].mxu0  ;;  %v5430_v61 = vpop.permute.xlu1 %2843 }
 0x200   : > { %2923 = vst [vmem:[%s5345_s19 + $0x78] sm:$0xff] %v2891_v58  ;;  %v2572_v38 = vadd.f32 %v4108_v39, %v5330_v27  ;;  %v4110_v55 = vadd.f32 %v2457_v29, %v1385_v31 }
 0x201   : > { %2921 = vst [vmem:[%s5345_s19 + $0x68] sm:$0xff] %v2889_v43  ;;  %vm2606_vm0 = vcmp.gt.f32.partialorder %v2574_v28, 0.0  ;;  %v2638_v7 = vmul.f32 0.2, %v2574_v28  ;;  %v2575_v59 = vadd.f32 %v4109_v45, %v5330_v27 }
 0x202   : > { %vm2604_vm1 = vcmp.gt.f32.partialorder %v2572_v38, 0.0  ;;  %v2636_v15 = vmul.f32 0.2, %v2572_v38  ;;  %v2573_v9 = vadd.f32 %v4110_v55, %v5330_v27 }
 0x203   : > { %v2670_v46 = vsel %vm2606_vm0, %v2574_v28, %v2638_v7  ;;  %vm2607_vm2 = vcmp.gt.f32.partialorder %v2575_v59, 0.0  ;;  %v2639_v5 = vmul.f32 0.2, %v2575_v59  ;;  %v3873_v12 = vpop.f32.mrb[20].mxu1 }
 0x204   : > { %v2894_v50 = vmul.f32 %v5369_v44, %v2670_v46  ;;  %v2668_v17 = vsel %vm2604_vm1, %v2572_v38, %v2636_v15  ;;  %vm2605_vm3 = vcmp.gt.f32.partialorder %v2573_v9, 0.0  ;;  %v2637_v56 = vmul.f32 0.2, %v2573_v9  ;;  %v4065_v60 = vpop.f32.mrb[20].mxu0  ;;  %v1398_v8 = vpop.f32.mrb[21].mxu1 }
 0x205   : > { %v2892_v25 = vmul.f32 %v5356_v63, %v2668_v17  ;;  %v2671_v6 = vsel %vm2607_vm2, %v2575_v59, %v2639_v5  ;;  %v4111_v35 = vadd.f32 %v4065_v60, %v3873_v12  ;;  %v2470_v11 = vpop.f32.mrb[21].mxu0  ;;  %v3874_v0 = vpop.f32.mrb[22].mxu1 }
 0x206   : > { %2926 = vst [vmem:[%s5345_s19 + $0x90] sm:$0xff] %v2894_v50  ;;  %v2895_v16 = vmul.f32 %v5381_v62, %v2671_v6  ;;  %v2669_v52 = vsel %vm2605_vm3, %v2573_v9, %v2637_v56  ;;  %v4112_v41 = vadd.f32 %v2470_v11, %v1398_v8  ;;  %v4066_v44 = vpop.f32.mrb[22].mxu0  ;;  %v1401_v54 = vpop.f32.mrb[23].mxu1 }
 0x207   : > { %2924 = vst [vmem:[%s5345_s19 + $0x80] sm:$0xff] %v2892_v25  ;;  %v2893_v40 = vmul.f32 %v5364_v14, %v2669_v52  ;;  %v2578_v47 = vadd.f32 %v4111_v35, %v5330_v27  ;;  %v4113_v18 = vadd.f32 %v4066_v44, %v3874_v0  ;;  %v2473_v63 = vpop.f32.mrb[23].mxu0  ;;  %v2849_v14 = vpop.permute.xlu0 %2848 }
 0x208   : > { %2927 = vst [vmem:[%s5345_s19 + $0x98] sm:$0xff] %v2895_v16  ;;  %v2576_v36 = vadd.f32 %v4112_v41, %v5330_v27  ;;  %v4114_v19 = vadd.f32 %v2473_v63, %v1401_v54  ;;  %v2854_v38 = vpop.permute.xlu1 %2853 }
 0x209   : > { %2925 = vst [vmem:[%s5345_s19 + $0x88] sm:$0xff] %v2893_v40  ;;  %vm2610_vm4 = vcmp.gt.f32.partialorder %v2578_v47, 0.0  ;;  %v2642_v34 = vmul.f32 0.2, %v2578_v47  ;;  %v2579_v62 = vadd.f32 %v4113_v18, %v5330_v27 }
 0x20a   : > { %vm2608_vm5 = vcmp.gt.f32.partialorder %v2576_v36, 0.0  ;;  %v2640_v53 = vmul.f32 0.2, %v2576_v36  ;;  %v2577_v23 = vadd.f32 %v4114_v19, %v5330_v27 }
 0x20b   : > { %v2674_v21 = vsel %vm2610_vm4, %v2578_v47, %v2642_v34  ;;  %vm2611_vm6 = vcmp.gt.f32.partialorder %v2579_v62, 0.0  ;;  %v2643_v24 = vmul.f32 0.2, %v2579_v62  ;;  %v3877_v2 = vpop.f32.mrb[24].mxu1  ;;  %v2859_v15 = vpop.permute.xlu0 %2858 }
 0x20c   : > { %v2898_v33 = vmul.f32 %v5403_v1, %v2674_v21  ;;  %v2672_v3 = vsel %vm2608_vm5, %v2576_v36, %v2640_v53  ;;  %vm2609_vm7 = vcmp.gt.f32.partialorder %v2577_v23, 0.0  ;;  %v2641_v4 = vmul.f32 0.2, %v2577_v23  ;;  %v4069_v13 = vpop.f32.mrb[24].mxu0  ;;  %v1414_v26 = vpop.f32.mrb[25].mxu1 }
 0x20d   : > { %v2896_v57 = vmul.f32 %v5384_v51, %v2672_v3  ;;  %v2675_v30 = vsel %vm2611_vm6, %v2579_v62, %v2643_v24  ;;  %v4115_v32 = vadd.f32 %v4069_v13, %v3877_v2  ;;  %v2486_v37 = vpop.f32.mrb[25].mxu0  ;;  %v3878_v22 = vpop.f32.mrb[26].mxu1 }
 0x20e   : > { %2930 = vst [vmem:[%s5345_s19 + $0xb0] sm:$0xff] %v2898_v33  ;;  %v2899_v58 = vmul.f32 %v2834_v48, %v2675_v30  ;;  %v2673_v42 = vsel %vm2609_vm7, %v2577_v23, %v2641_v4  ;;  %v4116_v39 = vadd.f32 %v2486_v37, %v1414_v26  ;;  %v4070_v10 = vpop.f32.mrb[26].mxu0  ;;  %v1417_v1 = vpop.f32.mrb[27].mxu1 }
 0x20f   : > { %2928 = vst [vmem:[%s5345_s19 + $0xa0] sm:$0xff] %v2896_v57  ;;  %v2897_v31 = vmul.f32 %v5400_v20, %v2673_v42  ;;  %v2582_v43 = vadd.f32 %v4115_v32, %v5330_v27  ;;  %v4117_v28 = vadd.f32 %v4070_v10, %v3878_v22  ;;  %v2489_v45 = vpop.f32.mrb[27].mxu0  ;;  %v2864_v44 = vpop.permute.xlu1 %2863 }
 0x210   : > { %2931 = vst [vmem:[%s5345_s19 + $0xb8] sm:$0xff] %v2899_v58  ;;  %v2580_v51 = vadd.f32 %v4116_v39, %v5330_v27  ;;  %v4118_v29 = vadd.f32 %v2489_v45, %v1417_v1 }
 0x211   : > { %2929 = vst [vmem:[%s5345_s19 + $0xa8] sm:$0xff] %v2897_v31  ;;  %vm2614_vm8 = vcmp.gt.f32.partialorder %v2582_v43, 0.0  ;;  %v2646_v55 = vmul.f32 0.2, %v2582_v43  ;;  %v2583_v7 = vadd.f32 %v4117_v28, %v5330_v27 }
 0x212   : > { %vm2612_vm9 = vcmp.gt.f32.partialorder %v2580_v51, 0.0  ;;  %v2644_v59 = vmul.f32 0.2, %v2580_v51  ;;  %v2581_v48 = vadd.f32 %v4118_v29, %v5330_v27 }
 0x213   : > { %v2678_v20 = vsel %vm2614_vm8, %v2582_v43, %v2646_v55  ;;  %vm2615_vm10 = vcmp.gt.f32.partialorder %v2583_v7, 0.0  ;;  %v2647_v9 = vmul.f32 0.2, %v2583_v7  ;;  %v3881_v46 = vpop.f32.mrb[28].mxu1  ;;  %v2874_v2 = vpop.permute.xlu1 %2873 }
 0x214   : > { %v2902_v5 = vmul.f32 %v2849_v14, %v2678_v20  ;;  %v2676_v12 = vsel %vm2612_vm9, %v2580_v51, %v2644_v59  ;;  %vm2613_vm11 = vcmp.gt.f32.partialorder %v2581_v48, 0.0  ;;  %v2645_v50 = vmul.f32 0.2, %v2581_v48  ;;  %v4073_v17 = vpop.f32.mrb[28].mxu0  ;;  %v1430_v56 = vpop.f32.mrb[29].mxu1 }
 0x215   : > { %v2900_v60 = vmul.f32 %v5417_v49, %v2676_v12  ;;  %v2679_v8 = vsel %vm2615_vm10, %v2583_v7, %v2647_v9  ;;  %v4119_v25 = vadd.f32 %v4073_v17, %v3881_v46  ;;  %v2502_v6 = vpop.f32.mrb[29].mxu0  ;;  %v3882_v35 = vpop.f32.mrb[30].mxu1 }
 0x216   : > { %2934 = vst [vmem:[%s5345_s19 + $0xd0] sm:$0xff] %v2902_v5  ;;  %v2903_v11 = vmul.f32 %v2854_v38, %v2679_v8  ;;  %v2677_v0 = vsel %vm2613_vm11, %v2581_v48, %v2645_v50  ;;  %v4120_v16 = vadd.f32 %v2502_v6, %v1430_v56  ;;  %v4074_v52 = vpop.f32.mrb[30].mxu0  ;;  %v1433_v41 = vpop.f32.mrb[31].mxu1 }
 0x217   : > { %2932 = vst [vmem:[%s5345_s19 + $0xc0] sm:$0xff] %v2900_v60  ;;  %v2901_v54 = vmul.f32 %v5430_v61, %v2677_v0  ;;  %v2586_v40 = vadd.f32 %v4119_v25, %v5330_v27  ;;  %v4121_v47 = vadd.f32 %v4074_v52, %v3882_v35  ;;  %v2505_v49 = vpop.f32.mrb[31].mxu0  ;;  %v2869_v61 = vpop.permute.xlu0 %2868 }
 0x218   : > { %2935 = vst [vmem:[%s5345_s19 + $0xd8] sm:$0xff] %v2903_v11  ;;  %v2584_v18 = vadd.f32 %v4120_v16, %v5330_v27  ;;  %v4122_v63 = vadd.f32 %v2505_v49, %v1433_v41 }
 0x219   : > { %2933 = vst [vmem:[%s5345_s19 + $0xc8] sm:$0xff] %v2901_v54  ;;  %vm2618_vm12 = vcmp.gt.f32.partialorder %v2586_v40, 0.0  ;;  %v2650_v36 = vmul.f32 0.2, %v2586_v40  ;;  %v2587_v19 = vadd.f32 %v4121_v47, %v5330_v27 }
 0x21a   : > { %vm2616_vm13 = vcmp.gt.f32.partialorder %v2584_v18, 0.0  ;;  %v2648_v34 = vmul.f32 0.2, %v2584_v18  ;;  %v2585_v62 = vadd.f32 %v4122_v63, %v5330_v27 }
 0x21b   : > { %v2682_v53 = vsel %vm2618_vm12, %v2586_v40, %v2650_v36  ;;  %vm2619_vm14 = vcmp.gt.f32.partialorder %v2587_v19, 0.0  ;;  %v2651_v23 = vmul.f32 0.2, %v2587_v19 }
 0x21c   : > { %v2906_v14 = vmul.f32 %v2869_v61, %v2682_v53  ;;  %v2680_v21 = vsel %vm2616_vm13, %v2584_v18, %v2648_v34  ;;  %vm2617_vm15 = vcmp.gt.f32.partialorder %v2585_v62, 0.0  ;;  %v2649_v24 = vmul.f32 0.2, %v2585_v62 }
 0x21d   : > { %v2904_v33 = vmul.f32 %v2859_v15, %v2680_v21  ;;  %v2683_v3 = vsel %vm2619_vm14, %v2587_v19, %v2651_v23 }
 0x21e   : > { %2938 = vst [vmem:[%s5345_s19 + $0xf0] sm:$0xff] %v2906_v14  ;;  %v2907_v4 = vmul.f32 %v2874_v2, %v2683_v3  ;;  %v2681_v13 = vsel %vm2617_vm15, %v2585_v62, %v2649_v24 }
 0x21f   : > { %2936 = vst [vmem:[%s5345_s19 + $0xe0] sm:$0xff] %v2904_v33  ;;  %v2905_v26 = vmul.f32 %v2864_v44, %v2681_v13 }
 0x220   : > { %2939 = vst [vmem:[%s5345_s19 + $0xf8] sm:$0xff] %v2907_v4 }
 0x221   : > { %2937 = vst [vmem:[%s5345_s19 + $0xe8] sm:$0xff] %v2905_v26 }
 0x222 PF: > { %s14_s15 = sadd.s32 1, %s4364_s15  }
 0x223   : > { %p11_p4 = scmp.ge.s32.totalorder %s14_s15, 5  }
 0x225   :  { %13 = sbr.rel (!%p11_p4) target bundleno = 1 (0x1), region = 83 }

// kernel: discriminator_forward.18
= control target key start
LH: loop header
LB: loop body
LE: loop exit
PB: predicated region body
PF: predicated region fallthrough
CT: control target
= control target key end

     0   :  { %s459_s14 = smov 0   ;;  %s577_s0 = inlined_call_operand.<no memory space> [shape: f32[1,1], index: 0, kind: input, shape index: {}]   ;;  %s578_s1 = inlined_call_operand.vmem [shape: f32[2,8,2,8,256], index: 1, kind: input, shape index: {}]   ;;  %s579_s2 = inlined_call_operand.vmem [shape: f32[2,10,10,128], index: 2, kind: input, shape index: {}]   ;;  %s580_s3 = inlined_call_operand.vmem [shape: f32[2,10,10,128], index: 3, kind: output, shape index: {}]  }
   0x1   :  { %8 = sst [smem:[#allocation2]] %s577_s0 }
   0x2 LB: > { %s389_s15 = sadd.s32 4294967295, %s433_s14   ;;  %p393_p0 = scmp.ge.s32.totalorder %s433_s14, 1  ;;  %s433_s14 = sphi %s459_s14, %s14_s14  }
   0x3   : > { %p148_p1 = scmp.lt.s32.totalorder %s433_s14, 3 }
   0x5   : > { %p149_p2 = pnand %p393_p0, %p148_p1 }
   0x6   : > { %p177_p3 = scmp.lt.s32.totalorder (!%p149_p2), %s389_s15, 1  ;;  %s467_s16 = sld [smem:[#allocation2]] (!%p149_p2)  ;;  %v435_v3 = vmov (!%p149_p2), 0.0  }
   0x7   : > { %152 = sbr.rel (%p149_p2) target bundleno = 45 (0x2d), region = 32 }
   0xc   : > { %s266_s27 = ssub.f32 (!%p149_p2), 1.0, %s467_s16  ;;  %v523_v23 = vstv (!%p149_p2), %s467_s16 }
   0xe   : > { %s582_s15 = smov (!%p177_p3, %s389_s15), 1  ;;  %v514_v12 = vstv %s266_s27 }
   0xf   : > { %s416_s0 = sshll.u32 %s582_s15, 8  ;;  %s417_s17 = smul.u32 160, %s582_s15 }
  0x10   : > { %s472_s20 = scalar_lea.vmem %s578_s1, %s416_s0 }
  0x11   : > { %s477_s23 = scalar_lea.vmem %s580_s3, %s417_s17  ;;  %s482_s26 = scalar_lea.vmem %s579_s2, %s417_s17  ;;  %v193_v0 = vld [vmem:[%s472_s20] sm:$0xff]  ;;  %v194_v1 = vld [vmem:[%s472_s20 + $0x8] sm:$0xff]  ;;  %v195_v2 = vld [vmem:[%s472_s20 + $0x10] sm:$0xff] }
  0x12   : > { %295 = vst [vmem:[%s477_s23 + $0x10] sm:$0xff] %v435_v3  ;;  %293 = vst [vmem:[%s477_s23] sm:$0xff] %v435_v3  ;;  %v196_v4 = vld [vmem:[%s472_s20 + $0x18] sm:$0xff]  ;;  %v225_v5 = vadd.f32 %v194_v1, %v193_v0  ;;  %v197_v7 = vld [vmem:[%s472_s20 + $0x20] sm:$0xff] }
  0x13   : > { %294 = vst [vmem:[%s477_s23 + $0x8] sm:$0x3] %v435_v3  ;;  %296 = vst [vmem:[%s477_s23 + $0x18] sm:$0x3] %v435_v3  ;;  %v398_v6 = vld [vmem:[%s482_s26 + $0x11] sm:$0xff]  ;;  %v226_v8 = vadd.f32 %v196_v4, %v195_v2  ;;  %v198_v9 = vld [vmem:[%s472_s20 + $0x28] sm:$0xff] }
  0x14   : > { %297 = vst [vmem:[%s477_s23 + $0x20] sm:$0xff] %v435_v3  ;;  %298 = vst [vmem:[%s477_s23 + $0x28] sm:$0x3] %v435_v3  ;;  %v199_v10 = vld [vmem:[%s472_s20 + $0x30] sm:$0xff]  ;;  %v200_v11 = vld [vmem:[%s472_s20 + $0x38] sm:$0xff]  ;;  %v227_v13 = vadd.f32 %v198_v9, %v197_v7  ;;  %v277_v30 = vmul.f32 %v398_v6, %v514_v12 }
  0x15   : > { %299 = vst [vmem:[%s477_s23 + $0x30] sm:$0xff] %v435_v3  ;;  %300 = vst [vmem:[%s477_s23 + $0x38] sm:$0x3] %v435_v3  ;;  %v228_v14 = vadd.f32 %v200_v11, %v199_v10  ;;  %v399_v15 = vld [vmem:[%s482_s26 + $0x21] sm:$0xff]  ;;  %v241_v18 = vadd.f32 %v226_v8, %v225_v5  ;;  %v203_v19 = vld [vmem:[%s472_s20 + $0x50] sm:$0xff] }
  0x16   : > { %301 = vst [vmem:[%s477_s23 + $0x40] sm:$0xff] %v435_v3  ;;  %302 = vst [vmem:[%s477_s23 + $0x48] sm:$0x3] %v435_v3  ;;  %v201_v16 = vld [vmem:[%s472_s20 + $0x40] sm:$0xff]  ;;  %v202_v17 = vld [vmem:[%s472_s20 + $0x48] sm:$0xff]  ;;  %v278_v36 = vmul.f32 %v399_v15, %v514_v12 }
  0x17   : > { %303 = vst [vmem:[%s477_s23 + $0x50] sm:$0xff] %v435_v3  ;;  %304 = vst [vmem:[%s477_s23 + $0x58] sm:$0x3] %v435_v3  ;;  %v204_v20 = vld [vmem:[%s472_s20 + $0x58] sm:$0xff]  ;;  %v229_v21 = vadd.f32 %v202_v17, %v201_v16  ;;  %v242_v24 = vadd.f32 %v228_v14, %v227_v13  ;;  %v205_v26 = vld [vmem:[%s472_s20 + $0x60] sm:$0xff]  ;;  %v249_v29 = vmul.f32 0.25, %v241_v18 }
  0x18   : > { %305 = vst [vmem:[%s477_s23 + $0x60] sm:$0xff] %v435_v3  ;;  %306 = vst [vmem:[%s477_s23 + $0x68] sm:$0x3] %v435_v3  ;;  %v400_v22 = vld [vmem:[%s482_s26 + $0x31] sm:$0xff]  ;;  %v230_v25 = vadd.f32 %v204_v20, %v203_v19  ;;  %v206_v27 = vld [vmem:[%s472_s20 + $0x68] sm:$0xff] }
  0x19   : > { %307 = vst [vmem:[%s477_s23 + $0x70] sm:$0xff] %v435_v3  ;;  %308 = vst [vmem:[%s477_s23 + $0x78] sm:$0x3] %v435_v3  ;;  %v207_v28 = vld [vmem:[%s472_s20 + $0x70] sm:$0xff]  ;;  %v208_v31 = vld [vmem:[%s472_s20 + $0x78] sm:$0xff]  ;;  %v231_v32 = vadd.f32 %v206_v27, %v205_v26  ;;  %v250_v35 = vmul.f32 0.25, %v242_v24  ;;  %v258_v42 = vmul.f32 %v523_v23, %v249_v29  ;;  %v279_v43 = vmul.f32 %v400_v22, %v514_v12 }
  0x1a   : > { %309 = vst [vmem:[%s477_s23 + $0x80] sm:$0xff] %v435_v3  ;;  %310 = vst [vmem:[%s477_s23 + $0x88] sm:$0x3] %v435_v3  ;;  %v401_v33 = vld [vmem:[%s482_s26 + $0x41] sm:$0xff]  ;;  %v243_v37 = vadd.f32 %v230_v25, %v229_v21  ;;  %v232_v38 = vadd.f32 %v208_v31, %v207_v28  ;;  %v211_v40 = vld [vmem:[%s472_s20 + $0x90] sm:$0xff] }
  0x1b   : > { %311 = vst [vmem:[%s477_s23 + $0x90] sm:$0xff] %v435_v3  ;;  %312 = vst [vmem:[%s477_s23 + $0x98] sm:$0x3] %v435_v3  ;;  %v209_v34 = vld [vmem:[%s472_s20 + $0x80] sm:$0xff]  ;;  %v210_v39 = vld [vmem:[%s472_s20 + $0x88] sm:$0xff]  ;;  %v259_v49 = vmul.f32 %v523_v23, %v250_v35  ;;  %v280_v52 = vmul.f32 %v401_v33, %v514_v12  ;;  %v285_v56 = vadd.f32 %v277_v30, %v258_v42 }
  0x1c   : > { %v212_v41 = vld [vmem:[%s472_s20 + $0x98] sm:$0xff]  ;;  %v233_v44 = vadd.f32 %v210_v39, %v209_v34  ;;  %v213_v47 = vld [vmem:[%s472_s20 + $0xa0] sm:$0xff]  ;;  %v214_v48 = vld [vmem:[%s472_s20 + $0xa8] sm:$0xff]  ;;  %v251_v50 = vmul.f32 0.25, %v243_v37  ;;  %v244_v51 = vadd.f32 %v232_v38, %v231_v32 }
  0x1d   : > { %v234_v45 = vadd.f32 %v212_v41, %v211_v40  ;;  %v402_v46 = vld [vmem:[%s482_s26 + $0x51] sm:$0xff]  ;;  %v403_v55 = vld [vmem:[%s482_s26 + $0x61] sm:$0xff]  ;;  %v235_v58 = vadd.f32 %v214_v48, %v213_v47  ;;  %v286_v63 = vadd.f32 %v278_v36, %v259_v49  ;;  %406 = vst [vmem:[%s477_s23 + $0x11] sm:$0xff] %v285_v56 }
  0x1e   : > { %v215_v53 = vld [vmem:[%s472_s20 + $0xb0] sm:$0xff]  ;;  %v216_v54 = vld [vmem:[%s472_s20 + $0xb8] sm:$0xff]  ;;  %v217_v60 = vld [vmem:[%s472_s20 + $0xc0] sm:$0xff]  ;;  %v260_v0 = vmul.f32 %v523_v23, %v251_v50  ;;  %v252_v1 = vmul.f32 0.25, %v244_v51  ;;  %v281_v2 = vmul.f32 %v402_v46, %v514_v12  ;;  %v282_v16 = vmul.f32 %v403_v55, %v514_v12 }
  0x1f   : > { %v245_v57 = vadd.f32 %v234_v45, %v233_v44  ;;  %v236_v59 = vadd.f32 %v216_v54, %v215_v53  ;;  %v218_v61 = vld [vmem:[%s472_s20 + $0xc8] sm:$0xff]  ;;  %v219_v62 = vld [vmem:[%s472_s20 + $0xd0] sm:$0xff]  ;;  %v220_v3 = vld [vmem:[%s472_s20 + $0xd8] sm:$0xff]  ;;  %407 = vst [vmem:[%s477_s23 + $0x21] sm:$0xff] %v286_v63 }
  0x20   : > { %v404_v4 = vld [vmem:[%s482_s26 + $0x71] sm:$0xff]  ;;  %v221_v5 = vld [vmem:[%s472_s20 + $0xe0] sm:$0xff]  ;;  %v237_v8 = vadd.f32 %v218_v61, %v217_v60  ;;  %v238_v9 = vadd.f32 %v220_v3, %v219_v62  ;;  %v222_v10 = vld [vmem:[%s472_s20 + $0xe8] sm:$0xff]  ;;  %v287_v14 = vadd.f32 %v279_v43, %v260_v0  ;;  %v261_v15 = vmul.f32 %v523_v23, %v252_v1 }
  0x21   : > { %v253_v6 = vmul.f32 0.25, %v245_v57  ;;  %v246_v7 = vadd.f32 %v236_v59, %v235_v58  ;;  %v223_v11 = vld [vmem:[%s472_s20 + $0xf0] sm:$0xff]  ;;  %v224_v13 = vld [vmem:[%s472_s20 + $0xf8] sm:$0xff]  ;;  %v239_v17 = vadd.f32 %v222_v10, %v221_v5  ;;  %v283_v24 = vmul.f32 %v404_v4, %v514_v12  ;;  %v405_v25 = vld [vmem:[%s482_s26 + $0x81] sm:$0xff] }
  0x22   : > { %v247_v20 = vadd.f32 %v238_v9, %v237_v8  ;;  %v240_v21 = vadd.f32 %v224_v13, %v223_v11  ;;  %408 = vst [vmem:[%s477_s23 + $0x31] sm:$0xff] %v287_v14  ;;  %v288_v22 = vadd.f32 %v280_v52, %v261_v15  ;;  %v284_v33 = vmul.f32 %v405_v25, %v514_v12 }
  0x23   : > { %v262_v18 = vmul.f32 %v523_v23, %v253_v6  ;;  %v254_v19 = vmul.f32 0.25, %v246_v7 }
  0x24   : > { %v255_v28 = vmul.f32 0.25, %v247_v20  ;;  %v248_v29 = vadd.f32 %v240_v21, %v239_v17  ;;  %409 = vst [vmem:[%s477_s23 + $0x41] sm:$0xff] %v288_v22 }
  0x25   : > { %v289_v26 = vadd.f32 %v281_v2, %v262_v18  ;;  %v263_v27 = vmul.f32 %v523_v23, %v254_v19 }
  0x26   : > { %v264_v31 = vmul.f32 %v523_v23, %v255_v28  ;;  %v256_v32 = vmul.f32 0.25, %v248_v29 }
  0x27   : > { %410 = vst [vmem:[%s477_s23 + $0x51] sm:$0xff] %v289_v26  ;;  %v290_v30 = vadd.f32 %v282_v16, %v263_v27 }
  0x28   : > { %v291_v34 = vadd.f32 %v283_v24, %v264_v31  ;;  %v265_v35 = vmul.f32 %v523_v23, %v256_v32 }
  0x29   : > { %411 = vst [vmem:[%s477_s23 + $0x61] sm:$0xff] %v290_v30 }
  0x2a   : > { %412 = vst [vmem:[%s477_s23 + $0x71] sm:$0xff] %v291_v34  ;;  %v292_v36 = vadd.f32 %v284_v33, %v265_v35 }
  0x2c   : > { %413 = vst [vmem:[%s477_s23 + $0x81] sm:$0xff] %v292_v36 }
  0x2d PF: > { %s14_s14 = sadd.s32 1, %s433_s14  }
  0x2e   : > { %p11_p4 = scmp.ge.s32.totalorder %s14_s14, 4  }
  0x30   :  { %13 = sbr.rel (!%p11_p4) target bundleno = 2 (0x2), region = 67 }

// kernel: discriminator_forward.21
= control target key start
LH: loop header
LB: loop body
LE: loop exit
PB: predicated region body
PF: predicated region fallthrough
CT: control target
= control target key end

     0   :  { %s275_s6 = smov 0   ;;  %s304_s0 = inlined_call_operand.vmem [shape: f32[2,4,2,4,256], index: 0, kind: input, shape index: {}]   ;;  %s305_s1 = inlined_call_operand.vmem [shape: f32[2,6,6,128], index: 1, kind: output, shape index: {}]  }
   0x1 LB: > { %s231_s7 = sadd.s32 4294967295, %s262_s6   ;;  %p235_p0 = scmp.ge.s32.totalorder %s262_s6, 1  ;;  %s262_s6 = sphi %s275_s6, %s11_s6  }
   0x2   : > { %p87_p1 = scmp.lt.s32.totalorder %s262_s6, 3 }
   0x4   : > { %p88_p2 = pnand %p235_p0, %p87_p1 }
   0x5   : > { %p107_p3 = scmp.lt.s32.totalorder (!%p88_p2), %s231_s7, 1  ;;  %v264_v3 = vmov (!%p88_p2), 0.0  }
   0x6   : > { %91 = sbr.rel (%p88_p2) target bundleno = 30 (0x1e), region = 24 }
   0xd   : > { %s307_s7 = smov (!%p107_p3, %s231_s7), 1 }
   0xe   : > { %s246_s8 = smul.u32 48, %s307_s7  ;;  %s245_s9 = sshll.u32 %s307_s7, 6 }
   0xf   : > { %s111_s12 = scalar_lea.vmem %s304_s0, %s245_s9 }
  0x10   : > { %s289_s15 = scalar_lea.vmem %s305_s1, %s246_s8  ;;  %v117_v0 = vld [vmem:[%s111_s12] sm:$0xff]  ;;  %v118_v1 = vld [vmem:[%s111_s12 + $0x8] sm:$0xff]  ;;  %v119_v2 = vld [vmem:[%s111_s12 + $0x10] sm:$0xff] }
  0x11   : > { %166 = vst [vmem:[%s289_s15 + $0x8] sm:$0x3f] %v264_v3  ;;  %165 = vst [vmem:[%s289_s15] sm:$0x3f] %v264_v3  ;;  %v133_v4 = vrot.slane %v117_v0, 4  ;;  %v134_v5 = vrot.slane %v118_v1, 4  ;;  %v120_v6 = vld [vmem:[%s111_s12 + $0x18] sm:$0xff] }
  0x12   : > { %167 = vst [vmem:[%s289_s15 + $0x10] sm:$0x3f] %v264_v3  ;;  %168 = vst [vmem:[%s289_s15 + $0x18] sm:$0x3f] %v264_v3  ;;  %v135_v7 = vrot.slane %v119_v2, 4  ;;  %v121_v8 = vld [vmem:[%s111_s12 + $0x20] sm:$0xff] }
  0x13   : > { %169 = vst [vmem:[%s289_s15 + $0x20] sm:$0x3f] %v264_v3  ;;  %170 = vst [vmem:[%s289_s15 + $0x28] sm:$0x3f] %v264_v3  ;;  %v122_v9 = vld [vmem:[%s111_s12 + $0x28] sm:$0xff]  ;;  %v136_v10 = vrot.slane %v120_v6, 4  ;;  %v149_v15 = vadd.f32 %v133_v4, %v117_v0  ;;  %v150_v16 = vadd.f32 %v134_v5, %v118_v1 }
  0x14   : > { %v137_v11 = vrot.slane %v121_v8, 4  ;;  %v138_v12 = vrot.slane %v122_v9, 4  ;;  %v123_v13 = vld [vmem:[%s111_s12 + $0x30] sm:$0xff]  ;;  %v124_v14 = vld [vmem:[%s111_s12 + $0x38] sm:$0xff]  ;;  %v151_v17 = vadd.f32 %v135_v7, %v119_v2 }
  0x15   : > { %v139_v18 = vrot.slane %v123_v13, 4  ;;  %v152_v19 = vadd.f32 %v136_v10, %v120_v6  ;;  %v140_v22 = vrot.slane %v124_v14, 4  ;;  %v157_v23 = vadd.f32 %v150_v16, %v149_v15 }
  0x16   : > { %v153_v20 = vadd.f32 %v137_v11, %v121_v8  ;;  %v154_v21 = vadd.f32 %v138_v12, %v122_v9 }
  0x17   : > { %v155_v24 = vadd.f32 %v139_v18, %v123_v13  ;;  %v158_v25 = vadd.f32 %v152_v19, %v151_v17  ;;  %v156_v27 = vadd.f32 %v140_v22, %v124_v14  ;;  %v161_v28 = vmul.f32 0.25, %v157_v23 }
  0x18   : > { %v159_v26 = vadd.f32 %v154_v21, %v153_v20 }
  0x19   : > { %v162_v29 = vmul.f32 0.25, %v158_v25  ;;  %v160_v31 = vadd.f32 %v156_v27, %v155_v24  ;;  %239 = vst [vmem:[%s289_s15 + $0x9] sm:$0xf] %v161_v28 }
  0x1a   : > { %v163_v30 = vmul.f32 0.25, %v159_v26 }
  0x1b   : > { %240 = vst [vmem:[%s289_s15 + $0x11] sm:$0xf] %v162_v29  ;;  %v164_v32 = vmul.f32 0.25, %v160_v31 }
  0x1c   : > { %241 = vst [vmem:[%s289_s15 + $0x19] sm:$0xf] %v163_v30 }
  0x1d   : > { %242 = vst [vmem:[%s289_s15 + $0x21] sm:$0xf] %v164_v32 }
  0x1e PF: > { %s11_s6 = sadd.s32 1, %s262_s6  }
  0x1f   : > { %p8_p4 = scmp.ge.s32.totalorder %s11_s6, 4  }
  0x21   :  { %10 = sbr.rel (!%p8_p4) target bundleno = 1 (0x1), region = 55 }

// kernel: discriminator_forward.22
= control target key start
LH: loop header
LB: loop body
LE: loop exit
PB: predicated region body
PF: predicated region fallthrough
CT: control target
= control target key end

     0   :  { %vm20_vm0 = vcmask 1045504   ;;  %s397_s0 = inlined_call_operand.vmem [shape: f32[2,6,6,128], index: 0, kind: input, shape index: {}]   ;;  %s398_s1 = inlined_call_operand.vmem [shape: f32[2,6,6,128], index: 1, kind: output, shape index: {}]  }
   0x1   :  { %v8_v0 = vld [vmem:[%s397_s0] sm:$0x3f]  ;;  %v229_v1 = vld [vmem:[%s397_s0 + $0x8] sm:$0x3f]  ;;  %v234_v2 = vld [vmem:[%s397_s0 + $0x10] sm:$0x3f] }
   0x2   :  { %v239_v3 = vld [vmem:[%s397_s0 + $0x18] sm:$0x3f]  ;;  %v13_v4 = vld [vmem:[%s397_s0 + $0x28] sm:$0x3f]  ;;  %183 = vst [vmem:[%s398_s1] sm:$0x3f] %v8_v0  ;;  %v21_v12 = vsel %vm20_vm0, %v8_v0, 0.0 }
   0x3   :  { %v14_v5 = vld [vmem:[%s397_s0 + $0x30] sm:$0x3f]  ;;  %v253_v6 = vld [vmem:[%s397_s0 + $0x38] sm:$0x3f]  ;;  %v258_v7 = vld [vmem:[%s397_s0 + $0x40] sm:$0x3f] }
   0x4   :  { %188 = vst [vmem:[%s398_s1 + $0x28] sm:$0x3f] %v13_v4  ;;  %v266_v8 = vld [vmem:[%s397_s0 + $0x20] sm:$0x3f]  ;;  %v271_v9 = vld [vmem:[%s397_s0 + $0x48] sm:$0x3f] }
   0x5   :  { %v19_v10 = vld [vmem:[%s397_s0 + $0x58] sm:$0x3f]  ;;  %189 = vst [vmem:[%s398_s1 + $0x30] sm:$0x3f] %v14_v5  ;;  %v282_v11 = vld [vmem:[%s397_s0 + $0x50] sm:$0x3f] }
   0x6   :  { %v22_v13 = vsel %vm20_vm0, %v14_v5, 0.0  ;;  %v24_v14 = vsel %vm20_vm0, %v229_v1, 0.0  ;;  %v25_v15 = vsel %vm20_vm0, %v253_v6, 0.0  ;;  %194 = vst [vmem:[%s398_s1 + $0x58] sm:$0x3f] %v19_v10  ;;  %v27_v18 = vsel %vm20_vm0, %v234_v2, 0.0 }
   0x7   :  { %v23_v16 = vadd.f32 %v22_v13, %v21_v12  ;;  %v26_v17 = vadd.f32 %v25_v15, %v24_v14  ;;  %v28_v19 = vsel %vm20_vm0, %v258_v7, 0.0  ;;  %v30_v21 = vsel %vm20_vm0, %v239_v3, 0.0 }
   0x8   :  { %v29_v20 = vadd.f32 %v28_v19, %v27_v18  ;;  %v31_v22 = vsel %vm20_vm0, %v271_v9, 0.0  ;;  %v33_v23 = vsel %vm20_vm0, %v266_v8, 0.0  ;;  %v34_v25 = vsel %vm20_vm0, %v282_v11, 0.0 }
   0x9   :  { %v32_v24 = vadd.f32 %v31_v22, %v30_v21  ;;  %v36_v26 = vsel %vm20_vm0, %v13_v4, 0.0  ;;  %v37_v27 = vsel %vm20_vm0, %v19_v10, 0.0  ;;  %v35_v28 = vadd.f32 %v34_v25, %v33_v23 }
   0xa   :  { %v38_v29 = vadd.f32 %v37_v27, %v36_v26  ;;  %v40_v30 = vmul.f32 0.5, %v23_v16  ;;  %v41_v31 = vmul.f32 0.5, %v26_v17  ;;  %v42_v32 = vmul.f32 0.5, %v29_v20 }
   0xb   :  { %v43_v33 = vmul.f32 0.5, %v32_v24  ;;  %v44_v34 = vmul.f32 0.5, %v35_v28 }
   0xc   :  { %v45_v35 = vmul.f32 0.5, %v38_v29  ;;  %v46_v36 = vsub.f32 %v8_v0, %v40_v30  ;;  %v47_v37 = vsub.f32 %v229_v1, %v41_v31  ;;  %v48_v38 = vsub.f32 %v234_v2, %v42_v32 }
   0xd   :  { %v49_v39 = vsub.f32 %v239_v3, %v43_v33  ;;  %v52_v40 = vsub.f32 %v14_v5, %v40_v30  ;;  %v53_v41 = vsub.f32 %v253_v6, %v41_v31  ;;  %v50_v42 = vsub.f32 %v266_v8, %v44_v34 }
   0xe   :  { %v51_v43 = vsub.f32 %v13_v4, %v45_v35  ;;  %v54_v44 = vsub.f32 %v258_v7, %v42_v32  ;;  %v55_v45 = vsub.f32 %v271_v9, %v43_v33  ;;  %v56_v46 = vsub.f32 %v282_v11, %v44_v34 }
   0xf   :  { %v57_v47 = vsub.f32 %v19_v10, %v45_v35  ;;  %v58_v48 = vmul.f32 %v46_v36, %v46_v36  ;;  %v59_v49 = vmul.f32 %v47_v37, %v47_v37  ;;  %v60_v50 = vmul.f32 %v48_v38, %v48_v38 }
  0x10   :  { %v61_v51 = vmul.f32 %v49_v39, %v49_v39  ;;  %v62_v52 = vmul.f32 %v50_v42, %v50_v42  ;;  %v63_v53 = vmul.f32 %v51_v43, %v51_v43  ;;  %v64_v54 = vmul.f32 %v52_v40, %v52_v40 }
  0x11   :  { %v65_v55 = vmul.f32 %v53_v41, %v53_v41  ;;  %v66_v56 = vmul.f32 %v54_v44, %v54_v44  ;;  %v67_v57 = vmul.f32 %v55_v45, %v55_v45  ;;  %v68_v58 = vmul.f32 %v56_v46, %v56_v46 }
  0x12   :  { %v69_v59 = vmul.f32 %v57_v47, %v57_v47  ;;  %v70_v60 = vsel %vm20_vm0, %v58_v48, 0.0  ;;  %v73_v61 = vsel %vm20_vm0, %v59_v49, 0.0  ;;  %v71_v62 = vsel %vm20_vm0, %v64_v54, 0.0 }
  0x13   :  { %v74_v63 = vsel %vm20_vm0, %v65_v55, 0.0  ;;  %v76_v0 = vsel %vm20_vm0, %v60_v50, 0.0  ;;  %v77_v4 = vsel %vm20_vm0, %v66_v56, 0.0  ;;  %v72_v5 = vadd.f32 %v71_v62, %v70_v60 }
  0x14   :  { %v75_v10 = vadd.f32 %v74_v63, %v73_v61  ;;  %v78_v12 = vadd.f32 %v77_v4, %v76_v0  ;;  %v79_v13 = vsel %vm20_vm0, %v61_v51, 0.0  ;;  %v80_v14 = vsel %vm20_vm0, %v67_v57, 0.0 }
  0x15   :  { %v82_v15 = vsel %vm20_vm0, %v62_v52, 0.0  ;;  %v83_v16 = vsel %vm20_vm0, %v68_v58, 0.0  ;;  %v85_v17 = vsel %vm20_vm0, %v63_v53, 0.0  ;;  %v81_v18 = vadd.f32 %v80_v14, %v79_v13 }
  0x16   :  { %v86_v19 = vsel %vm20_vm0, %v69_v59, 0.0  ;;  %201 = vrsqrt.f32 %v72_v5  ;;  %v84_v20 = vadd.f32 %v83_v16, %v82_v15  ;;  %vm90_vm1 = vcmp.eq.f32.partialorder %v72_v5, inf }
  0x17   :  { %v87_v21 = vadd.f32 %v86_v19, %v85_v17  ;;  %203 = vrsqrt.f32 %v75_v10  ;;  %vm92_vm2 = vcmp.eq.f32.partialorder %v72_v5, 0.0  ;;  %v93_v23 = vand.u32 2147483648, %v72_v5 }
  0x18   :  { %205 = vrsqrt.f32 %v78_v12  ;;  %vm97_vm3 = vcmp.eq.f32.partialorder %v75_v10, inf  ;;  %vm99_vm4 = vcmp.eq.f32.partialorder %v75_v10, 0.0  ;;  %v100_v25 = vand.u32 2147483648, %v75_v10 }
  0x19   :  { %207 = vrsqrt.f32 %v81_v18  ;;  %vm104_vm5 = vcmp.eq.f32.partialorder %v78_v12, inf  ;;  %vm106_vm6 = vcmp.eq.f32.partialorder %v78_v12, 0.0  ;;  %v107_v27 = vand.u32 2147483648, %v78_v12 }
  0x1a   :  { %209 = vrsqrt.f32 %v84_v20  ;;  %vm111_vm7 = vcmp.eq.f32.partialorder %v81_v18, inf  ;;  %vm113_vm8 = vcmp.eq.f32.partialorder %v81_v18, 0.0  ;;  %v114_v28 = vand.u32 2147483648, %v81_v18 }
  0x1b   :  { %211 = vrsqrt.f32 %v87_v21  ;;  %vm118_vm9 = vcmp.eq.f32.partialorder %v84_v20, inf  ;;  %vm120_vm10 = vcmp.eq.f32.partialorder %v84_v20, 0.0  ;;  %v121_v35 = vand.u32 2147483648, %v84_v20 }
  0x1c   :  { %vm125_vm11 = vcmp.eq.f32.partialorder %v87_v21, inf  ;;  %vm127_vm12 = vcmp.eq.f32.partialorder %v87_v21, 0.0  ;;  %v128_v44 = vand.u32 2147483648, %v87_v21  ;;  %v153_v14 = vlaneseq }
  0x1e   :  { %v154_v15 = vshrl.u32 %v153_v14, 7  ;;  %v156_v16 = vand.u32 127, %v153_v14 }
  0x20   :  { %v202_v22 = vpop.eup %201  ;;  %vm157_vm13 = vcmp.eq.s32.totalorder %v156_v16, 16  ;;  %vm162_vm14 = vcmp.ge.s32.totalorder %v154_v15, 1 }
  0x21   :  { %v89_v24 = vmul.f32 %v202_v22, %v72_v5  ;;  %v204_v26 = vpop.eup %203  ;;  %vm164_vm15 = vmand %vm157_vm13, %vm162_vm14 }
  0x22   :  { %v206_v29 = vpop.eup %205  ;;  %v96_v31 = vmul.f32 %v204_v26, %v75_v10 }
  0x23   :  { %v91_v30 = vsel %vm90_vm1, %v72_v5, %v89_v24  ;;  %v208_v32 = vpop.eup %207  ;;  %v103_v34 = vmul.f32 %v206_v29, %v78_v12  ;;  %vm166_vm1 = vcmp.le.s32.totalorder %v154_v15, 4 }
  0x24   :  { %v94_v33 = vsel %vm92_vm2, %v93_v23, %v91_v30  ;;  %v210_v36 = vpop.eup %209  ;;  %v98_v37 = vsel %vm97_vm3, %v75_v10, %v96_v31  ;;  %v110_v38 = vmul.f32 %v208_v32, %v81_v18 }
  0x25   :  { %v130_v39 = vsel %vm20_vm0, %v94_v33, 0.0  ;;  %v212_v40 = vpop.eup %211  ;;  %v101_v41 = vsel %vm99_vm4, %v100_v25, %v98_v37  ;;  %v105_v42 = vsel %vm104_vm5, %v78_v12, %v103_v34  ;;  %v117_v43 = vmul.f32 %v210_v36, %v84_v20 }
  0x26   :  { %v108_v45 = vsel %vm106_vm6, %v107_v27, %v105_v42  ;;  %v112_v46 = vsel %vm111_vm7, %v81_v18, %v110_v38  ;;  %v124_v47 = vmul.f32 %v212_v40, %v87_v21  ;;  %v131_v48 = vsel %vm20_vm0, %v101_v41, 0.0 }
  0x27   :  { %v115_v49 = vsel %vm113_vm8, %v114_v28, %v112_v46  ;;  %v119_v50 = vsel %vm118_vm9, %v84_v20, %v117_v43  ;;  %v132_v51 = vadd.f32 %v131_v48, %v130_v39  ;;  %v133_v52 = vsel %vm20_vm0, %v108_v45, 0.0 }
  0x28   :  { %v122_v53 = vsel %vm120_vm10, %v121_v35, %v119_v50  ;;  %v126_v54 = vsel %vm125_vm11, %v87_v21, %v124_v47  ;;  %v135_v55 = vsel %vm20_vm0, %v115_v49, 0.0 }
  0x29   :  { %v129_v56 = vsel %vm127_vm12, %v128_v44, %v126_v54  ;;  %v134_v57 = vadd.f32 %v133_v52, %v132_v51  ;;  %v137_v58 = vsel %vm20_vm0, %v122_v53, 0.0 }
  0x2a   :  { %v139_v60 = vsel %vm20_vm0, %v129_v56, 0.0  ;;  %vm345_vm0 = vmand %vm164_vm15, %vm166_vm1 }
  0x2b   :  { %v136_v59 = vadd.f32 %v135_v55, %v134_v57 }
  0x2d   :  { %v138_v61 = vadd.f32 %v137_v58, %v136_v59 }
  0x2f   :  { %v140_v62 = vadd.f32 %v139_v60, %v138_v61 }
  0x31   :  { %141 = vadd.xlane.f32.xlu0 %v140_v62 }
  0xbe   :  { %v142_v63 = vpop.xlane.xlu0 %141 }
  0xbf   :  { %v143_v0 = vrot.slane %v142_v63, 4 }
  0xc1   :  { %v144_v4 = vadd.f32 %v143_v0, %v142_v63 }
  0xc3   :  { %v145_v5 = vrot.slane %v144_v4, 2 }
  0xc5   :  { %v146_v10 = vadd.f32 %v145_v5, %v144_v4 }
  0xc7   :  { %v147_v12 = vrot.slane %v146_v10, 1 }
  0xc9   :  { %v148_v13 = vadd.f32 %v147_v12, %v146_v10 }
  0xcb   :  { %199 = vpush %v148_v13 }
  0xfc   :  { %s200_s0 = spop %199 }
  0xfd   :  { %s152_s9 = smul.f32 0.00390625, %s200_s0 }
  0xff   :  { %v170_v18 = vstv %s152_s9 }
 0x100   :  { %v172_v19 = vsel %vm345_vm0, %v170_v18, %v229_v1  ;;  %v173_v20 = vsel %vm345_vm0, %v170_v18, %v234_v2  ;;  %v174_v21 = vsel %vm345_vm0, %v170_v18, %v239_v3  ;;  %v175_v22 = vsel %vm345_vm0, %v170_v18, %v266_v8 }
 0x101   :  { %v178_v23 = vsel %vm345_vm0, %v170_v18, %v253_v6  ;;  %v179_v1 = vsel %vm345_vm0, %v170_v18, %v258_v7  ;;  %v180_v2 = vsel %vm345_vm0, %v170_v18, %v271_v9  ;;  %v181_v3 = vsel %vm345_vm0, %v170_v18, %v282_v11  ;;  %184 = vst [vmem:[%s398_s1 + $0x8] sm:$0x3f] %v172_v19 }
 0x102   :  { %185 = vst [vmem:[%s398_s1 + $0x10] sm:$0x3f] %v173_v20  ;;  %186 = vst [vmem:[%s398_s1 + $0x18] sm:$0x3f] %v174_v21 }
 0x103   :  { %187 = vst [vmem:[%s398_s1 + $0x20] sm:$0x3f] %v175_v22  ;;  %190 = vst [vmem:[%s398_s1 + $0x38] sm:$0x3f] %v178_v23 }
 0x104   :  { %191 = vst [vmem:[%s398_s1 + $0x40] sm:$0x3f] %v179_v1  ;;  %192 = vst [vmem:[%s398_s1 + $0x48] sm:$0x3f] %v180_v2 }
 0x105   :  { %193 = vst [vmem:[%s398_s1 + $0x50] sm:$0x3f] %v181_v3 }

// kernel: discriminator_forward.19
= control target key start
LH: loop header
LB: loop body
LE: loop exit
PB: predicated region body
PF: predicated region fallthrough
CT: control target
= control target key end

     0   :  { %v3471_v0 = vmov 0.0   ;;  %vm3472_vm0 = vmmov 0   ;;  %s5389_s1 = inlined_call_operand.vmem [shape: f32[9,128,128], index: 1, kind: input, shape index: {}]   ;;  %s5390_s0 = inlined_call_operand.vmem [shape: f32[222,128], index: 0, kind: input, shape index: {}]   ;;  %s5391_s3 = inlined_call_operand.vmem [shape: f32[200,1], index: 3, kind: input, shape index: {}]   ;;  %s5392_s2 = inlined_call_operand.vmem [shape: f32[1,128], index: 2, kind: input, shape index: {}]   ;;  %s5393_s4 = inlined_call_operand.vmem [shape: f32[200,128], index: 4, kind: output, shape index: {}]  }
   0x1   :  { %2838 = vmatprep.subr.bf16.mxu0 %v3471_v0  ;;  %3450 = vmatprep.subr.bf16.mxu1 %v3471_v0  ;;  %v2345_v1 = vld [vmem:[%s5389_s1 + $0x80] sm:$0xff]  ;;  %v2346_v2 = vld [vmem:[%s5389_s1 + $0x88] sm:$0xff]  ;;  %v2347_v3 = vld [vmem:[%s5389_s1 + $0x90] sm:$0xff] }
   0x2   :  { %v139_v4 = vpack.c.bf16 %v2346_v2, %v2345_v1  ;;  %v2348_v5 = vld [vmem:[%s5389_s1 + $0x98] sm:$0xff]  ;;  %2854 = vmatprep.mubr.msk.bf16.mxu0 %vm3472_vm0, %v3471_v0  ;;  %2882 = vmatprep.mubr.msk.bf16.mxu1 %vm3472_vm0, %v3471_v0  ;;  %v2349_v7 = vld [vmem:[%s5389_s1 + $0xa0] sm:$0xff]  ;;  %v2350_v8 = vld [vmem:[%s5389_s1 + $0xa8] sm:$0xff] }
   0x3   :  { %v140_v6 = vpack.c.bf16 %v2348_v5, %v2347_v3  ;;  %v141_v9 = vpack.c.bf16 %v2350_v8, %v2349_v7  ;;  %v2351_v10 = vld [vmem:[%s5389_s1 + $0xb0] sm:$0xff]  ;;  %v2352_v11 = vld [vmem:[%s5389_s1 + $0xb8] sm:$0xff]  ;;  %v2353_v13 = vld [vmem:[%s5389_s1 + $0xc0] sm:$0xff] }
   0x4   :  { %2839 = vmatpush3.bf16.msra.mxu0 %v139_v4  ;;  %3458 = vmatpush3.bf16.msra.mxu1 %v139_v4  ;;  %v142_v12 = vpack.c.bf16 %v2352_v11, %v2351_v10  ;;  %v2354_v14 = vld [vmem:[%s5389_s1 + $0xc8] sm:$0xff]  ;;  %v2355_v16 = vld [vmem:[%s5389_s1 + $0xd0] sm:$0xff]  ;;  %v2356_v17 = vld [vmem:[%s5389_s1 + $0xd8] sm:$0xff] }
   0x5   :  { %2840 = vmatprep.subr.bf16.mxu0 %v3471_v0  ;;  %3451 = vmatprep.subr.bf16.mxu1 %v3471_v0  ;;  %v143_v15 = vpack.c.bf16 %v2354_v14, %v2353_v13  ;;  %v144_v18 = vpack.c.bf16 %v2356_v17, %v2355_v16  ;;  %v2357_v19 = vld [vmem:[%s5389_s1 + $0xe0] sm:$0xff]  ;;  %v2358_v20 = vld [vmem:[%s5389_s1 + $0xe8] sm:$0xff]  ;;  %v2359_v22 = vld [vmem:[%s5389_s1 + $0xf0] sm:$0xff] }
   0x6   :  { %v145_v21 = vpack.c.bf16 %v2358_v20, %v2357_v19  ;;  %v2360_v23 = vld [vmem:[%s5389_s1 + $0xf8] sm:$0xff]  ;;  %v2320_v24 = vld [vmem:[%s5390_s0 + $0x1] sm:$0xff]  ;;  %v2321_v26 = vld [vmem:[%s5390_s0 + $0x9] sm:$0xff] }
   0x7   :  { %v146_v25 = vpack.c.bf16 %v2360_v23, %v2359_v22  ;;  %v2334_v27 = vld [vmem:[%s5390_s0 + $0x71] sm:$0xff]  ;;  %v2335_v28 = vld [vmem:[%s5390_s0 + $0x79] sm:$0xff]  ;;  %v2387_v30 = vld [vmem:[%s5389_s1 + $0x108] sm:$0xff]  ;;  %v109_v33 = vpack.c.bf16 %v2321_v26, %v2320_v24 }
   0x8   :  { %2841 = vmatpush3.bf16.msra.mxu0 %v140_v6  ;;  %3459 = vmatpush3.bf16.msra.mxu1 %v140_v6  ;;  %v2386_v29 = vld [vmem:[%s5389_s1 + $0x100] sm:$0xff]  ;;  %v59_v32 = vld [vmem:[%s5389_s1 + $0x8] sm:$0xff]  ;;  %v116_v34 = vpack.c.bf16 %v2335_v28, %v2334_v27  ;;  %v2388_v37 = vld [vmem:[%s5389_s1 + $0x110] sm:$0xff] }
   0x9   :  { %2842 = vmatprep.subr.bf16.mxu0 %v3471_v0  ;;  %3452 = vmatprep.subr.bf16.mxu1 %v3471_v0  ;;  %v58_v31 = vld [vmem:[%s5389_s1] sm:$0xff]  ;;  %v476_v35 = vpack.c.bf16 %v2387_v30, %v2386_v29  ;;  %v2389_v38 = vld [vmem:[%s5389_s1 + $0x118] sm:$0xff]  ;;  %v60_v39 = vld [vmem:[%s5389_s1 + $0x10] sm:$0xff] }
   0xa   :  { %v74_v36 = vpack.c.bf16 %v59_v32, %v58_v31  ;;  %v61_v40 = vld [vmem:[%s5389_s1 + $0x18] sm:$0xff]  ;;  %v2336_v43 = vld [vmem:[%s5390_s0 + $0x81] sm:$0xff]  ;;  %v2337_v44 = vld [vmem:[%s5390_s0 + $0x89] sm:$0xff]  ;;  %v477_v45 = vpack.c.bf16 %v2389_v38, %v2388_v37 }
   0xb   :  { %v2322_v41 = vld [vmem:[%s5390_s0 + $0x11] sm:$0xff]  ;;  %v2323_v42 = vld [vmem:[%s5390_s0 + $0x19] sm:$0xff]  ;;  %v75_v46 = vpack.c.bf16 %v61_v40, %v60_v39  ;;  %v2391_v48 = vld [vmem:[%s5389_s1 + $0x128] sm:$0xff]  ;;  %v117_v52 = vpack.c.bf16 %v2337_v44, %v2336_v43 }
   0xc   :  { %2843 = vmatpush3.bf16.msra.mxu0 %v141_v9  ;;  %3460 = vmatpush3.bf16.msra.mxu1 %v141_v9  ;;  %v2390_v47 = vld [vmem:[%s5389_s1 + $0x120] sm:$0xff]  ;;  %v63_v50 = vld [vmem:[%s5389_s1 + $0x28] sm:$0xff]  ;;  %v110_v51 = vpack.c.bf16 %v2323_v42, %v2322_v41  ;;  %v2392_v55 = vld [vmem:[%s5389_s1 + $0x130] sm:$0xff] }
   0xd   :  { %2844 = vmatprep.subr.bf16.mxu0 %v3471_v0  ;;  %3453 = vmatprep.subr.bf16.mxu1 %v3471_v0  ;;  %v62_v49 = vld [vmem:[%s5389_s1 + $0x20] sm:$0xff]  ;;  %v478_v53 = vpack.c.bf16 %v2391_v48, %v2390_v47  ;;  %v2393_v56 = vld [vmem:[%s5389_s1 + $0x138] sm:$0xff]  ;;  %v64_v57 = vld [vmem:[%s5389_s1 + $0x30] sm:$0xff] }
   0xe   :  { %v76_v54 = vpack.c.bf16 %v63_v50, %v62_v49  ;;  %v65_v58 = vld [vmem:[%s5389_s1 + $0x38] sm:$0xff]  ;;  %v2324_v59 = vld [vmem:[%s5390_s0 + $0x21] sm:$0xff]  ;;  %v2325_v60 = vld [vmem:[%s5390_s0 + $0x29] sm:$0xff]  ;;  %v479_v63 = vpack.c.bf16 %v2393_v56, %v2392_v55 }
   0xf   :  { %v2338_v61 = vld [vmem:[%s5390_s0 + $0x91] sm:$0xff]  ;;  %v2339_v62 = vld [vmem:[%s5390_s0 + $0x99] sm:$0xff]  ;;  %v77_v1 = vpack.c.bf16 %v65_v58, %v64_v57  ;;  %v2395_v3 = vld [vmem:[%s5389_s1 + $0x148] sm:$0xff]  ;;  %v111_v6 = vpack.c.bf16 %v2325_v60, %v2324_v59 }
  0x10   :  { %2845 = vmatpush3.bf16.msra.mxu0 %v142_v12  ;;  %3461 = vmatpush3.bf16.msra.mxu1 %v142_v12  ;;  %v2394_v2 = vld [vmem:[%s5389_s1 + $0x140] sm:$0xff]  ;;  %v67_v5 = vld [vmem:[%s5389_s1 + $0x48] sm:$0xff]  ;;  %v118_v7 = vpack.c.bf16 %v2339_v62, %v2338_v61  ;;  %v2396_v10 = vld [vmem:[%s5389_s1 + $0x150] sm:$0xff] }
  0x11   :  { %2846 = vmatprep.subr.bf16.mxu0 %v3471_v0  ;;  %3454 = vmatprep.subr.bf16.mxu1 %v3471_v0  ;;  %v66_v4 = vld [vmem:[%s5389_s1 + $0x40] sm:$0xff]  ;;  %v480_v8 = vpack.c.bf16 %v2395_v3, %v2394_v2  ;;  %v2397_v11 = vld [vmem:[%s5389_s1 + $0x158] sm:$0xff]  ;;  %v68_v12 = vld [vmem:[%s5389_s1 + $0x50] sm:$0xff] }
  0x12   :  { %v78_v9 = vpack.c.bf16 %v67_v5, %v66_v4  ;;  %v69_v13 = vld [vmem:[%s5389_s1 + $0x58] sm:$0xff]  ;;  %v2340_v16 = vld [vmem:[%s5390_s0 + $0xa1] sm:$0xff]  ;;  %v2341_v17 = vld [vmem:[%s5390_s0 + $0xa9] sm:$0xff] }
  0x13   :  { %v2326_v14 = vld [vmem:[%s5390_s0 + $0x31] sm:$0xff]  ;;  %v79_v19 = vpack.c.bf16 %v69_v13, %v68_v12  ;;  %v70_v20 = vld [vmem:[%s5389_s1 + $0x60] sm:$0xff]  ;;  %v2399_v23 = vld [vmem:[%s5389_s1 + $0x168] sm:$0xff] }
  0x14   :  { %2847 = vmatpush3.bf16.msra.mxu0 %v143_v15  ;;  %3462 = vmatpush3.bf16.msra.mxu1 %v143_v15  ;;  %v2327_v15 = vld [vmem:[%s5390_s0 + $0x39] sm:$0xff]  ;;  %v3726_v26 = vld [vmem:[%s5390_s0 + $0xa] sm:$0xff]  ;;  %v3773_v40 = vld [vmem:[%s5390_s0 + $0x22] sm:$0xff] }
  0x15   :  { %2848 = vmatprep.subr.bf16.mxu0 %v3471_v0  ;;  %3455 = vmatprep.subr.bf16.mxu1 %v3471_v0  ;;  %v2398_v22 = vld [vmem:[%s5389_s1 + $0x160] sm:$0xff]  ;;  %v112_v24 = vpack.c.bf16 %v2327_v15, %v2326_v14  ;;  %v3731_v27 = vld [vmem:[%s5390_s0 + $0x12] sm:$0xff]  ;;  %v3797_v49 = vld [vmem:[%s5390_s0 + $0x2a] sm:$0xff] }
  0x16   :  { %v482_v29 = vpack.c.bf16 %v2399_v23, %v2398_v22  ;;  %v72_v30 = vld [vmem:[%s5389_s1 + $0x70] sm:$0xff]  ;;  %v672_v31 = vpack.c.bf16 %v3731_v27, %v3726_v26  ;;  %v73_v32 = vld [vmem:[%s5389_s1 + $0x78] sm:$0xff]  ;;  %v2344_v48 = vld [vmem:[%s5390_s0 + $0xc1] sm:$0xff] }
  0x17   :  { %v2342_v37 = vld [vmem:[%s5390_s0 + $0xb1] sm:$0xff]  ;;  %v2343_v38 = vld [vmem:[%s5390_s0 + $0xb9] sm:$0xff]  ;;  %v81_v41 = vpack.c.bf16 %v73_v32, %v72_v30  ;;  %v3817_v56 = vld [vmem:[%s5390_s0 + $0x42] sm:$0xff] }
  0x18   :  { %2849 = vmatpush3.bf16.msra.mxu0 %v144_v18  ;;  %3463 = vmatpush3.bf16.msra.mxu1 %v144_v18  ;;  %v481_v18 = vpack.c.bf16 %v2397_v11, %v2396_v10  ;;  %v3768_v39 = vld [vmem:[%s5390_s0 + $0x1a] sm:$0xff]  ;;  %v3802_v50 = vld [vmem:[%s5390_s0 + $0x32] sm:$0xff]  ;;  %v2333_v57 = vld [vmem:[%s5390_s0 + $0x69] sm:$0xff] }
  0x19   :  { %2850 = vmatprep.subr.bf16.mxu0 %v3471_v0  ;;  %3456 = vmatprep.subr.bf16.mxu1 %v3471_v0  ;;  %v673_v43 = vpack.c.bf16 %v3773_v40, %v3768_v39  ;;  %v2331_v47 = vld [vmem:[%s5390_s0 + $0x59] sm:$0xff]  ;;  %v21_v59 = vld [vmem:[%s5390_s0 + $0x8] sm:$0xff]  ;;  %v2429_v3 = vld [vmem:[%s5389_s1 + $0x190] sm:$0xff] }
  0x1a   :  { %v3812_v55 = vld [vmem:[%s5390_s0 + $0x3a] sm:$0xff]  ;;  %v2428_v62 = vld [vmem:[%s5389_s1 + $0x188] sm:$0xff]  ;;  %v2433_v22 = vld [vmem:[%s5389_s1 + $0x1b0] sm:$0xff] }
  0x1b   :  { %v20_v58 = vld [vmem:[%s5390_s0] sm:$0xff]  ;;  %v675_v60 = vpack.c.bf16 %v3817_v56, %v3812_v55  ;;  %v2430_v4 = vld [vmem:[%s5389_s1 + $0x198] sm:$0xff]  ;;  %v3849_v5 = vld [vmem:[%s5390_s0 + $0x4a] sm:$0xff] }
  0x1c   :  { %2851 = vmatpush3.bf16.msra.mxu0 %v145_v21  ;;  %3464 = vmatpush3.bf16.msra.mxu1 %v145_v21  ;;  %v71_v21 = vld [vmem:[%s5389_s1 + $0x68] sm:$0xff]  ;;  %v2427_v61 = vld [vmem:[%s5389_s1 + $0x180] sm:$0xff]  ;;  %v703_v13 = vpack.c.bf16 %v2430_v4, %v2429_v3  ;;  %v2434_v23 = vld [vmem:[%s5389_s1 + $0x1b8] sm:$0xff] }
  0x1d   :  { %2852 = vmatprep.subr.bf16.mxu0 %v3471_v0  ;;  %3457 = vmatprep.subr.bf16.mxu1 %v3471_v0  ;;  %v80_v28 = vpack.c.bf16 %v71_v21, %v70_v20  ;;  %v702_v2 = vpack.c.bf16 %v2428_v62, %v2427_v61  ;;  %v2468_v11 = vld [vmem:[%s5389_s1 + $0x200] sm:$0xff]  ;;  %v2469_v12 = vld [vmem:[%s5389_s1 + $0x208] sm:$0xff]  ;;  %v2471_v20 = vld [vmem:[%s5389_s1 + $0x218] sm:$0xff] }
  0x1e   :  { %v2476_v61 = vld [vmem:[%s5389_s1 + $0x240] sm:$0xff]  ;;  %v2477_v62 = vld [vmem:[%s5389_s1 + $0x248] sm:$0xff] }
  0x1f   :  { %v2439_v3 = vld [vmem:[%s5389_s1 + $0x1e0] sm:$0xff]  ;;  %v2440_v4 = vld [vmem:[%s5389_s1 + $0x1e8] sm:$0xff] }
  0x20   :  { %2853 = vmatpush3.bf16.msra.mxu0 %v146_v25  ;;  %3465 = vmatpush3.bf16.msra.mxu1 %v146_v25  ;;  %v119_v25 = vpack.c.bf16 %v2341_v17, %v2340_v16  ;;  %v2431_v16 = vld [vmem:[%s5389_s1 + $0x1a0] sm:$0xff]  ;;  %v2432_v17 = vld [vmem:[%s5389_s1 + $0x1a8] sm:$0xff] }
  0x21   :  { %2974 = vmatprep.subr.bf16.mxu0 %v3471_v0  ;;  %2906 = vmatprep.subr.bf16.mxu1 %v3471_v0  ;;  %v704_v21 = vpack.c.bf16 %v2432_v17, %v2431_v16  ;;  %v28_v16 = vld [vmem:[%s5390_s0 + $0x40] sm:$0xff]  ;;  %v29_v17 = vld [vmem:[%s5390_s0 + $0x48] sm:$0xff] }
  0x23   :  { %2855 = vmatmul.mubr.bf16.vlgmr.msra.gmra.mrb[0].mxu0 %v109_v33  ;;  %2883 = vmatmul.mubr.bf16.vlgmr.msra.gmra.mrb[0].mxu1 %v116_v34  ;;  %v2400_v33 = vld [vmem:[%s5389_s1 + $0x170] sm:$0xff]  ;;  %v2401_v34 = vld [vmem:[%s5389_s1 + $0x178] sm:$0xff] }
  0x24   :  { %2975 = vmatpush3.bf16.msra.mxu0 %v476_v35  ;;  %2858 = vmatprep.mubr.msk.bf16.mxu0 %vm3472_vm0, %v3471_v0  ;;  %v2328_v35 = vld [vmem:[%s5390_s0 + $0x41] sm:$0xff]  ;;  %v483_v42 = vpack.c.bf16 %v2401_v34, %v2400_v33 }
  0x25   :  { %2886 = vmatprep.mubr.msk.bf16.mxu1 %vm3472_vm0, %v3471_v0  ;;  %2907 = vmatpush3.bf16.msra.mxu1 %v74_v36  ;;  %v2329_v36 = vld [vmem:[%s5390_s0 + $0x49] sm:$0xff]  ;;  %v2472_v33 = vld [vmem:[%s5389_s1 + $0x220] sm:$0xff] }
  0x26   :  { %2976 = vmatprep.subr.bf16.mxu0 %v3471_v0  ;;  %2908 = vmatprep.subr.bf16.mxu1 %v3471_v0  ;;  %v113_v44 = vpack.c.bf16 %v2329_v36, %v2328_v35  ;;  %v2473_v34 = vld [vmem:[%s5389_s1 + $0x228] sm:$0xff]  ;;  %v705_v35 = vpack.c.bf16 %v2434_v23, %v2433_v22  ;;  %v49_v23 = vpack.c.bf16 %v29_v17, %v28_v16  ;;  %v42_v16 = vld [vmem:[%s5390_s0 + $0xb0] sm:$0xff]  ;;  %v43_v17 = vld [vmem:[%s5390_s0 + $0xb8] sm:$0xff] }
  0x28   :  { %2977 = vmatpush3.bf16.msra.mxu0 %v477_v45  ;;  %v120_v45 = vpack.c.bf16 %v2343_v38, %v2342_v37  ;;  %v447_v37 = vpack.c.bf16 %v3768_v39, %v3731_v27  ;;  %v2435_v38 = vld [vmem:[%s5389_s1 + $0x1c0] sm:$0xff]  ;;  %v2551_v27 = vld [vmem:[%s5389_s1 + $0x308] sm:$0xff] }
  0x29   :  { %2909 = vmatpush3.bf16.msra.mxu1 %v75_v46  ;;  %2978 = vmatprep.subr.bf16.mxu0 %v3471_v0  ;;  %v2330_v46 = vld [vmem:[%s5390_s0 + $0x51] sm:$0xff]  ;;  %v2446_v39 = vld [vmem:[%s5390_s0 + $0x23] sm:$0xff] }
  0x2a   :  { %2910 = vmatprep.subr.bf16.mxu1 %v3471_v0 }
  0x2b   :  { %2859 = vmatmul.mubr.bf16.gmra.mrb[4].mxu0 %v110_v51  ;;  %2887 = vmatmul.mubr.bf16.gmra.mrb[4].mxu1 %v117_v52  ;;  %v674_v51 = vpack.c.bf16 %v3802_v50, %v3797_v49  ;;  %v114_v52 = vpack.c.bf16 %v2331_v47, %v2330_v46  ;;  %v3946_v46 = vld [vmem:[%s5390_s0 + $0x6a] sm:$0xff] }
  0x2c   :  { %2862 = vmatprep.mubr.msk.bf16.mxu0 %vm3472_vm0, %v3471_v0  ;;  %2890 = vmatprep.mubr.msk.bf16.mxu1 %vm3472_vm0, %v3471_v0 }
  0x2d   :  { %2979 = vmatpush3.bf16.msra.mxu0 %v478_v53  ;;  %2911 = vmatpush3.bf16.msra.mxu1 %v76_v54  ;;  %v121_v53 = vpack.c.bf16 %v2344_v48, %v2344_v48  ;;  %v2332_v54 = vld [vmem:[%s5390_s0 + $0x61] sm:$0xff]  ;;  %v3951_v48 = vld [vmem:[%s5390_s0 + $0x72] sm:$0xff] }
  0x2e   :  { %2980 = vmatprep.subr.bf16.mxu0 %v3471_v0  ;;  %2912 = vmatprep.subr.bf16.mxu1 %v3471_v0 }
  0x31   :  { %2981 = vmatpush3.bf16.msra.mxu0 %v479_v63  ;;  %2913 = vmatpush3.bf16.msra.mxu1 %v77_v1  ;;  %v115_v63 = vpack.c.bf16 %v2333_v57, %v2332_v54  ;;  %v45_v1 = vpack.c.bf16 %v21_v59, %v20_v58  ;;  %v26_v54 = vld [vmem:[%s5390_s0 + $0x30] sm:$0xff]  ;;  %v27_v57 = vld [vmem:[%s5390_s0 + $0x38] sm:$0xff]  ;;  %v678_v58 = vpack.c.bf16 %v3951_v48, %v3946_v46 }
  0x32   :  { %2982 = vmatprep.subr.bf16.mxu0 %v3471_v0  ;;  %2914 = vmatprep.subr.bf16.mxu1 %v3471_v0 }
  0x33   :  { %2863 = vmatmul.mubr.bf16.gmra.mrb[8].mxu0 %v111_v6  ;;  %2891 = vmatmul.mubr.bf16.gmra.mrb[8].mxu1 %v118_v7  ;;  %v3854_v6 = vld [vmem:[%s5390_s0 + $0x52] sm:$0xff] }
  0x34   :  { %2866 = vmatprep.mubr.msk.bf16.mxu0 %vm3472_vm0, %v3471_v0  ;;  %2894 = vmatprep.mubr.msk.bf16.mxu1 %vm3472_vm0, %v3471_v0  ;;  %v22_v7 = vld [vmem:[%s5390_s0 + $0x10] sm:$0xff]  ;;  %v676_v10 = vpack.c.bf16 %v3854_v6, %v3849_v5 }
  0x35   :  { %2983 = vmatpush3.bf16.msra.mxu0 %v480_v8  ;;  %2915 = vmatpush3.bf16.msra.mxu1 %v78_v9  ;;  %v23_v8 = vld [vmem:[%s5390_s0 + $0x18] sm:$0xff]  ;;  %v2361_v9 = vld [vmem:[%s5390_s0 + $0x2] sm:$0xff] }
  0x36   :  { %2984 = vmatprep.subr.bf16.mxu0 %v3471_v0  ;;  %2916 = vmatprep.subr.bf16.mxu1 %v3471_v0  ;;  %v46_v14 = vpack.c.bf16 %v23_v8, %v22_v7  ;;  %v446_v15 = vpack.c.bf16 %v3726_v26, %v2361_v9  ;;  %v932_v7 = vpack.c.bf16 %v2477_v62, %v2476_v61  ;;  %v3992_v8 = vld [vmem:[%s5390_s0 + $0x7a] sm:$0xff]  ;;  %v2478_v9 = vld [vmem:[%s5389_s1 + $0x250] sm:$0xff] }
  0x37   :  { %v453_v62 = vpack.c.bf16 %v3992_v8, %v3951_v48  ;;  %v2550_v26 = vld [vmem:[%s5389_s1 + $0x300] sm:$0xff] }
  0x38   :  { %v2458_v48 = vld [vmem:[%s5390_s0 + $0x83] sm:$0xff] }
  0x39   :  { %2985 = vmatpush3.bf16.msra.mxu0 %v481_v18  ;;  %2917 = vmatpush3.bf16.msra.mxu1 %v79_v19  ;;  %v928_v18 = vpack.c.bf16 %v2469_v12, %v2468_v11  ;;  %v2470_v19 = vld [vmem:[%s5389_s1 + $0x210] sm:$0xff]  ;;  %v2479_v11 = vld [vmem:[%s5389_s1 + $0x258] sm:$0xff]  ;;  %v708_v12 = vpack.c.bf16 %v2440_v4, %v2439_v3 }
  0x3a   :  { %2918 = vmatprep.subr.bf16.mxu1 %v3471_v0  ;;  %2986 = vmatprep.subr.bf16.mxu0 %v3471_v0  ;;  %v929_v30 = vpack.c.bf16 %v2471_v20, %v2470_v19  ;;  %v933_v19 = vpack.c.bf16 %v2479_v11, %v2478_v9  ;;  %v2480_v20 = vld [vmem:[%s5389_s1 + $0x260] sm:$0xff]  ;;  %v41_v9 = vld [vmem:[%s5390_s0 + $0xa8] sm:$0xff]  ;;  %v4122_v11 = vld [vmem:[%s5390_s0 + $0x92] sm:$0xff] }
  0x3b   :  { %2867 = vmatmul.mubr.bf16.gmra.mrb[12].mxu0 %v112_v24  ;;  %2895 = vmatmul.mubr.bf16.gmra.mrb[12].mxu1 %v119_v25  ;;  %v3901_v24 = vld [vmem:[%s5390_s0 + $0x5a] sm:$0xff]  ;;  %v3906_v25 = vld [vmem:[%s5390_s0 + $0x62] sm:$0xff] }
  0x3c   :  { %2870 = vmatprep.mubr.msk.bf16.mxu0 %vm3472_vm0, %v3471_v0  ;;  %2898 = vmatprep.mubr.msk.bf16.mxu1 %vm3472_vm0, %v3471_v0  ;;  %v677_v32 = vpack.c.bf16 %v3906_v25, %v3901_v24 }
  0x3d   :  { %2919 = vmatpush3.bf16.msra.mxu1 %v80_v28  ;;  %2987 = vmatpush3.bf16.msra.mxu0 %v482_v29  ;;  %v24_v28 = vld [vmem:[%s5390_s0 + $0x20] sm:$0xff]  ;;  %v25_v29 = vld [vmem:[%s5390_s0 + $0x28] sm:$0xff] }
  0x3e   :  { %2920 = vmatprep.subr.bf16.mxu1 %v3471_v0  ;;  %2988 = vmatprep.subr.bf16.mxu0 %v3471_v0  ;;  %v47_v36 = vpack.c.bf16 %v25_v29, %v24_v28  ;;  %v449_v28 = vpack.c.bf16 %v3812_v55, %v3802_v50  ;;  %v2448_v50 = vld [vmem:[%s5390_s0 + $0x33] sm:$0xff]  ;;  %v2449_v55 = vld [vmem:[%s5390_s0 + $0x3b] sm:$0xff] }
  0x41   :  { %2921 = vmatpush3.bf16.msra.mxu1 %v81_v41  ;;  %2989 = vmatpush3.bf16.msra.mxu0 %v483_v42  ;;  %v2436_v41 = vld [vmem:[%s5389_s1 + $0x1c8] sm:$0xff]  ;;  %v930_v42 = vpack.c.bf16 %v2473_v34, %v2472_v33  ;;  %v2483_v33 = vld [vmem:[%s5389_s1 + $0x278] sm:$0xff]  ;;  %v30_v34 = vld [vmem:[%s5390_s0 + $0x50] sm:$0xff] }
  0x42   :  { %3042 = vmatprep.subr.bf16.mxu1 %v3471_v0  ;;  %3110 = vmatprep.subr.bf16.mxu0 %v3471_v0  ;;  %v706_v47 = vpack.c.bf16 %v2436_v41, %v2435_v38  ;;  %v450_v38 = vpack.c.bf16 %v3849_v5, %v3817_v56  ;;  %v32_v41 = vld [vmem:[%s5390_s0 + $0x60] sm:$0xff] }
  0x43   :  { %2871 = vmatmul.mubr.bf16.gmra.mrb[16].mxu0 %v113_v44  ;;  %2899 = vmatmul.mubr.bf16.gmra.mrb[16].mxu1 %v120_v45  ;;  %v2474_v44 = vld [vmem:[%s5389_s1 + $0x230] sm:$0xff]  ;;  %v2475_v45 = vld [vmem:[%s5389_s1 + $0x238] sm:$0xff]  ;;  %v2450_v56 = vld [vmem:[%s5390_s0 + $0x43] sm:$0xff] }
  0x44   :  { %2874 = vmatprep.mubr.msk.bf16.mxu0 %vm3472_vm0, %v3471_v0  ;;  %2902 = vmatprep.mubr.msk.bf16.mxu1 %vm3472_vm0, %v3471_v0  ;;  %v931_v59 = vpack.c.bf16 %v2475_v45, %v2474_v44  ;;  %v451_v45 = vpack.c.bf16 %v3901_v24, %v3854_v6  ;;  %v2453_v6 = vld [vmem:[%s5390_s0 + $0x5b] sm:$0xff]  ;;  %v2455_v24 = vld [vmem:[%s5390_s0 + $0x6b] sm:$0xff] }
  0x4b   :  { %2875 = vmatmul.mubr.bf16.gmra.mrb[20].mxu0 %v114_v52  ;;  %2903 = vmatmul.mubr.bf16.gmra.mrb[20].mxu1 %v121_v53  ;;  %v2437_v52 = vld [vmem:[%s5389_s1 + $0x1d0] sm:$0xff]  ;;  %v2438_v53 = vld [vmem:[%s5389_s1 + $0x1d8] sm:$0xff] }
  0x4c   :  { %2878 = vmatprep.mubr.msk.bf16.mxu0 %vm3472_vm0, %v3471_v0  ;;  %2922 = vmatprep.mubr.msk.bf16.mxu1 %vm3472_vm0, %v3471_v0 }
  0x53   :  { %2879 = vmatmul.mubr.bf16.gmra.mrb[24].mxu0 %v115_v63  ;;  %2923 = vmatmul.mubr.bf16.vlgmr.msra.gmra.mrb[24].mxu1 %v45_v1  ;;  %v707_v63 = vpack.c.bf16 %v2438_v53, %v2437_v52  ;;  %v48_v1 = vpack.c.bf16 %v27_v57, %v26_v54  ;;  %v35_v52 = vld [vmem:[%s5390_s0 + $0x78] sm:$0xff]  ;;  %v452_v54 = vpack.c.bf16 %v3946_v46, %v3906_v25  ;;  %v36_v57 = vld [vmem:[%s5390_s0 + $0x80] sm:$0xff] }
  0x54   :  { %2926 = vmatprep.mubr.msk.bf16.mxu1 %vm3472_vm0, %v3471_v0  ;;  %2990 = vmatprep.mubr.msk.bf16.mxu0 %vm3472_vm0, %v3471_v0  ;;  %v2456_v25 = vld [vmem:[%s5390_s0 + $0x73] sm:$0xff]  ;;  %v2457_v46 = vld [vmem:[%s5390_s0 + $0x7b] sm:$0xff] }
  0x55   :  { %3043 = vmatpush3.bf16.msra.mxu1 %v702_v2  ;;  %v448_v2 = vpack.c.bf16 %v3797_v49, %v3773_v40  ;;  %v2447_v49 = vld [vmem:[%s5390_s0 + $0x2b] sm:$0xff] }
  0x56   :  { %3044 = vmatprep.subr.bf16.mxu1 %v3471_v0 }
  0x59   :  { %3045 = vmatpush3.bf16.msra.mxu1 %v703_v13  ;;  %v4003_v13 = vld [vmem:[%s5390_s0 + $0x82] sm:$0xff] }
  0x5a   :  { %3046 = vmatprep.subr.bf16.mxu1 %v3471_v0 }
  0x5b   :  { %2927 = vmatmul.mubr.bf16.gmra.mrb[28].mxu1 %v46_v14  ;;  %2991 = vmatmul.mubr.bf16.vlgmr.msra.gmra.mrb[28].mxu0 %v446_v15  ;;  %v2441_v14 = vld [vmem:[%s5389_s1 + $0x1f0] sm:$0xff]  ;;  %v2442_v15 = vld [vmem:[%s5389_s1 + $0x1f8] sm:$0xff] }
  0x5c   :  { %3111 = vmatpush3.bf16.msra.mxu0 %v928_v18  ;;  %2930 = vmatprep.mubr.msk.bf16.mxu1 %vm3472_vm0, %v3471_v0  ;;  %v679_v18 = vpack.c.bf16 %v4003_v13, %v3992_v8  ;;  %v709_v22 = vpack.c.bf16 %v2442_v15, %v2441_v14 }
  0x5d   :  { %2994 = vmatprep.mubr.msk.bf16.mxu0 %vm3472_vm0, %v3471_v0  ;;  %3112 = vmatprep.subr.bf16.mxu0 %v3471_v0 }
  0x5e   :  { %3047 = vmatpush3.bf16.msra.mxu1 %v704_v21  ;;  %v2481_v21 = vld [vmem:[%s5389_s1 + $0x268] sm:$0xff] }
  0x5f   :  { %3048 = vmatprep.subr.bf16.mxu1 %v3471_v0  ;;  %v934_v29 = vpack.c.bf16 %v2481_v21, %v2480_v20  ;;  %v4149_v20 = vld [vmem:[%s5390_s0 + $0xaa] sm:$0xff]  ;;  %v56_v21 = vpack.c.bf16 %v43_v17, %v42_v16  ;;  %v2557_v17 = vld [vmem:[%s5389_s1 + $0x338] sm:$0xff] }
  0x60   :  { %3113 = vmatpush3.bf16.msra.mxu0 %v929_v30  ;;  %v2482_v30 = vld [vmem:[%s5389_s1 + $0x270] sm:$0xff] }
  0x61   :  { %3114 = vmatprep.subr.bf16.mxu0 %v3471_v0  ;;  %v2556_v16 = vld [vmem:[%s5389_s1 + $0x330] sm:$0xff] }
  0x62   :  { %3049 = vmatpush3.bf16.msra.mxu1 %v705_v35  ;;  %v31_v35 = vld [vmem:[%s5390_s0 + $0x58] sm:$0xff] }
  0x63   :  { %2931 = vmatmul.mubr.bf16.gmra.mrb[32].mxu1 %v47_v36  ;;  %2995 = vmatmul.mubr.bf16.gmra.mrb[32].mxu0 %v447_v37  ;;  %v935_v36 = vpack.c.bf16 %v2483_v33, %v2482_v30  ;;  %v50_v37 = vpack.c.bf16 %v31_v35, %v30_v34  ;;  %v4179_v34 = vld [vmem:[%s5390_s0 + $0xc2] sm:$0xff] }
  0x64   :  { %2934 = vmatprep.mubr.msk.bf16.mxu1 %vm3472_vm0, %v3471_v0  ;;  %2998 = vmatprep.mubr.msk.bf16.mxu0 %vm3472_vm0, %v3471_v0  ;;  %v2509_v35 = vld [vmem:[%s5389_s1 + $0x280] sm:$0xff] }
  0x65   :  { %3115 = vmatpush3.bf16.msra.mxu0 %v930_v42  ;;  %3050 = vmatprep.subr.bf16.mxu1 %v3471_v0  ;;  %v33_v42 = vld [vmem:[%s5390_s0 + $0x68] sm:$0xff] }
  0x66   :  { %3116 = vmatprep.subr.bf16.mxu0 %v3471_v0  ;;  %3051 = vmatpush3.bf16.msra.mxu1 %v706_v47  ;;  %v51_v44 = vpack.c.bf16 %v33_v42, %v32_v41  ;;  %v34_v47 = vld [vmem:[%s5390_s0 + $0x70] sm:$0xff]  ;;  %v2512_v42 = vld [vmem:[%s5389_s1 + $0x298] sm:$0xff] }
  0x67   :  { %3052 = vmatprep.subr.bf16.mxu1 %v3471_v0  ;;  %v52_v53 = vpack.c.bf16 %v35_v52, %v34_v47  ;;  %v2511_v41 = vld [vmem:[%s5389_s1 + $0x290] sm:$0xff]  ;;  %v2513_v52 = vld [vmem:[%s5389_s1 + $0x2a0] sm:$0xff] }
  0x69   :  { %3117 = vmatpush3.bf16.msra.mxu0 %v931_v59  ;;  %v37_v59 = vld [vmem:[%s5390_s0 + $0x88] sm:$0xff] }
  0x6a   :  { %3118 = vmatprep.subr.bf16.mxu0 %v3471_v0  ;;  %3053 = vmatpush3.bf16.msra.mxu1 %v707_v63  ;;  %v53_v61 = vpack.c.bf16 %v37_v59, %v36_v57  ;;  %v38_v63 = vld [vmem:[%s5390_s0 + $0x90] sm:$0xff]  ;;  %v2553_v59 = vld [vmem:[%s5389_s1 + $0x318] sm:$0xff] }
  0x6b   :  { %2935 = vmatmul.mubr.bf16.gmra.mrb[36].mxu1 %v48_v1  ;;  %2999 = vmatmul.mubr.bf16.gmra.mrb[36].mxu0 %v448_v2  ;;  %v39_v1 = vld [vmem:[%s5390_s0 + $0x98] sm:$0xff]  ;;  %v4105_v2 = vld [vmem:[%s5390_s0 + $0x8a] sm:$0xff] }
  0x6c   :  { %2938 = vmatprep.mubr.msk.bf16.mxu1 %vm3472_vm0, %v3471_v0  ;;  %3002 = vmatprep.mubr.msk.bf16.mxu0 %vm3472_vm0, %v3471_v0  ;;  %v54_v3 = vpack.c.bf16 %v39_v1, %v38_v63  ;;  %v454_v4 = vpack.c.bf16 %v4105_v2, %v4003_v13  ;;  %v2552_v57 = vld [vmem:[%s5389_s1 + $0x310] sm:$0xff]  ;;  %v2516_v63 = vld [vmem:[%s5389_s1 + $0x2b8] sm:$0xff] }
  0x6d   :  { %3119 = vmatpush3.bf16.msra.mxu0 %v932_v7  ;;  %3054 = vmatprep.subr.bf16.mxu1 %v3471_v0  ;;  %v40_v7 = vld [vmem:[%s5390_s0 + $0xa0] sm:$0xff]  ;;  %v1381_v40 = vpack.c.bf16 %v2553_v59, %v2552_v57  ;;  %v2564_v57 = vld [vmem:[%s5389_s1 + $0x370] sm:$0xff]  ;;  %v2565_v59 = vld [vmem:[%s5389_s1 + $0x378] sm:$0xff] }
  0x6e   :  { %3120 = vmatprep.subr.bf16.mxu0 %v3471_v0  ;;  %3055 = vmatpush3.bf16.msra.mxu1 %v708_v12  ;;  %v4127_v12 = vld [vmem:[%s5390_s0 + $0x9a] sm:$0xff]  ;;  %v55_v14 = vpack.c.bf16 %v41_v9, %v40_v7 }
  0x6f   :  { %3056 = vmatprep.subr.bf16.mxu1 %v3471_v0  ;;  %v455_v15 = vpack.c.bf16 %v4127_v12, %v4122_v11  ;;  %v2445_v1 = vld [vmem:[%s5390_s0 + $0x1b] sm:$0xff] }
  0x70   :  { %v899_v7 = vpack.c.bf16 %v2446_v39, %v2445_v1  ;;  %v2517_v9 = vld [vmem:[%s5389_s1 + $0x2c0] sm:$0xff] }
  0x71   :  { %3121 = vmatpush3.bf16.msra.mxu0 %v933_v19  ;;  %v4144_v19 = vld [vmem:[%s5390_s0 + $0xa2] sm:$0xff] }
  0x72   :  { %3122 = vmatprep.subr.bf16.mxu0 %v3471_v0  ;;  %3057 = vmatpush3.bf16.msra.mxu1 %v709_v22  ;;  %v456_v22 = vpack.c.bf16 %v4149_v20, %v4144_v19 }
  0x73   :  { %2939 = vmatmul.mubr.bf16.gmra.mrb[40].mxu1 %v49_v23  ;;  %3003 = vmatmul.mubr.bf16.gmra.mrb[40].mxu0 %v449_v28  ;;  %v44_v23 = vld [vmem:[%s5390_s0 + $0xc0] sm:$0xff]  ;;  %v4163_v28 = vld [vmem:[%s5390_s0 + $0xb2] sm:$0xff] }
  0x74   :  { %2942 = vmatprep.mubr.msk.bf16.mxu1 %vm3472_vm0, %v3471_v0  ;;  %3006 = vmatprep.mubr.msk.bf16.mxu0 %vm3472_vm0, %v3471_v0  ;;  %v57_v30 = vpack.c.bf16 %v44_v23, %v44_v23  ;;  %v2520_v23 = vld [vmem:[%s5389_s1 + $0x2d8] sm:$0xff] }
  0x75   :  { %3123 = vmatpush3.bf16.msra.mxu0 %v934_v29  ;;  %3178 = vmatprep.subr.bf16.mxu1 %v3471_v0  ;;  %v4168_v29 = vld [vmem:[%s5390_s0 + $0xba] sm:$0xff] }
  0x76   :  { %3124 = vmatprep.subr.bf16.mxu0 %v3471_v0  ;;  %v457_v33 = vpack.c.bf16 %v4168_v29, %v4163_v28 }
  0x79   :  { %3125 = vmatpush3.bf16.msra.mxu0 %v935_v36  ;;  %v2510_v36 = vld [vmem:[%s5389_s1 + $0x288] sm:$0xff] }
  0x7a   :  { %3246 = vmatprep.subr.bf16.mxu0 %v3471_v0 }
  0x7b   :  { %2943 = vmatmul.mubr.bf16.gmra.mrb[44].mxu1 %v50_v37  ;;  %3007 = vmatmul.mubr.bf16.gmra.mrb[44].mxu0 %v450_v38  ;;  %v458_v37 = vpack.c.bf16 %v4179_v34, %v4179_v34  ;;  %v1154_v38 = vpack.c.bf16 %v2510_v36, %v2509_v35  ;;  %v900_v36 = vpack.c.bf16 %v2448_v50, %v2447_v49 }
  0x7c   :  { %2946 = vmatprep.mubr.msk.bf16.mxu1 %vm3472_vm0, %v3471_v0  ;;  %3010 = vmatprep.mubr.msk.bf16.mxu0 %vm3472_vm0, %v3471_v0 }
  0x83   :  { %2947 = vmatmul.mubr.bf16.gmra.mrb[48].mxu1 %v51_v44  ;;  %3011 = vmatmul.mubr.bf16.gmra.mrb[48].mxu0 %v451_v45  ;;  %v2443_v44 = vld [vmem:[%s5390_s0 + $0xb] sm:$0xff]  ;;  %v2444_v45 = vld [vmem:[%s5390_s0 + $0x13] sm:$0xff] }
  0x84   :  { %2950 = vmatprep.mubr.msk.bf16.mxu1 %vm3472_vm0, %v3471_v0  ;;  %3014 = vmatprep.mubr.msk.bf16.mxu0 %vm3472_vm0, %v3471_v0  ;;  %v898_v47 = vpack.c.bf16 %v2444_v45, %v2443_v44  ;;  %v2561_v44 = vld [vmem:[%s5389_s1 + $0x358] sm:$0xff] }
  0x8b   :  { %2951 = vmatmul.mubr.bf16.gmra.mrb[52].mxu1 %v52_v53  ;;  %3015 = vmatmul.mubr.bf16.gmra.mrb[52].mxu0 %v452_v54  ;;  %v2514_v53 = vld [vmem:[%s5389_s1 + $0x2a8] sm:$0xff]  ;;  %v1380_v54 = vpack.c.bf16 %v2551_v27, %v2550_v26  ;;  %v2523_v26 = vld [vmem:[%s5389_s1 + $0x2f0] sm:$0xff]  ;;  %v2524_v27 = vld [vmem:[%s5389_s1 + $0x2f8] sm:$0xff] }
  0x8c   :  { %2954 = vmatprep.mubr.msk.bf16.mxu1 %vm3472_vm0, %v3471_v0  ;;  %3018 = vmatprep.mubr.msk.bf16.mxu0 %vm3472_vm0, %v3471_v0 }
  0x93   :  { %2955 = vmatmul.mubr.bf16.gmra.mrb[56].mxu1 %v53_v61  ;;  %3019 = vmatmul.mubr.bf16.gmra.mrb[56].mxu0 %v453_v62  ;;  %v1156_v61 = vpack.c.bf16 %v2514_v53, %v2513_v52  ;;  %v2515_v62 = vld [vmem:[%s5389_s1 + $0x2b0] sm:$0xff]  ;;  %v1161_v52 = vpack.c.bf16 %v2524_v27, %v2523_v26  ;;  %v901_v53 = vpack.c.bf16 %v2450_v56, %v2449_v55 }
  0x94   :  { %2958 = vmatprep.mubr.msk.bf16.mxu1 %vm3472_vm0, %v3471_v0  ;;  %3022 = vmatprep.mubr.msk.bf16.mxu0 %vm3472_vm0, %v3471_v0  ;;  %v683_v56 = vpack.c.bf16 %v4179_v34, %v4168_v29  ;;  %v2465_v29 = vld [vmem:[%s5390_s0 + $0xbb] sm:$0xff]  ;;  %v2466_v34 = vld [vmem:[%s5390_s0 + $0xc3] sm:$0xff] }
  0x9b   :  { %2959 = vmatmul.mubr.bf16.gmra.mrb[60].mxu1 %v54_v3  ;;  %3023 = vmatmul.mubr.bf16.gmra.mrb[60].mxu0 %v454_v4  ;;  %v2555_v3 = vld [vmem:[%s5389_s1 + $0x328] sm:$0xff]  ;;  %v1157_v4 = vpack.c.bf16 %v2516_v63, %v2515_v62  ;;  %v2452_v62 = vld [vmem:[%s5390_s0 + $0x53] sm:$0xff]  ;;  %v1387_v63 = vpack.c.bf16 %v2565_v59, %v2564_v57 }
  0x9c   :  { %2962 = vmatprep.mubr.msk.bf16.mxu1 %vm3472_vm0, %v3471_v0  ;;  %3026 = vmatprep.mubr.msk.bf16.mxu0 %vm3472_vm0, %v3471_v0 }
  0xa3   :  { %2963 = vmatmul.mubr.bf16.gmra.mrb[64].mxu1 %v55_v14  ;;  %3027 = vmatmul.mubr.bf16.gmra.mrb[64].mxu0 %v455_v15  ;;  %v2518_v14 = vld [vmem:[%s5389_s1 + $0x2c8] sm:$0xff] }
  0xa4   :  { %2966 = vmatprep.mubr.msk.bf16.mxu1 %vm3472_vm0, %v3471_v0  ;;  %3030 = vmatprep.mubr.msk.bf16.mxu0 %vm3472_vm0, %v3471_v0 }
  0xab   :  { %2967 = vmatmul.mubr.bf16.gmra.mrb[68].mxu1 %v56_v21  ;;  %3031 = vmatmul.mubr.bf16.gmra.mrb[68].mxu0 %v456_v22  ;;  %v1158_v21 = vpack.c.bf16 %v2518_v14, %v2517_v9  ;;  %v2519_v22 = vld [vmem:[%s5389_s1 + $0x2d0] sm:$0xff] }
  0xac   :  { %2970 = vmatprep.mubr.msk.bf16.mxu1 %vm3472_vm0, %v3471_v0  ;;  %3034 = vmatprep.mubr.msk.bf16.mxu0 %vm3472_vm0, %v3471_v0  ;;  %v1159_v35 = vpack.c.bf16 %v2520_v23, %v2519_v22  ;;  %v2459_v9 = vld [vmem:[%s5390_s0 + $0x8b] sm:$0xff] }
  0xb3   :  { %2971 = vmatmul.mubr.bf16.gmra.mrb[72].mxu1 %v57_v30  ;;  %3035 = vmatmul.mubr.bf16.gmra.mrb[72].mxu0 %v457_v33  ;;  %v2558_v30 = vld [vmem:[%s5389_s1 + $0x340] sm:$0xff]  ;;  %v2559_v33 = vld [vmem:[%s5389_s1 + $0x348] sm:$0xff] }
  0xb4   :  { %3038 = vmatprep.mubr.msk.bf16.mxu0 %vm3472_vm0, %v3471_v0  ;;  %3058 = vmatprep.mubr.msk.bf16.mxu1 %vm3472_vm0, %v3471_v0 }
  0xbb   :  { %3039 = vmatmul.mubr.bf16.gmra.mrb[76].mxu0 %v458_v37  ;;  %3059 = vmatmul.mubr.bf16.vlgmr.msra.gmra.mrb[76].mxu1 %v672_v31  ;;  %v1155_v31 = vpack.c.bf16 %v2512_v42, %v2511_v41  ;;  %v2521_v37 = vld [vmem:[%s5389_s1 + $0x2e0] sm:$0xff]  ;;  %v1384_v41 = vpack.c.bf16 %v2559_v33, %v2558_v30  ;;  %v2560_v42 = vld [vmem:[%s5389_s1 + $0x350] sm:$0xff] }
  0xbc   :  { %3062 = vmatprep.mubr.msk.bf16.mxu1 %vm3472_vm0, %v3471_v0  ;;  %3126 = vmatprep.mubr.msk.bf16.mxu0 %vm3472_vm0, %v3471_v0 }
  0xbd   :  { %3179 = vmatpush3.bf16.msra.mxu1 %v1154_v38  ;;  %v2522_v38 = vld [vmem:[%s5389_s1 + $0x2e8] sm:$0xff] }
  0xbe   :  { %3180 = vmatprep.subr.bf16.mxu1 %v3471_v0  ;;  %v1160_v45 = vpack.c.bf16 %v2522_v38, %v2521_v37 }
  0xc1   :  { %3181 = vmatpush3.bf16.msra.mxu1 %v1155_v31  ;;  %v2562_v31 = vld [vmem:[%s5389_s1 + $0x360] sm:$0xff] }
  0xc2   :  { %3182 = vmatprep.subr.bf16.mxu1 %v3471_v0 }
  0xc3   :  { %3063 = vmatmul.mubr.bf16.gmra.mrb[80].mxu1 %v673_v43  ;;  %3127 = vmatmul.mubr.bf16.vlgmr.msra.gmra.mrb[80].mxu0 %v898_v47  ;;  %v2554_v43 = vld [vmem:[%s5389_s1 + $0x320] sm:$0xff]  ;;  %v2563_v47 = vld [vmem:[%s5389_s1 + $0x368] sm:$0xff] }
  0xc4   :  { %3247 = vmatpush3.bf16.msra.mxu0 %v1380_v54  ;;  %3066 = vmatprep.mubr.msk.bf16.mxu1 %vm3472_vm0, %v3471_v0  ;;  %v1382_v15 = vpack.c.bf16 %v2555_v3, %v2554_v43  ;;  %v1386_v54 = vpack.c.bf16 %v2563_v47, %v2562_v31 }
  0xc5   :  { %3130 = vmatprep.mubr.msk.bf16.mxu0 %vm3472_vm0, %v3471_v0  ;;  %3248 = vmatprep.subr.bf16.mxu0 %v3471_v0 }
  0xc6   :  { %3183 = vmatpush3.bf16.msra.mxu1 %v1156_v61  ;;  %v2451_v61 = vld [vmem:[%s5390_s0 + $0x4b] sm:$0xff] }
  0xc7   :  { %3184 = vmatprep.subr.bf16.mxu1 %v3471_v0  ;;  %v902_v5 = vpack.c.bf16 %v2452_v62, %v2451_v61 }
  0xc8   :  { %3249 = vmatpush3.bf16.msra.mxu0 %v1381_v40  ;;  %v905_v40 = vpack.c.bf16 %v2458_v48, %v2457_v46  ;;  %v2485_v46 = vld [vmem:[%s5390_s0 + $0x14] sm:$0xff] }
  0xc9   :  { %3250 = vmatprep.subr.bf16.mxu0 %v3471_v0 }
  0xca   :  { %3185 = vmatpush3.bf16.msra.mxu1 %v1157_v4 }
  0xcb   :  { %3067 = vmatmul.mubr.bf16.gmra.mrb[84].mxu1 %v674_v51  ;;  %3131 = vmatmul.mubr.bf16.gmra.mrb[84].mxu0 %v899_v7  ;;  %v1383_v51 = vpack.c.bf16 %v2557_v17, %v2556_v16  ;;  %v681_v17 = vpack.c.bf16 %v4144_v19, %v4127_v12  ;;  %v2462_v12 = vld [vmem:[%s5390_s0 + $0xa3] sm:$0xff] }
  0xcc   :  { %3070 = vmatprep.mubr.msk.bf16.mxu1 %vm3472_vm0, %v3471_v0  ;;  %3134 = vmatprep.mubr.msk.bf16.mxu0 %vm3472_vm0, %v3471_v0 }
  0xcd   :  { %3251 = vmatpush3.bf16.msra.mxu0 %v1382_v15  ;;  %3186 = vmatprep.subr.bf16.mxu1 %v3471_v0 }
  0xce   :  { %3252 = vmatprep.subr.bf16.mxu0 %v3471_v0  ;;  %3187 = vmatpush3.bf16.msra.mxu1 %v1158_v21 }
  0xcf   :  { %3188 = vmatprep.subr.bf16.mxu1 %v3471_v0 }
  0xd1   :  { %3253 = vmatpush3.bf16.msra.mxu0 %v1383_v51  ;;  %v2461_v51 = vld [vmem:[%s5390_s0 + $0x9b] sm:$0xff] }
  0xd2   :  { %3254 = vmatprep.subr.bf16.mxu0 %v3471_v0  ;;  %3189 = vmatpush3.bf16.msra.mxu1 %v1159_v35  ;;  %v907_v37 = vpack.c.bf16 %v2462_v12, %v2461_v51  ;;  %v2486_v51 = vld [vmem:[%s5390_s0 + $0x1c] sm:$0xff]  ;;  %v4531_v12 = vld [vmem:[%s5390_s0 + $0x24] sm:$0xff] }
  0xd3   :  { %3071 = vmatmul.mubr.bf16.gmra.mrb[88].mxu1 %v675_v60  ;;  %3135 = vmatmul.mubr.bf16.gmra.mrb[88].mxu0 %v900_v36  ;;  %v1385_v60 = vpack.c.bf16 %v2561_v44, %v2560_v42  ;;  %v682_v36 = vpack.c.bf16 %v4163_v28, %v4149_v20  ;;  %v2464_v20 = vld [vmem:[%s5390_s0 + $0xb3] sm:$0xff] }
  0xd4   :  { %3074 = vmatprep.mubr.msk.bf16.mxu1 %vm3472_vm0, %v3471_v0  ;;  %3138 = vmatprep.mubr.msk.bf16.mxu0 %vm3472_vm0, %v3471_v0 }
  0xd5   :  { %3255 = vmatpush3.bf16.msra.mxu0 %v1384_v41  ;;  %3190 = vmatprep.subr.bf16.mxu1 %v3471_v0 }
  0xd6   :  { %3256 = vmatprep.subr.bf16.mxu0 %v3471_v0  ;;  %3191 = vmatpush3.bf16.msra.mxu1 %v1160_v45  ;;  %v2463_v45 = vld [vmem:[%s5390_s0 + $0xab] sm:$0xff] }
  0xd7   :  { %3192 = vmatprep.subr.bf16.mxu1 %v3471_v0 }
  0xd9   :  { %3257 = vmatpush3.bf16.msra.mxu0 %v1385_v60  ;;  %v908_v60 = vpack.c.bf16 %v2464_v20, %v2463_v45 }
  0xda   :  { %3258 = vmatprep.subr.bf16.mxu0 %v3471_v0  ;;  %3193 = vmatpush3.bf16.msra.mxu1 %v1161_v52 }
  0xdb   :  { %3075 = vmatmul.mubr.bf16.gmra.mrb[92].mxu1 %v676_v10  ;;  %3139 = vmatmul.mubr.bf16.gmra.mrb[92].mxu0 %v901_v53  ;;  %v2454_v10 = vld [vmem:[%s5390_s0 + $0x63] sm:$0xff] }
  0xdc   :  { %3078 = vmatprep.mubr.msk.bf16.mxu1 %vm3472_vm0, %v3471_v0  ;;  %3142 = vmatprep.mubr.msk.bf16.mxu0 %vm3472_vm0, %v3471_v0  ;;  %v903_v1 = vpack.c.bf16 %v2454_v10, %v2453_v6 }
  0xdd   :  { %3259 = vmatpush3.bf16.msra.mxu0 %v1386_v54  ;;  %3314 = vmatprep.subr.bf16.mxu1 %v3471_v0  ;;  %v2426_v54 = vld [vmem:[%s5390_s0 + $0xca] sm:$0xff] }
  0xde   :  { %3260 = vmatprep.subr.bf16.mxu0 %v3471_v0 }
  0xe1   :  { %3261 = vmatpush3.bf16.msra.mxu0 %v1387_v63  ;;  %v684_v63 = vpack.c.bf16 %v2426_v54, %v2426_v54 }
  0xe2   :  { %3382 = vmatprep.subr.bf16.mxu0 %v3471_v0 }
  0xe3   :  { %3079 = vmatmul.mubr.bf16.gmra.mrb[96].mxu1 %v677_v32  ;;  %3143 = vmatmul.mubr.bf16.gmra.mrb[96].mxu0 %v902_v5  ;;  %v904_v32 = vpack.c.bf16 %v2456_v25, %v2455_v24  ;;  %v909_v5 = vpack.c.bf16 %v2466_v34, %v2465_v29  ;;  %v2467_v25 = vld [vmem:[%s5390_s0 + $0xcb] sm:$0xff] }
  0xe4   :  { %3082 = vmatprep.mubr.msk.bf16.mxu1 %vm3472_vm0, %v3471_v0  ;;  %3146 = vmatprep.mubr.msk.bf16.mxu0 %vm3472_vm0, %v3471_v0 }
  0xeb   :  { %3083 = vmatmul.mubr.bf16.gmra.mrb[100].mxu1 %v678_v58  ;;  %3147 = vmatmul.mubr.bf16.gmra.mrb[100].mxu0 %v903_v1 }
  0xec   :  { %3086 = vmatprep.mubr.msk.bf16.mxu1 %vm3472_vm0, %v3471_v0  ;;  %3150 = vmatprep.mubr.msk.bf16.mxu0 %vm3472_vm0, %v3471_v0 }
  0xf3   :  { %3087 = vmatmul.mubr.bf16.gmra.mrb[104].mxu1 %v679_v18  ;;  %3151 = vmatmul.mubr.bf16.gmra.mrb[104].mxu0 %v904_v32  ;;  %v680_v18 = vpack.c.bf16 %v4122_v11, %v4105_v2  ;;  %v2460_v2 = vld [vmem:[%s5390_s0 + $0x93] sm:$0xff] }
  0xf4   :  { %3090 = vmatprep.mubr.msk.bf16.mxu1 %vm3472_vm0, %v3471_v0  ;;  %3154 = vmatprep.mubr.msk.bf16.mxu0 %vm3472_vm0, %v3471_v0  ;;  %v906_v21 = vpack.c.bf16 %v2460_v2, %v2459_v9  ;;  %v2484_v32 = vld [vmem:[%s5390_s0 + $0xc] sm:$0xff] }
  0xf5   :  { %v1124_v9 = vpack.c.bf16 %v2485_v46, %v2484_v32 }
  0xf6   :  { %v4399_v58 = vpop.f32.mrb[0].mxu0  ;;  %v4401_v39 = vpop.f32.mrb[0].mxu1 }
  0xf7   :  { %v2856_v8 = vpop.f32.mrb[1].mxu0  ;;  %v2884_v13 = vpop.f32.mrb[1].mxu1 }
  0xf8   :  { %v4405_v43 = vpop.f32.mrb[2].mxu0  ;;  %v4407_v3 = vpop.f32.mrb[2].mxu1  ;;  %v2591_v13 = vld [vmem:[%s5389_s1 + $0x380] sm:$0xff] }
  0xf9   :  { %v2857_v4 = vpop.f32.mrb[3].mxu0  ;;  %v2885_v7 = vpop.f32.mrb[3].mxu1 }
  0xfa   :  { %v910_v7 = vpack.c.bf16 %v2467_v25, %v2467_v25 }
  0xfb   :  { %3091 = vmatmul.mubr.bf16.gmra.mrb[108].mxu1 %v680_v18  ;;  %3155 = vmatmul.mubr.bf16.gmra.mrb[108].mxu0 %v905_v40  ;;  %v2592_v18 = vld [vmem:[%s5389_s1 + $0x388] sm:$0xff] }
  0xfc   :  { %3094 = vmatprep.mubr.msk.bf16.mxu1 %vm3472_vm0, %v3471_v0  ;;  %3158 = vmatprep.mubr.msk.bf16.mxu0 %vm3472_vm0, %v3471_v0 }
  0xfe   :  { %v4419_v11 = vpop.f32.mrb[4].mxu0  ;;  %v4421_v14 = vpop.f32.mrb[4].mxu1 }
  0xff   :  { %v2860_v15 = vpop.f32.mrb[5].mxu0  ;;  %v2888_v16 = vpop.f32.mrb[5].mxu1 }
 0x100   :  { %v4425_v22 = vpop.f32.mrb[6].mxu0  ;;  %v4427_v23 = vpop.f32.mrb[6].mxu1 }
 0x101   :  { %v2861_v49 = vpop.f32.mrb[7].mxu0  ;;  %v2889_v50 = vpop.f32.mrb[7].mxu1 }
 0x102   :  { %v2593_v49 = vld [vmem:[%s5389_s1 + $0x390] sm:$0xff]  ;;  %v2594_v50 = vld [vmem:[%s5389_s1 + $0x398] sm:$0xff] }
 0x103   :  { %3095 = vmatmul.mubr.bf16.gmra.mrb[112].mxu1 %v681_v17  ;;  %3159 = vmatmul.mubr.bf16.gmra.mrb[112].mxu0 %v906_v21  ;;  %v1606_v21 = vpack.c.bf16 %v2592_v18, %v2591_v13  ;;  %v2636_v13 = vld [vmem:[%s5389_s1 + $0x420] sm:$0xff]  ;;  %v2637_v18 = vld [vmem:[%s5389_s1 + $0x428] sm:$0xff] }
 0x104   :  { %3098 = vmatprep.mubr.msk.bf16.mxu1 %vm3472_vm0, %v3471_v0  ;;  %3162 = vmatprep.mubr.msk.bf16.mxu0 %vm3472_vm0, %v3471_v0 }
 0x106   :  { %v4439_v19 = vpop.f32.mrb[8].mxu0  ;;  %v4441_v30 = vpop.f32.mrb[8].mxu1 }
 0x107   :  { %v2864_v33 = vpop.f32.mrb[9].mxu0  ;;  %v2892_v35 = vpop.f32.mrb[9].mxu1 }
 0x108   :  { %v4445_v38 = vpop.f32.mrb[10].mxu0  ;;  %v4447_v41 = vpop.f32.mrb[10].mxu1  ;;  %v2632_v33 = vld [vmem:[%s5389_s1 + $0x400] sm:$0xff]  ;;  %v2633_v35 = vld [vmem:[%s5389_s1 + $0x408] sm:$0xff] }
 0x109   :  { %v2865_v42 = vpop.f32.mrb[11].mxu0  ;;  %v2893_v44 = vpop.f32.mrb[11].mxu1  ;;  %v1832_v54 = vpack.c.bf16 %v2633_v35, %v2632_v33 }
 0x10b   :  { %3099 = vmatmul.mubr.bf16.gmra.mrb[116].mxu1 %v682_v36  ;;  %3163 = vmatmul.mubr.bf16.gmra.mrb[116].mxu0 %v907_v37  ;;  %v1607_v36 = vpack.c.bf16 %v2594_v50, %v2593_v49  ;;  %v2600_v49 = vld [vmem:[%s5389_s1 + $0x3c8] sm:$0xff] }
 0x10c   :  { %3102 = vmatprep.mubr.msk.bf16.mxu1 %vm3472_vm0, %v3471_v0  ;;  %3166 = vmatprep.mubr.msk.bf16.mxu0 %vm3472_vm0, %v3471_v0 }
 0x10e   :  { %v4459_v28 = vpop.f32.mrb[12].mxu0  ;;  %v4461_v26 = vpop.f32.mrb[12].mxu1 }
 0x10f   :  { %v2868_v27 = vpop.f32.mrb[13].mxu0  ;;  %v2896_v55 = vpop.f32.mrb[13].mxu1 }
 0x110   :  { %v4465_v31 = vpop.f32.mrb[14].mxu0  ;;  %v4467_v47 = vpop.f32.mrb[14].mxu1  ;;  %v1125_v27 = vpack.c.bf16 %v4531_v12, %v2486_v51  ;;  %v1350_v55 = vpack.c.bf16 %v2486_v51, %v2485_v46 }
 0x111   :  { %v2869_v52 = vpop.f32.mrb[15].mxu0  ;;  %v2897_v53 = vpop.f32.mrb[15].mxu1 }
 0x113   :  { %3103 = vmatmul.mubr.bf16.gmra.mrb[120].mxu1 %v683_v56  ;;  %3167 = vmatmul.mubr.bf16.gmra.mrb[120].mxu0 %v908_v60  ;;  %v2595_v56 = vld [vmem:[%s5389_s1 + $0x3a0] sm:$0xff]  ;;  %v2596_v60 = vld [vmem:[%s5389_s1 + $0x3a8] sm:$0xff] }
 0x114   :  { %3106 = vmatprep.mubr.msk.bf16.mxu1 %vm3472_vm0, %v3471_v0  ;;  %3170 = vmatprep.mubr.msk.bf16.mxu0 %vm3472_vm0, %v3471_v0 }
 0x116   :  { %v4482_v57 = vpop.f32.mrb[16].mxu0  ;;  %v4484_v59 = vpop.f32.mrb[16].mxu1 }
 0x117   :  { %v2872_v61 = vpop.f32.mrb[17].mxu0  ;;  %v2900_v62 = vpop.f32.mrb[17].mxu1 }
 0x118   :  { %v4486_v6 = vpop.f32.mrb[18].mxu0  ;;  %v4488_v10 = vpop.f32.mrb[18].mxu1  ;;  %v2634_v61 = vld [vmem:[%s5389_s1 + $0x410] sm:$0xff]  ;;  %v2635_v62 = vld [vmem:[%s5389_s1 + $0x418] sm:$0xff] }
 0x119   :  { %v2873_v1 = vpop.f32.mrb[19].mxu0  ;;  %v2901_v24 = vpop.f32.mrb[19].mxu1  ;;  %v1833_v25 = vpack.c.bf16 %v2635_v62, %v2634_v61 }
 0x11a   :  { %v2488_v1 = vld [vmem:[%s5390_s0 + $0x2c] sm:$0xff]  ;;  %v4574_v24 = vld [vmem:[%s5390_s0 + $0x34] sm:$0xff] }
 0x11b   :  { %3107 = vmatmul.mubr.bf16.gmra.mrb[124].mxu1 %v684_v63  ;;  %3171 = vmatmul.mubr.bf16.gmra.mrb[124].mxu0 %v909_v5  ;;  %v1608_v63 = vpack.c.bf16 %v2596_v60, %v2595_v56  ;;  %v2598_v5 = vld [vmem:[%s5389_s1 + $0x3b8] sm:$0xff] }
 0x11c   :  { %3174 = vmatprep.mubr.msk.bf16.mxu0 %vm3472_vm0, %v3471_v0  ;;  %3194 = vmatprep.mubr.msk.bf16.mxu1 %vm3472_vm0, %v3471_v0 }
 0x11e   :  { %v4503_v48 = vpop.f32.mrb[20].mxu0  ;;  %v4505_v8 = vpop.f32.mrb[20].mxu1 }
 0x11f   :  { %v2876_v40 = vpop.f32.mrb[21].mxu0  ;;  %v2904_v4 = vpop.f32.mrb[21].mxu1 }
 0x120   :  { %v4513_v2 = vpop.f32.mrb[22].mxu0  ;;  %v280_v15 = vpop.f32.mrb[22].mxu1 }
 0x121   :  { %v2877_v16 = vpop.f32.mrb[23].mxu0  ;;  %v2905_v17 = vpop.f32.mrb[23].mxu1 }
 0x122   :  { %v1126_v16 = vpack.c.bf16 %v4574_v24, %v2488_v1  ;;  %v1351_v17 = vpack.c.bf16 %v2488_v1, %v4531_v12  ;;  %v1834_v12 = vpack.c.bf16 %v2637_v18, %v2636_v13  ;;  %v2603_v1 = vld [vmem:[%s5389_s1 + $0x3e0] sm:$0xff] }
 0x123   :  { %3175 = vmatmul.mubr.bf16.gmra.mrb[128].mxu0 %v910_v7  ;;  %3195 = vmatmul.mubr.bf16.vlgmr.msra.gmra.mrb[128].mxu1 %v1124_v9 }
 0x124   :  { %3198 = vmatprep.mubr.msk.bf16.mxu1 %vm3472_vm0, %v3471_v0  ;;  %3262 = vmatprep.mubr.msk.bf16.mxu0 %vm3472_vm0, %v3471_v0 }
 0x125   :  { %3315 = vmatpush3.bf16.msra.mxu1 %v1606_v21  ;;  %v2599_v21 = vld [vmem:[%s5389_s1 + $0x3c0] sm:$0xff] }
 0x126   :  { %v4539_v37 = vpop.f32.mrb[24].mxu0  ;;  %v317_v42 = vpop.f32.mrb[24].mxu1  ;;  %3316 = vmatprep.subr.bf16.mxu1 %v3471_v0 }
 0x127   :  { %v318_v44 = vadd.f32 %v317_v42, %v4399_v58  ;;  %v2880_v45 = vpop.f32.mrb[25].mxu0  ;;  %v2924_v20 = vpop.f32.mrb[25].mxu1  ;;  %v2638_v42 = vld [vmem:[%s5389_s1 + $0x430] sm:$0xff] }
 0x128   :  { %v4550_v52 = vpop.f32.mrb[26].mxu0  ;;  %v320_v53 = vpop.f32.mrb[26].mxu1  ;;  %v1610_v45 = vpack.c.bf16 %v2600_v49, %v2599_v21  ;;  %v2602_v20 = vld [vmem:[%s5389_s1 + $0x3d8] sm:$0xff] }
 0x129   :  { %v321_v29 = vadd.f32 %v320_v53, %v4405_v43  ;;  %v2881_v58 = vpop.f32.mrb[27].mxu0  ;;  %v2925_v34 = vpop.f32.mrb[27].mxu1  ;;  %3317 = vmatpush3.bf16.msra.mxu1 %v1607_v36  ;;  %v2597_v43 = vld [vmem:[%s5389_s1 + $0x3b0] sm:$0xff] }
 0x12a   :  { %3318 = vmatprep.subr.bf16.mxu1 %v3471_v0  ;;  %v1609_v40 = vpack.c.bf16 %v2598_v5, %v2597_v43  ;;  %v2493_v21 = vld [vmem:[%s5390_s0 + $0x54] sm:$0xff] }
 0x12b   :  { %3199 = vmatmul.mubr.bf16.gmra.mrb[132].mxu1 %v1125_v27  ;;  %3263 = vmatmul.mubr.bf16.vlgmr.msra.gmra.mrb[132].mxu0 %v1350_v55  ;;  %v2490_v27 = vld [vmem:[%s5390_s0 + $0x3c] sm:$0xff]  ;;  %v4623_v55 = vld [vmem:[%s5390_s0 + $0x44] sm:$0xff] }
 0x12c   :  { %3383 = vmatpush3.bf16.msra.mxu0 %v1832_v54  ;;  %3202 = vmatprep.mubr.msk.bf16.mxu1 %vm3472_vm0, %v3471_v0  ;;  %v2640_v54 = vld [vmem:[%s5389_s1 + $0x440] sm:$0xff]  ;;  %v1127_v43 = vpack.c.bf16 %v4623_v55, %v2490_v27  ;;  %v1352_v5 = vpack.c.bf16 %v2490_v27, %v4574_v24 }
 0x12d   :  { %3266 = vmatprep.mubr.msk.bf16.mxu0 %vm3472_vm0, %v3471_v0  ;;  %3384 = vmatprep.subr.bf16.mxu0 %v3471_v0 }
 0x12e   :  { %v325_v32 = vpop.f32.mrb[28].mxu1  ;;  %v518_v46 = vpop.f32.mrb[28].mxu0  ;;  %3319 = vmatpush3.bf16.msra.mxu1 %v1608_v63 }
 0x12f   :  { %v326_v4 = vadd.f32 %v325_v32, %v4419_v11  ;;  %v4586_v7 = vadd.f32 %v518_v46, %v318_v44  ;;  %v2928_v9 = vpop.f32.mrb[29].mxu1  ;;  %v2992_v15 = vpop.f32.mrb[29].mxu0  ;;  %3320 = vmatprep.subr.bf16.mxu1 %v3471_v0  ;;  %v2639_v44 = vld [vmem:[%s5389_s1 + $0x438] sm:$0xff] }
 0x130   :  { %v328_v50 = vpop.f32.mrb[30].mxu1  ;;  %v521_v11 = vpop.f32.mrb[30].mxu0  ;;  %3385 = vmatpush3.bf16.msra.mxu0 %v1833_v25  ;;  %v1835_v56 = vpack.c.bf16 %v2639_v44, %v2638_v42  ;;  %v2604_v25 = vld [vmem:[%s5389_s1 + $0x3e8] sm:$0xff]  ;;  %v2643_v9 = vld [vmem:[%s5389_s1 + $0x458] sm:$0xff] }
 0x131   :  { %v329_v51 = vadd.f32 %v328_v50, %v4425_v22  ;;  %v4598_v33 = vadd.f32 %v521_v11, %v321_v29  ;;  %v2993_v35 = vpop.f32.mrb[31].mxu0  ;;  %v2929_v36 = vpop.f32.mrb[31].mxu1  ;;  %3386 = vmatprep.subr.bf16.mxu0 %v3471_v0  ;;  %v2601_v22 = vld [vmem:[%s5389_s1 + $0x3d0] sm:$0xff]  ;;  %v2641_v29 = vld [vmem:[%s5389_s1 + $0x448] sm:$0xff]  ;;  %v1612_v15 = vpack.c.bf16 %v2604_v25, %v2603_v1 }
 0x132   :  { %3321 = vmatpush3.bf16.msra.mxu1 %v1609_v40  ;;  %v1611_v58 = vpack.c.bf16 %v2602_v20, %v2601_v22  ;;  %v1836_v24 = vpack.c.bf16 %v2641_v29, %v2640_v54  ;;  %v2645_v35 = vld [vmem:[%s5389_s1 + $0x468] sm:$0xff] }
 0x133   :  { %3203 = vmatmul.mubr.bf16.gmra.mrb[136].mxu1 %v1126_v16  ;;  %3267 = vmatmul.mubr.bf16.gmra.mrb[136].mxu0 %v1351_v17  ;;  %v2606_v16 = vld [vmem:[%s5389_s1 + $0x3f8] sm:$0xff]  ;;  %v2492_v17 = vld [vmem:[%s5390_s0 + $0x4c] sm:$0xff] }
 0x134   :  { %3206 = vmatprep.mubr.msk.bf16.mxu1 %vm3472_vm0, %v3471_v0  ;;  %3270 = vmatprep.mubr.msk.bf16.mxu0 %vm3472_vm0, %v3471_v0  ;;  %v1128_v22 = vpack.c.bf16 %v2493_v21, %v2492_v17  ;;  %v1353_v20 = vpack.c.bf16 %v2492_v17, %v4623_v55  ;;  %v2647_v55 = vld [vmem:[%s5389_s1 + $0x478] sm:$0xff] }
 0x135   :  { %3387 = vmatpush3.bf16.msra.mxu0 %v1834_v12  ;;  %3322 = vmatprep.subr.bf16.mxu1 %v3471_v0 }
 0x136   :  { %v333_v60 = vpop.f32.mrb[32].mxu1  ;;  %v526_v53 = vpop.f32.mrb[32].mxu0  ;;  %3388 = vmatprep.subr.bf16.mxu0 %v3471_v0  ;;  %3323 = vmatpush3.bf16.msra.mxu1 %v1610_v45 }
 0x137   :  { %v334_v34 = vadd.f32 %v333_v60, %v4439_v19  ;;  %v4634_v61 = vadd.f32 %v526_v53, %v326_v4  ;;  %v2932_v62 = vpop.f32.mrb[33].mxu1  ;;  %v2996_v63 = vpop.f32.mrb[33].mxu0  ;;  %3324 = vmatprep.subr.bf16.mxu1 %v3471_v0  ;;  %v2642_v4 = vld [vmem:[%s5389_s1 + $0x450] sm:$0xff] }
 0x138   :  { %v336_v32 = vpop.f32.mrb[34].mxu1  ;;  %v529_v19 = vpop.f32.mrb[34].mxu0  ;;  %v1837_v49 = vpack.c.bf16 %v2643_v9, %v2642_v4 }
 0x139   :  { %v337_v46 = vadd.f32 %v336_v32, %v4445_v38  ;;  %v4646_v13 = vadd.f32 %v529_v19, %v329_v51  ;;  %v2997_v18 = vpop.f32.mrb[35].mxu0  ;;  %v2933_v40 = vpop.f32.mrb[35].mxu1  ;;  %3389 = vmatpush3.bf16.msra.mxu0 %v1835_v56  ;;  %v2605_v38 = vld [vmem:[%s5389_s1 + $0x3f0] sm:$0xff]  ;;  %v2644_v51 = vld [vmem:[%s5389_s1 + $0x460] sm:$0xff] }
 0x13a   :  { %3390 = vmatprep.subr.bf16.mxu0 %v3471_v0  ;;  %3325 = vmatpush3.bf16.msra.mxu1 %v1611_v58  ;;  %v1613_v36 = vpack.c.bf16 %v2606_v16, %v2605_v38  ;;  %v1838_v58 = vpack.c.bf16 %v2645_v35, %v2644_v51 }
 0x13b   :  { %3207 = vmatmul.mubr.bf16.gmra.mrb[140].mxu1 %v1127_v43  ;;  %3271 = vmatmul.mubr.bf16.gmra.mrb[140].mxu0 %v1352_v5 }
 0x13c   :  { %3210 = vmatprep.mubr.msk.bf16.mxu1 %vm3472_vm0, %v3471_v0  ;;  %3274 = vmatprep.mubr.msk.bf16.mxu0 %vm3472_vm0, %v3471_v0 }
 0x13d   :  { %3391 = vmatpush3.bf16.msra.mxu0 %v1836_v24  ;;  %3326 = vmatprep.subr.bf16.mxu1 %v3471_v0 }
 0x13e   :  { %v341_v50 = vpop.f32.mrb[36].mxu1  ;;  %v534_v11 = vpop.f32.mrb[36].mxu0  ;;  %3392 = vmatprep.subr.bf16.mxu0 %v3471_v0  ;;  %3327 = vmatpush3.bf16.msra.mxu1 %v1612_v15 }
 0x13f   :  { %v342_v12 = vadd.f32 %v341_v50, %v4459_v28  ;;  %v4680_v42 = vadd.f32 %v534_v11, %v334_v34  ;;  %v2936_v44 = vpop.f32.mrb[37].mxu1  ;;  %v3000_v45 = vpop.f32.mrb[37].mxu0  ;;  %3328 = vmatprep.subr.bf16.mxu1 %v3471_v0  ;;  %v2646_v28 = vld [vmem:[%s5389_s1 + $0x470] sm:$0xff]  ;;  %v2495_v34 = vld [vmem:[%s5390_s0 + $0x64] sm:$0xff] }
 0x140   :  { %v344_v27 = vpop.f32.mrb[38].mxu1  ;;  %v537_v56 = vpop.f32.mrb[38].mxu0  ;;  %v1839_v62 = vpack.c.bf16 %v2647_v55, %v2646_v28 }
 0x141   :  { %v345_v60 = vadd.f32 %v344_v27, %v4465_v31  ;;  %v4685_v53 = vadd.f32 %v537_v56, %v337_v46  ;;  %v3001_v54 = vpop.f32.mrb[39].mxu0  ;;  %v2937_v29 = vpop.f32.mrb[39].mxu1  ;;  %3393 = vmatpush3.bf16.msra.mxu0 %v1837_v49  ;;  %v2494_v31 = vld [vmem:[%s5390_s0 + $0x5c] sm:$0xff] }
 0x142   :  { %3394 = vmatprep.subr.bf16.mxu0 %v3471_v0  ;;  %3329 = vmatpush3.bf16.msra.mxu1 %v1613_v36  ;;  %v1129_v19 = vpack.c.bf16 %v2495_v34, %v2494_v31  ;;  %v1354_v46 = vpack.c.bf16 %v2494_v31, %v2493_v21 }
 0x143   :  { %3211 = vmatmul.mubr.bf16.gmra.mrb[144].mxu1 %v1128_v22  ;;  %3275 = vmatmul.mubr.bf16.gmra.mrb[144].mxu0 %v1353_v20 }
 0x144   :  { %3214 = vmatprep.mubr.msk.bf16.mxu1 %vm3472_vm0, %v3471_v0  ;;  %3278 = vmatprep.mubr.msk.bf16.mxu0 %vm3472_vm0, %v3471_v0 }
 0x145   :  { %3395 = vmatpush3.bf16.msra.mxu0 %v1838_v58 }
 0x146   :  { %v349_v63 = vpop.f32.mrb[40].mxu1  ;;  %v542_v43 = vpop.f32.mrb[40].mxu0  ;;  %3396 = vmatprep.subr.bf16.mxu0 %v3471_v0 }
 0x147   :  { %v350_v5 = vadd.f32 %v349_v63, %v4482_v57  ;;  %v4706_v1 = vadd.f32 %v542_v43, %v342_v12  ;;  %v2940_v25 = vpop.f32.mrb[41].mxu1  ;;  %v3004_v32 = vpop.f32.mrb[41].mxu0  ;;  %v2496_v57 = vld [vmem:[%s5390_s0 + $0x6c] sm:$0xff] }
 0x148   :  { %v352_v18 = vpop.f32.mrb[42].mxu1  ;;  %v545_v40 = vpop.f32.mrb[42].mxu0  ;;  %v1355_v51 = vpack.c.bf16 %v2496_v57, %v2495_v34 }
 0x149   :  { %v353_v24 = vadd.f32 %v352_v18, %v4486_v6  ;;  %v4709_v4 = vadd.f32 %v545_v40, %v345_v60  ;;  %v3005_v9 = vpop.f32.mrb[43].mxu0  ;;  %v2941_v15 = vpop.f32.mrb[43].mxu1  ;;  %3397 = vmatpush3.bf16.msra.mxu0 %v1839_v62  ;;  %v2497_v6 = vld [vmem:[%s5390_s0 + $0x74] sm:$0xff] }
 0x14a   :  { %v1130_v11 = vpack.c.bf16 %v2497_v6, %v2496_v57 }
 0x14b   :  { %3215 = vmatmul.mubr.bf16.gmra.mrb[148].mxu1 %v1129_v19  ;;  %3279 = vmatmul.mubr.bf16.gmra.mrb[148].mxu0 %v1354_v46 }
 0x14c   :  { %3218 = vmatprep.mubr.msk.bf16.mxu1 %vm3472_vm0, %v3471_v0  ;;  %3282 = vmatprep.mubr.msk.bf16.mxu0 %vm3472_vm0, %v3471_v0 }
 0x14e   :  { %v357_v38 = vpop.f32.mrb[44].mxu1  ;;  %v550_v16 = vpop.f32.mrb[44].mxu0 }
 0x14f   :  { %v358_v17 = vadd.f32 %v357_v38, %v4503_v48  ;;  %v4722_v21 = vadd.f32 %v550_v16, %v350_v5  ;;  %v2944_v49 = vpop.f32.mrb[45].mxu1  ;;  %v3008_v50 = vpop.f32.mrb[45].mxu0  ;;  %v2498_v48 = vld [vmem:[%s5390_s0 + $0x7c] sm:$0xff] }
 0x150   :  { %v360_v35 = vpop.f32.mrb[46].mxu1  ;;  %v553_v36 = vpop.f32.mrb[46].mxu0  ;;  %v1356_v28 = vpack.c.bf16 %v2498_v48, %v2497_v6 }
 0x151   :  { %v361_v12 = vadd.f32 %v360_v35, %v4513_v2  ;;  %v4725_v44 = vadd.f32 %v553_v36, %v353_v24  ;;  %v3009_v45 = vpop.f32.mrb[47].mxu0  ;;  %v2945_v22 = vpop.f32.mrb[47].mxu1  ;;  %v2499_v2 = vld [vmem:[%s5390_s0 + $0x84] sm:$0xff] }
 0x152   :  { %v1131_v58 = vpack.c.bf16 %v2499_v2, %v2498_v48 }
 0x153   :  { %3219 = vmatmul.mubr.bf16.gmra.mrb[152].mxu1 %v1130_v11  ;;  %3283 = vmatmul.mubr.bf16.gmra.mrb[152].mxu0 %v1355_v51 }
 0x154   :  { %3222 = vmatprep.mubr.msk.bf16.mxu1 %vm3472_vm0, %v3471_v0  ;;  %3286 = vmatprep.mubr.msk.bf16.mxu0 %vm3472_vm0, %v3471_v0 }
 0x156   :  { %v365_v20 = vpop.f32.mrb[48].mxu1  ;;  %v558_v27 = vpop.f32.mrb[48].mxu0 }
 0x157   :  { %v366_v56 = vadd.f32 %v365_v20, %v4539_v37  ;;  %v4738_v60 = vadd.f32 %v558_v27, %v358_v17  ;;  %v2948_v54 = vpop.f32.mrb[49].mxu1  ;;  %v3012_v29 = vpop.f32.mrb[49].mxu0  ;;  %v2500_v37 = vld [vmem:[%s5390_s0 + $0x8c] sm:$0xff] }
 0x158   :  { %v368_v55 = vpop.f32.mrb[50].mxu1  ;;  %v561_v31 = vpop.f32.mrb[50].mxu0  ;;  %v1357_v24 = vpack.c.bf16 %v2500_v37, %v2499_v2  ;;  %v2505_v54 = vld [vmem:[%s5390_s0 + $0xb4] sm:$0xff] }
 0x159   :  { %v369_v34 = vadd.f32 %v368_v55, %v4550_v52  ;;  %v4741_v62 = vadd.f32 %v561_v31, %v361_v12  ;;  %v3013_v63 = vpop.f32.mrb[51].mxu0  ;;  %v2949_v43 = vpop.f32.mrb[51].mxu1  ;;  %v2501_v52 = vld [vmem:[%s5390_s0 + $0x94] sm:$0xff] }
 0x15a   :  { %v1132_v40 = vpack.c.bf16 %v2501_v52, %v2500_v37  ;;  %v2109_v37 = vld [vmem:[%s5391_s3 + $0x8] sm:$0xff] }
 0x15b   :  { %3223 = vmatmul.mubr.bf16.gmra.mrb[156].mxu1 %v1131_v58  ;;  %3287 = vmatmul.mubr.bf16.gmra.mrb[156].mxu0 %v1356_v28 }
 0x15c   :  { %3226 = vmatprep.mubr.msk.bf16.mxu1 %vm3472_vm0, %v3471_v0  ;;  %3290 = vmatprep.mubr.msk.bf16.mxu0 %vm3472_vm0, %v3471_v0 }
 0x15e   :  { %v373_v5 = vpop.f32.mrb[52].mxu1  ;;  %v566_v25 = vpop.f32.mrb[52].mxu0 }
 0x15f   :  { %v374_v32 = vadd.f32 %v373_v5, %v4401_v39  ;;  %v4754_v19 = vadd.f32 %v566_v25, %v366_v56  ;;  %v2952_v46 = vpop.f32.mrb[53].mxu1  ;;  %v3016_v18 = vpop.f32.mrb[53].mxu0  ;;  %v2502_v39 = vld [vmem:[%s5390_s0 + $0x9c] sm:$0xff]  ;;  %v3473_v56 = vmov 0  }
 0x160   :  { %v376_v9 = vpop.f32.mrb[54].mxu1  ;;  %v569_v15 = vpop.f32.mrb[54].mxu0  ;;  %v1358_v12 = vpack.c.bf16 %v2502_v39, %v2501_v52  ;;  %3469 = vset.pattern.permute.xlu0 %v3473_v56  ;;  %3470 = vset.pattern.permute.xlu1 %v3473_v56 }
 0x161   :  { %v377_v57 = vadd.f32 %v376_v9, %v4407_v3  ;;  %v4757_v6 = vadd.f32 %v569_v15, %v369_v34  ;;  %v3017_v38 = vpop.f32.mrb[55].mxu0  ;;  %v2953_v16 = vpop.f32.mrb[55].mxu1  ;;  %v2503_v3 = vld [vmem:[%s5390_s0 + $0xa4] sm:$0xff] }
 0x162   :  { %v1133_v36 = vpack.c.bf16 %v2503_v3, %v2502_v39 }
 0x163   :  { %3227 = vmatmul.mubr.bf16.gmra.mrb[160].mxu1 %v1132_v40  ;;  %3291 = vmatmul.mubr.bf16.gmra.mrb[160].mxu0 %v1357_v24  ;;  %v2507_v40 = vld [vmem:[%s5390_s0 + $0xc4] sm:$0xff] }
 0x164   :  { %3230 = vmatprep.mubr.msk.bf16.mxu1 %vm3472_vm0, %v3471_v0  ;;  %3294 = vmatprep.mubr.msk.bf16.mxu0 %vm3472_vm0, %v3471_v0  ;;  %v2112_v24 = vld [vmem:[%s5391_s3 + $0x20] sm:$0xff] }
 0x166   :  { %v381_v17 = vpop.f32.mrb[56].mxu1  ;;  %v574_v49 = vpop.f32.mrb[56].mxu0 }
 0x167   :  { %v382_v50 = vadd.f32 %v381_v17, %v4421_v14  ;;  %v4770_v11 = vadd.f32 %v574_v49, %v374_v32  ;;  %v2956_v51 = vpop.f32.mrb[57].mxu1  ;;  %v3020_v35 = vpop.f32.mrb[57].mxu0  ;;  %v2108_v14 = vld [vmem:[%s5391_s3] sm:$0xff]  ;;  %v2111_v49 = vld [vmem:[%s5391_s3 + $0x18] sm:$0xff] }
 0x168   :  { %v384_v45 = vpop.f32.mrb[58].mxu1  ;;  %v577_v22 = vpop.f32.mrb[58].mxu0  ;;  %2135 = vperm.xlu0 %3469, %v2108_v14  }
 0x169   :  { %v385_v48 = vadd.f32 %v384_v45, %v4427_v23  ;;  %v4773_v2 = vadd.f32 %v577_v22, %v377_v57  ;;  %v3021_v20 = vpop.f32.mrb[59].mxu0  ;;  %v2957_v27 = vpop.f32.mrb[59].mxu1  ;;  %v2504_v23 = vld [vmem:[%s5390_s0 + $0xac] sm:$0xff] }
 0x16a   :  { %v1134_v63 = vpack.c.bf16 %v2505_v54, %v2504_v23  ;;  %v1359_v43 = vpack.c.bf16 %v2504_v23, %v2503_v3  ;;  %v2113_v22 = vld [vmem:[%s5391_s3 + $0x28] sm:$0xff] }
 0x16b   :  { %3231 = vmatmul.mubr.bf16.gmra.mrb[164].mxu1 %v1133_v36  ;;  %3295 = vmatmul.mubr.bf16.gmra.mrb[164].mxu0 %v1358_v12 }
 0x16c   :  { %3234 = vmatprep.mubr.msk.bf16.mxu1 %vm3472_vm0, %v3471_v0  ;;  %3298 = vmatprep.mubr.msk.bf16.mxu0 %vm3472_vm0, %v3471_v0 }
 0x16d   :  { %2140 = vperm.xlu0 %3469, %v2109_v37  }
 0x16e   :  { %v389_v29 = vpop.f32.mrb[60].mxu1  ;;  %v582_v58 = vpop.f32.mrb[60].mxu0 }
 0x16f   :  { %v390_v28 = vadd.f32 %v389_v29, %v4441_v30  ;;  %v4789_v55 = vadd.f32 %v582_v58, %v382_v50  ;;  %v2960_v31 = vpop.f32.mrb[61].mxu1  ;;  %v3024_v34 = vpop.f32.mrb[61].mxu0  ;;  %v2110_v30 = vld [vmem:[%s5391_s3 + $0x10] sm:$0xff] }
 0x170   :  { %v392_v52 = vpop.f32.mrb[62].mxu1  ;;  %v585_v5 = vpop.f32.mrb[62].mxu0  ;;  %2145 = vperm.xlu1 %3470, %v2110_v30  }
 0x171   :  { %v393_v25 = vadd.f32 %v392_v52, %v4447_v41  ;;  %v4795_v32 = vadd.f32 %v585_v5, %v385_v48  ;;  %v3025_v46 = vpop.f32.mrb[63].mxu0  ;;  %v2961_v18 = vpop.f32.mrb[63].mxu1  ;;  %v2506_v41 = vld [vmem:[%s5390_s0 + $0xbc] sm:$0xff]  ;;  %2155 = vperm.xlu0 %3469, %v2112_v24  }
 0x172   :  { %v1135_v3 = vpack.c.bf16 %v2507_v40, %v2506_v41  ;;  %v1360_v17 = vpack.c.bf16 %v2506_v41, %v2505_v54  ;;  %v2116_v48 = vld [vmem:[%s5391_s3 + $0x40] sm:$0xff]  ;;  %v2115_v52 = vld [vmem:[%s5391_s3 + $0x38] sm:$0xff]  ;;  %v2117_v46 = vld [vmem:[%s5391_s3 + $0x48] sm:$0xff] }
 0x173   :  { %3235 = vmatmul.mubr.bf16.gmra.mrb[168].mxu1 %v1134_v63  ;;  %3299 = vmatmul.mubr.bf16.gmra.mrb[168].mxu0 %v1359_v43  ;;  %v2566_v5 = vld [vmem:[%s5390_s0 + $0x15] sm:$0xff]  ;;  %v2120_v18 = vld [vmem:[%s5391_s3 + $0x60] sm:$0xff] }
 0x174   :  { %3238 = vmatprep.mubr.msk.bf16.mxu1 %vm3472_vm0, %v3471_v0  ;;  %3302 = vmatprep.mubr.msk.bf16.mxu0 %vm3472_vm0, %v3471_v0 }
 0x175   :  { %2150 = vperm.xlu1 %3470, %v2111_v49  }
 0x176   :  { %v397_v9 = vpop.f32.mrb[64].mxu1  ;;  %v590_v15 = vpop.f32.mrb[64].mxu0 }
 0x177   :  { %v398_v57 = vadd.f32 %v397_v9, %v4461_v26  ;;  %v4814_v38 = vadd.f32 %v590_v15, %v390_v28  ;;  %v2964_v16 = vpop.f32.mrb[65].mxu1  ;;  %v3028_v39 = vpop.f32.mrb[65].mxu0  ;;  %v2114_v26 = vld [vmem:[%s5391_s3 + $0x30] sm:$0xff] }
 0x178   :  { %v400_v50 = vpop.f32.mrb[66].mxu1  ;;  %v593_v51 = vpop.f32.mrb[66].mxu0  ;;  %2165 = vperm.xlu0 %3469, %v2114_v26   ;;  %v2608_v26 = vld [vmem:[%s5390_s0 + $0x1e] sm:$0xff] }
 0x179   :  { %v401_v35 = vadd.f32 %v400_v50, %v4467_v47  ;;  %v4820_v36 = vadd.f32 %v593_v51, %v393_v25  ;;  %v3029_v12 = vpop.f32.mrb[67].mxu0  ;;  %v2965_v45 = vpop.f32.mrb[67].mxu1  ;;  %v2508_v47 = vld [vmem:[%s5390_s0 + $0xcc] sm:$0xff]  ;;  %2160 = vperm.xlu1 %3470, %v2113_v22   ;;  %v2567_v25 = vld [vmem:[%s5390_s0 + $0x1d] sm:$0xff] }
 0x17a   :  { %v1136_v29 = vpack.c.bf16 %v2508_v47, %v2508_v47  ;;  %v1361_v58 = vpack.c.bf16 %v2508_v47, %v2507_v40  ;;  %v1576_v16 = vpack.c.bf16 %v2567_v25, %v2566_v5  ;;  %v2119_v51 = vld [vmem:[%s5391_s3 + $0x58] sm:$0xff]  ;;  %v2569_v12 = vld [vmem:[%s5390_s0 + $0x2d] sm:$0xff]  ;;  %v2124_v22 = vld [vmem:[%s5391_s3 + $0x80] sm:$0xff] }
 0x17b   :  { %3239 = vmatmul.mubr.bf16.gmra.mrb[172].mxu1 %v1135_v3  ;;  %3303 = vmatmul.mubr.bf16.gmra.mrb[172].mxu0 %v1360_v17  ;;  %v2607_v45 = vld [vmem:[%s5390_s0 + $0x16] sm:$0xff]  ;;  %v2121_v47 = vld [vmem:[%s5391_s3 + $0x68] sm:$0xff] }
 0x17c   :  { %3242 = vmatprep.mubr.msk.bf16.mxu1 %vm3472_vm0, %v3471_v0  ;;  %3306 = vmatprep.mubr.msk.bf16.mxu0 %vm3472_vm0, %v3471_v0  ;;  %v2610_v5 = vld [vmem:[%s5390_s0 + $0x2e] sm:$0xff] }
 0x17d   :  { %2175 = vperm.xlu0 %3469, %v2116_v48   ;;  %2170 = vperm.xlu1 %3470, %v2115_v52   ;;  %v2123_v52 = vld [vmem:[%s5391_s3 + $0x78] sm:$0xff]  ;;  %v2125_v25 = vld [vmem:[%s5391_s3 + $0x88] sm:$0xff] }
 0x17e   :  { %v405_v20 = vpop.f32.mrb[68].mxu1  ;;  %v598_v27 = vpop.f32.mrb[68].mxu0 }
 0x17f   :  { %v406_v56 = vadd.f32 %v405_v20, %v4484_v59  ;;  %v4839_v14 = vadd.f32 %v598_v27, %v398_v57  ;;  %v2968_v23 = vpop.f32.mrb[69].mxu1  ;;  %v3032_v54 = vpop.f32.mrb[69].mxu0  ;;  %v2118_v59 = vld [vmem:[%s5391_s3 + $0x50] sm:$0xff] }
 0x180   :  { %v408_v28 = vpop.f32.mrb[70].mxu1  ;;  %v601_v31 = vpop.f32.mrb[70].mxu0 }
 0x181   :  { %v409_v34 = vadd.f32 %v408_v28, %v4488_v10  ;;  %v4842_v63 = vadd.f32 %v601_v31, %v401_v35  ;;  %v3033_v43 = vpop.f32.mrb[71].mxu0  ;;  %v2969_v37 = vpop.f32.mrb[71].mxu1  ;;  %2185 = vperm.xlu0 %3469, %v2118_v59   ;;  %v2549_v10 = vld [vmem:[%s5390_s0 + $0xd4] sm:$0xff]  ;;  %2180 = vperm.xlu1 %3470, %v2117_v46   ;;  %v2568_v35 = vld [vmem:[%s5390_s0 + $0x25] sm:$0xff] }
 0x182   :  { %v1362_v57 = vpack.c.bf16 %v2549_v10, %v2549_v10  ;;  %v2126_v59 = vld [vmem:[%s5391_s3 + $0x90] sm:$0xff]  ;;  %v2609_v10 = vld [vmem:[%s5390_s0 + $0x26] sm:$0xff] }
 0x183   :  { %3243 = vmatmul.mubr.bf16.gmra.mrb[176].mxu1 %v1136_v29  ;;  %3307 = vmatmul.mubr.bf16.gmra.mrb[176].mxu0 %v1361_v58  ;;  %v1577_v29 = vpack.c.bf16 %v2569_v12, %v2568_v35  ;;  %v1802_v58 = vpack.c.bf16 %v2608_v26, %v2607_v45  ;;  %v2128_v46 = vld [vmem:[%s5391_s3 + $0xa0] sm:$0xff]  ;;  %v2127_v35 = vld [vmem:[%s5391_s3 + $0x98] sm:$0xff]  ;;  %v2573_v12 = vld [vmem:[%s5390_s0 + $0x4d] sm:$0xff] }
 0x184   :  { %3310 = vmatprep.mubr.msk.bf16.mxu0 %vm3472_vm0, %v3471_v0  ;;  %3330 = vmatprep.mubr.msk.bf16.mxu1 %vm3472_vm0, %v3471_v0  ;;  %v2611_v45 = vld [vmem:[%s5390_s0 + $0x36] sm:$0xff]  ;;  %v2612_v26 = vld [vmem:[%s5390_s0 + $0x3e] sm:$0xff] }
 0x185   :  { %2195 = vperm.xlu0 %3469, %v2120_v18   ;;  %2190 = vperm.xlu1 %3470, %v2119_v51  }
 0x186   :  { %v413_v30 = vpop.f32.mrb[72].mxu1  ;;  %v606_v41 = vpop.f32.mrb[72].mxu0 }
 0x187   :  { %v414_v40 = vadd.f32 %v413_v30, %v4505_v8  ;;  %v4870_v24 = vadd.f32 %v606_v41, %v406_v56  ;;  %v3036_v9 = vpop.f32.mrb[73].mxu0  ;;  %v2972_v15 = vpop.f32.mrb[73].mxu1  ;;  %v2122_v8 = vld [vmem:[%s5391_s3 + $0x70] sm:$0xff] }
 0x188   :  { %v609_v39 = vpop.f32.mrb[74].mxu0  ;;  %v416_v3 = vpop.f32.mrb[74].mxu1 }
 0x189   :  { %v4872_v17 = vadd.f32 %v609_v39, %v409_v34  ;;  %v3037_v49 = vpop.f32.mrb[75].mxu0  ;;  %v2973_v50 = vpop.f32.mrb[75].mxu1  ;;  %2205 = vperm.xlu0 %3469, %v2122_v8   ;;  %2200 = vperm.xlu1 %3470, %v2121_v47   ;;  %v2129_v47 = vld [vmem:[%s5391_s3 + $0xa8] sm:$0xff] }
 0x18b   :  { %3311 = vmatmul.mubr.bf16.gmra.mrb[180].mxu0 %v1362_v57  ;;  %3331 = vmatmul.mubr.bf16.vlgmr.msra.gmra.mrb[180].mxu1 %v1576_v16  ;;  %v1803_v16 = vpack.c.bf16 %v2610_v5, %v2609_v10  ;;  %v2614_v10 = vld [vmem:[%s5390_s0 + $0x4e] sm:$0xff] }
 0x18c   :  { %3334 = vmatprep.mubr.msk.bf16.mxu1 %vm3472_vm0, %v3471_v0  ;;  %3398 = vmatprep.mubr.msk.bf16.mxu0 %vm3472_vm0, %v3471_v0 }
 0x18d   :  { %2215 = vperm.xlu0 %3469, %v2124_v22   ;;  %2210 = vperm.xlu1 %3470, %v2123_v52   ;;  %v2132_v22 = vld [vmem:[%s5391_s3 + $0xc0] sm:$0xff] }
 0x18e   :  { %v614_v48 = vpop.f32.mrb[76].mxu0  ;;  %v744_v20 = vpop.f32.mrb[76].mxu1 }
 0x18f   :  { %v4902_v27 = vadd.f32 %v614_v48, %v414_v40  ;;  %v846_v56 = vadd.f32 %v744_v20, %v4586_v7  ;;  %v3040_v23 = vpop.f32.mrb[77].mxu0  ;;  %v3060_v54 = vpop.f32.mrb[77].mxu1  ;;  %v2570_v7 = vld [vmem:[%s5390_s0 + $0x35] sm:$0xff] }
 0x190   :  { %v617_v28 = vpop.f32.mrb[78].mxu0  ;;  %v747_v31 = vpop.f32.mrb[78].mxu1 }
 0x191   :  { %v847_v34 = vadd.f32 %v747_v31, %v4598_v33  ;;  %v3041_v43 = vpop.f32.mrb[79].mxu0  ;;  %v3061_v37 = vpop.f32.mrb[79].mxu1  ;;  %2225 = vperm.xlu0 %3469, %v2126_v59   ;;  %v2571_v33 = vld [vmem:[%s5390_s0 + $0x3d] sm:$0xff]  ;;  %2220 = vperm.xlu1 %3470, %v2125_v25   ;;  %v1804_v28 = vpack.c.bf16 %v2612_v26, %v2611_v45 }
 0x192   :  { %v1578_v57 = vpack.c.bf16 %v2571_v33, %v2570_v7  ;;  %v2131_v7 = vld [vmem:[%s5391_s3 + $0xb8] sm:$0xff]  ;;  %v2613_v33 = vld [vmem:[%s5390_s0 + $0x46] sm:$0xff] }
 0x193   :  { %3335 = vmatmul.mubr.bf16.gmra.mrb[184].mxu1 %v1577_v29  ;;  %3399 = vmatmul.mubr.bf16.vlgmr.msra.gmra.mrb[184].mxu0 %v1802_v58 }
 0x194   :  { %3338 = vmatprep.mubr.msk.bf16.mxu1 %vm3472_vm0, %v3471_v0  ;;  %3402 = vmatprep.mubr.msk.bf16.mxu0 %vm3472_vm0, %v3471_v0 }
 0x195   :  { %2235 = vperm.xlu0 %3469, %v2128_v46   ;;  %2230 = vperm.xlu1 %3470, %v2127_v35   ;;  %v2616_v35 = vld [vmem:[%s5390_s0 + $0x5e] sm:$0xff] }
 0x196   :  { %v752_v18 = vpop.f32.mrb[80].mxu1  ;;  %v970_v30 = vpop.f32.mrb[80].mxu0 }
 0x197   :  { %v848_v41 = vadd.f32 %v752_v18, %v4634_v61  ;;  %v4935_v40 = vadd.f32 %v970_v30, %v846_v56  ;;  %v3064_v9 = vpop.f32.mrb[81].mxu1  ;;  %v3128_v15 = vpop.f32.mrb[81].mxu0  ;;  %v2130_v61 = vld [vmem:[%s5391_s3 + $0xb0] sm:$0xff] }
 0x198   :  { %v755_v39 = vpop.f32.mrb[82].mxu1  ;;  %v973_v3 = vpop.f32.mrb[82].mxu0  ;;  %v1805_v15 = vpack.c.bf16 %v2614_v10, %v2613_v33 }
 0x199   :  { %v849_v49 = vadd.f32 %v755_v39, %v4646_v13  ;;  %v4938_v50 = vadd.f32 %v973_v3, %v847_v34  ;;  %v3129_v51 = vpop.f32.mrb[83].mxu0  ;;  %v3065_v8 = vpop.f32.mrb[83].mxu1  ;;  %2245 = vperm.xlu0 %3469, %v2130_v61   ;;  %v2572_v13 = vld [vmem:[%s5390_s0 + $0x45] sm:$0xff]  ;;  %2240 = vperm.xlu1 %3470, %v2129_v47  }
 0x19a   :  { %v1579_v58 = vpack.c.bf16 %v2573_v12, %v2572_v13  ;;  %v2615_v8 = vld [vmem:[%s5390_s0 + $0x56] sm:$0xff] }
 0x19b   :  { %3339 = vmatmul.mubr.bf16.gmra.mrb[188].mxu1 %v1578_v57  ;;  %3403 = vmatmul.mubr.bf16.gmra.mrb[188].mxu0 %v1803_v16 }
 0x19c   :  { %3342 = vmatprep.mubr.msk.bf16.mxu1 %vm3472_vm0, %v3471_v0  ;;  %3406 = vmatprep.mubr.msk.bf16.mxu0 %vm3472_vm0, %v3471_v0 }
 0x19d   :  { %2255 = vperm.xlu0 %3469, %v2132_v22   ;;  %2250 = vperm.xlu1 %3470, %v2131_v7  }
 0x19e   :  { %v760_v48 = vpop.f32.mrb[84].mxu1  ;;  %v978_v20 = vpop.f32.mrb[84].mxu0 }
 0x19f   :  { %v850_v56 = vadd.f32 %v760_v48, %v4680_v42  ;;  %v4969_v23 = vadd.f32 %v978_v20, %v848_v41  ;;  %v3068_v54 = vpop.f32.mrb[85].mxu1  ;;  %v3132_v29 = vpop.f32.mrb[85].mxu0  ;;  %v2574_v42 = vld [vmem:[%s5390_s0 + $0x55] sm:$0xff]  ;;  %v1806_v48 = vpack.c.bf16 %v2616_v35, %v2615_v8 }
 0x1a0   :  { %v763_v31 = vpop.f32.mrb[86].mxu1  ;;  %v981_v34 = vpop.f32.mrb[86].mxu0 }
 0x1a1   :  { %v851_v43 = vadd.f32 %v763_v31, %v4685_v53  ;;  %v4972_v37 = vadd.f32 %v981_v34, %v849_v49  ;;  %v3133_v52 = vpop.f32.mrb[87].mxu0  ;;  %v3069_v59 = vpop.f32.mrb[87].mxu1  ;;  %v2575_v53 = vld [vmem:[%s5390_s0 + $0x5d] sm:$0xff]  ;;  %v2617_v31 = vld [vmem:[%s5390_s0 + $0x66] sm:$0xff]  ;;  %v2618_v34 = vld [vmem:[%s5390_s0 + $0x6e] sm:$0xff] }
 0x1a2   :  { %v1580_v9 = vpack.c.bf16 %v2575_v53, %v2574_v42  ;;  %v1807_v10 = vpack.c.bf16 %v2618_v34, %v2617_v31 }
 0x1a3   :  { %3343 = vmatmul.mubr.bf16.gmra.mrb[192].mxu1 %v1579_v58  ;;  %3407 = vmatmul.mubr.bf16.gmra.mrb[192].mxu0 %v1804_v28 }
 0x1a4   :  { %3346 = vmatprep.mubr.msk.bf16.mxu1 %vm3472_vm0, %v3471_v0  ;;  %3410 = vmatprep.mubr.msk.bf16.mxu0 %vm3472_vm0, %v3471_v0 }
 0x1a6   :  { %v768_v5 = vpop.f32.mrb[88].mxu1  ;;  %v986_v25 = vpop.f32.mrb[88].mxu0 }
 0x1a7   :  { %v852_v46 = vadd.f32 %v768_v5, %v4706_v1  ;;  %v4994_v18 = vadd.f32 %v986_v25, %v850_v56  ;;  %v3072_v30 = vpop.f32.mrb[89].mxu1  ;;  %v3136_v41 = vpop.f32.mrb[89].mxu0  ;;  %v2576_v1 = vld [vmem:[%s5390_s0 + $0x65] sm:$0xff] }
 0x1a8   :  { %v771_v57 = vpop.f32.mrb[90].mxu1  ;;  %v989_v16 = vpop.f32.mrb[90].mxu0 }
 0x1a9   :  { %v853_v39 = vadd.f32 %v771_v57, %v4709_v4  ;;  %v4997_v3 = vadd.f32 %v989_v16, %v851_v43  ;;  %v3137_v49 = vpop.f32.mrb[91].mxu0  ;;  %v3073_v51 = vpop.f32.mrb[91].mxu1  ;;  %v2577_v4 = vld [vmem:[%s5390_s0 + $0x6d] sm:$0xff]  ;;  %v2620_v57 = vld [vmem:[%s5390_s0 + $0x7e] sm:$0xff] }
 0x1aa   :  { %v1581_v22 = vpack.c.bf16 %v2577_v4, %v2576_v1 }
 0x1ab   :  { %3347 = vmatmul.mubr.bf16.gmra.mrb[196].mxu1 %v1580_v9  ;;  %3411 = vmatmul.mubr.bf16.gmra.mrb[196].mxu0 %v1805_v15  ;;  %v2619_v15 = vld [vmem:[%s5390_s0 + $0x76] sm:$0xff] }
 0x1ac   :  { %3350 = vmatprep.mubr.msk.bf16.mxu1 %vm3472_vm0, %v3471_v0  ;;  %3414 = vmatprep.mubr.msk.bf16.mxu0 %vm3472_vm0, %v3471_v0  ;;  %v1808_v35 = vpack.c.bf16 %v2620_v57, %v2619_v15 }
 0x1ae   :  { %v776_v61 = vpop.f32.mrb[92].mxu1  ;;  %v994_v13 = vpop.f32.mrb[92].mxu0 }
 0x1af   :  { %v854_v12 = vadd.f32 %v776_v61, %v4722_v21  ;;  %v5016_v45 = vadd.f32 %v994_v13, %v852_v46  ;;  %v3076_v26 = vpop.f32.mrb[93].mxu1  ;;  %v3140_v47 = vpop.f32.mrb[93].mxu0  ;;  %v2578_v21 = vld [vmem:[%s5390_s0 + $0x75] sm:$0xff] }
 0x1b0   :  { %v779_v20 = vpop.f32.mrb[94].mxu1  ;;  %v997_v56 = vpop.f32.mrb[94].mxu0 }
 0x1b1   :  { %v855_v54 = vadd.f32 %v779_v20, %v4725_v44  ;;  %v5019_v29 = vadd.f32 %v997_v56, %v853_v39  ;;  %v3141_v58 = vpop.f32.mrb[95].mxu0  ;;  %v3077_v28 = vpop.f32.mrb[95].mxu1  ;;  %v2579_v44 = vld [vmem:[%s5390_s0 + $0x7d] sm:$0xff]  ;;  %v2622_v20 = vld [vmem:[%s5390_s0 + $0x8e] sm:$0xff] }
 0x1b2   :  { %v1582_v33 = vpack.c.bf16 %v2579_v44, %v2578_v21 }
 0x1b3   :  { %3351 = vmatmul.mubr.bf16.gmra.mrb[200].mxu1 %v1581_v22  ;;  %3415 = vmatmul.mubr.bf16.gmra.mrb[200].mxu0 %v1806_v48  ;;  %v2621_v48 = vld [vmem:[%s5390_s0 + $0x86] sm:$0xff] }
 0x1b4   :  { %3354 = vmatprep.mubr.msk.bf16.mxu1 %vm3472_vm0, %v3471_v0  ;;  %3418 = vmatprep.mubr.msk.bf16.mxu0 %vm3472_vm0, %v3471_v0  ;;  %v1809_v34 = vpack.c.bf16 %v2622_v20, %v2621_v48 }
 0x1b6   :  { %v784_v43 = vpop.f32.mrb[96].mxu1  ;;  %v1002_v52 = vpop.f32.mrb[96].mxu0 }
 0x1b7   :  { %v856_v59 = vadd.f32 %v784_v43, %v4738_v60  ;;  %v5038_v7 = vadd.f32 %v1002_v52, %v854_v12  ;;  %v3080_v42 = vpop.f32.mrb[97].mxu1  ;;  %v3144_v53 = vpop.f32.mrb[97].mxu0  ;;  %v2580_v60 = vld [vmem:[%s5390_s0 + $0x85] sm:$0xff] }
 0x1b8   :  { %v787_v5 = vpop.f32.mrb[98].mxu1  ;;  %v1005_v25 = vpop.f32.mrb[98].mxu0 }
 0x1b9   :  { %v857_v46 = vadd.f32 %v787_v5, %v4741_v62  ;;  %v5041_v30 = vadd.f32 %v1005_v25, %v855_v54  ;;  %v3145_v41 = vpop.f32.mrb[99].mxu0  ;;  %v3081_v9 = vpop.f32.mrb[99].mxu1  ;;  %v2581_v62 = vld [vmem:[%s5390_s0 + $0x8d] sm:$0xff]  ;;  %v2624_v5 = vld [vmem:[%s5390_s0 + $0x9e] sm:$0xff] }
 0x1ba   :  { %v1583_v8 = vpack.c.bf16 %v2581_v62, %v2580_v60 }
 0x1bb   :  { %3355 = vmatmul.mubr.bf16.gmra.mrb[204].mxu1 %v1582_v33  ;;  %3419 = vmatmul.mubr.bf16.gmra.mrb[204].mxu0 %v1807_v10  ;;  %v2623_v10 = vld [vmem:[%s5390_s0 + $0x96] sm:$0xff] }
 0x1bc   :  { %3358 = vmatprep.mubr.msk.bf16.mxu1 %vm3472_vm0, %v3471_v0  ;;  %3422 = vmatprep.mubr.msk.bf16.mxu0 %vm3472_vm0, %v3471_v0  ;;  %v1810_v57 = vpack.c.bf16 %v2624_v5, %v2623_v10 }
 0x1be   :  { %v792_v16 = vpop.f32.mrb[100].mxu1  ;;  %v1010_v39 = vpop.f32.mrb[100].mxu0 }
 0x1bf   :  { %v858_v49 = vadd.f32 %v792_v16, %v4754_v19  ;;  %v5060_v51 = vadd.f32 %v1010_v39, %v856_v59  ;;  %v3084_v1 = vpop.f32.mrb[101].mxu1  ;;  %v3148_v4 = vpop.f32.mrb[101].mxu0  ;;  %v2582_v19 = vld [vmem:[%s5390_s0 + $0x95] sm:$0xff] }
 0x1c0   :  { %v795_v61 = vpop.f32.mrb[102].mxu1  ;;  %v1013_v13 = vpop.f32.mrb[102].mxu0 }
 0x1c1   :  { %v859_v12 = vadd.f32 %v795_v61, %v4757_v6  ;;  %v5063_v26 = vadd.f32 %v1013_v13, %v857_v46  ;;  %v3149_v47 = vpop.f32.mrb[103].mxu0  ;;  %v3085_v22 = vpop.f32.mrb[103].mxu1  ;;  %v2583_v6 = vld [vmem:[%s5390_s0 + $0x9d] sm:$0xff]  ;;  %v2626_v61 = vld [vmem:[%s5390_s0 + $0xae] sm:$0xff] }
 0x1c2   :  { %v1584_v31 = vpack.c.bf16 %v2583_v6, %v2582_v19 }
 0x1c3   :  { %3359 = vmatmul.mubr.bf16.gmra.mrb[208].mxu1 %v1583_v8  ;;  %3423 = vmatmul.mubr.bf16.gmra.mrb[208].mxu0 %v1808_v35  ;;  %v2625_v35 = vld [vmem:[%s5390_s0 + $0xa6] sm:$0xff] }
 0x1c4   :  { %3362 = vmatprep.mubr.msk.bf16.mxu1 %vm3472_vm0, %v3471_v0  ;;  %3426 = vmatprep.mubr.msk.bf16.mxu0 %vm3472_vm0, %v3471_v0  ;;  %v1811_v20 = vpack.c.bf16 %v2626_v61, %v2625_v35 }
 0x1c6   :  { %v800_v56 = vpop.f32.mrb[104].mxu1  ;;  %v1018_v54 = vpop.f32.mrb[104].mxu0 }
 0x1c7   :  { %v860_v58 = vadd.f32 %v800_v56, %v4770_v11  ;;  %v5082_v28 = vadd.f32 %v1018_v54, %v858_v49  ;;  %v3088_v21 = vpop.f32.mrb[105].mxu1  ;;  %v3152_v44 = vpop.f32.mrb[105].mxu0  ;;  %v2584_v11 = vld [vmem:[%s5390_s0 + $0xa5] sm:$0xff] }
 0x1c8   :  { %v803_v43 = vpop.f32.mrb[106].mxu1  ;;  %v1021_v52 = vpop.f32.mrb[106].mxu0 }
 0x1c9   :  { %v861_v59 = vadd.f32 %v803_v43, %v4773_v2  ;;  %v5085_v42 = vadd.f32 %v1021_v52, %v859_v12  ;;  %v3153_v53 = vpop.f32.mrb[107].mxu0  ;;  %v3089_v33 = vpop.f32.mrb[107].mxu1  ;;  %v2585_v2 = vld [vmem:[%s5390_s0 + $0xad] sm:$0xff]  ;;  %v2628_v43 = vld [vmem:[%s5390_s0 + $0xbe] sm:$0xff] }
 0x1ca   :  { %v1585_v15 = vpack.c.bf16 %v2585_v2, %v2584_v11 }
 0x1cb   :  { %3363 = vmatmul.mubr.bf16.gmra.mrb[212].mxu1 %v1584_v31  ;;  %3427 = vmatmul.mubr.bf16.gmra.mrb[212].mxu0 %v1809_v34  ;;  %v2627_v34 = vld [vmem:[%s5390_s0 + $0xb6] sm:$0xff] }
 0x1cc   :  { %3366 = vmatprep.mubr.msk.bf16.mxu1 %vm3472_vm0, %v3471_v0  ;;  %3430 = vmatprep.mubr.msk.bf16.mxu0 %vm3472_vm0, %v3471_v0  ;;  %v1812_v5 = vpack.c.bf16 %v2628_v43, %v2627_v34 }
 0x1ce   :  { %v808_v25 = vpop.f32.mrb[108].mxu1  ;;  %v1026_v46 = vpop.f32.mrb[108].mxu0 }
 0x1cf   :  { %v862_v41 = vadd.f32 %v808_v25, %v4789_v55  ;;  %v5104_v9 = vadd.f32 %v1026_v46, %v860_v58  ;;  %v3092_v60 = vpop.f32.mrb[109].mxu1  ;;  %v3156_v62 = vpop.f32.mrb[109].mxu0  ;;  %v2586_v55 = vld [vmem:[%s5390_s0 + $0xb5] sm:$0xff] }
 0x1d0   :  { %v811_v16 = vpop.f32.mrb[110].mxu1  ;;  %v1029_v39 = vpop.f32.mrb[110].mxu0 }
 0x1d1   :  { %v863_v49 = vadd.f32 %v811_v16, %v4795_v32  ;;  %v5107_v1 = vadd.f32 %v1029_v39, %v861_v59  ;;  %v3157_v4 = vpop.f32.mrb[111].mxu0  ;;  %v3093_v8 = vpop.f32.mrb[111].mxu1  ;;  %v2587_v32 = vld [vmem:[%s5390_s0 + $0xbd] sm:$0xff] }
 0x1d2   :  { %v1586_v48 = vpack.c.bf16 %v2587_v32, %v2586_v55 }
 0x1d3   :  { %3367 = vmatmul.mubr.bf16.gmra.mrb[216].mxu1 %v1585_v15  ;;  %3431 = vmatmul.mubr.bf16.gmra.mrb[216].mxu0 %v1810_v57  ;;  %v2630_v57 = vld [vmem:[%s5390_s0 + $0xce] sm:$0xff] }
 0x1d4   :  { %3370 = vmatprep.mubr.msk.bf16.mxu1 %vm3472_vm0, %v3471_v0  ;;  %3434 = vmatprep.mubr.msk.bf16.mxu0 %vm3472_vm0, %v3471_v0 }
 0x1d6   :  { %v816_v13 = vpop.f32.mrb[112].mxu1  ;;  %v1034_v12 = vpop.f32.mrb[112].mxu0 }
 0x1d7   :  { %v864_v47 = vadd.f32 %v816_v13, %v4814_v38  ;;  %v5126_v22 = vadd.f32 %v1034_v12, %v862_v41  ;;  %v3096_v19 = vpop.f32.mrb[113].mxu1  ;;  %v3160_v6 = vpop.f32.mrb[113].mxu0  ;;  %v2588_v38 = vld [vmem:[%s5390_s0 + $0xc5] sm:$0xff] }
 0x1d8   :  { %v819_v56 = vpop.f32.mrb[114].mxu1  ;;  %v1037_v54 = vpop.f32.mrb[114].mxu0 }
 0x1d9   :  { %v865_v58 = vadd.f32 %v819_v56, %v4820_v36  ;;  %v5129_v21 = vadd.f32 %v1037_v54, %v863_v49  ;;  %v3161_v44 = vpop.f32.mrb[115].mxu0  ;;  %v3097_v31 = vpop.f32.mrb[115].mxu1  ;;  %v2589_v36 = vld [vmem:[%s5390_s0 + $0xcd] sm:$0xff] }
 0x1da   :  { %v1587_v10 = vpack.c.bf16 %v2589_v36, %v2588_v38 }
 0x1db   :  { %3371 = vmatmul.mubr.bf16.gmra.mrb[220].mxu1 %v1586_v48  ;;  %3435 = vmatmul.mubr.bf16.gmra.mrb[220].mxu0 %v1811_v20 }
 0x1dc   :  { %3374 = vmatprep.mubr.msk.bf16.mxu1 %vm3472_vm0, %v3471_v0  ;;  %3438 = vmatprep.mubr.msk.bf16.mxu0 %vm3472_vm0, %v3471_v0 }
 0x1de   :  { %v824_v52 = vpop.f32.mrb[116].mxu1  ;;  %v1042_v59 = vpop.f32.mrb[116].mxu0 }
 0x1df   :  { %v866_v53 = vadd.f32 %v824_v52, %v4839_v14  ;;  %v5148_v33 = vadd.f32 %v1042_v59, %v864_v47  ;;  %v3100_v11 = vpop.f32.mrb[117].mxu1  ;;  %v3164_v2 = vpop.f32.mrb[117].mxu0  ;;  %v2590_v14 = vld [vmem:[%s5390_s0 + $0xd5] sm:$0xff] }
 0x1e0   :  { %v827_v25 = vpop.f32.mrb[118].mxu1  ;;  %v1045_v46 = vpop.f32.mrb[118].mxu0  ;;  %v1588_v32 = vpack.c.bf16 %v2590_v14, %v2590_v14 }
 0x1e1   :  { %v867_v41 = vadd.f32 %v827_v25, %v4842_v63  ;;  %v5151_v60 = vadd.f32 %v1045_v46, %v865_v58  ;;  %v3165_v62 = vpop.f32.mrb[119].mxu0  ;;  %v3101_v15 = vpop.f32.mrb[119].mxu1  ;;  %v2629_v63 = vld [vmem:[%s5390_s0 + $0xc6] sm:$0xff] }
 0x1e2   :  { %v1813_v35 = vpack.c.bf16 %v2630_v57, %v2629_v63 }
 0x1e3   :  { %3375 = vmatmul.mubr.bf16.gmra.mrb[224].mxu1 %v1587_v10  ;;  %3439 = vmatmul.mubr.bf16.gmra.mrb[224].mxu0 %v1812_v5 }
 0x1e4   :  { %3378 = vmatprep.mubr.msk.bf16.mxu1 %vm3472_vm0, %v3471_v0  ;;  %3442 = vmatprep.mubr.msk.bf16.mxu0 %vm3472_vm0, %v3471_v0 }
 0x1e6   :  { %v832_v16 = vpop.f32.mrb[120].mxu1  ;;  %v1050_v39 = vpop.f32.mrb[120].mxu0 }
 0x1e7   :  { %v868_v49 = vadd.f32 %v832_v16, %v4870_v24  ;;  %v5167_v4 = vadd.f32 %v1050_v39, %v866_v53  ;;  %v3104_v8 = vpop.f32.mrb[121].mxu1  ;;  %v3168_v55 = vpop.f32.mrb[121].mxu0  ;;  %v2631_v24 = vld [vmem:[%s5390_s0 + $0xd6] sm:$0xff] }
 0x1e8   :  { %v835_v61 = vpop.f32.mrb[122].mxu1  ;;  %v1053_v13 = vpop.f32.mrb[122].mxu0  ;;  %v1814_v44 = vpack.c.bf16 %v2631_v24, %v2631_v24 }
 0x1e9   :  { %v869_v12 = vadd.f32 %v835_v61, %v4872_v17  ;;  %v5170_v47 = vadd.f32 %v1053_v13, %v867_v41  ;;  %v3169_v19 = vpop.f32.mrb[123].mxu0  ;;  %v3105_v6 = vpop.f32.mrb[123].mxu1 }
 0x1eb   :  { %3379 = vmatmul.mubr.bf16.gmra.mrb[228].mxu1 %v1588_v32  ;;  %3443 = vmatmul.mubr.bf16.gmra.mrb[228].mxu0 %v1813_v35 }
 0x1ec   :  { %3446 = vmatprep.mubr.msk.bf16.mxu0 %vm3472_vm0, %v3471_v0 }
 0x1ee   :  { %v840_v48 = vpop.f32.mrb[124].mxu1  ;;  %v1058_v20 = vpop.f32.mrb[124].mxu0 }
 0x1ef   :  { %v870_v56 = vadd.f32 %v840_v48, %v4902_v27  ;;  %v5178_v54 = vadd.f32 %v1058_v20, %v868_v49  ;;  %v3172_v17 = vpop.f32.mrb[125].mxu0  ;;  %v3108_v58 = vpop.f32.mrb[125].mxu1 }
 0x1f0   :  { %v1061_v31 = vpop.f32.mrb[126].mxu0  ;;  %v843_v38 = vpop.f32.mrb[126].mxu1 }
 0x1f1   :  { %v5180_v36 = vadd.f32 %v1061_v31, %v869_v12  ;;  %v3173_v34 = vpop.f32.mrb[127].mxu0  ;;  %v3109_v43 = vpop.f32.mrb[127].mxu1 }
 0x1f3   :  { %3447 = vmatmul.mubr.bf16.gmra.mrb[232].mxu0 %v1814_v44 }
 0x1f6   :  { %v1066_v0 = vpop.f32.mrb[128].mxu0  ;;  %v1196_v52 = vpop.f32.mrb[128].mxu1 }
 0x1f7   :  { %v5182_v59 = vadd.f32 %v1066_v0, %v870_v56  ;;  %v1298_v53 = vadd.f32 %v1196_v52, %v4935_v40  ;;  %v3176_v11 = vpop.f32.mrb[129].mxu0  ;;  %v3196_v27 = vpop.f32.mrb[129].mxu1 }
 0x1f8   :  { %v1069_v2 = vpop.f32.mrb[130].mxu0  ;;  %v1199_v10 = vpop.f32.mrb[130].mxu1 }
 0x1f9   :  { %v1299_v5 = vadd.f32 %v1199_v10, %v4938_v50  ;;  %v3177_v25 = vpop.f32.mrb[131].mxu0  ;;  %v3197_v46 = vpop.f32.mrb[131].mxu1 }
 0x1fe   :  { %v1204_v41 = vpop.f32.mrb[132].mxu1  ;;  %v1422_v62 = vpop.f32.mrb[132].mxu0 }
 0x1ff   :  { %v1300_v15 = vadd.f32 %v1204_v41, %v4969_v23  ;;  %v5187_v14 = vadd.f32 %v1422_v62, %v1298_v53  ;;  %v3200_v63 = vpop.f32.mrb[133].mxu1  ;;  %v3264_v57 = vpop.f32.mrb[133].mxu0 }
 0x200   :  { %v1207_v16 = vpop.f32.mrb[134].mxu1  ;;  %v1425_v39 = vpop.f32.mrb[134].mxu0 }
 0x201   :  { %v1301_v40 = vadd.f32 %v1207_v16, %v4972_v37  ;;  %v5190_v49 = vadd.f32 %v1425_v39, %v1299_v5  ;;  %v3265_v8 = vpop.f32.mrb[135].mxu0  ;;  %v3201_v55 = vpop.f32.mrb[135].mxu1 }
 0x206   :  { %v1212_v32 = vpop.f32.mrb[136].mxu1  ;;  %v1430_v50 = vpop.f32.mrb[136].mxu0 }
 0x207   :  { %v1302_v35 = vadd.f32 %v1212_v32, %v4994_v18  ;;  %v5193_v61 = vadd.f32 %v1430_v50, %v1300_v15  ;;  %v3204_v13 = vpop.f32.mrb[137].mxu1  ;;  %v3268_v23 = vpop.f32.mrb[137].mxu0 }
 0x208   :  { %v1215_v12 = vpop.f32.mrb[138].mxu1  ;;  %v1433_v19 = vpop.f32.mrb[138].mxu0 }
 0x209   :  { %v1303_v6 = vadd.f32 %v1215_v12, %v4997_v3  ;;  %v5196_v24 = vadd.f32 %v1433_v19, %v1301_v40  ;;  %v3269_v48 = vpop.f32.mrb[139].mxu0  ;;  %v3205_v37 = vpop.f32.mrb[139].mxu1 }
 0x20e   :  { %v1220_v20 = vpop.f32.mrb[140].mxu1  ;;  %v1438_v56 = vpop.f32.mrb[140].mxu0 }
 0x20f   :  { %v1304_v17 = vadd.f32 %v1220_v20, %v5016_v45  ;;  %v5199_v58 = vadd.f32 %v1438_v56, %v1302_v35  ;;  %v3208_v44 = vpop.f32.mrb[141].mxu1  ;;  %v3272_v18 = vpop.f32.mrb[141].mxu0 }
 0x210   :  { %v1223_v31 = vpop.f32.mrb[142].mxu1  ;;  %v1441_v38 = vpop.f32.mrb[142].mxu0 }
 0x211   :  { %v1305_v34 = vadd.f32 %v1223_v31, %v5019_v29  ;;  %v5202_v43 = vadd.f32 %v1441_v38, %v1303_v6  ;;  %v3273_v0 = vpop.f32.mrb[143].mxu0  ;;  %v3209_v3 = vpop.f32.mrb[143].mxu1 }
 0x216   :  { %v1228_v52 = vpop.f32.mrb[144].mxu1  ;;  %v1446_v53 = vpop.f32.mrb[144].mxu0 }
 0x217   :  { %v1306_v11 = vadd.f32 %v1228_v52, %v5038_v7  ;;  %v5205_v27 = vadd.f32 %v1446_v53, %v1304_v17  ;;  %v3212_v2 = vpop.f32.mrb[145].mxu1  ;;  %v3276_v45 = vpop.f32.mrb[145].mxu0 }
 0x218   :  { %v1231_v10 = vpop.f32.mrb[146].mxu1  ;;  %v1449_v5 = vpop.f32.mrb[146].mxu0 }
 0x219   :  { %v1307_v25 = vadd.f32 %v1231_v10, %v5041_v30  ;;  %v5208_v46 = vadd.f32 %v1449_v5, %v1305_v34  ;;  %v3277_v41 = vpop.f32.mrb[147].mxu0  ;;  %v3213_v29 = vpop.f32.mrb[147].mxu1 }
 0x21e   :  { %v1236_v62 = vpop.f32.mrb[148].mxu1  ;;  %v1454_v15 = vpop.f32.mrb[148].mxu0 }
 0x21f   :  { %v1308_v63 = vadd.f32 %v1236_v62, %v5060_v51  ;;  %v5211_v57 = vadd.f32 %v1454_v15, %v1306_v11  ;;  %v3216_v16 = vpop.f32.mrb[149].mxu1  ;;  %v3280_v7 = vpop.f32.mrb[149].mxu0 }
 0x220   :  { %v1239_v39 = vpop.f32.mrb[150].mxu1  ;;  %v1457_v40 = vpop.f32.mrb[150].mxu0 }
 0x221   :  { %v1309_v8 = vadd.f32 %v1239_v39, %v5063_v26  ;;  %v5214_v55 = vadd.f32 %v1457_v40, %v1307_v25  ;;  %v3281_v32 = vpop.f32.mrb[151].mxu0  ;;  %v3217_v30 = vpop.f32.mrb[151].mxu1 }
 0x226   :  { %v1244_v50 = vpop.f32.mrb[152].mxu1  ;;  %v1462_v35 = vpop.f32.mrb[152].mxu0 }
 0x227   :  { %v1310_v13 = vadd.f32 %v1244_v50, %v5082_v28  ;;  %v5217_v23 = vadd.f32 %v1462_v35, %v1308_v63  ;;  %v3220_v12 = vpop.f32.mrb[153].mxu1  ;;  %v3284_v51 = vpop.f32.mrb[153].mxu0 }
 0x228   :  { %v1247_v19 = vpop.f32.mrb[154].mxu1  ;;  %v1465_v6 = vpop.f32.mrb[154].mxu0 }
 0x229   :  { %v1311_v48 = vadd.f32 %v1247_v19, %v5085_v42  ;;  %v5220_v37 = vadd.f32 %v1465_v6, %v1309_v8  ;;  %v3285_v20 = vpop.f32.mrb[155].mxu0  ;;  %v3221_v26 = vpop.f32.mrb[155].mxu1 }
 0x22e   :  { %v1252_v56 = vpop.f32.mrb[156].mxu1  ;;  %v1470_v17 = vpop.f32.mrb[156].mxu0 }
 0x22f   :  { %v1312_v44 = vadd.f32 %v1252_v56, %v5104_v9  ;;  %v5223_v18 = vadd.f32 %v1470_v17, %v1310_v13  ;;  %v3224_v31 = vpop.f32.mrb[157].mxu1  ;;  %v3288_v28 = vpop.f32.mrb[157].mxu0 }
 0x230   :  { %v1255_v38 = vpop.f32.mrb[158].mxu1  ;;  %v1473_v34 = vpop.f32.mrb[158].mxu0 }
 0x231   :  { %v1313_v0 = vadd.f32 %v1255_v38, %v5107_v1  ;;  %v5226_v3 = vadd.f32 %v1473_v34, %v1311_v48  ;;  %v3289_v52 = vpop.f32.mrb[159].mxu0  ;;  %v3225_v42 = vpop.f32.mrb[159].mxu1 }
 0x236   :  { %v1260_v53 = vpop.f32.mrb[160].mxu1  ;;  %v1478_v11 = vpop.f32.mrb[160].mxu0 }
 0x237   :  { %v1314_v2 = vadd.f32 %v1260_v53, %v5126_v22  ;;  %v5229_v45 = vadd.f32 %v1478_v11, %v1312_v44  ;;  %v3228_v10 = vpop.f32.mrb[161].mxu1  ;;  %v3292_v9 = vpop.f32.mrb[161].mxu0 }
 0x238   :  { %v1263_v5 = vpop.f32.mrb[162].mxu1  ;;  %v1481_v25 = vpop.f32.mrb[162].mxu0 }
 0x239   :  { %v1315_v41 = vadd.f32 %v1263_v5, %v5129_v21  ;;  %v5232_v29 = vadd.f32 %v1481_v25, %v1313_v0  ;;  %v3293_v62 = vpop.f32.mrb[163].mxu0  ;;  %v3229_v1 = vpop.f32.mrb[163].mxu1 }
 0x23e   :  { %v1268_v15 = vpop.f32.mrb[164].mxu1  ;;  %v1486_v63 = vpop.f32.mrb[164].mxu0 }
 0x23f   :  { %v1316_v16 = vadd.f32 %v1268_v15, %v5148_v33  ;;  %v5235_v7 = vadd.f32 %v1486_v63, %v1314_v2  ;;  %v3232_v39 = vpop.f32.mrb[165].mxu1  ;;  %v3296_v22 = vpop.f32.mrb[165].mxu0 }
 0x240   :  { %v1271_v40 = vpop.f32.mrb[166].mxu1  ;;  %v1489_v8 = vpop.f32.mrb[166].mxu0 }
 0x241   :  { %v1317_v32 = vadd.f32 %v1271_v40, %v5151_v60  ;;  %v5238_v30 = vadd.f32 %v1489_v8, %v1315_v41  ;;  %v3297_v50 = vpop.f32.mrb[167].mxu0  ;;  %v3233_v21 = vpop.f32.mrb[167].mxu1 }
 0x246   :  { %v1276_v35 = vpop.f32.mrb[168].mxu1  ;;  %v1494_v13 = vpop.f32.mrb[168].mxu0 }
 0x247   :  { %v1318_v12 = vadd.f32 %v1276_v35, %v5167_v4  ;;  %v5241_v51 = vadd.f32 %v1494_v13, %v1316_v16  ;;  %v3236_v19 = vpop.f32.mrb[169].mxu1  ;;  %v3300_v33 = vpop.f32.mrb[169].mxu0 }
 0x248   :  { %v1279_v6 = vpop.f32.mrb[170].mxu1  ;;  %v1497_v48 = vpop.f32.mrb[170].mxu0  ;;  %v5264_v19 = vld [vmem:[%s5392_s2] ss:$0 sm:$0xff] }
 0x249   :  { %v1319_v20 = vadd.f32 %v1279_v6, %v5170_v47  ;;  %v5244_v26 = vadd.f32 %v1497_v48, %v1317_v32  ;;  %v3301_v56 = vpop.f32.mrb[171].mxu0  ;;  %v3237_v60 = vpop.f32.mrb[171].mxu1 }
 0x24a   :  { %v2136_v35 = vpop.permute.xlu0 %2135 }
 0x24e   :  { %v1284_v17 = vpop.f32.mrb[172].mxu1  ;;  %v1502_v44 = vpop.f32.mrb[172].mxu0 }
 0x24f   :  { %v1320_v31 = vadd.f32 %v1284_v17, %v5178_v54  ;;  %v5247_v28 = vadd.f32 %v1502_v44, %v1318_v12  ;;  %v3240_v38 = vpop.f32.mrb[173].mxu1  ;;  %v3304_v4 = vpop.f32.mrb[173].mxu0 }
 0x250   :  { %v1287_v34 = vpop.f32.mrb[174].mxu1  ;;  %v1505_v0 = vpop.f32.mrb[174].mxu0 }
 0x251   :  { %v1321_v52 = vadd.f32 %v1287_v34, %v5180_v36  ;;  %v5250_v42 = vadd.f32 %v1505_v0, %v1319_v20  ;;  %v3305_v53 = vpop.f32.mrb[175].mxu0  ;;  %v3241_v47 = vpop.f32.mrb[175].mxu1 }
 0x252   :  { %v2141_v0 = vpop.permute.xlu0 %2140 }
 0x256   :  { %v1292_v11 = vpop.f32.mrb[176].mxu1  ;;  %v1510_v2 = vpop.f32.mrb[176].mxu0 }
 0x257   :  { %v1322_v10 = vadd.f32 %v1292_v11, %v5182_v59  ;;  %v5253_v9 = vadd.f32 %v1510_v2, %v1320_v31  ;;  %v3308_v5 = vpop.f32.mrb[177].mxu0  ;;  %v3244_v54 = vpop.f32.mrb[177].mxu1 }
 0x258   :  { %v1513_v25 = vpop.f32.mrb[178].mxu0  ;;  %v1295_v41 = vpop.f32.mrb[178].mxu1 }
 0x259   :  { %v5255_v62 = vadd.f32 %v1513_v25, %v1321_v52  ;;  %v3309_v1 = vpop.f32.mrb[179].mxu0  ;;  %v3245_v15 = vpop.f32.mrb[179].mxu1 }
 0x25a   :  { %v2146_v52 = vpop.permute.xlu1 %2145 }
 0x25e   :  { %v1518_v63 = vpop.f32.mrb[180].mxu0  ;;  %v1648_v36 = vpop.f32.mrb[180].mxu1 }
 0x25f   :  { %v5257_v16 = vadd.f32 %v1518_v63, %v1322_v10  ;;  %v1750_v39 = vadd.f32 %v1648_v36, %v5187_v14  ;;  %v3312_v22 = vpop.f32.mrb[181].mxu0  ;;  %v3332_v40 = vpop.f32.mrb[181].mxu1 }
 0x260   :  { %v1521_v8 = vpop.f32.mrb[182].mxu0  ;;  %v1651_v59 = vpop.f32.mrb[182].mxu1 }
 0x261   :  { %v1751_v32 = vadd.f32 %v1651_v59, %v5190_v49  ;;  %v3313_v50 = vpop.f32.mrb[183].mxu0  ;;  %v3333_v21 = vpop.f32.mrb[183].mxu1 }
 0x262   :  { %v2151_v59 = vpop.permute.xlu1 %2150 }
 0x266   :  { %v1656_v13 = vpop.f32.mrb[184].mxu1  ;;  %v1874_v12 = vpop.f32.mrb[184].mxu0 }
 0x267   :  { %v1752_v33 = vadd.f32 %v1656_v13, %v5193_v61  ;;  %v1976_v6 = vadd.f32 %v1874_v12, %v1750_v39  ;;  %v3336_v14 = vpop.f32.mrb[185].mxu1  ;;  %v3400_v48 = vpop.f32.mrb[185].mxu0 }
 0x268   :  { %v1659_v20 = vpop.f32.mrb[186].mxu1  ;;  %v1877_v56 = vpop.f32.mrb[186].mxu0 }
 0x269   :  { %v2008_v60 = vadd.f32 %v5264_v19, %v1976_v6  ;;  %v1753_v49 = vadd.f32 %v1659_v20, %v5196_v24  ;;  %v1977_v17 = vadd.f32 %v1877_v56, %v1751_v32  ;;  %v3401_v44 = vpop.f32.mrb[187].mxu0  ;;  %v3337_v31 = vpop.f32.mrb[187].mxu1 }
 0x26b   :  { %v2009_v38 = vadd.f32 %v5264_v19, %v1977_v17  ;;  %vm2033_vm1 = vcmp.gt.f32.partialorder %v2008_v60, 0.0  ;;  %v2058_v4 = vmul.f32 0.2, %v2008_v60 }
 0x26d   :  { %v2083_v34 = vsel %vm2033_vm1, %v2008_v60, %v2058_v4  ;;  %vm2034_vm2 = vcmp.gt.f32.partialorder %v2009_v38, 0.0  ;;  %v2059_v61 = vmul.f32 0.2, %v2009_v38 }
 0x26e   :  { %v2258_v53 = vmul.f32 %v2136_v35, %v2083_v34  ;;  %v1664_v47 = vpop.f32.mrb[188].mxu1  ;;  %v1882_v11 = vpop.f32.mrb[188].mxu0 }
 0x26f   :  { %v1754_v2 = vadd.f32 %v1664_v47, %v5199_v58  ;;  %v1978_v10 = vadd.f32 %v1882_v11, %v1752_v33  ;;  %v2084_v5 = vsel %vm2034_vm2, %v2009_v38, %v2059_v61  ;;  %v3340_v24 = vpop.f32.mrb[189].mxu1  ;;  %v3404_v54 = vpop.f32.mrb[189].mxu0 }
 0x270   :  { %2283 = vst [vmem:[%s5393_s4] sm:$0xff] %v2258_v53  ;;  %v2259_v25 = vmul.f32 %v2141_v0, %v2084_v5  ;;  %v1667_v41 = vpop.f32.mrb[190].mxu1  ;;  %v1885_v1 = vpop.f32.mrb[190].mxu0 }
 0x271   :  { %v2010_v15 = vadd.f32 %v5264_v19, %v1978_v10  ;;  %v1755_v63 = vadd.f32 %v1667_v41, %v5202_v43  ;;  %v1979_v36 = vadd.f32 %v1885_v1, %v1753_v49  ;;  %v3405_v39 = vpop.f32.mrb[191].mxu0  ;;  %v3341_v22 = vpop.f32.mrb[191].mxu1 }
 0x272   :  { %2284 = vst [vmem:[%s5393_s4 + $0x8] sm:$0xff] %v2259_v25  ;;  %v2156_v38 = vpop.permute.xlu0 %2155  ;;  %v2161_v34 = vpop.permute.xlu1 %2160 }
 0x273   :  { %v2011_v58 = vadd.f32 %v5264_v19, %v1979_v36  ;;  %vm2035_vm3 = vcmp.gt.f32.partialorder %v2010_v15, 0.0  ;;  %v2060_v40 = vmul.f32 0.2, %v2010_v15 }
 0x275   :  { %v2085_v8 = vsel %vm2035_vm3, %v2010_v15, %v2060_v40  ;;  %vm2036_vm4 = vcmp.gt.f32.partialorder %v2011_v58, 0.0  ;;  %v2061_v32 = vmul.f32 0.2, %v2011_v58 }
 0x276   :  { %v2260_v50 = vmul.f32 %v2146_v52, %v2085_v8  ;;  %v1672_v21 = vpop.f32.mrb[192].mxu1  ;;  %v1890_v35 = vpop.f32.mrb[192].mxu0 }
 0x277   :  { %v1756_v43 = vadd.f32 %v1672_v21, %v5205_v27  ;;  %v1980_v13 = vadd.f32 %v1890_v35, %v1754_v2  ;;  %v2086_v12 = vsel %vm2036_vm4, %v2011_v58, %v2061_v32  ;;  %v3344_v33 = vpop.f32.mrb[193].mxu1  ;;  %v3408_v6 = vpop.f32.mrb[193].mxu0 }
 0x278   :  { %2285 = vst [vmem:[%s5393_s4 + $0x10] sm:$0xff] %v2260_v50  ;;  %v2261_v14 = vmul.f32 %v2151_v59, %v2086_v12  ;;  %v1675_v48 = vpop.f32.mrb[194].mxu1  ;;  %v1893_v20 = vpop.f32.mrb[194].mxu0 }
 0x279   :  { %v2012_v56 = vadd.f32 %v5264_v19, %v1980_v13  ;;  %v1757_v60 = vadd.f32 %v1675_v48, %v5208_v46  ;;  %v1981_v49 = vadd.f32 %v1893_v20, %v1755_v63  ;;  %v3409_v17 = vpop.f32.mrb[195].mxu0  ;;  %v3345_v44 = vpop.f32.mrb[195].mxu1 }
 0x27a   :  { %2286 = vst [vmem:[%s5393_s4 + $0x18] sm:$0xff] %v2261_v14  ;;  %v2166_v39 = vpop.permute.xlu0 %2165  ;;  %v2171_v58 = vpop.permute.xlu1 %2170 }
 0x27b   :  { %vm2037_vm5 = vcmp.gt.f32.partialorder %v2012_v56, 0.0  ;;  %v2062_v27 = vmul.f32 0.2, %v2012_v56  ;;  %v2013_v31 = vadd.f32 %v5264_v19, %v1981_v49 }
 0x27d   :  { %v2087_v4 = vsel %vm2037_vm5, %v2012_v56, %v2062_v27  ;;  %vm2038_vm6 = vcmp.gt.f32.partialorder %v2013_v31, 0.0  ;;  %v2063_v0 = vmul.f32 0.2, %v2013_v31 }
 0x27e   :  { %v2262_v61 = vmul.f32 %v2156_v38, %v2087_v4  ;;  %v1680_v52 = vpop.f32.mrb[196].mxu1  ;;  %v1898_v53 = vpop.f32.mrb[196].mxu0 }
 0x27f   :  { %v2088_v46 = vsel %vm2038_vm6, %v2013_v31, %v2063_v0  ;;  %v1758_v47 = vadd.f32 %v1680_v52, %v5211_v57  ;;  %v1982_v11 = vadd.f32 %v1898_v53, %v1756_v43  ;;  %v3348_v2 = vpop.f32.mrb[197].mxu1  ;;  %v3412_v10 = vpop.f32.mrb[197].mxu0 }
 0x280   :  { %2287 = vst [vmem:[%s5393_s4 + $0x20] sm:$0xff] %v2262_v61  ;;  %v2263_v5 = vmul.f32 %v2161_v34, %v2088_v46  ;;  %v1683_v24 = vpop.f32.mrb[198].mxu1  ;;  %v1901_v54 = vpop.f32.mrb[198].mxu0 }
 0x281   :  { %v2014_v25 = vadd.f32 %v5264_v19, %v1982_v11  ;;  %v1759_v41 = vadd.f32 %v1683_v24, %v5214_v55  ;;  %v1983_v1 = vadd.f32 %v1901_v54, %v1757_v60  ;;  %v3413_v15 = vpop.f32.mrb[199].mxu0  ;;  %v3349_v63 = vpop.f32.mrb[199].mxu1 }
 0x282   :  { %2288 = vst [vmem:[%s5393_s4 + $0x28] sm:$0xff] %v2263_v5  ;;  %v2176_v49 = vpop.permute.xlu0 %2175  ;;  %v2181_v17 = vpop.permute.xlu1 %2180 }
 0x283   :  { %vm2039_vm7 = vcmp.gt.f32.partialorder %v2014_v25, 0.0  ;;  %v2064_v57 = vmul.f32 0.2, %v2014_v25  ;;  %v2015_v36 = vadd.f32 %v5264_v19, %v1983_v1 }
 0x285   :  { %v2089_v22 = vsel %vm2039_vm7, %v2014_v25, %v2064_v57  ;;  %vm2040_vm8 = vcmp.gt.f32.partialorder %v2015_v36, 0.0  ;;  %v2065_v40 = vmul.f32 0.2, %v2015_v36 }
 0x286   :  { %v2264_v8 = vmul.f32 %v2166_v39, %v2089_v22  ;;  %v1688_v59 = vpop.f32.mrb[200].mxu1  ;;  %v1906_v32 = vpop.f32.mrb[200].mxu0 }
 0x287   :  { %v2090_v55 = vsel %vm2040_vm8, %v2015_v36, %v2065_v40  ;;  %v1760_v50 = vadd.f32 %v1688_v59, %v5217_v23  ;;  %v1984_v21 = vadd.f32 %v1906_v32, %v1758_v47  ;;  %v3352_v35 = vpop.f32.mrb[201].mxu1  ;;  %v3416_v43 = vpop.f32.mrb[201].mxu0 }
 0x288   :  { %2289 = vst [vmem:[%s5393_s4 + $0x30] sm:$0xff] %v2264_v8  ;;  %v2265_v13 = vmul.f32 %v2171_v58, %v2090_v55  ;;  %v1691_v12 = vpop.f32.mrb[202].mxu1  ;;  %v1909_v33 = vpop.f32.mrb[202].mxu0 }
 0x289   :  { %v2016_v6 = vadd.f32 %v5264_v19, %v1984_v21  ;;  %v1761_v14 = vadd.f32 %v1691_v12, %v5220_v37  ;;  %v1985_v48 = vadd.f32 %v1909_v33, %v1759_v41  ;;  %v3417_v20 = vpop.f32.mrb[203].mxu0  ;;  %v3353_v56 = vpop.f32.mrb[203].mxu1 }
 0x28a   :  { %2290 = vst [vmem:[%s5393_s4 + $0x38] sm:$0xff] %v2265_v13  ;;  %v2186_v25 = vpop.permute.xlu0 %2185  ;;  %v2191_v41 = vpop.permute.xlu1 %2190 }
 0x28b   :  { %vm2041_vm9 = vcmp.gt.f32.partialorder %v2016_v6, 0.0  ;;  %v2066_v23 = vmul.f32 0.2, %v2016_v6  ;;  %v2017_v60 = vadd.f32 %v5264_v19, %v1985_v48 }
 0x28d   :  { %v2091_v44 = vsel %vm2041_vm9, %v2016_v6, %v2066_v23  ;;  %vm2042_vm10 = vcmp.gt.f32.partialorder %v2017_v60, 0.0  ;;  %v2067_v27 = vmul.f32 0.2, %v2017_v60 }
 0x28e   :  { %v2266_v31 = vmul.f32 %v2176_v49, %v2091_v44  ;;  %v1696_v38 = vpop.f32.mrb[204].mxu1  ;;  %v1914_v4 = vpop.f32.mrb[204].mxu0 }
 0x28f   :  { %v2092_v37 = vsel %vm2042_vm10, %v2017_v60, %v2067_v27  ;;  %v1762_v34 = vadd.f32 %v1696_v38, %v5223_v18  ;;  %v1986_v0 = vadd.f32 %v1914_v4, %v1760_v50  ;;  %v3356_v61 = vpop.f32.mrb[205].mxu1  ;;  %v3420_v52 = vpop.f32.mrb[205].mxu0 }
 0x290   :  { %2291 = vst [vmem:[%s5393_s4 + $0x40] sm:$0xff] %v2266_v31  ;;  %v2267_v53 = vmul.f32 %v2181_v17, %v2092_v37  ;;  %v1699_v46 = vpop.f32.mrb[206].mxu1  ;;  %v1917_v47 = vpop.f32.mrb[206].mxu0 }
 0x291   :  { %v2018_v11 = vadd.f32 %v5264_v19, %v1986_v0  ;;  %v1763_v2 = vadd.f32 %v1699_v46, %v5226_v3  ;;  %v1987_v10 = vadd.f32 %v1917_v47, %v1761_v14  ;;  %v3421_v5 = vpop.f32.mrb[207].mxu0  ;;  %v3357_v24 = vpop.f32.mrb[207].mxu1 }
 0x292   :  { %2292 = vst [vmem:[%s5393_s4 + $0x48] sm:$0xff] %v2267_v53  ;;  %v2196_v12 = vpop.permute.xlu0 %2195  ;;  %v2201_v33 = vpop.permute.xlu1 %2200 }
 0x293   :  { %vm2043_vm11 = vcmp.gt.f32.partialorder %v2018_v11, 0.0  ;;  %v2068_v18 = vmul.f32 0.2, %v2018_v11  ;;  %v2019_v54 = vadd.f32 %v5264_v19, %v1987_v10 }
 0x295   :  { %v2093_v1 = vsel %vm2043_vm11, %v2018_v11, %v2068_v18  ;;  %vm2044_vm12 = vcmp.gt.f32.partialorder %v2019_v54, 0.0  ;;  %v2069_v15 = vmul.f32 0.2, %v2019_v54 }
 0x296   :  { %v2268_v63 = vmul.f32 %v2186_v25, %v2093_v1  ;;  %v1704_v57 = vpop.f32.mrb[208].mxu1  ;;  %v1922_v36 = vpop.f32.mrb[208].mxu0 }
 0x297   :  { %v2094_v3 = vsel %vm2044_vm12, %v2019_v54, %v2069_v15  ;;  %v1764_v39 = vadd.f32 %v1704_v57, %v5229_v45  ;;  %v1988_v22 = vadd.f32 %v1922_v36, %v1762_v34  ;;  %v3360_v58 = vpop.f32.mrb[209].mxu1  ;;  %v3424_v40 = vpop.f32.mrb[209].mxu0 }
 0x298   :  { %2293 = vst [vmem:[%s5393_s4 + $0x50] sm:$0xff] %v2268_v63  ;;  %v2269_v8 = vmul.f32 %v2191_v41, %v2094_v3  ;;  %v1707_v59 = vpop.f32.mrb[210].mxu1  ;;  %v1925_v32 = vpop.f32.mrb[210].mxu0 }
 0x299   :  { %v2020_v55 = vadd.f32 %v5264_v19, %v1988_v22  ;;  %v1765_v50 = vadd.f32 %v1707_v59, %v5232_v29  ;;  %v1989_v21 = vadd.f32 %v1925_v32, %v1763_v2  ;;  %v3425_v35 = vpop.f32.mrb[211].mxu0  ;;  %v3361_v43 = vpop.f32.mrb[211].mxu1 }
 0x29a   :  { %2294 = vst [vmem:[%s5393_s4 + $0x58] sm:$0xff] %v2269_v8  ;;  %v2206_v52 = vpop.permute.xlu0 %2205  ;;  %v2211_v53 = vpop.permute.xlu1 %2210 }
 0x29b   :  { %vm2045_vm13 = vcmp.gt.f32.partialorder %v2020_v55, 0.0  ;;  %v2070_v45 = vmul.f32 0.2, %v2020_v55  ;;  %v2021_v13 = vadd.f32 %v5264_v19, %v1989_v21 }
 0x29d   :  { %v2095_v6 = vsel %vm2045_vm13, %v2020_v55, %v2070_v45  ;;  %vm2046_vm14 = vcmp.gt.f32.partialorder %v2021_v13, 0.0  ;;  %v2071_v14 = vmul.f32 0.2, %v2021_v13 }
 0x29e   :  { %v2270_v48 = vmul.f32 %v2196_v12, %v2095_v6  ;;  %v1712_v20 = vpop.f32.mrb[212].mxu1  ;;  %v1930_v56 = vpop.f32.mrb[212].mxu0 }
 0x29f   :  { %v2096_v29 = vsel %vm2046_vm14, %v2021_v13, %v2071_v14  ;;  %v1766_v23 = vadd.f32 %v1712_v20, %v5235_v7  ;;  %v1990_v60 = vadd.f32 %v1930_v56, %v1764_v39  ;;  %v3364_v49 = vpop.f32.mrb[213].mxu1  ;;  %v3428_v17 = vpop.f32.mrb[213].mxu0 }
 0x2a0   :  { %2295 = vst [vmem:[%s5393_s4 + $0x60] sm:$0xff] %v2270_v48  ;;  %v2271_v44 = vmul.f32 %v2201_v33, %v2096_v29  ;;  %v1715_v27 = vpop.f32.mrb[214].mxu1  ;;  %v1933_v31 = vpop.f32.mrb[214].mxu0 }
 0x2a1   :  { %v2022_v38 = vadd.f32 %v5264_v19, %v1990_v60  ;;  %v1767_v4 = vadd.f32 %v1715_v27, %v5238_v30  ;;  %v1991_v37 = vadd.f32 %v1933_v31, %v1765_v50  ;;  %v3429_v34 = vpop.f32.mrb[215].mxu0  ;;  %v3365_v0 = vpop.f32.mrb[215].mxu1 }
 0x2a2   :  { %2296 = vst [vmem:[%s5393_s4 + $0x68] sm:$0xff] %v2271_v44  ;;  %v2216_v22 = vpop.permute.xlu0 %2215  ;;  %v2221_v58 = vpop.permute.xlu1 %2220 }
 0x2a3   :  { %vm2047_vm15 = vcmp.gt.f32.partialorder %v2022_v38, 0.0  ;;  %v2072_v7 = vmul.f32 0.2, %v2022_v38  ;;  %v2023_v61 = vadd.f32 %v5264_v19, %v1991_v37 }
 0x2a5   :  { %v2097_v46 = vsel %vm2047_vm15, %v2022_v38, %v2072_v7  ;;  %vm2048_vm0 = vcmp.gt.f32.partialorder %v2023_v61, 0.0  ;;  %v2073_v47 = vmul.f32 0.2, %v2023_v61 }
 0x2a6   :  { %v2272_v11 = vmul.f32 %v2206_v52, %v2097_v46  ;;  %v1720_v2 = vpop.f32.mrb[216].mxu1  ;;  %v1938_v10 = vpop.f32.mrb[216].mxu0 }
 0x2a7   :  { %v2098_v30 = vsel %vm2048_vm0, %v2023_v61, %v2073_v47  ;;  %v1768_v5 = vadd.f32 %v1720_v2, %v5241_v51  ;;  %v1992_v24 = vadd.f32 %v1938_v10, %v1766_v23  ;;  %v3368_v18 = vpop.f32.mrb[217].mxu1  ;;  %v3432_v54 = vpop.f32.mrb[217].mxu0 }
 0x2a8   :  { %2297 = vst [vmem:[%s5393_s4 + $0x70] sm:$0xff] %v2272_v11  ;;  %v2273_v25 = vmul.f32 %v2211_v53, %v2098_v30  ;;  %v1723_v41 = vpop.f32.mrb[218].mxu1  ;;  %v1941_v1 = vpop.f32.mrb[218].mxu0 }
 0x2a9   :  { %v2024_v15 = vadd.f32 %v5264_v19, %v1992_v24  ;;  %v1769_v63 = vadd.f32 %v1723_v41, %v5244_v26  ;;  %v1993_v57 = vadd.f32 %v1941_v1, %v1767_v4  ;;  %v3433_v36 = vpop.f32.mrb[219].mxu0  ;;  %v3369_v3 = vpop.f32.mrb[219].mxu1 }
 0x2aa   :  { %2298 = vst [vmem:[%s5393_s4 + $0x78] sm:$0xff] %v2273_v25  ;;  %v2226_v29 = vpop.permute.xlu0 %2225  ;;  %v2231_v23 = vpop.permute.xlu1 %2230 }
 0x2ab   :  { %vm2049_vm1 = vcmp.gt.f32.partialorder %v2024_v15, 0.0  ;;  %v2074_v51 = vmul.f32 0.2, %v2024_v15  ;;  %v2025_v39 = vadd.f32 %v5264_v19, %v1993_v57 }
 0x2ad   :  { %v2099_v40 = vsel %vm2049_vm1, %v2024_v15, %v2074_v51  ;;  %vm2050_vm2 = vcmp.gt.f32.partialorder %v2025_v39, 0.0  ;;  %v2075_v8 = vmul.f32 0.2, %v2025_v39 }
 0x2ae   :  { %v2274_v59 = vmul.f32 %v2216_v22, %v2099_v40  ;;  %v1728_v32 = vpop.f32.mrb[220].mxu1  ;;  %v1946_v55 = vpop.f32.mrb[220].mxu0 }
 0x2af   :  { %v2100_v26 = vsel %vm2050_vm2, %v2025_v39, %v2075_v8  ;;  %v1770_v50 = vadd.f32 %v1728_v32, %v5247_v28  ;;  %v1994_v21 = vadd.f32 %v1946_v55, %v1768_v5  ;;  %v3372_v35 = vpop.f32.mrb[221].mxu1  ;;  %v3436_v43 = vpop.f32.mrb[221].mxu0 }
 0x2b0   :  { %2299 = vst [vmem:[%s5393_s4 + $0x80] sm:$0xff] %v2274_v59  ;;  %v2275_v45 = vmul.f32 %v2221_v58, %v2100_v26  ;;  %v1731_v13 = vpop.f32.mrb[222].mxu1  ;;  %v1949_v12 = vpop.f32.mrb[222].mxu0 }
 0x2b1   :  { %v2026_v33 = vadd.f32 %v5264_v19, %v1994_v21  ;;  %v1771_v6 = vadd.f32 %v1731_v13, %v5250_v42  ;;  %v1995_v14 = vadd.f32 %v1949_v12, %v1769_v63  ;;  %v3437_v48 = vpop.f32.mrb[223].mxu0  ;;  %v3373_v20 = vpop.f32.mrb[223].mxu1 }
 0x2b2   :  { %2300 = vst [vmem:[%s5393_s4 + $0x88] sm:$0xff] %v2275_v45  ;;  %v2236_v2 = vpop.permute.xlu0 %2235  ;;  %v2241_v10 = vpop.permute.xlu1 %2240 }
 0x2b3   :  { %vm2051_vm3 = vcmp.gt.f32.partialorder %v2026_v33, 0.0  ;;  %v2076_v28 = vmul.f32 0.2, %v2026_v33  ;;  %v2027_v56 = vadd.f32 %v5264_v19, %v1995_v14 }
 0x2b5   :  { %v2101_v60 = vsel %vm2051_vm3, %v2026_v33, %v2076_v28  ;;  %vm2052_vm4 = vcmp.gt.f32.partialorder %v2027_v56, 0.0  ;;  %v2077_v49 = vmul.f32 0.2, %v2027_v56 }
 0x2b6   :  { %v2276_v17 = vmul.f32 %v2226_v29, %v2101_v60  ;;  %v1736_v44 = vpop.f32.mrb[224].mxu1  ;;  %v1954_v27 = vpop.f32.mrb[224].mxu0 }
 0x2b7   :  { %v2102_v42 = vsel %vm2052_vm4, %v2027_v56, %v2077_v49  ;;  %v1772_v31 = vadd.f32 %v1736_v44, %v5253_v9  ;;  %v1996_v38 = vadd.f32 %v1954_v27, %v1770_v50  ;;  %v3376_v4 = vpop.f32.mrb[225].mxu1  ;;  %v3440_v37 = vpop.f32.mrb[225].mxu0 }
 0x2b8   :  { %2301 = vst [vmem:[%s5393_s4 + $0x90] sm:$0xff] %v2276_v17  ;;  %v2277_v34 = vmul.f32 %v2231_v23, %v2102_v42  ;;  %v1739_v0 = vpop.f32.mrb[226].mxu1  ;;  %v1957_v7 = vpop.f32.mrb[226].mxu0 }
 0x2b9   :  { %v2028_v61 = vadd.f32 %v5264_v19, %v1996_v38  ;;  %v1773_v52 = vadd.f32 %v1739_v0, %v5255_v62  ;;  %v1997_v53 = vadd.f32 %v1957_v7, %v1771_v6  ;;  %v3441_v46 = vpop.f32.mrb[227].mxu0  ;;  %v3377_v47 = vpop.f32.mrb[227].mxu1 }
 0x2ba   :  { %2302 = vst [vmem:[%s5393_s4 + $0x98] sm:$0xff] %v2277_v34  ;;  %v2246_v40 = vpop.permute.xlu0 %2245  ;;  %v2251_v26 = vpop.permute.xlu1 %2250 }
 0x2bb   :  { %vm2053_vm5 = vcmp.gt.f32.partialorder %v2028_v61, 0.0  ;;  %v2078_v9 = vmul.f32 0.2, %v2028_v61  ;;  %v2029_v11 = vadd.f32 %v5264_v19, %v1997_v53 }
 0x2bd   :  { %v2103_v30 = vsel %vm2053_vm5, %v2028_v61, %v2078_v9  ;;  %vm2054_vm6 = vcmp.gt.f32.partialorder %v2029_v11, 0.0  ;;  %v2079_v5 = vmul.f32 0.2, %v2029_v11 }
 0x2be   :  { %v2278_v24 = vmul.f32 %v2236_v2, %v2103_v30  ;;  %v1744_v18 = vpop.f32.mrb[228].mxu1  ;;  %v1962_v54 = vpop.f32.mrb[228].mxu0 }
 0x2bf   :  { %v2104_v62 = vsel %vm2054_vm6, %v2029_v11, %v2079_v5  ;;  %v1774_v25 = vadd.f32 %v1744_v18, %v5257_v16  ;;  %v1998_v41 = vadd.f32 %v1962_v54, %v1772_v31  ;;  %v3444_v1 = vpop.f32.mrb[229].mxu0  ;;  %v3380_v15 = vpop.f32.mrb[229].mxu1 }
 0x2c0   :  { %2303 = vst [vmem:[%s5393_s4 + $0xa0] sm:$0xff] %v2278_v24  ;;  %v2279_v63 = vmul.f32 %v2241_v10, %v2104_v62  ;;  %v1965_v57 = vpop.f32.mrb[230].mxu0  ;;  %v1747_v36 = vpop.f32.mrb[230].mxu1 }
 0x2c1   :  { %v2030_v3 = vadd.f32 %v5264_v19, %v1998_v41  ;;  %v1999_v51 = vadd.f32 %v1965_v57, %v1773_v52  ;;  %v3445_v39 = vpop.f32.mrb[231].mxu0  ;;  %v3381_v22 = vpop.f32.mrb[231].mxu1 }
 0x2c2   :  { %2304 = vst [vmem:[%s5393_s4 + $0xa8] sm:$0xff] %v2279_v63  ;;  %v2256_v6 = vpop.permute.xlu0 %2255 }
 0x2c3   :  { %vm2055_vm7 = vcmp.gt.f32.partialorder %v2030_v3, 0.0  ;;  %v2080_v16 = vmul.f32 0.2, %v2030_v3  ;;  %v2031_v58 = vadd.f32 %v5264_v19, %v1999_v51 }
 0x2c5   :  { %v2105_v8 = vsel %vm2055_vm7, %v2030_v3, %v2080_v16  ;;  %vm2056_vm8 = vcmp.gt.f32.partialorder %v2031_v58, 0.0  ;;  %v2081_v59 = vmul.f32 0.2, %v2031_v58 }
 0x2c6   :  { %v2280_v32 = vmul.f32 %v2246_v40, %v2105_v8  ;;  %v1970_v55 = vpop.f32.mrb[232].mxu0 }
 0x2c7   :  { %v2106_v50 = vsel %vm2056_vm8, %v2031_v58, %v2081_v59  ;;  %v2000_v21 = vadd.f32 %v1970_v55, %v1774_v25  ;;  %v3448_v35 = vpop.f32.mrb[233].mxu0 }
 0x2c8   :  { %2305 = vst [vmem:[%s5393_s4 + $0xb0] sm:$0xff] %v2280_v32  ;;  %v2281_v43 = vmul.f32 %v2251_v26, %v2106_v50  ;;  %v1973_v45 = vpop.f32.mrb[234].mxu0 }
 0x2c9   :  { %v2032_v13 = vadd.f32 %v5264_v19, %v2000_v21  ;;  %v3449_v12 = vpop.f32.mrb[235].mxu0 }
 0x2ca   :  { %2306 = vst [vmem:[%s5393_s4 + $0xb8] sm:$0xff] %v2281_v43 }
 0x2cb   :  { %vm2057_vm9 = vcmp.gt.f32.partialorder %v2032_v13, 0.0  ;;  %v2082_v33 = vmul.f32 0.2, %v2032_v13 }
 0x2cd   :  { %v2107_v14 = vsel %vm2057_vm9, %v2032_v13, %v2082_v33 }
 0x2ce   :  { %v2282_v48 = vmul.f32 %v2256_v6, %v2107_v14 }
 0x2d0   :  { %2307 = vst [vmem:[%s5393_s4 + $0xc0] sm:$0xff] %v2282_v48 }

// kernel: discriminator_forward.24
= control target key start
LH: loop header
LB: loop body
LE: loop exit
PB: predicated region body
PF: predicated region fallthrough
CT: control target
= control target key end

     0   :  { %v1024_v47 = vmov 1983009808   ;;  %v27_v49 = vlaneseq  ;;  %s1877_s1 = inlined_call_operand.vmem [shape: f32[2048,128], index: 1, kind: input, shape index: {}]   ;;  %s1878_s0 = inlined_call_operand.vmem [shape: f32[2,2048], index: 0, kind: input, shape index: {}]   ;;  %s1879_s2 = inlined_call_operand.vmem [shape: f32[1,128], index: 2, kind: input, shape index: {}]   ;;  %s1880_s3 = inlined_call_operand.vmem [shape: f32[2,128], index: 3, kind: output, shape index: {}]  }
   0x1   :  { %v139_v0 = vld [vmem:[%s1877_s1 + $0x80] sm:$0xff]  ;;  %v140_v1 = vld [vmem:[%s1877_s1 + $0x88] sm:$0xff]  ;;  %v141_v11 = vld [vmem:[%s1877_s1 + $0x90] sm:$0xff]  ;;  %v25_v48 = vunpack.c.l.s4 %v1024_v47 }
   0x2   :  { %v171_v2 = vld [vmem:[%s1877_s1 + $0x180] sm:$0xff]  ;;  %v387_v3 = vpack.c.bf16 %v140_v1, %v139_v0  ;;  %v172_v4 = vld [vmem:[%s1877_s1 + $0x188] sm:$0xff]  ;;  %v142_v13 = vld [vmem:[%s1877_s1 + $0x98] sm:$0xff]  ;;  %v28_v0 = vshrl.u32 %v27_v49, 7 }
   0x3   :  { %v123_v5 = vld [vmem:[%s1877_s1] sm:$0xff]  ;;  %v124_v6 = vld [vmem:[%s1877_s1 + $0x8] sm:$0xff]  ;;  %v403_v7 = vpack.c.bf16 %v172_v4, %v171_v2  ;;  %v173_v14 = vld [vmem:[%s1877_s1 + $0x190] sm:$0xff]  ;;  %v388_v16 = vpack.c.bf16 %v142_v13, %v141_v11  ;;  %v26_v63 = vunpack.c.0.s8 %v25_v48 }
   0x4   :  { %v379_v8 = vpack.c.bf16 %v124_v6, %v123_v5  ;;  %v155_v9 = vld [vmem:[%s1877_s1 + $0x100] sm:$0xff]  ;;  %v156_v10 = vld [vmem:[%s1877_s1 + $0x108] sm:$0xff]  ;;  %843 = vmatprep.subr.bf16.mxu0 %v387_v3  ;;  %v174_v15 = vld [vmem:[%s1877_s1 + $0x198] sm:$0xff] }
   0x5   :  { %v395_v12 = vpack.c.bf16 %v156_v10, %v155_v9  ;;  %865 = vmatprep.subr.bf16.mxu1 %v403_v7  ;;  %v404_v17 = vpack.c.bf16 %v174_v15, %v173_v14  ;;  %v125_v18 = vld [vmem:[%s1877_s1 + $0x10] sm:$0xff]  ;;  %v126_v19 = vld [vmem:[%s1877_s1 + $0x18] sm:$0xff]  ;;  %v143_v23 = vld [vmem:[%s1877_s1 + $0xa0] sm:$0xff]  ;;  %v1195_v13 = vsub.s32 %v26_v63, %v28_v0 }
   0x6   :  { %844 = vmatpush3.bf16.msra.mxu0 %v379_v8  ;;  %v157_v20 = vld [vmem:[%s1877_s1 + $0x110] sm:$0xff]  ;;  %v380_v21 = vpack.c.bf16 %v126_v19, %v125_v18  ;;  %v158_v22 = vld [vmem:[%s1877_s1 + $0x118] sm:$0xff]  ;;  %v144_v24 = vld [vmem:[%s1877_s1 + $0xa8] sm:$0xff] }
   0x7   :  { %866 = vmatpush3.bf16.msra.mxu1 %v395_v12  ;;  %845 = vmatprep.subr.bf16.mxu0 %v388_v16  ;;  %v396_v25 = vpack.c.bf16 %v158_v22, %v157_v20  ;;  %v389_v26 = vpack.c.bf16 %v144_v24, %v143_v23  ;;  %v175_v27 = vld [vmem:[%s1877_s1 + $0x1a0] sm:$0xff]  ;;  %v176_v28 = vld [vmem:[%s1877_s1 + $0x1a8] sm:$0xff]  ;;  %v145_v35 = vld [vmem:[%s1877_s1 + $0xb0] sm:$0xff] }
   0x8   :  { %867 = vmatprep.subr.bf16.mxu1 %v404_v17  ;;  %v127_v29 = vld [vmem:[%s1877_s1 + $0x20] sm:$0xff]  ;;  %v405_v30 = vpack.c.bf16 %v176_v28, %v175_v27  ;;  %v128_v31 = vld [vmem:[%s1877_s1 + $0x28] sm:$0xff]  ;;  %v146_v36 = vld [vmem:[%s1877_s1 + $0xb8] sm:$0xff] }
   0x9   :  { %v159_v32 = vld [vmem:[%s1877_s1 + $0x120] sm:$0xff]  ;;  %v160_v33 = vld [vmem:[%s1877_s1 + $0x128] sm:$0xff]  ;;  %v381_v34 = vpack.c.bf16 %v128_v31, %v127_v29  ;;  %v177_v37 = vld [vmem:[%s1877_s1 + $0x1b0] sm:$0xff]  ;;  %v390_v39 = vpack.c.bf16 %v146_v36, %v145_v35 }
   0xa   :  { %846 = vmatpush3.bf16.msra.mxu0 %v380_v21  ;;  %v397_v38 = vpack.c.bf16 %v160_v33, %v159_v32  ;;  %v178_v40 = vld [vmem:[%s1877_s1 + $0x1b8] sm:$0xff]  ;;  %v129_v41 = vld [vmem:[%s1877_s1 + $0x30] sm:$0xff]  ;;  %v147_v46 = vld [vmem:[%s1877_s1 + $0xc0] sm:$0xff] }
   0xb   :  { %868 = vmatpush3.bf16.msra.mxu1 %v396_v25  ;;  %847 = vmatprep.subr.bf16.mxu0 %v389_v26  ;;  %v130_v42 = vld [vmem:[%s1877_s1 + $0x38] sm:$0xff]  ;;  %v406_v43 = vpack.c.bf16 %v178_v40, %v177_v37  ;;  %v161_v44 = vld [vmem:[%s1877_s1 + $0x130] sm:$0xff]  ;;  %v148_v50 = vld [vmem:[%s1877_s1 + $0xc8] sm:$0xff] }
   0xc   :  { %869 = vmatprep.subr.bf16.mxu1 %v405_v30  ;;  %v162_v45 = vld [vmem:[%s1877_s1 + $0x138] sm:$0xff]  ;;  %v179_v51 = vld [vmem:[%s1877_s1 + $0x1c0] sm:$0xff]  ;;  %v180_v52 = vld [vmem:[%s1877_s1 + $0x1c8] sm:$0xff]  ;;  %v382_v53 = vpack.c.bf16 %v130_v42, %v129_v41  ;;  %v391_v55 = vpack.c.bf16 %v148_v50, %v147_v46 }
   0xd   :  { %v398_v54 = vpack.c.bf16 %v162_v45, %v161_v44  ;;  %v131_v56 = vld [vmem:[%s1877_s1 + $0x40] sm:$0xff]  ;;  %v132_v57 = vld [vmem:[%s1877_s1 + $0x48] sm:$0xff]  ;;  %v407_v59 = vpack.c.bf16 %v180_v52, %v179_v51  ;;  %v149_v61 = vld [vmem:[%s1877_s1 + $0xd0] sm:$0xff] }
   0xe   :  { %848 = vmatpush3.bf16.msra.mxu0 %v381_v34  ;;  %v163_v58 = vld [vmem:[%s1877_s1 + $0x140] sm:$0xff]  ;;  %v164_v60 = vld [vmem:[%s1877_s1 + $0x148] sm:$0xff]  ;;  %v150_v62 = vld [vmem:[%s1877_s1 + $0xd8] sm:$0xff]  ;;  %v383_v3 = vpack.c.bf16 %v132_v57, %v131_v56 }
   0xf   :  { %870 = vmatpush3.bf16.msra.mxu1 %v397_v38  ;;  %849 = vmatprep.subr.bf16.mxu0 %v390_v39  ;;  %v181_v1 = vld [vmem:[%s1877_s1 + $0x1d0] sm:$0xff]  ;;  %v182_v2 = vld [vmem:[%s1877_s1 + $0x1d8] sm:$0xff]  ;;  %v399_v4 = vpack.c.bf16 %v164_v60, %v163_v58  ;;  %v392_v5 = vpack.c.bf16 %v150_v62, %v149_v61  ;;  %v151_v11 = vld [vmem:[%s1877_s1 + $0xe0] sm:$0xff] }
  0x10   :  { %871 = vmatprep.subr.bf16.mxu1 %v406_v43  ;;  %v133_v6 = vld [vmem:[%s1877_s1 + $0x50] sm:$0xff]  ;;  %v134_v7 = vld [vmem:[%s1877_s1 + $0x58] sm:$0xff]  ;;  %v408_v9 = vpack.c.bf16 %v182_v2, %v181_v1  ;;  %v152_v12 = vld [vmem:[%s1877_s1 + $0xe8] sm:$0xff] }
  0x11   :  { %v165_v8 = vld [vmem:[%s1877_s1 + $0x150] sm:$0xff]  ;;  %v166_v10 = vld [vmem:[%s1877_s1 + $0x158] sm:$0xff]  ;;  %v183_v14 = vld [vmem:[%s1877_s1 + $0x1e0] sm:$0xff]  ;;  %v384_v16 = vpack.c.bf16 %v134_v7, %v133_v6  ;;  %v393_v19 = vpack.c.bf16 %v152_v12, %v151_v11 }
  0x12   :  { %850 = vmatpush3.bf16.msra.mxu0 %v382_v53  ;;  %v184_v15 = vld [vmem:[%s1877_s1 + $0x1e8] sm:$0xff]  ;;  %v135_v17 = vld [vmem:[%s1877_s1 + $0x60] sm:$0xff]  ;;  %v400_v18 = vpack.c.bf16 %v166_v10, %v165_v8  ;;  %v153_v25 = vld [vmem:[%s1877_s1 + $0xf0] sm:$0xff] }
  0x13   :  { %872 = vmatpush3.bf16.msra.mxu1 %v398_v54  ;;  %851 = vmatprep.subr.bf16.mxu0 %v391_v55  ;;  %v136_v20 = vld [vmem:[%s1877_s1 + $0x68] sm:$0xff]  ;;  %v167_v21 = vld [vmem:[%s1877_s1 + $0x160] sm:$0xff]  ;;  %v409_v23 = vpack.c.bf16 %v184_v15, %v183_v14  ;;  %v154_v26 = vld [vmem:[%s1877_s1 + $0xf8] sm:$0xff] }
  0x14   :  { %873 = vmatprep.subr.bf16.mxu1 %v407_v59  ;;  %v15_v22 = vld [vmem:[%s1878_s0] sm:$0xff]  ;;  %v168_v24 = vld [vmem:[%s1877_s1 + $0x168] sm:$0xff]  ;;  %v185_v29 = vld [vmem:[%s1877_s1 + $0x1f0] sm:$0xff]  ;;  %v385_v31 = vpack.c.bf16 %v136_v20, %v135_v17  ;;  %v394_v35 = vpack.c.bf16 %v154_v26, %v153_v25 }
  0x15   :  { %v30_v27 = vrot.slane %v15_v22, %v1195_v13  ;;  %v23_v28 = vcombine.high %v15_v22, %v15_v22  ;;  %v186_v30 = vld [vmem:[%s1877_s1 + $0x1f8] sm:$0xff]  ;;  %v401_v34 = vpack.c.bf16 %v168_v24, %v167_v21  ;;  %v137_v36 = vld [vmem:[%s1877_s1 + $0x70] sm:$0xff]  ;;  %v203_v43 = vld [vmem:[%s1877_s1 + $0x280] sm:$0xff] }
  0x16   :  { %852 = vmatpush3.bf16.msra.mxu0 %v383_v3  ;;  %v138_v37 = vld [vmem:[%s1877_s1 + $0x78] sm:$0xff]  ;;  %v169_v38 = vld [vmem:[%s1877_s1 + $0x170] sm:$0xff]  ;;  %v410_v39 = vpack.c.bf16 %v186_v30, %v185_v29  ;;  %v204_v44 = vld [vmem:[%s1877_s1 + $0x288] sm:$0xff] }
  0x17   :  { %874 = vmatpush3.bf16.msra.mxu1 %v399_v4  ;;  %853 = vmatprep.subr.bf16.mxu0 %v392_v5  ;;  %v38_v32 = vcombine.high %v30_v27, %v30_v27  ;;  %v37_v33 = vrot.slane %v23_v28, %v1195_v13  ;;  %v170_v40 = vld [vmem:[%s1877_s1 + $0x178] sm:$0xff]  ;;  %v235_v45 = vld [vmem:[%s1877_s1 + $0x380] sm:$0xff]  ;;  %v236_v46 = vld [vmem:[%s1877_s1 + $0x388] sm:$0xff]  ;;  %v386_v47 = vpack.c.bf16 %v138_v37, %v137_v36 }
  0x18   :  { %875 = vmatprep.subr.bf16.mxu1 %v408_v9  ;;  %v402_v49 = vpack.c.bf16 %v170_v40, %v169_v38  ;;  %v419_v50 = vpack.c.bf16 %v204_v44, %v203_v43  ;;  %v187_v51 = vld [vmem:[%s1877_s1 + $0x200] sm:$0xff]  ;;  %v188_v52 = vld [vmem:[%s1877_s1 + $0x208] sm:$0xff]  ;;  %v435_v54 = vpack.c.bf16 %v236_v46, %v235_v45  ;;  %v205_v56 = vld [vmem:[%s1877_s1 + $0x290] sm:$0xff]  ;;  %v107_v58 = vpack.c.bf16 %v30_v27, %v30_v27 }
  0x19   :  { %v108_v41 = vpack.c.bf16 %v38_v32, %v38_v32  ;;  %v39_v42 = vcombine.high %v37_v33, %v37_v33  ;;  %v219_v53 = vld [vmem:[%s1877_s1 + $0x300] sm:$0xff]  ;;  %v220_v55 = vld [vmem:[%s1877_s1 + $0x308] sm:$0xff]  ;;  %v206_v57 = vld [vmem:[%s1877_s1 + $0x298] sm:$0xff]  ;;  %v109_v61 = vpack.c.bf16 %v37_v33, %v37_v33  ;;  %v411_v62 = vpack.c.bf16 %v188_v52, %v187_v51 }
  0x1a   :  { %854 = vmatpush3.bf16.msra.mxu0 %v384_v16  ;;  %v237_v59 = vld [vmem:[%s1877_s1 + $0x390] sm:$0xff]  ;;  %v238_v60 = vld [vmem:[%s1877_s1 + $0x398] sm:$0xff]  ;;  %v427_v63 = vpack.c.bf16 %v220_v55, %v219_v53  ;;  %v420_v0 = vpack.c.bf16 %v206_v57, %v205_v56  ;;  %v207_v6 = vld [vmem:[%s1877_s1 + $0x2a0] sm:$0xff] }
  0x1b   :  { %876 = vmatpush3.bf16.msra.mxu1 %v400_v18  ;;  %855 = vmatprep.subr.bf16.mxu0 %v393_v19  ;;  %v110_v48 = vpack.c.bf16 %v39_v42, %v39_v42  ;;  %v189_v1 = vld [vmem:[%s1877_s1 + $0x210] sm:$0xff]  ;;  %v190_v2 = vld [vmem:[%s1877_s1 + $0x218] sm:$0xff]  ;;  %v436_v4 = vpack.c.bf16 %v238_v60, %v237_v59  ;;  %v208_v7 = vld [vmem:[%s1877_s1 + $0x2a8] sm:$0xff] }
  0x1c   :  { %877 = vmatprep.subr.bf16.mxu1 %v409_v23  ;;  %546 = vmatprep.mubr.bf16.mxu0 %v108_v41  ;;  %v221_v3 = vld [vmem:[%s1877_s1 + $0x310] sm:$0xff]  ;;  %v222_v5 = vld [vmem:[%s1877_s1 + $0x318] sm:$0xff]  ;;  %v239_v8 = vld [vmem:[%s1877_s1 + $0x3a0] sm:$0xff]  ;;  %v412_v10 = vpack.c.bf16 %v190_v2, %v189_v1  ;;  %v421_v12 = vpack.c.bf16 %v208_v7, %v207_v6 }
  0x1d   :  { %586 = vmatprep.mubr.bf16.mxu1 %v110_v48  ;;  %v240_v9 = vld [vmem:[%s1877_s1 + $0x3a8] sm:$0xff]  ;;  %v428_v11 = vpack.c.bf16 %v222_v5, %v221_v3  ;;  %v191_v14 = vld [vmem:[%s1877_s1 + $0x220] sm:$0xff]  ;;  %v209_v19 = vld [vmem:[%s1877_s1 + $0x2b0] sm:$0xff] }
  0x1e   :  { %856 = vmatpush3.bf16.msra.mxu0 %v385_v31  ;;  %v192_v15 = vld [vmem:[%s1877_s1 + $0x228] sm:$0xff]  ;;  %v223_v16 = vld [vmem:[%s1877_s1 + $0x320] sm:$0xff]  ;;  %v437_v17 = vpack.c.bf16 %v240_v9, %v239_v8  ;;  %v210_v20 = vld [vmem:[%s1877_s1 + $0x2b8] sm:$0xff] }
  0x1f   :  { %878 = vmatpush3.bf16.msra.mxu1 %v401_v34  ;;  %857 = vmatprep.subr.bf16.mxu0 %v394_v35  ;;  %v224_v18 = vld [vmem:[%s1877_s1 + $0x328] sm:$0xff]  ;;  %v241_v21 = vld [vmem:[%s1877_s1 + $0x3b0] sm:$0xff]  ;;  %v242_v22 = vld [vmem:[%s1877_s1 + $0x3b8] sm:$0xff]  ;;  %v413_v23 = vpack.c.bf16 %v192_v15, %v191_v14  ;;  %v422_v25 = vpack.c.bf16 %v210_v20, %v209_v19 }
  0x20   :  { %879 = vmatprep.subr.bf16.mxu1 %v410_v39  ;;  %v429_v24 = vpack.c.bf16 %v224_v18, %v223_v16  ;;  %v193_v26 = vld [vmem:[%s1877_s1 + $0x230] sm:$0xff]  ;;  %v194_v27 = vld [vmem:[%s1877_s1 + $0x238] sm:$0xff]  ;;  %v438_v29 = vpack.c.bf16 %v242_v22, %v241_v21  ;;  %v211_v31 = vld [vmem:[%s1877_s1 + $0x2c0] sm:$0xff] }
  0x21   :  { %v225_v28 = vld [vmem:[%s1877_s1 + $0x330] sm:$0xff]  ;;  %v226_v30 = vld [vmem:[%s1877_s1 + $0x338] sm:$0xff]  ;;  %v212_v32 = vld [vmem:[%s1877_s1 + $0x2c8] sm:$0xff]  ;;  %v414_v36 = vpack.c.bf16 %v194_v27, %v193_v26 }
  0x22   :  { %858 = vmatpush3.bf16.msra.mxu0 %v386_v47  ;;  %v243_v33 = vld [vmem:[%s1877_s1 + $0x3c0] sm:$0xff]  ;;  %v244_v34 = vld [vmem:[%s1877_s1 + $0x3c8] sm:$0xff]  ;;  %v430_v39 = vpack.c.bf16 %v226_v30, %v225_v28  ;;  %v423_v40 = vpack.c.bf16 %v212_v32, %v211_v31  ;;  %v213_v46 = vld [vmem:[%s1877_s1 + $0x2d0] sm:$0xff] }
  0x23   :  { %880 = vmatpush3.bf16.msra.mxu1 %v402_v49  ;;  %887 = vmatprep.subr.bf16.mxu0 %v419_v50  ;;  %v16_v35 = vld [vmem:[%s1878_s0 + $0x8] sm:$0xff]  ;;  %v195_v41 = vld [vmem:[%s1877_s1 + $0x240] sm:$0xff]  ;;  %v439_v44 = vpack.c.bf16 %v244_v34, %v243_v33  ;;  %v214_v47 = vld [vmem:[%s1877_s1 + $0x2d8] sm:$0xff] }
  0x24   :  { %909 = vmatprep.subr.bf16.mxu1 %v435_v54  ;;  %v1356_v37 = vrot.slane %v16_v35, %v1195_v13  ;;  %v40_v38 = vcombine.high %v16_v35, %v16_v35  ;;  %v196_v42 = vld [vmem:[%s1877_s1 + $0x248] sm:$0xff]  ;;  %v227_v43 = vld [vmem:[%s1877_s1 + $0x340] sm:$0xff]  ;;  %v245_v50 = vld [vmem:[%s1877_s1 + $0x3d0] sm:$0xff]  ;;  %v424_v56 = vpack.c.bf16 %v214_v47, %v213_v46 }
  0x25   :  { %547 = vmatmul.mubr.bf16.vlgmr.msra.gmra.mrb[0].mxu0 %v107_v58  ;;  %v228_v45 = vld [vmem:[%s1877_s1 + $0x348] sm:$0xff]  ;;  %v246_v51 = vld [vmem:[%s1877_s1 + $0x3d8] sm:$0xff]  ;;  %v415_v52 = vpack.c.bf16 %v196_v42, %v195_v41  ;;  %v197_v57 = vld [vmem:[%s1877_s1 + $0x250] sm:$0xff] }
  0x26   :  { %587 = vmatmul.mubr.bf16.vlgmr.msra.gmra.mrb[0].mxu1 %v109_v61  ;;  %888 = vmatpush3.bf16.msra.mxu0 %v411_v62  ;;  %v55_v48 = vcombine.high %v1356_v37, %v1356_v37  ;;  %v1379_v49 = vrot.slane %v40_v38, %v1195_v13  ;;  %v431_v55 = vpack.c.bf16 %v228_v45, %v227_v43  ;;  %v198_v58 = vld [vmem:[%s1877_s1 + $0x258] sm:$0xff]  ;;  %v229_v59 = vld [vmem:[%s1877_s1 + $0x350] sm:$0xff]  ;;  %v215_v62 = vld [vmem:[%s1877_s1 + $0x2e0] sm:$0xff] }
  0x27   :  { %910 = vmatpush3.bf16.msra.mxu1 %v427_v63  ;;  %889 = vmatprep.subr.bf16.mxu0 %v420_v0  ;;  %v440_v60 = vpack.c.bf16 %v246_v51, %v245_v50  ;;  %v230_v61 = vld [vmem:[%s1877_s1 + $0x358] sm:$0xff]  ;;  %v216_v63 = vld [vmem:[%s1877_s1 + $0x2e8] sm:$0xff]  ;;  %v247_v1 = vld [vmem:[%s1877_s1 + $0x3e0] sm:$0xff]  ;;  %v416_v3 = vpack.c.bf16 %v198_v58, %v197_v57 }
  0x28   :  { %911 = vmatprep.subr.bf16.mxu1 %v436_v4  ;;  %v112_v53 = vpack.c.bf16 %v55_v48, %v55_v48  ;;  %v56_v54 = vcombine.high %v1379_v49, %v1379_v49  ;;  %v248_v2 = vld [vmem:[%s1877_s1 + $0x3e8] sm:$0xff]  ;;  %v432_v4 = vpack.c.bf16 %v230_v61, %v229_v59  ;;  %v425_v5 = vpack.c.bf16 %v216_v63, %v215_v62  ;;  %v199_v6 = vld [vmem:[%s1877_s1 + $0x260] sm:$0xff]  ;;  %v249_v14 = vld [vmem:[%s1877_s1 + $0x3f0] sm:$0xff] }
  0x29   :  { %v200_v7 = vld [vmem:[%s1877_s1 + $0x268] sm:$0xff]  ;;  %v231_v8 = vld [vmem:[%s1877_s1 + $0x360] sm:$0xff]  ;;  %v441_v9 = vpack.c.bf16 %v248_v2, %v247_v1  ;;  %v250_v15 = vld [vmem:[%s1877_s1 + $0x3f8] sm:$0xff]  ;;  %v113_v42 = vpack.c.bf16 %v1379_v49, %v1379_v49 }
  0x2a   :  { %890 = vmatpush3.bf16.msra.mxu0 %v412_v10  ;;  %626 = vmatprep.mubr.bf16.mxu0 %v112_v53  ;;  %v114_v0 = vpack.c.bf16 %v56_v54, %v56_v54  ;;  %v232_v10 = vld [vmem:[%s1877_s1 + $0x368] sm:$0xff]  ;;  %v417_v16 = vpack.c.bf16 %v200_v7, %v199_v6  ;;  %v201_v19 = vld [vmem:[%s1877_s1 + $0x270] sm:$0xff]  ;;  %v202_v20 = vld [vmem:[%s1877_s1 + $0x278] sm:$0xff]  ;;  %v442_v22 = vpack.c.bf16 %v250_v15, %v249_v14 }
  0x2b   :  { %912 = vmatpush3.bf16.msra.mxu1 %v428_v11  ;;  %891 = vmatprep.subr.bf16.mxu0 %v421_v12  ;;  %v217_v11 = vld [vmem:[%s1877_s1 + $0x2f0] sm:$0xff]  ;;  %v218_v12 = vld [vmem:[%s1877_s1 + $0x2f8] sm:$0xff]  ;;  %v299_v26 = vld [vmem:[%s1877_s1 + $0x580] sm:$0xff]  ;;  %v418_v28 = vpack.c.bf16 %v202_v20, %v201_v19 }
  0x2c   :  { %913 = vmatprep.subr.bf16.mxu1 %v437_v17  ;;  %666 = vmatprep.mubr.bf16.mxu1 %v114_v0  ;;  %v433_v17 = vpack.c.bf16 %v232_v10, %v231_v8  ;;  %v426_v18 = vpack.c.bf16 %v218_v12, %v217_v11  ;;  %v233_v21 = vld [vmem:[%s1877_s1 + $0x370] sm:$0xff]  ;;  %v300_v27 = vld [vmem:[%s1877_s1 + $0x588] sm:$0xff]  ;;  %v283_v33 = vld [vmem:[%s1877_s1 + $0x500] sm:$0xff] }
  0x2d   :  { %v252_v32 = vld [vmem:[%s1877_s1 + $0x408] sm:$0xff]  ;;  %v467_v35 = vpack.c.bf16 %v300_v27, %v299_v26  ;;  %v270_v38 = vld [vmem:[%s1877_s1 + $0x498] sm:$0xff]  ;;  %v253_v45 = vld [vmem:[%s1877_s1 + $0x410] sm:$0xff] }
  0x2e   :  { %892 = vmatpush3.bf16.msra.mxu0 %v413_v23  ;;  %v234_v23 = vld [vmem:[%s1877_s1 + $0x378] sm:$0xff]  ;;  %v284_v34 = vld [vmem:[%s1877_s1 + $0x508] sm:$0xff]  ;;  %v285_v48 = vld [vmem:[%s1877_s1 + $0x510] sm:$0xff] }
  0x2f   :  { %914 = vmatpush3.bf16.msra.mxu1 %v429_v24  ;;  %893 = vmatprep.subr.bf16.mxu0 %v422_v25  ;;  %v267_v24 = vld [vmem:[%s1877_s1 + $0x480] sm:$0xff]  ;;  %v268_v25 = vld [vmem:[%s1877_s1 + $0x488] sm:$0xff]  ;;  %v434_v30 = vpack.c.bf16 %v234_v23, %v233_v21  ;;  %v302_v41 = vld [vmem:[%s1877_s1 + $0x598] sm:$0xff] }
  0x30   :  { %915 = vmatprep.subr.bf16.mxu1 %v438_v29  ;;  %v251_v29 = vld [vmem:[%s1877_s1 + $0x400] sm:$0xff]  ;;  %v451_v31 = vpack.c.bf16 %v268_v25, %v267_v24  ;;  %v254_v47 = vld [vmem:[%s1877_s1 + $0x418] sm:$0xff]  ;;  %v272_v54 = vld [vmem:[%s1877_s1 + $0x4a8] sm:$0xff] }
  0x31   :  { %v443_v43 = vpack.c.bf16 %v252_v32, %v251_v29  ;;  %v286_v49 = vld [vmem:[%s1877_s1 + $0x518] sm:$0xff]  ;;  %v271_v53 = vld [vmem:[%s1877_s1 + $0x4a0] sm:$0xff]  ;;  %v444_v59 = vpack.c.bf16 %v254_v47, %v253_v45  ;;  %v256_v63 = vld [vmem:[%s1877_s1 + $0x428] sm:$0xff] }
  0x32   :  { %894 = vmatpush3.bf16.msra.mxu0 %v414_v36  ;;  %v269_v36 = vld [vmem:[%s1877_s1 + $0x490] sm:$0xff]  ;;  %v453_v61 = vpack.c.bf16 %v272_v54, %v271_v53  ;;  %v255_v62 = vld [vmem:[%s1877_s1 + $0x420] sm:$0xff]  ;;  %v274_v6 = vld [vmem:[%s1877_s1 + $0x4b8] sm:$0xff] }
  0x33   :  { %916 = vmatpush3.bf16.msra.mxu1 %v430_v39  ;;  %895 = vmatprep.subr.bf16.mxu0 %v423_v40  ;;  %v111_v39 = vpack.c.bf16 %v1356_v37, %v1356_v37  ;;  %v301_v40 = vld [vmem:[%s1877_s1 + $0x590] sm:$0xff]  ;;  %v452_v46 = vpack.c.bf16 %v270_v38, %v269_v36  ;;  %v287_v0 = vld [vmem:[%s1877_s1 + $0x520] sm:$0xff]  ;;  %v306_v8 = vld [vmem:[%s1877_s1 + $0x5b8] sm:$0xff]  ;;  %v445_v10 = vpack.c.bf16 %v256_v63, %v255_v62 }
  0x34   :  { %917 = vmatprep.subr.bf16.mxu1 %v439_v44  ;;  %v459_v44 = vpack.c.bf16 %v284_v34, %v283_v33  ;;  %v17_v37 = vld [vmem:[%s1878_s0 + $0x10] sm:$0xff]  ;;  %v258_v15 = vld [vmem:[%s1877_s1 + $0x438] sm:$0xff]  ;;  %v275_v19 = vld [vmem:[%s1877_s1 + $0x4c0] sm:$0xff] }
  0x35   :  { %v1505_v50 = vrot.slane %v17_v37, %v1195_v13  ;;  %v57_v51 = vcombine.high %v17_v37, %v17_v37  ;;  %v305_v7 = vld [vmem:[%s1877_s1 + $0x5b0] sm:$0xff]  ;;  %v276_v20 = vld [vmem:[%s1877_s1 + $0x4c8] sm:$0xff]  ;;  %v307_v21 = vld [vmem:[%s1877_s1 + $0x5c0] sm:$0xff] }
  0x36   :  { %896 = vmatpush3.bf16.msra.mxu0 %v415_v52  ;;  %v468_v52 = vpack.c.bf16 %v302_v41, %v301_v40  ;;  %v257_v14 = vld [vmem:[%s1877_s1 + $0x430] sm:$0xff]  ;;  %v455_v25 = vpack.c.bf16 %v276_v20, %v275_v19  ;;  %v259_v26 = vld [vmem:[%s1877_s1 + $0x440] sm:$0xff]  ;;  %v260_v27 = vld [vmem:[%s1877_s1 + $0x448] sm:$0xff] }
  0x37   :  { %918 = vmatpush3.bf16.msra.mxu1 %v431_v55  ;;  %897 = vmatprep.subr.bf16.mxu0 %v424_v56  ;;  %v303_v55 = vld [vmem:[%s1877_s1 + $0x5a0] sm:$0xff]  ;;  %v304_v56 = vld [vmem:[%s1877_s1 + $0x5a8] sm:$0xff]  ;;  %v72_v57 = vcombine.high %v1505_v50, %v1505_v50  ;;  %v1522_v58 = vrot.slane %v57_v51, %v1195_v13  ;;  %v446_v23 = vpack.c.bf16 %v258_v15, %v257_v14  ;;  %v278_v32 = vld [vmem:[%s1877_s1 + $0x4d8] sm:$0xff] }
  0x38   :  { %919 = vmatprep.subr.bf16.mxu1 %v440_v60  ;;  %v460_v60 = vpack.c.bf16 %v286_v49, %v285_v48  ;;  %v309_v33 = vld [vmem:[%s1877_s1 + $0x5d0] sm:$0xff]  ;;  %v310_v34 = vld [vmem:[%s1877_s1 + $0x5d8] sm:$0xff]  ;;  %v280_v45 = vld [vmem:[%s1877_s1 + $0x4e8] sm:$0xff] }
  0x39   :  { %v116_v1 = vpack.c.bf16 %v72_v57, %v72_v57  ;;  %v73_v2 = vcombine.high %v1522_v58, %v1522_v58  ;;  %v262_v40 = vld [vmem:[%s1877_s1 + $0x458] sm:$0xff]  ;;  %v293_v41 = vld [vmem:[%s1877_s1 + $0x550] sm:$0xff]  ;;  %v311_v37 = vld [vmem:[%s1877_s1 + $0x5e0] sm:$0xff] }
  0x3a   :  { %898 = vmatpush3.bf16.msra.mxu0 %v416_v3  ;;  %v469_v3 = vpack.c.bf16 %v304_v56, %v303_v55  ;;  %v263_v48 = vld [vmem:[%s1877_s1 + $0x460] sm:$0xff]  ;;  %v296_v54 = vld [vmem:[%s1877_s1 + $0x568] sm:$0xff]  ;;  %v281_v56 = vld [vmem:[%s1877_s1 + $0x4f0] sm:$0xff] }
  0x3b   :  { %920 = vmatpush3.bf16.msra.mxu1 %v432_v4  ;;  %899 = vmatprep.subr.bf16.mxu0 %v425_v5  ;;  %v288_v4 = vld [vmem:[%s1877_s1 + $0x528] sm:$0xff]  ;;  %v273_v5 = vld [vmem:[%s1877_s1 + $0x4b0] sm:$0xff]  ;;  %v295_v53 = vld [vmem:[%s1877_s1 + $0x560] sm:$0xff] }
  0x3c   :  { %921 = vmatprep.subr.bf16.mxu1 %v441_v9  ;;  %v118_v9 = vpack.c.bf16 %v73_v2, %v73_v2  ;;  %v461_v11 = vpack.c.bf16 %v288_v4, %v287_v0  ;;  %v454_v12 = vpack.c.bf16 %v274_v6, %v273_v5  ;;  %v282_v57 = vld [vmem:[%s1877_s1 + $0x4f8] sm:$0xff]  ;;  %v465_v0 = vpack.c.bf16 %v296_v54, %v295_v53  ;;  %v265_v2 = vld [vmem:[%s1877_s1 + $0x470] sm:$0xff]  ;;  %v347_v19 = vld [vmem:[%s1877_s1 + $0x700] sm:$0xff] }
  0x3d   :  { %v297_v4 = vld [vmem:[%s1877_s1 + $0x570] sm:$0xff]  ;;  %v298_v6 = vld [vmem:[%s1877_s1 + $0x578] sm:$0xff]  ;;  %v348_v20 = vld [vmem:[%s1877_s1 + $0x708] sm:$0xff] }
  0x3e   :  { %900 = vmatpush3.bf16.msra.mxu0 %v417_v16  ;;  %v289_v16 = vld [vmem:[%s1877_s1 + $0x530] sm:$0xff]  ;;  %v466_v15 = vpack.c.bf16 %v298_v6, %v297_v4  ;;  %v370_v53 = vld [vmem:[%s1877_s1 + $0x7b8] sm:$0xff]  ;;  %v323_v6 = vld [vmem:[%s1877_s1 + $0x640] sm:$0xff] }
  0x3f   :  { %922 = vmatpush3.bf16.msra.mxu1 %v433_v17  ;;  %901 = vmatprep.subr.bf16.mxu0 %v426_v18  ;;  %v470_v17 = vpack.c.bf16 %v306_v8, %v305_v7  ;;  %v290_v18 = vld [vmem:[%s1877_s1 + $0x538] sm:$0xff]  ;;  %v331_v7 = vld [vmem:[%s1877_s1 + $0x680] sm:$0xff]  ;;  %v332_v8 = vld [vmem:[%s1877_s1 + $0x688] sm:$0xff] }
  0x40   :  { %923 = vmatprep.subr.bf16.mxu1 %v442_v22  ;;  %v308_v22 = vld [vmem:[%s1877_s1 + $0x5c8] sm:$0xff]  ;;  %v462_v24 = vpack.c.bf16 %v290_v18, %v289_v16  ;;  %v483_v16 = vpack.c.bf16 %v332_v8, %v331_v7  ;;  %v355_v8 = vld [vmem:[%s1877_s1 + $0x740] sm:$0xff] }
  0x41   :  { %v471_v29 = vpack.c.bf16 %v308_v22, %v307_v21  ;;  %v316_v18 = vld [vmem:[%s1877_s1 + $0x608] sm:$0xff]  ;;  %v333_v21 = vld [vmem:[%s1877_s1 + $0x690] sm:$0xff]  ;;  %v334_v22 = vld [vmem:[%s1877_s1 + $0x698] sm:$0xff] }
  0x42   :  { %902 = vmatpush3.bf16.msra.mxu0 %v418_v28  ;;  %v291_v28 = vld [vmem:[%s1877_s1 + $0x540] sm:$0xff]  ;;  %v324_v7 = vld [vmem:[%s1877_s1 + $0x648] sm:$0xff] }
  0x43   :  { %924 = vmatpush3.bf16.msra.mxu1 %v434_v30  ;;  %931 = vmatprep.subr.bf16.mxu0 %v451_v31  ;;  %v292_v30 = vld [vmem:[%s1877_s1 + $0x548] sm:$0xff]  ;;  %v277_v31 = vld [vmem:[%s1877_s1 + $0x4d0] sm:$0xff] }
  0x44   :  { %953 = vmatprep.subr.bf16.mxu1 %v467_v35  ;;  %v447_v35 = vpack.c.bf16 %v260_v27, %v259_v26  ;;  %v463_v36 = vpack.c.bf16 %v292_v30, %v291_v28  ;;  %v456_v38 = vpack.c.bf16 %v278_v32, %v277_v31  ;;  %v366_v26 = vld [vmem:[%s1877_s1 + $0x798] sm:$0xff]  ;;  %v117_v28 = vpack.c.bf16 %v1522_v58, %v1522_v58  ;;  %v317_v31 = vld [vmem:[%s1877_s1 + $0x610] sm:$0xff] }
  0x45   :  { %627 = vmatmul.mubr.bf16.vlgmr.msra.gmra.mrb[4].mxu0 %v111_v39  ;;  %v261_v39 = vld [vmem:[%s1877_s1 + $0x450] sm:$0xff]  ;;  %v491_v30 = vpack.c.bf16 %v348_v20, %v347_v19  ;;  %v318_v32 = vld [vmem:[%s1877_s1 + $0x618] sm:$0xff] }
  0x46   :  { %667 = vmatmul.mubr.bf16.vlgmr.msra.gmra.mrb[4].mxu1 %v113_v42  ;;  %932 = vmatpush3.bf16.msra.mxu0 %v443_v43  ;;  %v472_v42 = vpack.c.bf16 %v310_v34, %v309_v33  ;;  %v294_v43 = vld [vmem:[%s1877_s1 + $0x558] sm:$0xff]  ;;  %v448_v47 = vpack.c.bf16 %v262_v40, %v261_v39  ;;  %v349_v33 = vld [vmem:[%s1877_s1 + $0x710] sm:$0xff]  ;;  %v367_v39 = vld [vmem:[%s1877_s1 + $0x7a0] sm:$0xff] }
  0x47   :  { %954 = vmatpush3.bf16.msra.mxu1 %v459_v44  ;;  %933 = vmatprep.subr.bf16.mxu0 %v452_v46  ;;  %v279_v44 = vld [vmem:[%s1877_s1 + $0x4e0] sm:$0xff]  ;;  %v312_v46 = vld [vmem:[%s1877_s1 + $0x5e8] sm:$0xff]  ;;  %v464_v49 = vpack.c.bf16 %v294_v43, %v293_v41  ;;  %v350_v58 = vld [vmem:[%s1877_s1 + $0x718] sm:$0xff] }
  0x48   :  { %955 = vmatprep.subr.bf16.mxu1 %v468_v52  ;;  %706 = vmatprep.mubr.bf16.mxu0 %v116_v1  ;;  %v457_v51 = vpack.c.bf16 %v280_v45, %v279_v44  ;;  %v264_v52 = vld [vmem:[%s1877_s1 + $0x468] sm:$0xff]  ;;  %v473_v55 = vpack.c.bf16 %v312_v46, %v311_v37  ;;  %v458_v1 = vpack.c.bf16 %v282_v57, %v281_v56  ;;  %v319_v45 = vld [vmem:[%s1877_s1 + $0x620] sm:$0xff]  ;;  %v321_v57 = vld [vmem:[%s1877_s1 + $0x630] sm:$0xff] }
  0x49   :  { %746 = vmatprep.mubr.bf16.mxu1 %v118_v9  ;;  %v449_v63 = vpack.c.bf16 %v264_v52, %v263_v48  ;;  %v368_v40 = vld [vmem:[%s1877_s1 + $0x7a8] sm:$0xff]  ;;  %v492_v43 = vpack.c.bf16 %v350_v58, %v349_v33  ;;  %v351_v46 = vld [vmem:[%s1877_s1 + $0x720] sm:$0xff]  ;;  %v369_v52 = vld [vmem:[%s1877_s1 + $0x7b0] sm:$0xff] }
  0x4a   :  { %934 = vmatpush3.bf16.msra.mxu0 %v444_v59  ;;  %v18_v59 = vld [vmem:[%s1878_s0 + $0x18] sm:$0xff]  ;;  %v320_v37 = vld [vmem:[%s1877_s1 + $0x628] sm:$0xff]  ;;  %v325_v20 = vld [vmem:[%s1877_s1 + $0x650] sm:$0xff] }
  0x4b   :  { %956 = vmatpush3.bf16.msra.mxu1 %v460_v60  ;;  %935 = vmatprep.subr.bf16.mxu0 %v453_v61  ;;  %v313_v60 = vld [vmem:[%s1877_s1 + $0x5f0] sm:$0xff]  ;;  %v314_v61 = vld [vmem:[%s1877_s1 + $0x5f8] sm:$0xff]  ;;  %v74_v62 = vcombine.high %v18_v59, %v18_v59  ;;  %v1668_v9 = vrot.slane %v18_v59, %v1195_v13  ;;  %v352_v48 = vld [vmem:[%s1877_s1 + $0x728] sm:$0xff]  ;;  %v477_v54 = vpack.c.bf16 %v320_v37, %v319_v45 }
  0x4c   :  { %957 = vmatprep.subr.bf16.mxu1 %v469_v3  ;;  %v266_v3 = vld [vmem:[%s1877_s1 + $0x478] sm:$0xff]  ;;  %v474_v5 = vpack.c.bf16 %v314_v61, %v313_v60  ;;  %v353_v60 = vld [vmem:[%s1877_s1 + $0x730] sm:$0xff]  ;;  %v502_v61 = vpack.c.bf16 %v370_v53, %v369_v52  ;;  %v359_v33 = vld [vmem:[%s1877_s1 + $0x760] sm:$0xff] }
  0x4d   :  { %v450_v14 = vpack.c.bf16 %v266_v3, %v265_v2  ;;  %v322_v59 = vld [vmem:[%s1877_s1 + $0x638] sm:$0xff]  ;;  %v372_v2 = vld [vmem:[%s1877_s1 + $0x7c8] sm:$0xff]  ;;  %v361_v37 = vld [vmem:[%s1877_s1 + $0x770] sm:$0xff] }
  0x4e   :  { %936 = vmatpush3.bf16.msra.mxu0 %v445_v10  ;;  %v363_v10 = vld [vmem:[%s1877_s1 + $0x780] sm:$0xff]  ;;  %v478_v3 = vpack.c.bf16 %v322_v59, %v321_v57  ;;  %v360_v58 = vld [vmem:[%s1877_s1 + $0x768] sm:$0xff] }
  0x4f   :  { %958 = vmatpush3.bf16.msra.mxu1 %v461_v11  ;;  %937 = vmatprep.subr.bf16.mxu0 %v454_v12  ;;  %v364_v11 = vld [vmem:[%s1877_s1 + $0x788] sm:$0xff]  ;;  %v1677_v12 = vrot.slane %v74_v62, %v1195_v13  ;;  %v354_v62 = vld [vmem:[%s1877_s1 + $0x738] sm:$0xff] }
  0x50   :  { %959 = vmatprep.subr.bf16.mxu1 %v470_v17  ;;  %v315_v17 = vld [vmem:[%s1877_s1 + $0x600] sm:$0xff]  ;;  %v499_v13 = vpack.c.bf16 %v364_v11, %v363_v10  ;;  %v494_v4 = vpack.c.bf16 %v354_v62, %v353_v60  ;;  %v356_v11 = vld [vmem:[%s1877_s1 + $0x748] sm:$0xff] }
  0x51   :  { %v90_v27 = vcombine.high %v1677_v12, %v1677_v12  ;;  %v495_v19 = vpack.c.bf16 %v356_v11, %v355_v8 }
  0x52   :  { %938 = vmatpush3.bf16.msra.mxu0 %v446_v23  ;;  %v89_v23 = vcombine.high %v1668_v9, %v1668_v9 }
  0x53   :  { %960 = vmatpush3.bf16.msra.mxu1 %v462_v24  ;;  %939 = vmatprep.subr.bf16.mxu0 %v455_v25  ;;  %v115_v24 = vpack.c.bf16 %v1505_v50, %v1505_v50  ;;  %v365_v25 = vld [vmem:[%s1877_s1 + $0x790] sm:$0xff]  ;;  %v484_v50 = vpack.c.bf16 %v334_v22, %v333_v21  ;;  %v122_v41 = vpack.c.bf16 %v90_v27, %v90_v27  ;;  %v326_v21 = vld [vmem:[%s1877_s1 + $0x658] sm:$0xff]  ;;  %v375_v27 = vld [vmem:[%s1877_s1 + $0x7e0] sm:$0xff] }
  0x54   :  { %961 = vmatprep.subr.bf16.mxu1 %v471_v29  ;;  %v475_v29 = vpack.c.bf16 %v316_v18, %v315_v17  ;;  %v500_v34 = vpack.c.bf16 %v366_v26, %v365_v25  ;;  %v374_v17 = vld [vmem:[%s1877_s1 + $0x7d8] sm:$0xff]  ;;  %v479_v18 = vpack.c.bf16 %v324_v7, %v323_v6  ;;  %v357_v22 = vld [vmem:[%s1877_s1 + $0x750] sm:$0xff]  ;;  %v343_v25 = vld [vmem:[%s1877_s1 + $0x6e0] sm:$0xff] }
  0x55   :  { %v344_v26 = vld [vmem:[%s1877_s1 + $0x6e8] sm:$0xff] }
  0x56   :  { %940 = vmatpush3.bf16.msra.mxu0 %v447_v35  ;;  %v335_v35 = vld [vmem:[%s1877_s1 + $0x6a0] sm:$0xff] }
  0x57   :  { %962 = vmatpush3.bf16.msra.mxu1 %v463_v36  ;;  %941 = vmatprep.subr.bf16.mxu0 %v456_v38  ;;  %v336_v36 = vld [vmem:[%s1877_s1 + $0x6a8] sm:$0xff]  ;;  %v120_v38 = vpack.c.bf16 %v89_v23, %v89_v23 }
  0x58   :  { %963 = vmatprep.subr.bf16.mxu1 %v472_v42  ;;  %v476_v42 = vpack.c.bf16 %v318_v32, %v317_v31  ;;  %v485_v44 = vpack.c.bf16 %v336_v36, %v335_v35  ;;  %v327_v31 = vld [vmem:[%s1877_s1 + $0x660] sm:$0xff]  ;;  %v328_v32 = vld [vmem:[%s1877_s1 + $0x668] sm:$0xff]  ;;  %v345_v35 = vld [vmem:[%s1877_s1 + $0x6f0] sm:$0xff] }
  0x59   :  { %v346_v36 = vld [vmem:[%s1877_s1 + $0x6f8] sm:$0xff] }
  0x5a   :  { %942 = vmatpush3.bf16.msra.mxu0 %v448_v47  ;;  %v501_v47 = vpack.c.bf16 %v368_v40, %v367_v39  ;;  %v378_v39 = vld [vmem:[%s1877_s1 + $0x7f8] sm:$0xff]  ;;  %v481_v40 = vpack.c.bf16 %v328_v32, %v327_v31 }
  0x5b   :  { %964 = vmatpush3.bf16.msra.mxu1 %v464_v49  ;;  %943 = vmatprep.subr.bf16.mxu0 %v457_v51  ;;  %v337_v49 = vld [vmem:[%s1877_s1 + $0x6b0] sm:$0xff]  ;;  %v338_v51 = vld [vmem:[%s1877_s1 + $0x6b8] sm:$0xff] }
  0x5c   :  { %965 = vmatprep.subr.bf16.mxu1 %v473_v55  ;;  %v493_v55 = vpack.c.bf16 %v352_v48, %v351_v46  ;;  %v486_v56 = vpack.c.bf16 %v338_v51, %v337_v49  ;;  %v362_v46 = vld [vmem:[%s1877_s1 + $0x778] sm:$0xff]  ;;  %v119_v49 = vpack.c.bf16 %v1668_v9, %v1668_v9  ;;  %v121_v51 = vpack.c.bf16 %v1677_v12, %v1677_v12 }
  0x5d   :  { %v498_v48 = vpack.c.bf16 %v362_v46, %v361_v37 }
  0x5e   :  { %944 = vmatpush3.bf16.msra.mxu0 %v449_v63  ;;  %v339_v63 = vld [vmem:[%s1877_s1 + $0x6c0] sm:$0xff] }
  0x5f   :  { %966 = vmatpush3.bf16.msra.mxu1 %v465_v0  ;;  %945 = vmatprep.subr.bf16.mxu0 %v458_v1  ;;  %v340_v0 = vld [vmem:[%s1877_s1 + $0x6c8] sm:$0xff]  ;;  %v371_v1 = vld [vmem:[%s1877_s1 + $0x7c0] sm:$0xff] }
  0x60   :  { %967 = vmatprep.subr.bf16.mxu1 %v474_v5  ;;  %v487_v5 = vpack.c.bf16 %v340_v0, %v339_v63  ;;  %v503_v10 = vpack.c.bf16 %v372_v2, %v371_v1 }
  0x62   :  { %946 = vmatpush3.bf16.msra.mxu0 %v450_v14  ;;  %v341_v14 = vld [vmem:[%s1877_s1 + $0x6d0] sm:$0xff] }
  0x63   :  { %968 = vmatpush3.bf16.msra.mxu1 %v466_v15  ;;  %975 = vmatprep.subr.bf16.mxu0 %v483_v16  ;;  %v342_v15 = vld [vmem:[%s1877_s1 + $0x6d8] sm:$0xff]  ;;  %v373_v16 = vld [vmem:[%s1877_s1 + $0x7d0] sm:$0xff] }
  0x64   :  { %997 = vmatprep.subr.bf16.mxu1 %v499_v13  ;;  %v488_v13 = vpack.c.bf16 %v342_v15, %v341_v14  ;;  %v504_v23 = vpack.c.bf16 %v374_v17, %v373_v16 }
  0x65   :  { %707 = vmatmul.mubr.bf16.vlgmr.msra.gmra.mrb[8].mxu0 %v115_v24  ;;  %v358_v24 = vld [vmem:[%s1877_s1 + $0x758] sm:$0xff] }
  0x66   :  { %747 = vmatmul.mubr.bf16.vlgmr.msra.gmra.mrb[8].mxu1 %v117_v28  ;;  %976 = vmatpush3.bf16.msra.mxu0 %v475_v29  ;;  %v376_v28 = vld [vmem:[%s1877_s1 + $0x7e8] sm:$0xff]  ;;  %v480_v29 = vpack.c.bf16 %v326_v21, %v325_v20 }
  0x67   :  { %998 = vmatpush3.bf16.msra.mxu1 %v491_v30  ;;  %977 = vmatprep.subr.bf16.mxu0 %v484_v50  ;;  %v496_v30 = vpack.c.bf16 %v358_v24, %v357_v22  ;;  %v489_v50 = vpack.c.bf16 %v344_v26, %v343_v25 }
  0x68   :  { %999 = vmatprep.subr.bf16.mxu1 %v500_v34  ;;  %786 = vmatprep.mubr.bf16.mxu0 %v120_v38  ;;  %v505_v34 = vpack.c.bf16 %v376_v28, %v375_v27  ;;  %v377_v38 = vld [vmem:[%s1877_s1 + $0x7f0] sm:$0xff] }
  0x69   :  { %826 = vmatprep.mubr.bf16.mxu1 %v122_v41  ;;  %v497_v41 = vpack.c.bf16 %v360_v58, %v359_v33  ;;  %v506_v45 = vpack.c.bf16 %v378_v39, %v377_v38 }
  0x6a   :  { %978 = vmatpush3.bf16.msra.mxu0 %v476_v42  ;;  %v490_v42 = vpack.c.bf16 %v346_v36, %v345_v35 }
  0x6b   :  { %1000 = vmatpush3.bf16.msra.mxu1 %v492_v43  ;;  %979 = vmatprep.subr.bf16.mxu0 %v485_v44  ;;  %v329_v43 = vld [vmem:[%s1877_s1 + $0x670] sm:$0xff]  ;;  %v330_v44 = vld [vmem:[%s1877_s1 + $0x678] sm:$0xff] }
  0x6c   :  { %1001 = vmatprep.subr.bf16.mxu1 %v501_v47  ;;  %v482_v47 = vpack.c.bf16 %v330_v44, %v329_v43 }
  0x6e   :  { %980 = vmatpush3.bf16.msra.mxu0 %v477_v54  ;;  %v842_v54 = vld [vmem:[%s1879_s2] ss:$0 sm:$0xff] }
  0x6f   :  { %1002 = vmatpush3.bf16.msra.mxu1 %v493_v55  ;;  %981 = vmatprep.subr.bf16.mxu0 %v486_v56 }
  0x70   :  { %1003 = vmatprep.subr.bf16.mxu1 %v502_v61 }
  0x72   :  { %982 = vmatpush3.bf16.msra.mxu0 %v478_v3 }
  0x73   :  { %1004 = vmatpush3.bf16.msra.mxu1 %v494_v4  ;;  %983 = vmatprep.subr.bf16.mxu0 %v487_v5 }
  0x74   :  { %1005 = vmatprep.subr.bf16.mxu1 %v503_v10 }
  0x76   :  { %984 = vmatpush3.bf16.msra.mxu0 %v479_v18 }
  0x77   :  { %1006 = vmatpush3.bf16.msra.mxu1 %v495_v19  ;;  %985 = vmatprep.subr.bf16.mxu0 %v488_v13 }
  0x78   :  { %1007 = vmatprep.subr.bf16.mxu1 %v504_v23 }
  0x7a   :  { %986 = vmatpush3.bf16.msra.mxu0 %v480_v29 }
  0x7b   :  { %1008 = vmatpush3.bf16.msra.mxu1 %v496_v30  ;;  %987 = vmatprep.subr.bf16.mxu0 %v489_v50 }
  0x7c   :  { %1009 = vmatprep.subr.bf16.mxu1 %v505_v34 }
  0x7e   :  { %988 = vmatpush3.bf16.msra.mxu0 %v481_v40 }
  0x7f   :  { %1010 = vmatpush3.bf16.msra.mxu1 %v497_v41  ;;  %989 = vmatprep.subr.bf16.mxu0 %v490_v42 }
  0x80   :  { %1011 = vmatprep.subr.bf16.mxu1 %v506_v45 }
  0x82   :  { %990 = vmatpush3.bf16.msra.mxu0 %v482_v47 }
  0x83   :  { %1012 = vmatpush3.bf16.msra.mxu1 %v498_v48 }
  0x85   :  { %787 = vmatmul.mubr.bf16.vlgmr.msra.gmra.mrb[12].mxu0 %v119_v49 }
  0x86   :  { %827 = vmatmul.mubr.bf16.vlgmr.msra.gmra.mrb[12].mxu1 %v121_v51 }
  0xf8   :  { %v859_v52 = vpop.f32.mrb[0].mxu0 }
  0xf9   :  { %v881_v53 = vpop.f32.mrb[0].mxu1  ;;  %v860_v55 = vpop.f32.mrb[1].mxu0 }
  0xfa   :  { %v861_v56 = vadd.f32 %v860_v55, %v859_v52  ;;  %v882_v57 = vpop.f32.mrb[1].mxu1  ;;  %v862_v59 = vpop.f32.mrb[2].mxu0 }
  0xfb   :  { %v883_v60 = vadd.f32 %v882_v57, %v881_v53  ;;  %v884_v61 = vpop.f32.mrb[2].mxu1  ;;  %v863_v9 = vpop.f32.mrb[3].mxu0 }
  0xfc   :  { %v549_v62 = vadd.f32 %v861_v56, %v842_v54  ;;  %v885_v63 = vpop.f32.mrb[3].mxu1 }
  0xfe   :  { %v589_v0 = vadd.f32 %v883_v60, %v549_v62 }
 0x118   :  { %v903_v12 = vpop.f32.mrb[4].mxu0 }
 0x119   :  { %v925_v1 = vpop.f32.mrb[4].mxu1  ;;  %v904_v2 = vpop.f32.mrb[5].mxu0 }
 0x11a   :  { %v905_v3 = vadd.f32 %v904_v2, %v903_v12  ;;  %v926_v4 = vpop.f32.mrb[5].mxu1  ;;  %v906_v5 = vpop.f32.mrb[6].mxu0 }
 0x11b   :  { %v927_v6 = vadd.f32 %v926_v4, %v925_v1  ;;  %v928_v7 = vpop.f32.mrb[6].mxu1  ;;  %v907_v8 = vpop.f32.mrb[7].mxu0 }
 0x11c   :  { %v629_v10 = vadd.f32 %v905_v3, %v589_v0  ;;  %v929_v11 = vpop.f32.mrb[7].mxu1 }
 0x11e   :  { %v669_v14 = vadd.f32 %v927_v6, %v629_v10 }
 0x138   :  { %v947_v15 = vpop.f32.mrb[8].mxu0 }
 0x139   :  { %v969_v16 = vpop.f32.mrb[8].mxu1  ;;  %v948_v17 = vpop.f32.mrb[9].mxu0 }
 0x13a   :  { %v949_v18 = vadd.f32 %v948_v17, %v947_v15  ;;  %v970_v19 = vpop.f32.mrb[9].mxu1  ;;  %v950_v13 = vpop.f32.mrb[10].mxu0 }
 0x13b   :  { %v971_v20 = vadd.f32 %v970_v19, %v969_v16  ;;  %v972_v21 = vpop.f32.mrb[10].mxu1  ;;  %v951_v22 = vpop.f32.mrb[11].mxu0 }
 0x13c   :  { %v709_v23 = vadd.f32 %v949_v18, %v669_v14  ;;  %v973_v24 = vpop.f32.mrb[11].mxu1 }
 0x13e   :  { %v749_v25 = vadd.f32 %v971_v20, %v709_v23 }
 0x158   :  { %v991_v26 = vpop.f32.mrb[12].mxu0 }
 0x159   :  { %v1013_v27 = vpop.f32.mrb[12].mxu1  ;;  %v992_v28 = vpop.f32.mrb[13].mxu0 }
 0x15a   :  { %v993_v29 = vadd.f32 %v992_v28, %v991_v26  ;;  %v1014_v30 = vpop.f32.mrb[13].mxu1  ;;  %v994_v50 = vpop.f32.mrb[14].mxu0 }
 0x15b   :  { %v1015_v31 = vadd.f32 %v1014_v30, %v1013_v27  ;;  %v1016_v32 = vpop.f32.mrb[14].mxu1  ;;  %v995_v33 = vpop.f32.mrb[15].mxu0 }
 0x15c   :  { %v789_v34 = vadd.f32 %v993_v29, %v749_v25  ;;  %v1017_v58 = vpop.f32.mrb[15].mxu1 }
 0x15e   :  { %v829_v35 = vadd.f32 %v1015_v31, %v789_v34 }
 0x160   :  { %vm834_vm0 = vcmp.gt.f32.partialorder %v829_v35, 0.0  ;;  %v835_v36 = vmul.f32 0.2, %v829_v35 }
 0x162   :  { %v836_v38 = vsel %vm834_vm0, %v829_v35, %v835_v36 }
 0x163   :  { %837 = vst [vmem:[%s1880_s3] sm:$0x3] %v836_v38 }

// kernel: discriminator_forward.23
= control target key start
LH: loop header
LB: loop body
LE: loop exit
PB: predicated region body
PF: predicated region fallthrough
CT: control target
= control target key end

     0   :  { %v1887_v0 = vmov 0.0   ;;  %vm1888_vm0 = vmmov 0   ;;  %s2897_s1 = inlined_call_operand.vmem [shape: f32[9,128,128], index: 1, kind: input, shape index: {}]   ;;  %s2898_s0 = inlined_call_operand.vmem [shape: f32[86,128], index: 0, kind: input, shape index: {}]   ;;  %s2899_s3 = inlined_call_operand.vmem [shape: f32[72,1], index: 3, kind: input, shape index: {}]   ;;  %s2900_s2 = inlined_call_operand.vmem [shape: f32[1,128], index: 2, kind: input, shape index: {}]   ;;  %s2901_s4 = inlined_call_operand.vmem [shape: f32[72,128], index: 4, kind: output, shape index: {}]  }
   0x1   :  { %1542 = vmatprep.subr.bf16.mxu0 %v1887_v0  ;;  %1578 = vmatprep.subr.bf16.mxu1 %v1887_v0  ;;  %v1233_v1 = vld [vmem:[%s2897_s1 + $0x80] sm:$0xff]  ;;  %v1234_v2 = vld [vmem:[%s2897_s1 + $0x88] sm:$0xff]  ;;  %v1235_v6 = vld [vmem:[%s2897_s1 + $0x90] sm:$0xff] }
   0x2   :  { %v34_v3 = vld [vmem:[%s2897_s1] sm:$0xff]  ;;  %v91_v4 = vpack.c.bf16 %v1234_v2, %v1233_v1  ;;  %v35_v5 = vld [vmem:[%s2897_s1 + $0x8] sm:$0xff]  ;;  %v1236_v7 = vld [vmem:[%s2897_s1 + $0x98] sm:$0xff]  ;;  %1558 = vmatprep.mubr.msk.bf16.mxu0 %vm1888_vm0, %v1887_v0  ;;  %1594 = vmatprep.mubr.msk.bf16.mxu1 %vm1888_vm0, %v1887_v0 }
   0x3   :  { %v50_v8 = vpack.c.bf16 %v35_v5, %v34_v3  ;;  %v36_v9 = vld [vmem:[%s2897_s1 + $0x10] sm:$0xff]  ;;  %v37_v10 = vld [vmem:[%s2897_s1 + $0x18] sm:$0xff]  ;;  %v92_v11 = vpack.c.bf16 %v1236_v7, %v1235_v6  ;;  %v1237_v13 = vld [vmem:[%s2897_s1 + $0xa0] sm:$0xff] }
   0x4   :  { %1543 = vmatpush3.bf16.msra.mxu0 %v91_v4  ;;  %v51_v12 = vpack.c.bf16 %v37_v10, %v36_v9  ;;  %v1238_v14 = vld [vmem:[%s2897_s1 + $0xa8] sm:$0xff]  ;;  %v38_v15 = vld [vmem:[%s2897_s1 + $0x20] sm:$0xff]  ;;  %v1239_v19 = vld [vmem:[%s2897_s1 + $0xb0] sm:$0xff] }
   0x5   :  { %1579 = vmatpush3.bf16.msra.mxu1 %v50_v8  ;;  %1544 = vmatprep.subr.bf16.mxu0 %v1887_v0  ;;  %v39_v16 = vld [vmem:[%s2897_s1 + $0x28] sm:$0xff]  ;;  %v93_v17 = vpack.c.bf16 %v1238_v14, %v1237_v13  ;;  %v1240_v20 = vld [vmem:[%s2897_s1 + $0xb8] sm:$0xff]  ;;  %v40_v21 = vld [vmem:[%s2897_s1 + $0x30] sm:$0xff] }
   0x6   :  { %1580 = vmatprep.subr.bf16.mxu1 %v1887_v0  ;;  %v52_v18 = vpack.c.bf16 %v39_v16, %v38_v15  ;;  %v41_v22 = vld [vmem:[%s2897_s1 + $0x38] sm:$0xff]  ;;  %v94_v23 = vpack.c.bf16 %v1240_v20, %v1239_v19  ;;  %v1241_v25 = vld [vmem:[%s2897_s1 + $0xc0] sm:$0xff]  ;;  %v1242_v26 = vld [vmem:[%s2897_s1 + $0xc8] sm:$0xff] }
   0x7   :  { %v53_v24 = vpack.c.bf16 %v41_v22, %v40_v21  ;;  %v42_v27 = vld [vmem:[%s2897_s1 + $0x40] sm:$0xff]  ;;  %v43_v28 = vld [vmem:[%s2897_s1 + $0x48] sm:$0xff]  ;;  %v1995_v30 = vld [vmem:[%s2898_s0 + $0x10] sm:$0xff]  ;;  %v95_v31 = vpack.c.bf16 %v1242_v26, %v1241_v25 }
   0x8   :  { %1545 = vmatpush3.bf16.msra.mxu0 %v92_v11  ;;  %v1990_v29 = vld [vmem:[%s2898_s0 + $0x8] sm:$0xff]  ;;  %v54_v33 = vpack.c.bf16 %v43_v28, %v42_v27  ;;  %v1243_v34 = vld [vmem:[%s2897_s1 + $0xd0] sm:$0xff]  ;;  %v1244_v35 = vld [vmem:[%s2897_s1 + $0xd8] sm:$0xff] }
   0x9   :  { %1581 = vmatpush3.bf16.msra.mxu1 %v51_v12  ;;  %1546 = vmatprep.subr.bf16.mxu0 %v1887_v0  ;;  %v620_v32 = vpack.c.bf16 %v1995_v30, %v1990_v29  ;;  %v44_v36 = vld [vmem:[%s2897_s1 + $0x50] sm:$0xff]  ;;  %v45_v37 = vld [vmem:[%s2897_s1 + $0x58] sm:$0xff]  ;;  %v2021_v39 = vld [vmem:[%s2898_s0 + $0x20] sm:$0xff]  ;;  %v96_v41 = vpack.c.bf16 %v1244_v35, %v1243_v34 }
   0xa   :  { %1582 = vmatprep.subr.bf16.mxu1 %v1887_v0  ;;  %v2016_v38 = vld [vmem:[%s2898_s0 + $0x18] sm:$0xff]  ;;  %v55_v42 = vpack.c.bf16 %v45_v37, %v44_v36  ;;  %v1245_v43 = vld [vmem:[%s2897_s1 + $0xe0] sm:$0xff]  ;;  %v1246_v44 = vld [vmem:[%s2897_s1 + $0xe8] sm:$0xff] }
   0xb   :  { %v621_v40 = vpack.c.bf16 %v2021_v39, %v2016_v38  ;;  %v46_v45 = vld [vmem:[%s2897_s1 + $0x60] sm:$0xff]  ;;  %v47_v46 = vld [vmem:[%s2897_s1 + $0x68] sm:$0xff]  ;;  %v2047_v48 = vld [vmem:[%s2898_s0 + $0x30] sm:$0xff]  ;;  %v97_v50 = vpack.c.bf16 %v1246_v44, %v1245_v43  ;;  %v30_v22 = vpack.c.bf16 %v2016_v38, %v1995_v30 }
   0xc   :  { %1547 = vmatpush3.bf16.msra.mxu0 %v93_v17  ;;  %v2042_v47 = vld [vmem:[%s2898_s0 + $0x28] sm:$0xff]  ;;  %v56_v51 = vpack.c.bf16 %v47_v46, %v46_v45  ;;  %v1247_v52 = vld [vmem:[%s2897_s1 + $0xf0] sm:$0xff]  ;;  %v1248_v53 = vld [vmem:[%s2897_s1 + $0xf8] sm:$0xff] }
   0xd   :  { %1583 = vmatpush3.bf16.msra.mxu1 %v52_v18  ;;  %1548 = vmatprep.subr.bf16.mxu0 %v1887_v0  ;;  %v622_v49 = vpack.c.bf16 %v2047_v48, %v2042_v47  ;;  %v48_v54 = vld [vmem:[%s2897_s1 + $0x70] sm:$0xff]  ;;  %v49_v55 = vld [vmem:[%s2897_s1 + $0x78] sm:$0xff]  ;;  %v2073_v57 = vld [vmem:[%s2898_s0 + $0x40] sm:$0xff]  ;;  %v98_v59 = vpack.c.bf16 %v1248_v53, %v1247_v52  ;;  %v31_v44 = vpack.c.bf16 %v2042_v47, %v2021_v39 }
   0xe   :  { %1584 = vmatprep.subr.bf16.mxu1 %v1887_v0  ;;  %v2068_v56 = vld [vmem:[%s2898_s0 + $0x38] sm:$0xff]  ;;  %v1224_v60 = vld [vmem:[%s2898_s0 + $0x1] sm:$0xff]  ;;  %v1225_v61 = vld [vmem:[%s2898_s0 + $0x9] sm:$0xff]  ;;  %v57_v62 = vpack.c.bf16 %v49_v55, %v48_v54 }
   0xf   :  { %v623_v58 = vpack.c.bf16 %v2073_v57, %v2068_v56  ;;  %v20_v63 = vld [vmem:[%s2898_s0] sm:$0xff]  ;;  %v1259_v2 = vld [vmem:[%s2897_s1 + $0x108] sm:$0xff]  ;;  %v69_v3 = vpack.c.bf16 %v1225_v61, %v1224_v60  ;;  %v1260_v8 = vld [vmem:[%s2897_s1 + $0x110] sm:$0xff] }
  0x10   :  { %1549 = vmatpush3.bf16.msra.mxu0 %v94_v23  ;;  %v1258_v1 = vld [vmem:[%s2897_s1 + $0x100] sm:$0xff]  ;;  %v1284_v5 = vld [vmem:[%s2897_s1 + $0x188] sm:$0xff]  ;;  %v29_v6 = vpack.c.bf16 %v1990_v29, %v20_v63  ;;  %v1261_v9 = vld [vmem:[%s2897_s1 + $0x118] sm:$0xff] }
  0x11   :  { %1585 = vmatpush3.bf16.msra.mxu1 %v53_v24  ;;  %1550 = vmatprep.subr.bf16.mxu0 %v1887_v0  ;;  %v1283_v4 = vld [vmem:[%s2897_s1 + $0x180] sm:$0xff]  ;;  %v276_v7 = vpack.c.bf16 %v1259_v2, %v1258_v1  ;;  %v1285_v11 = vld [vmem:[%s2897_s1 + $0x190] sm:$0xff]  ;;  %v1286_v12 = vld [vmem:[%s2897_s1 + $0x198] sm:$0xff]  ;;  %v277_v13 = vpack.c.bf16 %v1261_v9, %v1260_v8 }
  0x12   :  { %1586 = vmatprep.subr.bf16.mxu1 %v1887_v0  ;;  %v398_v10 = vpack.c.bf16 %v1284_v5, %v1283_v4  ;;  %v1226_v14 = vld [vmem:[%s2898_s0 + $0x11] sm:$0xff]  ;;  %v1227_v15 = vld [vmem:[%s2898_s0 + $0x19] sm:$0xff]  ;;  %v1263_v17 = vld [vmem:[%s2897_s1 + $0x128] sm:$0xff]  ;;  %v399_v18 = vpack.c.bf16 %v1286_v12, %v1285_v11 }
  0x13   :  { %v1262_v16 = vld [vmem:[%s2897_s1 + $0x120] sm:$0xff]  ;;  %v70_v19 = vpack.c.bf16 %v1227_v15, %v1226_v14  ;;  %v1288_v21 = vld [vmem:[%s2897_s1 + $0x1a8] sm:$0xff]  ;;  %v1264_v24 = vld [vmem:[%s2897_s1 + $0x130] sm:$0xff] }
  0x14   :  { %1551 = vmatpush3.bf16.msra.mxu0 %v95_v31  ;;  %v1287_v20 = vld [vmem:[%s2897_s1 + $0x1a0] sm:$0xff]  ;;  %v278_v23 = vpack.c.bf16 %v1263_v17, %v1262_v16  ;;  %v1265_v25 = vld [vmem:[%s2897_s1 + $0x138] sm:$0xff]  ;;  %v1289_v27 = vld [vmem:[%s2897_s1 + $0x1b0] sm:$0xff]  ;;  %v33_v17 = vpack.c.bf16 %v2073_v57, %v2073_v57 }
  0x15   :  { %1587 = vmatpush3.bf16.msra.mxu1 %v54_v33  ;;  %1552 = vmatprep.subr.bf16.mxu0 %v1887_v0  ;;  %v400_v26 = vpack.c.bf16 %v1288_v21, %v1287_v20  ;;  %v1290_v28 = vld [vmem:[%s2897_s1 + $0x1b8] sm:$0xff]  ;;  %v1228_v31 = vld [vmem:[%s2898_s0 + $0x21] sm:$0xff]  ;;  %v1229_v33 = vld [vmem:[%s2898_s0 + $0x29] sm:$0xff]  ;;  %v279_v34 = vpack.c.bf16 %v1265_v25, %v1264_v24 }
  0x16   :  { %1588 = vmatprep.subr.bf16.mxu1 %v1887_v0  ;;  %v1266_v35 = vld [vmem:[%s2897_s1 + $0x140] sm:$0xff]  ;;  %v1267_v36 = vld [vmem:[%s2897_s1 + $0x148] sm:$0xff]  ;;  %v401_v37 = vpack.c.bf16 %v1290_v28, %v1289_v27  ;;  %v1268_v46 = vld [vmem:[%s2897_s1 + $0x150] sm:$0xff] }
  0x17   :  { %v1292_v43 = vld [vmem:[%s2897_s1 + $0x1c8] sm:$0xff]  ;;  %v280_v45 = vpack.c.bf16 %v1267_v36, %v1266_v35  ;;  %v1293_v52 = vld [vmem:[%s2897_s1 + $0x1d0] sm:$0xff]  ;;  %v1294_v53 = vld [vmem:[%s2897_s1 + $0x1d8] sm:$0xff] }
  0x18   :  { %1553 = vmatpush3.bf16.msra.mxu0 %v96_v41  ;;  %v71_v41 = vpack.c.bf16 %v1229_v33, %v1228_v31  ;;  %v1230_v54 = vld [vmem:[%s2898_s0 + $0x31] sm:$0xff]  ;;  %v1231_v55 = vld [vmem:[%s2898_s0 + $0x39] sm:$0xff]  ;;  %v403_v60 = vpack.c.bf16 %v1294_v53, %v1293_v52  ;;  %v1296_v2 = vld [vmem:[%s2897_s1 + $0x1e8] sm:$0xff] }
  0x19   :  { %1589 = vmatpush3.bf16.msra.mxu1 %v55_v42  ;;  %1554 = vmatprep.subr.bf16.mxu0 %v1887_v0  ;;  %v1291_v42 = vld [vmem:[%s2897_s1 + $0x1c0] sm:$0xff]  ;;  %v72_v63 = vpack.c.bf16 %v1231_v55, %v1230_v54  ;;  %v1297_v8 = vld [vmem:[%s2897_s1 + $0x1f0] sm:$0xff]  ;;  %v1298_v9 = vld [vmem:[%s2897_s1 + $0x1f8] sm:$0xff] }
  0x1a   :  { %1590 = vmatprep.subr.bf16.mxu1 %v1887_v0  ;;  %v1270_v61 = vld [vmem:[%s2897_s1 + $0x160] sm:$0xff]  ;;  %v2243_v11 = vld [vmem:[%s2898_s0 + $0xe] sm:$0xff]  ;;  %v2248_v12 = vld [vmem:[%s2898_s0 + $0x16] sm:$0xff]  ;;  %v405_v15 = vpack.c.bf16 %v1298_v9, %v1297_v8 }
  0x1b   :  { %v1295_v1 = vld [vmem:[%s2897_s1 + $0x1e0] sm:$0xff]  ;;  %v986_v14 = vpack.c.bf16 %v2248_v12, %v2243_v11  ;;  %v1309_v27 = vld [vmem:[%s2897_s1 + $0x208] sm:$0xff] }
  0x1c   :  { %1555 = vmatpush3.bf16.msra.mxu0 %v97_v50  ;;  %v1269_v50 = vld [vmem:[%s2897_s1 + $0x158] sm:$0xff]  ;;  %v404_v5 = vpack.c.bf16 %v1296_v2, %v1295_v1  ;;  %v1249_v21 = vld [vmem:[%s2898_s0 + $0x2] sm:$0xff]  ;;  %v1314_v2 = vld [vmem:[%s2897_s1 + $0x230] sm:$0xff] }
  0x1d   :  { %1591 = vmatpush3.bf16.msra.mxu1 %v56_v51  ;;  %1556 = vmatprep.subr.bf16.mxu0 %v1887_v0  ;;  %v402_v51 = vpack.c.bf16 %v1292_v43, %v1291_v42  ;;  %v2288_v24 = vld [vmem:[%s2898_s0 + $0x26] sm:$0xff]  ;;  %v1335_v43 = vld [vmem:[%s2897_s1 + $0x290] sm:$0xff]  ;;  %v1252_v52 = vld [vmem:[%s2898_s0 + $0x1a] sm:$0xff] }
  0x1e   :  { %1592 = vmatprep.subr.bf16.mxu1 %v1887_v0  ;;  %v1274_v25 = vld [vmem:[%s2898_s0 + $0x6] sm:$0xff] }
  0x1f   :  { %v1333_v33 = vld [vmem:[%s2897_s1 + $0x280] sm:$0xff]  ;;  %v376_v35 = vpack.c.bf16 %v2243_v11, %v1274_v25  ;;  %v1313_v55 = vld [vmem:[%s2897_s1 + $0x228] sm:$0xff] }
  0x20   :  { %1557 = vmatpush3.bf16.msra.mxu0 %v98_v59  ;;  %v281_v59 = vpack.c.bf16 %v1269_v50, %v1268_v46  ;;  %v2330_v46 = vld [vmem:[%s2898_s0 + $0x36] sm:$0xff]  ;;  %v1312_v54 = vld [vmem:[%s2897_s1 + $0x220] sm:$0xff]  ;;  %v1254_v8 = vld [vmem:[%s2898_s0 + $0x2a] sm:$0xff] }
  0x21   :  { %1593 = vmatpush3.bf16.msra.mxu1 %v57_v62  ;;  %1614 = vmatprep.subr.bf16.mxu0 %v1887_v0  ;;  %v1271_v62 = vld [vmem:[%s2897_s1 + $0x168] sm:$0xff]  ;;  %v522_v1 = vpack.c.bf16 %v1313_v55, %v1312_v54  ;;  %v1362_v29 = vld [vmem:[%s2897_s1 + $0x320] sm:$0xff] }
  0x22   :  { %1650 = vmatprep.subr.bf16.mxu1 %v1887_v0  ;;  %v282_v4 = vpack.c.bf16 %v1271_v62, %v1270_v61  ;;  %v1337_v61 = vld [vmem:[%s2897_s1 + $0x2a0] sm:$0xff]  ;;  %v1338_v62 = vld [vmem:[%s2897_s1 + $0x2a8] sm:$0xff] }
  0x23   :  { %1559 = vmatmul.mubr.bf16.vlgmr.msra.gmra.mrb[0].mxu0 %v69_v3  ;;  %v32_v3 = vpack.c.bf16 %v2068_v56, %v2047_v48  ;;  %v1363_v30 = vld [vmem:[%s2897_s1 + $0x328] sm:$0xff]  ;;  %v1366_v38 = vld [vmem:[%s2897_s1 + $0x340] sm:$0xff] }
  0x24   :  { %1595 = vmatmul.mubr.bf16.vlgmr.msra.gmra.mrb[0].mxu1 %v29_v6  ;;  %1615 = vmatpush3.bf16.msra.mxu0 %v276_v7  ;;  %v1272_v6 = vld [vmem:[%s2897_s1 + $0x170] sm:$0xff]  ;;  %v1273_v7 = vld [vmem:[%s2897_s1 + $0x178] sm:$0xff]  ;;  %v1367_v39 = vld [vmem:[%s2897_s1 + $0x348] sm:$0xff] }
  0x25   :  { %1616 = vmatprep.subr.bf16.mxu0 %v1887_v0  ;;  %1562 = vmatprep.mubr.msk.bf16.mxu0 %vm1888_vm0, %v1887_v0  ;;  %v1370_v48 = vld [vmem:[%s2897_s1 + $0x360] sm:$0xff] }
  0x26   :  { %1598 = vmatprep.mubr.msk.bf16.mxu1 %vm1888_vm0, %v1887_v0  ;;  %1651 = vmatpush3.bf16.msra.mxu1 %v398_v10  ;;  %v1232_v10 = vld [vmem:[%s2898_s0 + $0x41] sm:$0xff] }
  0x27   :  { %1652 = vmatprep.subr.bf16.mxu1 %v1887_v0  ;;  %v73_v16 = vpack.c.bf16 %v1232_v10, %v1232_v10  ;;  %v1316_v10 = vld [vmem:[%s2897_s1 + $0x240] sm:$0xff] }
  0x28   :  { %1617 = vmatpush3.bf16.msra.mxu0 %v277_v13  ;;  %v283_v13 = vpack.c.bf16 %v1273_v7, %v1272_v6  ;;  %v1340_v6 = vld [vmem:[%s2897_s1 + $0x2b8] sm:$0xff]  ;;  %v1253_v7 = vld [vmem:[%s2898_s0 + $0x22] sm:$0xff] }
  0x29   :  { %1618 = vmatprep.subr.bf16.mxu0 %v1887_v0 }
  0x2a   :  { %1653 = vmatpush3.bf16.msra.mxu1 %v399_v18  ;;  %v2261_v18 = vld [vmem:[%s2898_s0 + $0x3e] sm:$0xff] }
  0x2b   :  { %1563 = vmatmul.mubr.bf16.gmra.mrb[4].mxu0 %v70_v19  ;;  %1654 = vmatprep.subr.bf16.mxu1 %v1887_v0  ;;  %v2266_v19 = vld [vmem:[%s2898_s0 + $0x46] sm:$0xff] }
  0x2c   :  { %1599 = vmatmul.mubr.bf16.gmra.mrb[4].mxu1 %v30_v22  ;;  %1619 = vmatpush3.bf16.msra.mxu0 %v278_v23  ;;  %v989_v20 = vpack.c.bf16 %v2266_v19, %v2261_v18  ;;  %v1250_v22 = vld [vmem:[%s2898_s0 + $0xa] sm:$0xff]  ;;  %v2283_v23 = vld [vmem:[%s2898_s0 + $0x1e] sm:$0xff] }
  0x2d   :  { %1566 = vmatprep.mubr.msk.bf16.mxu0 %vm1888_vm0, %v1887_v0  ;;  %1602 = vmatprep.mubr.msk.bf16.mxu1 %vm1888_vm0, %v1887_v0  ;;  %v987_v28 = vpack.c.bf16 %v2288_v24, %v2283_v23  ;;  %v254_v31 = vpack.c.bf16 %v1250_v22, %v1249_v21  ;;  %v1342_v21 = vld [vmem:[%s2897_s1 + $0x2c8] sm:$0xff] }
  0x2e   :  { %1620 = vmatprep.subr.bf16.mxu0 %v1887_v0  ;;  %1655 = vmatpush3.bf16.msra.mxu1 %v400_v26  ;;  %v1308_v26 = vld [vmem:[%s2897_s1 + $0x200] sm:$0xff] }
  0x2f   :  { %1656 = vmatprep.subr.bf16.mxu1 %v1887_v0  ;;  %v520_v36 = vpack.c.bf16 %v1309_v27, %v1308_v26  ;;  %v1318_v26 = vld [vmem:[%s2897_s1 + $0x250] sm:$0xff]  ;;  %v1319_v27 = vld [vmem:[%s2897_s1 + $0x258] sm:$0xff] }
  0x30   :  { %1621 = vmatpush3.bf16.msra.mxu0 %v279_v34  ;;  %v1334_v34 = vld [vmem:[%s2897_s1 + $0x288] sm:$0xff] }
  0x31   :  { %1622 = vmatprep.subr.bf16.mxu0 %v1887_v0  ;;  %v642_v42 = vpack.c.bf16 %v1334_v34, %v1333_v33  ;;  %v1343_v33 = vld [vmem:[%s2897_s1 + $0x2d0] sm:$0xff]  ;;  %v1344_v34 = vld [vmem:[%s2897_s1 + $0x2d8] sm:$0xff] }
  0x32   :  { %1657 = vmatpush3.bf16.msra.mxu1 %v401_v37  ;;  %v1310_v37 = vld [vmem:[%s2897_s1 + $0x210] sm:$0xff] }
  0x33   :  { %1567 = vmatmul.mubr.bf16.gmra.mrb[8].mxu0 %v71_v41  ;;  %1658 = vmatprep.subr.bf16.mxu1 %v1887_v0  ;;  %v1311_v41 = vld [vmem:[%s2897_s1 + $0x218] sm:$0xff] }
  0x34   :  { %1603 = vmatmul.mubr.bf16.gmra.mrb[8].mxu1 %v31_v44  ;;  %1623 = vmatpush3.bf16.msra.mxu0 %v280_v45  ;;  %v1336_v44 = vld [vmem:[%s2897_s1 + $0x298] sm:$0xff]  ;;  %v2325_v45 = vld [vmem:[%s2898_s0 + $0x2e] sm:$0xff]  ;;  %v521_v50 = vpack.c.bf16 %v1311_v41, %v1310_v37  ;;  %v525_v37 = vpack.c.bf16 %v1319_v27, %v1318_v26  ;;  %v647_v41 = vpack.c.bf16 %v1344_v34, %v1343_v33  ;;  %v1387_v34 = vld [vmem:[%s2897_s1 + $0x3a0] sm:$0xff] }
  0x35   :  { %1570 = vmatprep.mubr.msk.bf16.mxu0 %vm1888_vm0, %v1887_v0  ;;  %1606 = vmatprep.mubr.msk.bf16.mxu1 %vm1888_vm0, %v1887_v0  ;;  %v988_v53 = vpack.c.bf16 %v2330_v46, %v2325_v45  ;;  %v378_v22 = vpack.c.bf16 %v2325_v45, %v2288_v24  ;;  %v1301_v27 = vld [vmem:[%s2898_s0 + $0x17] sm:$0xff] }
  0x36   :  { %1624 = vmatprep.subr.bf16.mxu0 %v1887_v0  ;;  %1659 = vmatpush3.bf16.msra.mxu1 %v402_v51  ;;  %v1251_v51 = vld [vmem:[%s2898_s0 + $0x12] sm:$0xff] }
  0x37   :  { %1660 = vmatprep.subr.bf16.mxu1 %v1887_v0 }
  0x38   :  { %1625 = vmatpush3.bf16.msra.mxu0 %v281_v59  ;;  %v643_v59 = vpack.c.bf16 %v1336_v44, %v1335_v43  ;;  %v1321_v43 = vld [vmem:[%s2897_s1 + $0x268] sm:$0xff] }
  0x39   :  { %1626 = vmatprep.subr.bf16.mxu0 %v1887_v0 }
  0x3a   :  { %1661 = vmatpush3.bf16.msra.mxu1 %v403_v60  ;;  %v255_v60 = vpack.c.bf16 %v1252_v52, %v1251_v51  ;;  %v1346_v51 = vld [vmem:[%s2897_s1 + $0x2e8] sm:$0xff]  ;;  %v379_v52 = vpack.c.bf16 %v2261_v18, %v2330_v46 }
  0x3b   :  { %1571 = vmatmul.mubr.bf16.gmra.mrb[12].mxu0 %v72_v63  ;;  %1662 = vmatprep.subr.bf16.mxu1 %v1887_v0  ;;  %v377_v63 = vpack.c.bf16 %v2283_v23, %v2248_v12 }
  0x3c   :  { %1607 = vmatmul.mubr.bf16.gmra.mrb[12].mxu1 %v32_v3  ;;  %1574 = vmatprep.mubr.msk.bf16.mxu0 %vm1888_vm0, %v1887_v0  ;;  %v1315_v3 = vld [vmem:[%s2897_s1 + $0x238] sm:$0xff] }
  0x3d   :  { %1610 = vmatprep.mubr.msk.bf16.mxu1 %vm1888_vm0, %v1887_v0  ;;  %1627 = vmatpush3.bf16.msra.mxu0 %v282_v4  ;;  %v644_v4 = vpack.c.bf16 %v1338_v62, %v1337_v61  ;;  %v523_v9 = vpack.c.bf16 %v1315_v3, %v1314_v2  ;;  %v1347_v61 = vld [vmem:[%s2897_s1 + $0x2f0] sm:$0xff]  ;;  %v1348_v62 = vld [vmem:[%s2897_s1 + $0x2f8] sm:$0xff] }
  0x3e   :  { %1663 = vmatpush3.bf16.msra.mxu1 %v404_v5  ;;  %1628 = vmatprep.subr.bf16.mxu0 %v1887_v0  ;;  %v1339_v5 = vld [vmem:[%s2897_s1 + $0x2b0] sm:$0xff]  ;;  %v649_v2 = vpack.c.bf16 %v1348_v62, %v1347_v61  ;;  %v1369_v62 = vld [vmem:[%s2897_s1 + $0x358] sm:$0xff] }
  0x3f   :  { %1664 = vmatprep.subr.bf16.mxu1 %v1887_v0  ;;  %v1368_v61 = vld [vmem:[%s2897_s1 + $0x350] sm:$0xff] }
  0x41   :  { %1629 = vmatpush3.bf16.msra.mxu0 %v283_v13  ;;  %v1317_v13 = vld [vmem:[%s2897_s1 + $0x248] sm:$0xff] }
  0x42   :  { %1665 = vmatpush3.bf16.msra.mxu1 %v405_v15  ;;  %1686 = vmatprep.subr.bf16.mxu0 %v1887_v0  ;;  %v645_v15 = vpack.c.bf16 %v1340_v6, %v1339_v5  ;;  %v524_v25 = vpack.c.bf16 %v1317_v13, %v1316_v10  ;;  %v1299_v5 = vld [vmem:[%s2898_s0 + $0x7] sm:$0xff]  ;;  %v1300_v6 = vld [vmem:[%s2898_s0 + $0xf] sm:$0xff] }
  0x43   :  { %1575 = vmatmul.mubr.bf16.gmra.mrb[16].mxu0 %v73_v16  ;;  %1722 = vmatprep.subr.bf16.mxu1 %v1887_v0  ;;  %v256_v16 = vpack.c.bf16 %v1254_v8, %v1253_v7  ;;  %v1358_v7 = vld [vmem:[%s2897_s1 + $0x300] sm:$0xff]  ;;  %v1359_v8 = vld [vmem:[%s2897_s1 + $0x308] sm:$0xff] }
  0x44   :  { %1611 = vmatmul.mubr.bf16.gmra.mrb[16].mxu1 %v33_v17  ;;  %1630 = vmatprep.mubr.msk.bf16.mxu0 %vm1888_vm0, %v1887_v0  ;;  %v1341_v17 = vld [vmem:[%s2897_s1 + $0x2c0] sm:$0xff]  ;;  %v1384_v13 = vld [vmem:[%s2897_s1 + $0x388] sm:$0xff] }
  0x45   :  { %1666 = vmatprep.mubr.msk.bf16.mxu1 %vm1888_vm0, %v1887_v0  ;;  %v1383_v10 = vld [vmem:[%s2897_s1 + $0x380] sm:$0xff] }
  0x4b   :  { %1631 = vmatmul.mubr.bf16.vlgmr.msra.gmra.mrb[20].mxu0 %v254_v31  ;;  %v646_v31 = vpack.c.bf16 %v1342_v21, %v1341_v17  ;;  %v1361_v17 = vld [vmem:[%s2897_s1 + $0x318] sm:$0xff]  ;;  %v886_v21 = vpack.c.bf16 %v1384_v13, %v1383_v10  ;;  %v1372_v13 = vld [vmem:[%s2897_s1 + $0x370] sm:$0xff] }
  0x4c   :  { %1667 = vmatmul.mubr.bf16.vlgmr.msra.gmra.mrb[20].mxu1 %v376_v35  ;;  %1687 = vmatpush3.bf16.msra.mxu0 %v520_v36  ;;  %v1255_v35 = vld [vmem:[%s2898_s0 + $0x32] sm:$0xff]  ;;  %v1256_v36 = vld [vmem:[%s2898_s0 + $0x3a] sm:$0xff] }
  0x4d   :  { %1688 = vmatprep.subr.bf16.mxu0 %v1887_v0  ;;  %1634 = vmatprep.mubr.msk.bf16.mxu0 %vm1888_vm0, %v1887_v0  ;;  %v257_v44 = vpack.c.bf16 %v1256_v36, %v1255_v35  ;;  %v1388_v35 = vld [vmem:[%s2897_s1 + $0x3a8] sm:$0xff]  ;;  %v766_v36 = vpack.c.bf16 %v1363_v30, %v1362_v29 }
  0x4e   :  { %1670 = vmatprep.mubr.msk.bf16.mxu1 %vm1888_vm0, %v1887_v0  ;;  %1723 = vmatpush3.bf16.msra.mxu1 %v642_v42  ;;  %v1320_v42 = vld [vmem:[%s2897_s1 + $0x260] sm:$0xff]  ;;  %v1141_v29 = vld [vmem:[%s2899_s3 + $0x8] sm:$0xff] }
  0x4f   :  { %1724 = vmatprep.subr.bf16.mxu1 %v1887_v0  ;;  %v526_v54 = vpack.c.bf16 %v1321_v43, %v1320_v42  ;;  %v888_v42 = vpack.c.bf16 %v1388_v35, %v1387_v34  ;;  %v1389_v43 = vld [vmem:[%s2897_s1 + $0x3b0] sm:$0xff]  ;;  %v1408_v35 = vld [vmem:[%s2897_s1 + $0x400] sm:$0xff] }
  0x50   :  { %1689 = vmatpush3.bf16.msra.mxu0 %v521_v50  ;;  %v1345_v50 = vld [vmem:[%s2897_s1 + $0x2e0] sm:$0xff]  ;;  %v1349_v30 = vld [vmem:[%s2898_s0 + $0xc] sm:$0xff]  ;;  %v1375_v34 = vld [vmem:[%s2898_s0 + $0x15] sm:$0xff] }
  0x51   :  { %1690 = vmatprep.subr.bf16.mxu0 %v1887_v0  ;;  %v648_v55 = vpack.c.bf16 %v1346_v51, %v1345_v50  ;;  %v1303_v50 = vld [vmem:[%s2898_s0 + $0x27] sm:$0xff]  ;;  %v1304_v51 = vld [vmem:[%s2898_s0 + $0x2f] sm:$0xff] }
  0x52   :  { %1725 = vmatpush3.bf16.msra.mxu1 %v643_v59  ;;  %v1322_v59 = vld [vmem:[%s2897_s1 + $0x270] sm:$0xff] }
  0x53   :  { %1635 = vmatmul.mubr.bf16.gmra.mrb[24].mxu0 %v255_v60  ;;  %1726 = vmatprep.subr.bf16.mxu1 %v1887_v0  ;;  %v1323_v60 = vld [vmem:[%s2897_s1 + $0x278] sm:$0xff] }
  0x54   :  { %1671 = vmatmul.mubr.bf16.gmra.mrb[24].mxu1 %v377_v63  ;;  %1691 = vmatpush3.bf16.msra.mxu0 %v522_v1  ;;  %v1257_v63 = vld [vmem:[%s2898_s0 + $0x42] sm:$0xff]  ;;  %v527_v1 = vpack.c.bf16 %v1323_v60, %v1322_v59  ;;  %v768_v60 = vpack.c.bf16 %v1367_v39, %v1366_v38 }
  0x55   :  { %1638 = vmatprep.mubr.msk.bf16.mxu0 %vm1888_vm0, %v1887_v0  ;;  %1674 = vmatprep.mubr.msk.bf16.mxu1 %vm1888_vm0, %v1887_v0  ;;  %v258_v3 = vpack.c.bf16 %v1257_v63, %v1257_v63  ;;  %v1392_v59 = vld [vmem:[%s2897_s1 + $0x3c8] sm:$0xff] }
  0x56   :  { %1692 = vmatprep.subr.bf16.mxu0 %v1887_v0  ;;  %1727 = vmatpush3.bf16.msra.mxu1 %v644_v4  ;;  %v380_v4 = vpack.c.bf16 %v2266_v19, %v2266_v19  ;;  %v1352_v38 = vld [vmem:[%s2898_s0 + $0x24] sm:$0xff] }
  0x57   :  { %1728 = vmatprep.subr.bf16.mxu1 %v1887_v0 }
  0x58   :  { %1693 = vmatpush3.bf16.msra.mxu0 %v523_v9  ;;  %v498_v9 = vpack.c.bf16 %v1300_v6, %v1299_v5  ;;  %v769_v5 = vpack.c.bf16 %v1369_v62, %v1368_v61  ;;  %v1146_v61 = vld [vmem:[%s2899_s3 + $0x30] sm:$0xff] }
  0x59   :  { %1694 = vmatprep.subr.bf16.mxu0 %v1887_v0 }
  0x5a   :  { %1729 = vmatpush3.bf16.msra.mxu1 %v645_v15  ;;  %v764_v15 = vpack.c.bf16 %v1359_v8, %v1358_v7  ;;  %v1395_v7 = vld [vmem:[%s2897_s1 + $0x3e0] sm:$0xff]  ;;  %v1396_v8 = vld [vmem:[%s2897_s1 + $0x3e8] sm:$0xff] }
  0x5b   :  { %1639 = vmatmul.mubr.bf16.gmra.mrb[28].mxu0 %v256_v16  ;;  %1730 = vmatprep.subr.bf16.mxu1 %v1887_v0  ;;  %v1360_v16 = vld [vmem:[%s2897_s1 + $0x310] sm:$0xff]  ;;  %v892_v10 = vpack.c.bf16 %v1396_v8, %v1395_v7  ;;  %v1416_v7 = vld [vmem:[%s2897_s1 + $0x440] sm:$0xff]  ;;  %v1417_v8 = vld [vmem:[%s2897_s1 + $0x448] sm:$0xff] }
  0x5c   :  { %1675 = vmatmul.mubr.bf16.gmra.mrb[28].mxu1 %v378_v22  ;;  %1695 = vmatpush3.bf16.msra.mxu0 %v524_v25  ;;  %v1385_v22 = vld [vmem:[%s2897_s1 + $0x390] sm:$0xff]  ;;  %v1386_v25 = vld [vmem:[%s2897_s1 + $0x398] sm:$0xff]  ;;  %v765_v26 = vpack.c.bf16 %v1361_v17, %v1360_v16 }
  0x5d   :  { %1642 = vmatprep.mubr.msk.bf16.mxu0 %vm1888_vm0, %v1887_v0  ;;  %1678 = vmatprep.mubr.msk.bf16.mxu1 %vm1888_vm0, %v1887_v0  ;;  %v1397_v16 = vld [vmem:[%s2897_s1 + $0x3f0] sm:$0xff]  ;;  %v1398_v17 = vld [vmem:[%s2897_s1 + $0x3f8] sm:$0xff] }
  0x5e   :  { %1696 = vmatprep.subr.bf16.mxu0 %v1887_v0  ;;  %1731 = vmatpush3.bf16.msra.mxu1 %v646_v31  ;;  %v1302_v31 = vld [vmem:[%s2898_s0 + $0x1f] sm:$0xff]  ;;  %v893_v56 = vpack.c.bf16 %v1398_v17, %v1397_v16  ;;  %v1418_v16 = vld [vmem:[%s2897_s1 + $0x450] sm:$0xff] }
  0x5f   :  { %1732 = vmatprep.subr.bf16.mxu1 %v1887_v0  ;;  %v499_v33 = vpack.c.bf16 %v1302_v31, %v1301_v27  ;;  %v1140_v27 = vld [vmem:[%s2899_s3] sm:$0xff]  ;;  %v1142_v31 = vld [vmem:[%s2899_s3 + $0x10] sm:$0xff]  ;;  %v1419_v17 = vld [vmem:[%s2897_s1 + $0x458] sm:$0xff] }
  0x60   :  { %1697 = vmatpush3.bf16.msra.mxu0 %v525_v37  ;;  %v1364_v37 = vld [vmem:[%s2897_s1 + $0x330] sm:$0xff] }
  0x61   :  { %1698 = vmatprep.subr.bf16.mxu0 %v1887_v0 }
  0x62   :  { %1733 = vmatpush3.bf16.msra.mxu1 %v647_v41  ;;  %v1365_v41 = vld [vmem:[%s2897_s1 + $0x338] sm:$0xff] }
  0x63   :  { %1643 = vmatmul.mubr.bf16.gmra.mrb[32].mxu0 %v257_v44  ;;  %1734 = vmatprep.subr.bf16.mxu1 %v1887_v0  ;;  %v1390_v44 = vld [vmem:[%s2897_s1 + $0x3b8] sm:$0xff] }
  0x64   :  { %1679 = vmatmul.mubr.bf16.gmra.mrb[32].mxu1 %v379_v52  ;;  %1646 = vmatprep.mubr.msk.bf16.mxu0 %vm1888_vm0, %v1887_v0  ;;  %v767_v52 = vpack.c.bf16 %v1365_v41, %v1364_v37 }
  0x65   :  { %1682 = vmatprep.mubr.msk.bf16.mxu1 %vm1888_vm0, %v1887_v0  ;;  %1699 = vmatpush3.bf16.msra.mxu0 %v526_v54  ;;  %v500_v54 = vpack.c.bf16 %v1304_v51, %v1303_v50  ;;  %v1410_v50 = vld [vmem:[%s2897_s1 + $0x410] sm:$0xff]  ;;  %v1411_v51 = vld [vmem:[%s2897_s1 + $0x418] sm:$0xff] }
  0x66   :  { %1735 = vmatpush3.bf16.msra.mxu1 %v648_v55  ;;  %1700 = vmatprep.subr.bf16.mxu0 %v1887_v0  ;;  %v1391_v55 = vld [vmem:[%s2897_s1 + $0x3c0] sm:$0xff]  ;;  %v1009_v39 = vpack.c.bf16 %v1411_v51, %v1410_v50 }
  0x67   :  { %1736 = vmatprep.subr.bf16.mxu1 %v1887_v0  ;;  %v890_v63 = vpack.c.bf16 %v1392_v59, %v1391_v55  ;;  %v1145_v55 = vld [vmem:[%s2899_s3 + $0x28] sm:$0xff]  ;;  %v1412_v59 = vld [vmem:[%s2897_s1 + $0x420] sm:$0xff] }
  0x69   :  { %1701 = vmatpush3.bf16.msra.mxu0 %v527_v1  ;;  %v1393_v1 = vld [vmem:[%s2897_s1 + $0x3d0] sm:$0xff] }
  0x6a   :  { %1737 = vmatpush3.bf16.msra.mxu1 %v649_v2  ;;  %1758 = vmatprep.subr.bf16.mxu0 %v1887_v0  ;;  %v1394_v2 = vld [vmem:[%s2897_s1 + $0x3d8] sm:$0xff] }
  0x6b   :  { %1647 = vmatmul.mubr.bf16.gmra.mrb[36].mxu0 %v258_v3  ;;  %1794 = vmatprep.subr.bf16.mxu1 %v1887_v0  ;;  %v1305_v3 = vld [vmem:[%s2898_s0 + $0x37] sm:$0xff]  ;;  %v891_v47 = vpack.c.bf16 %v1394_v2, %v1393_v1 }
  0x6c   :  { %1683 = vmatmul.mubr.bf16.gmra.mrb[36].mxu1 %v380_v4  ;;  %1702 = vmatprep.mubr.msk.bf16.mxu0 %vm1888_vm0, %v1887_v0  ;;  %v1306_v4 = vld [vmem:[%s2898_s0 + $0x3f] sm:$0xff]  ;;  %v1414_v2 = vld [vmem:[%s2897_s1 + $0x430] sm:$0xff] }
  0x6d   :  { %1738 = vmatprep.mubr.msk.bf16.mxu1 %vm1888_vm0, %v1887_v0  ;;  %v501_v6 = vpack.c.bf16 %v1306_v4, %v1305_v3  ;;  %v1415_v3 = vld [vmem:[%s2897_s1 + $0x438] sm:$0xff]  ;;  %v1353_v4 = vld [vmem:[%s2898_s0 + $0x2c] sm:$0xff] }
  0x73   :  { %1703 = vmatmul.mubr.bf16.vlgmr.msra.gmra.mrb[40].mxu0 %v498_v9 }
  0x74   :  { %1739 = vmatmul.mubr.bf16.vlgmr.msra.gmra.mrb[40].mxu1 %v620_v32  ;;  %1759 = vmatpush3.bf16.msra.mxu0 %v764_v15  ;;  %v887_v32 = vpack.c.bf16 %v1386_v25, %v1385_v22  ;;  %v1373_v15 = vld [vmem:[%s2897_s1 + $0x378] sm:$0xff]  ;;  %v1332_v22 = vld [vmem:[%s2898_s0 + $0x48] sm:$0xff] }
  0x75   :  { %1760 = vmatprep.subr.bf16.mxu0 %v1887_v0  ;;  %1706 = vmatprep.mubr.msk.bf16.mxu0 %vm1888_vm0, %v1887_v0  ;;  %v771_v25 = vpack.c.bf16 %v1373_v15, %v1372_v13  ;;  %v1012_v15 = vpack.c.bf16 %v1417_v8, %v1416_v7 }
  0x76   :  { %1742 = vmatprep.mubr.msk.bf16.mxu1 %vm1888_vm0, %v1887_v0  ;;  %1795 = vmatpush3.bf16.msra.mxu1 %v886_v21  ;;  %v1307_v21 = vld [vmem:[%s2898_s0 + $0x47] sm:$0xff] }
  0x77   :  { %1796 = vmatprep.subr.bf16.mxu1 %v1887_v0  ;;  %v502_v57 = vpack.c.bf16 %v1307_v21, %v1307_v21  ;;  %v1355_v21 = vld [vmem:[%s2898_s0 + $0x3c] sm:$0xff] }
  0x78   :  { %1761 = vmatpush3.bf16.msra.mxu0 %v765_v26  ;;  %v1889_v26 = vmov 0  }
  0x79   :  { %1762 = vmatprep.subr.bf16.mxu0 %v1887_v0  ;;  %1885 = vset.pattern.permute.xlu0 %v1889_v26 }
  0x7a   :  { %1797 = vmatpush3.bf16.msra.mxu1 %v887_v32  ;;  %1886 = vset.pattern.permute.xlu1 %v1889_v26  ;;  %v1350_v32 = vld [vmem:[%s2898_s0 + $0x14] sm:$0xff]  ;;  %v1421_v26 = vld [vmem:[%s2897_s1 + $0x468] sm:$0xff] }
  0x7b   :  { %1707 = vmatmul.mubr.bf16.gmra.mrb[44].mxu0 %v499_v33  ;;  %1798 = vmatprep.subr.bf16.mxu1 %v1887_v0  ;;  %v1374_v33 = vld [vmem:[%s2898_s0 + $0xd] sm:$0xff]  ;;  %v742_v37 = vpack.c.bf16 %v1350_v32, %v1349_v30  ;;  %v1423_v32 = vld [vmem:[%s2897_s1 + $0x478] sm:$0xff] }
  0x7c   :  { %1743 = vmatmul.mubr.bf16.gmra.mrb[44].mxu1 %v621_v40  ;;  %1763 = vmatpush3.bf16.msra.mxu0 %v766_v36  ;;  %v889_v40 = vpack.c.bf16 %v1390_v44, %v1389_v43  ;;  %v1409_v36 = vld [vmem:[%s2897_s1 + $0x408] sm:$0xff]  ;;  %v864_v41 = vpack.c.bf16 %v1375_v34, %v1374_v33  ;;  %v1143_v43 = vld [vmem:[%s2899_s3 + $0x18] sm:$0xff]  ;;  %v1144_v44 = vld [vmem:[%s2899_s3 + $0x20] sm:$0xff] }
  0x7d   :  { %1710 = vmatprep.mubr.msk.bf16.mxu0 %vm1888_vm0, %v1887_v0  ;;  %1746 = vmatprep.mubr.msk.bf16.mxu1 %vm1888_vm0, %v1887_v0  ;;  %v1422_v30 = vld [vmem:[%s2897_s1 + $0x470] sm:$0xff] }
  0x7e   :  { %1764 = vmatprep.subr.bf16.mxu0 %v1887_v0  ;;  %1799 = vmatpush3.bf16.msra.mxu1 %v888_v42  ;;  %v1008_v42 = vpack.c.bf16 %v1409_v36, %v1408_v35  ;;  %v1357_v33 = vld [vmem:[%s2898_s0 + $0x4c] sm:$0xff]  ;;  %v1015_v35 = vpack.c.bf16 %v1423_v32, %v1422_v30 }
  0x7f   :  { %1800 = vmatprep.subr.bf16.mxu1 %v1887_v0  ;;  %1151 = vperm.xlu0 %1885, %v1140_v27   ;;  %v1382_v34 = vld [vmem:[%s2898_s0 + $0x4d] sm:$0xff]  ;;  %v746_v36 = vpack.c.bf16 %v1357_v33, %v1357_v33 }
  0x80   :  { %1765 = vmatpush3.bf16.msra.mxu0 %v767_v52  ;;  %1161 = vperm.xlu1 %1886, %v1142_v31   ;;  %v1351_v52 = vld [vmem:[%s2898_s0 + $0x1c] sm:$0xff] }
  0x81   :  { %1766 = vmatprep.subr.bf16.mxu0 %v1887_v0  ;;  %v743_v62 = vpack.c.bf16 %v1352_v38, %v1351_v52 }
  0x82   :  { %1801 = vmatpush3.bf16.msra.mxu1 %v889_v40  ;;  %v1376_v40 = vld [vmem:[%s2898_s0 + $0x1d] sm:$0xff] }
  0x83   :  { %1711 = vmatmul.mubr.bf16.gmra.mrb[48].mxu0 %v500_v54  ;;  %1802 = vmatprep.subr.bf16.mxu1 %v1887_v0  ;;  %v1377_v54 = vld [vmem:[%s2898_s0 + $0x25] sm:$0xff] }
  0x84   :  { %1747 = vmatmul.mubr.bf16.gmra.mrb[48].mxu1 %v622_v49  ;;  %1767 = vmatpush3.bf16.msra.mxu0 %v768_v60  ;;  %v1371_v49 = vld [vmem:[%s2897_s1 + $0x368] sm:$0xff] }
  0x85   :  { %1714 = vmatprep.mubr.msk.bf16.mxu0 %vm1888_vm0, %v1887_v0  ;;  %1750 = vmatprep.mubr.msk.bf16.mxu1 %vm1888_vm0, %v1887_v0  ;;  %v770_v9 = vpack.c.bf16 %v1371_v49, %v1370_v48  ;;  %v1413_v60 = vld [vmem:[%s2897_s1 + $0x428] sm:$0xff]  ;;  %v1379_v48 = vld [vmem:[%s2898_s0 + $0x35] sm:$0xff]  ;;  %v1011_v49 = vpack.c.bf16 %v1415_v3, %v1414_v2 }
  0x86   :  { %1768 = vmatprep.subr.bf16.mxu0 %v1887_v0  ;;  %1803 = vmatpush3.bf16.msra.mxu1 %v890_v63  ;;  %v865_v63 = vpack.c.bf16 %v1377_v54, %v1376_v40  ;;  %v1010_v1 = vpack.c.bf16 %v1413_v60, %v1412_v59 }
  0x87   :  { %1804 = vmatprep.subr.bf16.mxu1 %v1887_v0  ;;  %1156 = vperm.xlu0 %1885, %v1141_v29  }
  0x88   :  { %1769 = vmatpush3.bf16.msra.mxu0 %v769_v5  ;;  %1166 = vperm.xlu1 %1886, %v1143_v43   ;;  %v1354_v5 = vld [vmem:[%s2898_s0 + $0x34] sm:$0xff] }
  0x89   :  { %1770 = vmatprep.subr.bf16.mxu0 %v1887_v0 }
  0x8a   :  { %1805 = vmatpush3.bf16.msra.mxu1 %v891_v47  ;;  %v1378_v47 = vld [vmem:[%s2898_s0 + $0x2d] sm:$0xff] }
  0x8b   :  { %1715 = vmatmul.mubr.bf16.gmra.mrb[52].mxu0 %v501_v6  ;;  %1806 = vmatprep.subr.bf16.mxu1 %v1887_v0  ;;  %v1147_v6 = vld [vmem:[%s2899_s3 + $0x38] sm:$0xff]  ;;  %v866_v13 = vpack.c.bf16 %v1379_v48, %v1378_v47 }
  0x8c   :  { %1751 = vmatmul.mubr.bf16.gmra.mrb[52].mxu1 %v623_v58  ;;  %1718 = vmatprep.mubr.msk.bf16.mxu0 %vm1888_vm0, %v1887_v0  ;;  %v624_v58 = vpack.c.bf16 %v1332_v22, %v1332_v22  ;;  %v1356_v22 = vld [vmem:[%s2898_s0 + $0x44] sm:$0xff] }
  0x8d   :  { %1754 = vmatprep.mubr.msk.bf16.mxu1 %vm1888_vm0, %v1887_v0  ;;  %1771 = vmatpush3.bf16.msra.mxu0 %v770_v9  ;;  %v1148_v9 = vld [vmem:[%s2899_s3 + $0x40] sm:$0xff]  ;;  %v745_v27 = vpack.c.bf16 %v1356_v22, %v1355_v21 }
  0x8e   :  { %1807 = vmatpush3.bf16.msra.mxu1 %v892_v10  ;;  %1772 = vmatprep.subr.bf16.mxu0 %v1887_v0  ;;  %v744_v10 = vpack.c.bf16 %v1354_v5, %v1353_v4 }
  0x8f   :  { %1808 = vmatprep.subr.bf16.mxu1 %v1887_v0  ;;  %1171 = vperm.xlu0 %1885, %v1144_v44  }
  0x90   :  { %1176 = vperm.xlu1 %1886, %v1145_v55  }
  0x91   :  { %1773 = vmatpush3.bf16.msra.mxu0 %v771_v25  ;;  %v1013_v25 = vpack.c.bf16 %v1419_v17, %v1418_v16 }
  0x92   :  { %1809 = vmatpush3.bf16.msra.mxu1 %v893_v56  ;;  %1830 = vmatprep.subr.bf16.mxu0 %v1887_v0  ;;  %v1380_v56 = vld [vmem:[%s2898_s0 + $0x3d] sm:$0xff] }
  0x93   :  { %1719 = vmatmul.mubr.bf16.gmra.mrb[56].mxu0 %v502_v57  ;;  %1866 = vmatprep.subr.bf16.mxu1 %v1887_v0  ;;  %v1381_v57 = vld [vmem:[%s2898_s0 + $0x45] sm:$0xff] }
  0x94   :  { %1755 = vmatmul.mubr.bf16.gmra.mrb[56].mxu1 %v624_v58  ;;  %1774 = vmatprep.mubr.msk.bf16.mxu0 %vm1888_vm0, %v1887_v0  ;;  %v1420_v58 = vld [vmem:[%s2897_s1 + $0x460] sm:$0xff]  ;;  %v867_v31 = vpack.c.bf16 %v1381_v57, %v1380_v56 }
  0x95   :  { %1810 = vmatprep.mubr.msk.bf16.mxu1 %vm1888_vm0, %v1887_v0  ;;  %1181 = vperm.xlu0 %1885, %v1146_v61   ;;  %v1014_v29 = vpack.c.bf16 %v1421_v26, %v1420_v58 }
  0x96   :  { %1186 = vperm.xlu1 %1886, %v1147_v6  }
  0x99   :  { %1191 = vperm.xlu0 %1885, %v1148_v9  }
  0x9b   :  { %1775 = vmatmul.mubr.bf16.vlgmr.msra.gmra.mrb[60].mxu0 %v742_v37  ;;  %v868_v37 = vpack.c.bf16 %v1382_v34, %v1382_v34 }
  0x9c   :  { %1811 = vmatmul.mubr.bf16.vlgmr.msra.gmra.mrb[60].mxu1 %v864_v41  ;;  %1831 = vmatpush3.bf16.msra.mxu0 %v1008_v42  ;;  %v1407_v41 = vld [vmem:[%s2898_s0 + $0x4e] sm:$0xff] }
  0x9d   :  { %1832 = vmatprep.subr.bf16.mxu0 %v1887_v0  ;;  %1778 = vmatprep.mubr.msk.bf16.mxu0 %vm1888_vm0, %v1887_v0 }
  0x9e   :  { %1814 = vmatprep.mubr.msk.bf16.mxu1 %vm1888_vm0, %v1887_v0  ;;  %1874 = vmatpush3.bf16.msra.mxu1 %v1008_v42  ;;  %v990_v42 = vpack.c.bf16 %v1407_v41, %v1407_v41 }
  0x9f   :  { %1867 = vmatprep.subr.bf16.mxu1 %v1887_v0 }
  0xa0   :  { %1833 = vmatpush3.bf16.msra.mxu0 %v1009_v39 }
  0xa1   :  { %1834 = vmatprep.subr.bf16.mxu0 %v1887_v0 }
  0xa2   :  { %1875 = vmatpush3.bf16.msra.mxu1 %v1009_v39 }
  0xa3   :  { %1779 = vmatmul.mubr.bf16.gmra.mrb[64].mxu0 %v743_v62  ;;  %1868 = vmatprep.subr.bf16.mxu1 %v1887_v0 }
  0xa4   :  { %1815 = vmatmul.mubr.bf16.gmra.mrb[64].mxu1 %v865_v63  ;;  %1835 = vmatpush3.bf16.msra.mxu0 %v1010_v1 }
  0xa5   :  { %1782 = vmatprep.mubr.msk.bf16.mxu0 %vm1888_vm0, %v1887_v0  ;;  %1818 = vmatprep.mubr.msk.bf16.mxu1 %vm1888_vm0, %v1887_v0 }
  0xa6   :  { %1836 = vmatprep.subr.bf16.mxu0 %v1887_v0  ;;  %1876 = vmatpush3.bf16.msra.mxu1 %v1010_v1 }
  0xa7   :  { %1869 = vmatprep.subr.bf16.mxu1 %v1887_v0 }
  0xa8   :  { %1837 = vmatpush3.bf16.msra.mxu0 %v1011_v49 }
  0xa9   :  { %1838 = vmatprep.subr.bf16.mxu0 %v1887_v0 }
  0xaa   :  { %1877 = vmatpush3.bf16.msra.mxu1 %v1011_v49 }
  0xab   :  { %1783 = vmatmul.mubr.bf16.gmra.mrb[68].mxu0 %v744_v10  ;;  %1870 = vmatprep.subr.bf16.mxu1 %v1887_v0 }
  0xac   :  { %1819 = vmatmul.mubr.bf16.gmra.mrb[68].mxu1 %v866_v13  ;;  %1839 = vmatpush3.bf16.msra.mxu0 %v1012_v15 }
  0xad   :  { %1786 = vmatprep.mubr.msk.bf16.mxu0 %vm1888_vm0, %v1887_v0  ;;  %1822 = vmatprep.mubr.msk.bf16.mxu1 %vm1888_vm0, %v1887_v0 }
  0xae   :  { %1878 = vmatpush3.bf16.msra.mxu1 %v1012_v15  ;;  %1840 = vmatprep.subr.bf16.mxu0 %v1887_v0 }
  0xaf   :  { %1871 = vmatprep.subr.bf16.mxu1 %v1887_v0 }
  0xb0   :  { %1841 = vmatpush3.bf16.msra.mxu0 %v1013_v25 }
  0xb1   :  { %1842 = vmatprep.subr.bf16.mxu0 %v1887_v0 }
  0xb2   :  { %1879 = vmatpush3.bf16.msra.mxu1 %v1013_v25 }
  0xb3   :  { %1787 = vmatmul.mubr.bf16.gmra.mrb[72].mxu0 %v745_v27  ;;  %1872 = vmatprep.subr.bf16.mxu1 %v1887_v0 }
  0xb4   :  { %1823 = vmatmul.mubr.bf16.gmra.mrb[72].mxu1 %v867_v31  ;;  %1790 = vmatprep.mubr.msk.bf16.mxu0 %vm1888_vm0, %v1887_v0 }
  0xb5   :  { %1826 = vmatprep.mubr.msk.bf16.mxu1 %vm1888_vm0, %v1887_v0  ;;  %1843 = vmatpush3.bf16.msra.mxu0 %v1014_v29 }
  0xb6   :  { %1880 = vmatpush3.bf16.msra.mxu1 %v1014_v29  ;;  %1844 = vmatprep.subr.bf16.mxu0 %v1887_v0 }
  0xb7   :  { %1873 = vmatprep.subr.bf16.mxu1 %v1887_v0 }
  0xb9   :  { %1845 = vmatpush3.bf16.msra.mxu0 %v1015_v35 }
  0xba   :  { %1881 = vmatpush3.bf16.msra.mxu1 %v1015_v35 }
  0xbb   :  { %1791 = vmatmul.mubr.bf16.gmra.mrb[76].mxu0 %v746_v36 }
  0xbc   :  { %1827 = vmatmul.mubr.bf16.gmra.mrb[76].mxu1 %v868_v37  ;;  %1846 = vmatprep.mubr.msk.bf16.mxu0 %vm1888_vm0, %v1887_v0 }
  0xbd   :  { %1858 = vmatprep.mubr.msk.bf16.mxu1 %vm1888_vm0, %v1887_v0 }
  0xc3   :  { %1847 = vmatmul.mubr.bf16.vlgmr.msra.gmra.mrb[80].mxu0 %v986_v14 }
  0xc4   :  { %1859 = vmatmul.mubr.bf16.vlgmr.msra.gmra.mrb[80].mxu1 %v989_v20  ;;  %1850 = vmatprep.mubr.msk.bf16.mxu0 %vm1888_vm0, %v1887_v0 }
  0xc5   :  { %1862 = vmatprep.mubr.msk.bf16.mxu1 %vm1888_vm0, %v1887_v0 }
  0xcb   :  { %1851 = vmatmul.mubr.bf16.gmra.mrb[84].mxu0 %v987_v28 }
  0xcc   :  { %1863 = vmatmul.mubr.bf16.gmra.mrb[84].mxu1 %v990_v42  ;;  %1854 = vmatprep.mubr.msk.bf16.mxu0 %vm1888_vm0, %v1887_v0 }
  0xd3   :  { %1855 = vmatmul.mubr.bf16.gmra.mrb[88].mxu0 %v988_v53 }
  0xf6   :  { %v133_v11 = vpop.f32.mrb[0].mxu0 }
  0xf7   :  { %v205_v12 = vpop.f32.mrb[0].mxu1  ;;  %v1560_v14 = vpop.f32.mrb[1].mxu0 }
  0xf8   :  { %v206_v18 = vadd.f32 %v205_v12, %v133_v11  ;;  %v1596_v19 = vpop.f32.mrb[1].mxu1  ;;  %v136_v20 = vpop.f32.mrb[2].mxu0 }
  0xf9   :  { %v208_v43 = vpop.f32.mrb[2].mxu1  ;;  %v1561_v44 = vpop.f32.mrb[3].mxu0 }
  0xfa   :  { %v209_v50 = vadd.f32 %v208_v43, %v136_v20  ;;  %v1597_v51 = vpop.f32.mrb[3].mxu1 }
  0xfe   :  { %v141_v23 = vpop.f32.mrb[4].mxu0 }
  0xff   :  { %v213_v24 = vpop.f32.mrb[4].mxu1  ;;  %v1564_v28 = vpop.f32.mrb[5].mxu0 }
 0x100   :  { %v214_v52 = vadd.f32 %v213_v24, %v141_v23  ;;  %v1600_v38 = vpop.f32.mrb[5].mxu1  ;;  %v144_v0 = vpop.f32.mrb[6].mxu0 }
 0x101   :  { %v216_v39 = vpop.f32.mrb[6].mxu1  ;;  %v1565_v40 = vpop.f32.mrb[7].mxu0 }
 0x102   :  { %v217_v45 = vadd.f32 %v216_v39, %v144_v0  ;;  %v1601_v46 = vpop.f32.mrb[7].mxu1 }
 0x106   :  { %v149_v53 = vpop.f32.mrb[8].mxu0 }
 0x107   :  { %v221_v54 = vpop.f32.mrb[8].mxu1  ;;  %v1568_v55 = vpop.f32.mrb[9].mxu0 }
 0x108   :  { %v222_v59 = vadd.f32 %v221_v54, %v149_v53  ;;  %v1604_v60 = vpop.f32.mrb[9].mxu1  ;;  %v152_v61 = vpop.f32.mrb[10].mxu0 }
 0x109   :  { %v224_v62 = vpop.f32.mrb[10].mxu1  ;;  %v1569_v63 = vpop.f32.mrb[11].mxu0 }
 0x10a   :  { %v225_v1 = vadd.f32 %v224_v62, %v152_v61  ;;  %v1605_v2 = vpop.f32.mrb[11].mxu1 }
 0x10e   :  { %v157_v3 = vpop.f32.mrb[12].mxu0 }
 0x10f   :  { %v229_v4 = vpop.f32.mrb[12].mxu1  ;;  %v1572_v5 = vpop.f32.mrb[13].mxu0 }
 0x110   :  { %v230_v47 = vadd.f32 %v229_v4, %v157_v3  ;;  %v1608_v48 = vpop.f32.mrb[13].mxu1  ;;  %v160_v49 = vpop.f32.mrb[14].mxu0 }
 0x111   :  { %v232_v6 = vpop.f32.mrb[14].mxu1  ;;  %v1573_v7 = vpop.f32.mrb[15].mxu0 }
 0x112   :  { %v233_v8 = vadd.f32 %v232_v6, %v160_v49  ;;  %v1609_v9 = vpop.f32.mrb[15].mxu1 }
 0x116   :  { %v165_v10 = vpop.f32.mrb[16].mxu0 }
 0x117   :  { %v1576_v13 = vpop.f32.mrb[17].mxu0  ;;  %v237_v15 = vpop.f32.mrb[16].mxu1 }
 0x118   :  { %v238_v16 = vadd.f32 %v237_v15, %v165_v10  ;;  %v168_v17 = vpop.f32.mrb[18].mxu0  ;;  %v1612_v21 = vpop.f32.mrb[17].mxu1 }
 0x119   :  { %v1577_v22 = vpop.f32.mrb[19].mxu0  ;;  %v240_v25 = vpop.f32.mrb[18].mxu1 }
 0x11a   :  { %v1613_v56 = vpop.f32.mrb[19].mxu1 }
 0x11e   :  { %v318_v57 = vpop.f32.mrb[20].mxu0 }
 0x11f   :  { %v356_v58 = vadd.f32 %v318_v57, %v206_v18  ;;  %v1632_v26 = vpop.f32.mrb[21].mxu0  ;;  %v440_v27 = vpop.f32.mrb[20].mxu1 }
 0x120   :  { %v321_v31 = vpop.f32.mrb[22].mxu0  ;;  %v1668_v29 = vpop.f32.mrb[21].mxu1 }
 0x121   :  { %v357_v30 = vadd.f32 %v321_v31, %v209_v50  ;;  %v478_v32 = vadd.f32 %v440_v27, %v356_v58  ;;  %v1633_v33 = vpop.f32.mrb[23].mxu0  ;;  %v443_v34 = vpop.f32.mrb[22].mxu1 }
 0x122   :  { %v1669_v35 = vpop.f32.mrb[23].mxu1 }
 0x123   :  { %v479_v36 = vadd.f32 %v443_v34, %v357_v30 }
 0x126   :  { %v326_v37 = vpop.f32.mrb[24].mxu0 }
 0x127   :  { %v358_v41 = vadd.f32 %v326_v37, %v214_v52  ;;  %v1636_v42 = vpop.f32.mrb[25].mxu0  ;;  %v448_v11 = vpop.f32.mrb[24].mxu1 }
 0x128   :  { %v329_v12 = vpop.f32.mrb[26].mxu0  ;;  %v1672_v14 = vpop.f32.mrb[25].mxu1 }
 0x129   :  { %v359_v19 = vadd.f32 %v329_v12, %v217_v45  ;;  %v480_v20 = vadd.f32 %v448_v11, %v358_v41  ;;  %v1637_v43 = vpop.f32.mrb[27].mxu0  ;;  %v451_v18 = vpop.f32.mrb[26].mxu1 }
 0x12a   :  { %v1673_v44 = vpop.f32.mrb[27].mxu1 }
 0x12b   :  { %v481_v51 = vadd.f32 %v451_v18, %v359_v19 }
 0x12e   :  { %v334_v23 = vpop.f32.mrb[28].mxu0 }
 0x12f   :  { %v360_v24 = vadd.f32 %v334_v23, %v222_v59  ;;  %v1640_v50 = vpop.f32.mrb[29].mxu0  ;;  %v456_v28 = vpop.f32.mrb[28].mxu1 }
 0x130   :  { %v337_v38 = vpop.f32.mrb[30].mxu0  ;;  %v1676_v0 = vpop.f32.mrb[29].mxu1 }
 0x131   :  { %v361_v39 = vadd.f32 %v337_v38, %v225_v1  ;;  %v482_v40 = vadd.f32 %v456_v28, %v360_v24  ;;  %v1641_v46 = vpop.f32.mrb[31].mxu0  ;;  %v459_v52 = vpop.f32.mrb[30].mxu1 }
 0x132   :  { %v1677_v53 = vpop.f32.mrb[31].mxu1 }
 0x133   :  { %v483_v54 = vadd.f32 %v459_v52, %v361_v39 }
 0x136   :  { %v342_v55 = vpop.f32.mrb[32].mxu0 }
 0x137   :  { %v362_v60 = vadd.f32 %v342_v55, %v230_v47  ;;  %v1644_v45 = vpop.f32.mrb[33].mxu0  ;;  %v464_v61 = vpop.f32.mrb[32].mxu1 }
 0x138   :  { %v345_v62 = vpop.f32.mrb[34].mxu0  ;;  %v1680_v63 = vpop.f32.mrb[33].mxu1 }
 0x139   :  { %v363_v2 = vadd.f32 %v345_v62, %v233_v8  ;;  %v484_v3 = vadd.f32 %v464_v61, %v362_v60  ;;  %v1645_v4 = vpop.f32.mrb[35].mxu0  ;;  %v467_v59 = vpop.f32.mrb[34].mxu1 }
 0x13a   :  { %v1681_v5 = vpop.f32.mrb[35].mxu1 }
 0x13b   :  { %v485_v48 = vadd.f32 %v467_v59, %v363_v2 }
 0x13e   :  { %v350_v49 = vpop.f32.mrb[36].mxu0 }
 0x13f   :  { %v364_v6 = vadd.f32 %v350_v49, %v238_v16  ;;  %v1648_v1 = vpop.f32.mrb[37].mxu0  ;;  %v472_v7 = vpop.f32.mrb[36].mxu1 }
 0x140   :  { %v353_v9 = vpop.f32.mrb[38].mxu0  ;;  %v1684_v10 = vpop.f32.mrb[37].mxu1 }
 0x141   :  { %v486_v13 = vadd.f32 %v472_v7, %v364_v6  ;;  %v1649_v15 = vpop.f32.mrb[39].mxu0  ;;  %v475_v17 = vpop.f32.mrb[38].mxu1 }
 0x142   :  { %v1685_v47 = vpop.f32.mrb[39].mxu1 }
 0x146   :  { %v562_v21 = vpop.f32.mrb[40].mxu0 }
 0x147   :  { %v600_v22 = vadd.f32 %v562_v21, %v478_v32  ;;  %v1704_v25 = vpop.f32.mrb[41].mxu0  ;;  %v684_v56 = vpop.f32.mrb[40].mxu1 }
 0x148   :  { %v565_v8 = vpop.f32.mrb[42].mxu0  ;;  %v1740_v57 = vpop.f32.mrb[41].mxu1 }
 0x149   :  { %v601_v58 = vadd.f32 %v565_v8, %v479_v36  ;;  %v722_v26 = vadd.f32 %v684_v56, %v600_v22  ;;  %v1705_v27 = vpop.f32.mrb[43].mxu0  ;;  %v687_v31 = vpop.f32.mrb[42].mxu1 }
 0x14a   :  { %v1741_v29 = vpop.f32.mrb[43].mxu1 }
 0x14b   :  { %v723_v16 = vadd.f32 %v687_v31, %v601_v58 }
 0x14e   :  { %v570_v30 = vpop.f32.mrb[44].mxu0 }
 0x14f   :  { %v602_v33 = vadd.f32 %v570_v30, %v480_v20  ;;  %v1708_v34 = vpop.f32.mrb[45].mxu0  ;;  %v692_v35 = vpop.f32.mrb[44].mxu1 }
 0x150   :  { %v573_v37 = vpop.f32.mrb[46].mxu0  ;;  %v1744_v41 = vpop.f32.mrb[45].mxu1 }
 0x151   :  { %v603_v42 = vadd.f32 %v573_v37, %v481_v51  ;;  %v724_v11 = vadd.f32 %v692_v35, %v602_v33  ;;  %v1709_v12 = vpop.f32.mrb[47].mxu0  ;;  %v695_v32 = vpop.f32.mrb[46].mxu1 }
 0x152   :  { %v1745_v14 = vpop.f32.mrb[47].mxu1 }
 0x153   :  { %v725_v19 = vadd.f32 %v695_v32, %v603_v42 }
 0x156   :  { %v578_v43 = vpop.f32.mrb[48].mxu0 }
 0x157   :  { %v604_v18 = vadd.f32 %v578_v43, %v482_v40  ;;  %v1712_v36 = vpop.f32.mrb[49].mxu0  ;;  %v700_v44 = vpop.f32.mrb[48].mxu1 }
 0x158   :  { %v581_v23 = vpop.f32.mrb[50].mxu0  ;;  %v1748_v24 = vpop.f32.mrb[49].mxu1 }
 0x159   :  { %v605_v50 = vadd.f32 %v581_v23, %v483_v54  ;;  %v726_v28 = vadd.f32 %v700_v44, %v604_v18  ;;  %v1713_v38 = vpop.f32.mrb[51].mxu0  ;;  %v703_v20 = vpop.f32.mrb[50].mxu1 }
 0x15a   :  { %v1749_v0 = vpop.f32.mrb[51].mxu1 }
 0x15b   :  { %v727_v39 = vadd.f32 %v703_v20, %v605_v50  ;;  %v1152_v50 = vpop.permute.xlu0 %1151  ;;  %v2839_v20 = vpop.permute.xlu1 %1161 }
 0x15e   :  { %v586_v46 = vpop.f32.mrb[52].mxu0 }
 0x15f   :  { %v606_v52 = vadd.f32 %v586_v46, %v484_v3  ;;  %v1716_v51 = vpop.f32.mrb[53].mxu0  ;;  %v708_v53 = vpop.f32.mrb[52].mxu1 }
 0x160   :  { %v589_v55 = vpop.f32.mrb[54].mxu0  ;;  %v1752_v60 = vpop.f32.mrb[53].mxu1 }
 0x161   :  { %v607_v45 = vadd.f32 %v589_v55, %v485_v48  ;;  %v728_v61 = vadd.f32 %v708_v53, %v606_v52  ;;  %v1717_v62 = vpop.f32.mrb[55].mxu0  ;;  %v711_v40 = vpop.f32.mrb[54].mxu1 }
 0x162   :  { %v1753_v63 = vpop.f32.mrb[55].mxu1 }
 0x163   :  { %v729_v2 = vadd.f32 %v711_v40, %v607_v45  ;;  %v1157_v40 = vpop.permute.xlu0 %1156 }
 0x166   :  { %v594_v4 = vpop.f32.mrb[56].mxu0 }
 0x167   :  { %v608_v59 = vadd.f32 %v594_v4, %v486_v13  ;;  %v1720_v54 = vpop.f32.mrb[57].mxu0  ;;  %v716_v5 = vpop.f32.mrb[56].mxu1 }
 0x168   :  { %v597_v49 = vpop.f32.mrb[58].mxu0  ;;  %v1756_v6 = vpop.f32.mrb[57].mxu1 }
 0x169   :  { %v730_v1 = vadd.f32 %v716_v5, %v608_v59  ;;  %v1721_v7 = vpop.f32.mrb[59].mxu0  ;;  %v719_v9 = vpop.f32.mrb[58].mxu1 }
 0x16a   :  { %v1757_v3 = vpop.f32.mrb[59].mxu1  ;;  %v2841_v4 = vpop.permute.xlu1 %1166 }
 0x16e   :  { %v806_v10 = vpop.f32.mrb[60].mxu0 }
 0x16f   :  { %v844_v15 = vadd.f32 %v806_v10, %v722_v26  ;;  %v1776_v17 = vpop.f32.mrb[61].mxu0  ;;  %v928_v47 = vpop.f32.mrb[60].mxu1 }
 0x170   :  { %v809_v48 = vpop.f32.mrb[62].mxu0  ;;  %v1812_v21 = vpop.f32.mrb[61].mxu1 }
 0x171   :  { %v845_v22 = vadd.f32 %v809_v48, %v723_v16  ;;  %v966_v25 = vadd.f32 %v928_v47, %v844_v15  ;;  %v1777_v56 = vpop.f32.mrb[63].mxu0  ;;  %v931_v8 = vpop.f32.mrb[62].mxu1  ;;  %v2848_v15 = vld [vmem:[%s2900_s2] ss:$0 sm:$0xff] }
 0x172   :  { %v1813_v57 = vpop.f32.mrb[63].mxu1  ;;  %v2843_v10 = vpop.permute.xlu0 %1171 }
 0x173   :  { %v2829_v13 = vadd.f32 %v931_v8, %v845_v22  ;;  %v2850_v17 = vpop.permute.xlu1 %1176 }
 0x176   :  { %v814_v58 = vpop.f32.mrb[64].mxu0 }
 0x177   :  { %v846_v27 = vadd.f32 %v814_v58, %v724_v11  ;;  %v1780_v31 = vpop.f32.mrb[65].mxu0  ;;  %v936_v29 = vpop.f32.mrb[64].mxu1 }
 0x178   :  { %v817_v30 = vpop.f32.mrb[66].mxu0  ;;  %v1816_v33 = vpop.f32.mrb[65].mxu1 }
 0x179   :  { %v847_v34 = vadd.f32 %v817_v30, %v725_v19  ;;  %v2831_v35 = vadd.f32 %v936_v29, %v846_v27  ;;  %v1781_v26 = vpop.f32.mrb[67].mxu0  ;;  %v939_v37 = vpop.f32.mrb[66].mxu1 }
 0x17a   :  { %v1817_v41 = vpop.f32.mrb[67].mxu1 }
 0x17b   :  { %v2833_v42 = vadd.f32 %v939_v37, %v847_v34 }
 0x17e   :  { %v822_v16 = vpop.f32.mrb[68].mxu0 }
 0x17f   :  { %v848_v12 = vadd.f32 %v822_v16, %v726_v28  ;;  %v1784_v32 = vpop.f32.mrb[69].mxu0  ;;  %v944_v14 = vpop.f32.mrb[68].mxu1 }
 0x180   :  { %v825_v43 = vpop.f32.mrb[70].mxu0  ;;  %v1820_v18 = vpop.f32.mrb[69].mxu1 }
 0x181   :  { %v849_v36 = vadd.f32 %v825_v43, %v727_v39  ;;  %v2835_v11 = vadd.f32 %v944_v14, %v848_v12  ;;  %v1785_v44 = vpop.f32.mrb[71].mxu0  ;;  %v947_v23 = vpop.f32.mrb[70].mxu1 }
 0x182   :  { %v1821_v24 = vpop.f32.mrb[71].mxu1  ;;  %v1182_v16 = vpop.permute.xlu0 %1181 }
 0x183   :  { %v2837_v19 = vadd.f32 %v947_v23, %v849_v36  ;;  %v1187_v14 = vpop.permute.xlu1 %1186 }
 0x186   :  { %v830_v38 = vpop.f32.mrb[72].mxu0 }
 0x187   :  { %v850_v0 = vadd.f32 %v830_v38, %v728_v61  ;;  %v1788_v46 = vpop.f32.mrb[73].mxu0  ;;  %v952_v52 = vpop.f32.mrb[72].mxu1 }
 0x188   :  { %v833_v28 = vpop.f32.mrb[74].mxu0  ;;  %v1824_v51 = vpop.f32.mrb[73].mxu1 }
 0x189   :  { %v851_v53 = vadd.f32 %v833_v28, %v729_v2  ;;  %v972_v55 = vadd.f32 %v952_v52, %v850_v0  ;;  %v1789_v60 = vpop.f32.mrb[75].mxu0  ;;  %v955_v39 = vpop.f32.mrb[74].mxu1 }
 0x18a   :  { %v1825_v45 = vpop.f32.mrb[75].mxu1 }
 0x18b   :  { %v973_v62 = vadd.f32 %v955_v39, %v851_v53 }
 0x18e   :  { %v838_v63 = vpop.f32.mrb[76].mxu0 }
 0x18f   :  { %v852_v59 = vadd.f32 %v838_v63, %v730_v1  ;;  %v1792_v54 = vpop.f32.mrb[77].mxu0  ;;  %v960_v5 = vpop.f32.mrb[76].mxu1 }
 0x190   :  { %v841_v49 = vpop.f32.mrb[78].mxu0  ;;  %v1828_v6 = vpop.f32.mrb[77].mxu1 }
 0x191   :  { %v974_v61 = vadd.f32 %v960_v5, %v852_v59  ;;  %v1793_v7 = vpop.f32.mrb[79].mxu0  ;;  %v963_v9 = vpop.f32.mrb[78].mxu1 }
 0x192   :  { %v1829_v3 = vpop.f32.mrb[79].mxu1  ;;  %v1192_v54 = vpop.permute.xlu0 %1191 }
 0x196   :  { %v1050_v2 = vpop.f32.mrb[80].mxu0 }
 0x197   :  { %v1088_v47 = vadd.f32 %v1050_v2, %v966_v25  ;;  %v1074_v1 = vpop.f32.mrb[80].mxu1  ;;  %v1848_v48 = vpop.f32.mrb[81].mxu0 }
 0x198   :  { %v1094_v21 = vadd.f32 %v1074_v1, %v972_v55  ;;  %v1860_v22 = vpop.f32.mrb[81].mxu1  ;;  %v1053_v56 = vpop.f32.mrb[82].mxu0 }
 0x199   :  { %v1104_v8 = vadd.f32 %v2848_v15, %v1088_v47  ;;  %v1089_v57 = vadd.f32 %v1053_v56, %v2829_v13  ;;  %v1077_v58 = vpop.f32.mrb[82].mxu1  ;;  %v1849_v27 = vpop.f32.mrb[83].mxu0 }
 0x19a   :  { %v1110_v31 = vadd.f32 %v2848_v15, %v1094_v21  ;;  %v1095_v29 = vadd.f32 %v1077_v58, %v973_v62  ;;  %v1861_v30 = vpop.f32.mrb[83].mxu1 }
 0x19b   :  { %vm1113_vm1 = vcmp.gt.f32.partialorder %v1104_v8, 0.0  ;;  %v1122_v33 = vmul.f32 0.2, %v1104_v8  ;;  %v1105_v34 = vadd.f32 %v2848_v15, %v1089_v57 }
 0x19c   :  { %v1111_v25 = vadd.f32 %v2848_v15, %v1095_v29  ;;  %vm1119_vm2 = vcmp.gt.f32.partialorder %v1110_v31, 0.0  ;;  %v1128_v26 = vmul.f32 0.2, %v1110_v31 }
 0x19d   :  { %v1131_v37 = vsel %vm1113_vm1, %v1104_v8, %v1122_v33  ;;  %vm1114_vm3 = vcmp.gt.f32.partialorder %v1105_v34, 0.0  ;;  %v1123_v41 = vmul.f32 0.2, %v1105_v34 }
 0x19e   :  { %v1194_v12 = vmul.f32 %v1152_v50, %v1131_v37  ;;  %v1137_v13 = vsel %vm1119_vm2, %v1110_v31, %v1128_v26  ;;  %v1058_v32 = vpop.f32.mrb[84].mxu0  ;;  %vm1120_vm4 = vcmp.gt.f32.partialorder %v1111_v25, 0.0  ;;  %v1129_v43 = vmul.f32 0.2, %v1111_v25 }
 0x19f   :  { %v1132_v18 = vsel %vm1114_vm3, %v1105_v34, %v1123_v41  ;;  %v1200_v36 = vmul.f32 %v1182_v16, %v1137_v13  ;;  %v1090_v44 = vadd.f32 %v1058_v32, %v2831_v35  ;;  %v1082_v23 = vpop.f32.mrb[84].mxu1  ;;  %v1852_v24 = vpop.f32.mrb[85].mxu0 }
 0x1a0   :  { %1203 = vst [vmem:[%s2901_s4] sm:$0xff] %v1194_v12  ;;  %v1195_v38 = vmul.f32 %v1157_v40, %v1132_v18  ;;  %v1096_v0 = vadd.f32 %v1082_v23, %v974_v61  ;;  %v1138_v46 = vsel %vm1120_vm4, %v1111_v25, %v1129_v43  ;;  %v1061_v52 = vpop.f32.mrb[86].mxu0  ;;  %v1864_v50 = vpop.f32.mrb[85].mxu1 }
 0x1a1   :  { %1209 = vst [vmem:[%s2901_s4 + $0x30] sm:$0xff] %v1200_v36  ;;  %v1106_v28 = vadd.f32 %v2848_v15, %v1090_v44  ;;  %v1201_v51 = vmul.f32 %v1187_v14, %v1138_v46  ;;  %v1091_v35 = vadd.f32 %v1061_v52, %v2833_v42  ;;  %v1853_v53 = vpop.f32.mrb[87].mxu0  ;;  %v1085_v55 = vpop.f32.mrb[86].mxu1 }
 0x1a2   :  { %1204 = vst [vmem:[%s2901_s4 + $0x8] sm:$0xff] %v1195_v38  ;;  %v1112_v60 = vadd.f32 %v2848_v15, %v1096_v0  ;;  %v1865_v39 = vpop.f32.mrb[87].mxu1 }
 0x1a3   :  { %vm1115_vm5 = vcmp.gt.f32.partialorder %v1106_v28, 0.0  ;;  %v1124_v45 = vmul.f32 0.2, %v1106_v28  ;;  %1210 = vst [vmem:[%s2901_s4 + $0x38] sm:$0xff] %v1201_v51  ;;  %v1107_v62 = vadd.f32 %v2848_v15, %v1091_v35 }
 0x1a4   :  { %vm1121_vm6 = vcmp.gt.f32.partialorder %v1112_v60, 0.0  ;;  %v1130_v40 = vmul.f32 0.2, %v1112_v60 }
 0x1a5   :  { %v1133_v42 = vsel %vm1115_vm5, %v1106_v28, %v1124_v45  ;;  %vm1116_vm7 = vcmp.gt.f32.partialorder %v1107_v62, 0.0  ;;  %v1125_v63 = vmul.f32 0.2, %v1107_v62 }
 0x1a6   :  { %v1196_v59 = vmul.f32 %v2839_v20, %v1133_v42  ;;  %v1139_v5 = vsel %vm1121_vm6, %v1112_v60, %v1130_v40  ;;  %v1066_v49 = vpop.f32.mrb[88].mxu0 }
 0x1a7   :  { %v1202_v6 = vmul.f32 %v1192_v54, %v1139_v5  ;;  %v1134_v61 = vsel %vm1116_vm7, %v1107_v62, %v1125_v63  ;;  %v1092_v7 = vadd.f32 %v1066_v49, %v2835_v11  ;;  %v1856_v9 = vpop.f32.mrb[89].mxu0 }
 0x1a8   :  { %1205 = vst [vmem:[%s2901_s4 + $0x10] sm:$0xff] %v1196_v59  ;;  %v1197_v3 = vmul.f32 %v2841_v4, %v1134_v61  ;;  %v1069_v2 = vpop.f32.mrb[90].mxu0 }
 0x1a9   :  { %1211 = vst [vmem:[%s2901_s4 + $0x40] sm:$0xff] %v1202_v6  ;;  %v1108_v20 = vadd.f32 %v2848_v15, %v1092_v7  ;;  %v1093_v47 = vadd.f32 %v1069_v2, %v2837_v19  ;;  %v1857_v1 = vpop.f32.mrb[91].mxu0 }
 0x1aa   :  { %1206 = vst [vmem:[%s2901_s4 + $0x18] sm:$0xff] %v1197_v3 }
 0x1ab   :  { %vm1117_vm8 = vcmp.gt.f32.partialorder %v1108_v20, 0.0  ;;  %v1126_v11 = vmul.f32 0.2, %v1108_v20  ;;  %v1109_v48 = vadd.f32 %v2848_v15, %v1093_v47 }
 0x1ad   :  { %v1135_v21 = vsel %vm1117_vm8, %v1108_v20, %v1126_v11  ;;  %vm1118_vm9 = vcmp.gt.f32.partialorder %v1109_v48, 0.0  ;;  %v1127_v4 = vmul.f32 0.2, %v1109_v48 }
 0x1ae   :  { %v1198_v22 = vmul.f32 %v2843_v10, %v1135_v21 }
 0x1af   :  { %v1136_v56 = vsel %vm1118_vm9, %v1109_v48, %v1127_v4 }
 0x1b0   :  { %1207 = vst [vmem:[%s2901_s4 + $0x20] sm:$0xff] %v1198_v22  ;;  %v1199_v19 = vmul.f32 %v2850_v17, %v1136_v56 }
 0x1b2   :  { %1208 = vst [vmem:[%s2901_s4 + $0x28] sm:$0xff] %v1199_v19 }

// kernel: discriminator_forward.25
= control target key start
LH: loop header
LB: loop body
LE: loop exit
PB: predicated region body
PF: predicated region fallthrough
CT: control target
= control target key end

     0   :  { %v134_v0 = vmov 0.0   ;;  %vm135_vm0 = vmmov 0   ;;  %s213_s1 = inlined_call_operand.vmem [shape: f32[128,128], index: 1, kind: input, shape index: {}]   ;;  %s214_s0 = inlined_call_operand.vmem [shape: f32[2,128], index: 0, kind: input, shape index: {}]   ;;  %s215_s2 = inlined_call_operand.vmem [shape: f32[1,128], index: 2, kind: input, shape index: {}]   ;;  %s216_s3 = inlined_call_operand.vmem [shape: f32[2,128], index: 3, kind: output, shape index: {}]  }
   0x1   :  { %108 = vmatprep.subr.bf16.mxu0 %v134_v0  ;;  %v17_v1 = vld [vmem:[%s213_s1] sm:$0xff]  ;;  %v18_v2 = vld [vmem:[%s213_s1 + $0x8] sm:$0xff]  ;;  %v19_v3 = vld [vmem:[%s213_s1 + $0x10] sm:$0xff]  ;;  %124 = vmatprep.mubr.msk.bf16.mxu0 %vm135_vm0, %v134_v0 }
   0x2   :  { %v33_v4 = vpack.c.bf16 %v18_v2, %v17_v1  ;;  %v20_v5 = vld [vmem:[%s213_s1 + $0x18] sm:$0xff]  ;;  %v21_v7 = vld [vmem:[%s213_s1 + $0x20] sm:$0xff]  ;;  %v22_v8 = vld [vmem:[%s213_s1 + $0x28] sm:$0xff] }
   0x3   :  { %v34_v6 = vpack.c.bf16 %v20_v5, %v19_v3  ;;  %v35_v9 = vpack.c.bf16 %v22_v8, %v21_v7  ;;  %v23_v10 = vld [vmem:[%s213_s1 + $0x30] sm:$0xff]  ;;  %v24_v11 = vld [vmem:[%s213_s1 + $0x38] sm:$0xff]  ;;  %v25_v13 = vld [vmem:[%s213_s1 + $0x40] sm:$0xff] }
   0x4   :  { %109 = vmatpush3.bf16.msra.mxu0 %v33_v4  ;;  %v36_v12 = vpack.c.bf16 %v24_v11, %v23_v10  ;;  %v26_v14 = vld [vmem:[%s213_s1 + $0x48] sm:$0xff]  ;;  %v27_v16 = vld [vmem:[%s213_s1 + $0x50] sm:$0xff]  ;;  %v28_v17 = vld [vmem:[%s213_s1 + $0x58] sm:$0xff] }
   0x5   :  { %110 = vmatprep.subr.bf16.mxu0 %v134_v0  ;;  %v37_v15 = vpack.c.bf16 %v26_v14, %v25_v13  ;;  %v38_v18 = vpack.c.bf16 %v28_v17, %v27_v16  ;;  %v29_v19 = vld [vmem:[%s213_s1 + $0x60] sm:$0xff]  ;;  %v30_v20 = vld [vmem:[%s213_s1 + $0x68] sm:$0xff]  ;;  %v31_v22 = vld [vmem:[%s213_s1 + $0x70] sm:$0xff] }
   0x6   :  { %v39_v21 = vpack.c.bf16 %v30_v20, %v29_v19  ;;  %v32_v23 = vld [vmem:[%s213_s1 + $0x78] sm:$0xff]  ;;  %v15_v25 = vld [vmem:[%s214_s0] sm:$0x3] }
   0x7   :  { %v40_v24 = vpack.c.bf16 %v32_v23, %v31_v22  ;;  %v16_v26 = vpack.c.bf16 %v15_v25, %v15_v25  ;;  %v98_v27 = vld [vmem:[%s215_s2] ss:$0 sm:$0xff] }
   0x8   :  { %111 = vmatpush3.bf16.msra.mxu0 %v34_v6 }
   0x9   :  { %112 = vmatprep.subr.bf16.mxu0 %v134_v0 }
   0xc   :  { %113 = vmatpush3.bf16.msra.mxu0 %v35_v9 }
   0xd   :  { %114 = vmatprep.subr.bf16.mxu0 %v134_v0 }
  0x10   :  { %115 = vmatpush3.bf16.msra.mxu0 %v36_v12 }
  0x11   :  { %116 = vmatprep.subr.bf16.mxu0 %v134_v0 }
  0x14   :  { %117 = vmatpush3.bf16.msra.mxu0 %v37_v15 }
  0x15   :  { %118 = vmatprep.subr.bf16.mxu0 %v134_v0 }
  0x18   :  { %119 = vmatpush3.bf16.msra.mxu0 %v38_v18 }
  0x19   :  { %120 = vmatprep.subr.bf16.mxu0 %v134_v0 }
  0x1c   :  { %121 = vmatpush3.bf16.msra.mxu0 %v39_v21 }
  0x1d   :  { %122 = vmatprep.subr.bf16.mxu0 %v134_v0 }
  0x20   :  { %123 = vmatpush3.bf16.msra.mxu0 %v40_v24 }
  0x23   :  { %125 = vmatmul.mubr.bf16.vlgmr.msra.gmra.mrb[0].mxu0 %v16_v26 }
  0xf6   :  { %v82_v28 = vpop.f32.mrb[0].mxu0 }
  0xf7   :  { %v83_v29 = vadd.f32 %v98_v27, %v82_v28  ;;  %v126_v30 = vpop.f32.mrb[1].mxu0 }
  0xf8   :  { %v85_v31 = vpop.f32.mrb[2].mxu0 }
  0xf9   :  { %v88_v32 = vsub.f32 0.0, %v83_v29  ;;  %v127_v33 = vpop.f32.mrb[3].mxu0 }
  0xfb   :  { %v89_v34 = vmul.f32 1.442695, %v88_v32 }
  0xfd   :  { %130 = vpow2.f32 %v89_v34 }
 0x107   :  { %v131_v35 = vpop.eup %130 }
 0x108   :  { %v91_v36 = vadd.f32 1.0, %v131_v35 }
 0x10a   :  { %132 = vrcp.f32 %v91_v36 }
 0x114   :  { %v133_v37 = vpop.eup %132 }
 0x115   :  { %93 = vst [vmem:[%s216_s3] sm:$0x3] %v133_v37 }

</bundles_post_ra>
